<compile_context>
chip_gen: v6e
topology: v6e:2x2x1
jax: 0.10.0
libtpu: 0.0.40
codegen_flags: <defaults>
</compile_context>

<pallas_src>
import functools
import math

import jax
import jax.numpy as jnp
from jax.experimental import pallas as pl
from jax.experimental.pallas import tpu as pltpu

MXU_DTYPE = jnp.bfloat16   # MXU operand dtype (v5e/v6e/v7x bf16-native path)


# ----------------------------------------------------------------------------
# tile picking
# ----------------------------------------------------------------------------

def _pick_tile(dim, target, mult):
    """Largest divisor of `dim` that is a multiple of `mult` and <= target; else full dim."""
    start = min(target, dim)
    start -= start % mult
    for cand in range(start, 0, -mult):
        if dim % cand == 0:
            return cand
    return dim      # full-dim block is always legal


# ----------------------------------------------------------------------------
# Pallas kernels
# ----------------------------------------------------------------------------

def _mm_kernel(*refs, activation, has_residual, nk):
    """x @ w + b [-> quick_gelu] [+ residual], K-tiled with f32 VMEM accumulator."""
    if has_residual:
        x_ref, w_ref, b_ref, res_ref, o_ref, acc_ref = refs
    else:
        x_ref, w_ref, b_ref, o_ref, acc_ref = refs
    k = pl.program_id(2)

    @pl.when(k == 0)
    def _():
        acc_ref[...] = jnp.zeros_like(acc_ref)

    acc_ref[...] += jnp.dot(x_ref[...].astype(MXU_DTYPE), w_ref[...].astype(MXU_DTYPE),
                            preferred_element_type=jnp.float32)

    @pl.when(k == nk - 1)
    def _():
        acc = acc_ref[...] + b_ref[...].astype(jnp.float32)
        if activation == "quick_gelu":                 # CLIP quick_gelu: x*sigmoid(1.702x)
            acc = acc * jax.nn.sigmoid(1.702 * acc)
        if has_residual:
            acc = acc + res_ref[...].astype(jnp.float32)
        o_ref[...] = acc.astype(o_ref.dtype)


def matmul_bias(x, w, b, residual=None, activation="none",
                tm_target=512, tn_target=512, tk_target=512):
    """(M,K) @ (K,N) + b[N] (+ residual), M/N tiled, K tiled with accumulator."""
    M, K = x.shape
    _, N = w.shape
    tm = _pick_tile(M, tm_target, 8)
    tn = _pick_tile(N, tn_target, 128)
    tk = _pick_tile(K, tk_target, 128)
    nk = K // tk

    in_specs = [
        pl.BlockSpec((tm, tk), lambda i, j, k: (i, k)),
        pl.BlockSpec((tk, tn), lambda i, j, k: (k, j)),
        pl.BlockSpec((1, tn), lambda i, j, k: (0, j)),
    ]
    args = [x, w, b.reshape(1, N)]
    if residual is not None:
        in_specs.append(pl.BlockSpec((tm, tn), lambda i, j, k: (i, j)))
        args.append(residual)

    return pl.pallas_call(
        functools.partial(_mm_kernel, activation=activation,
                          has_residual=residual is not None, nk=nk),
        out_shape=jax.ShapeDtypeStruct((M, N), x.dtype),
        grid=(M // tm, N // tn, nk),
        in_specs=in_specs,
        out_specs=pl.BlockSpec((tm, tn), lambda i, j, k: (i, j)),
        scratch_shapes=[pltpu.VMEM((tm, tn), jnp.float32)],
        compiler_params=pltpu.CompilerParams(
            dimension_semantics=("parallel", "parallel", "arbitrary")),
    )(*args)


def _ln_mm_kernel(x_ref, g_ref, bt_ref, w_ref, b_ref, o_ref, *, activation, eps):
    """LayerNorm(x) @ w + b [-> quick_gelu].  LN math in f32, MXU fed bf16."""
    x = x_ref[...].astype(jnp.float32)
    mean = jnp.mean(x, axis=-1, keepdims=True)
    var = jnp.mean(jnp.square(x - mean), axis=-1, keepdims=True)
    h = (x - mean) * jax.lax.rsqrt(var + eps)
    h = h * g_ref[...].astype(jnp.float32) + bt_ref[...].astype(jnp.float32)
    acc = jnp.dot(h.astype(MXU_DTYPE), w_ref[...].astype(MXU_DTYPE),
                  preferred_element_type=jnp.float32)
    acc = acc + b_ref[...].astype(jnp.float32)
    if activation == "quick_gelu":
        acc = acc * jax.nn.sigmoid(1.702 * acc)
    o_ref[...] = acc.astype(o_ref.dtype)


def ln_matmul_bias(x, gamma, beta, w, b, activation="none", eps=1e-5,
                   tm_target=512, tn_target=512):
    """Fused LayerNorm + projection.  K (=hidden) kept whole: LN needs the full row."""
    M, K = x.shape
    _, N = w.shape
    tm = _pick_tile(M, tm_target, 8)
    tn = _pick_tile(N, tn_target, 128)
    return pl.pallas_call(
        functools.partial(_ln_mm_kernel, activation=activation, eps=eps),
        out_shape=jax.ShapeDtypeStruct((M, N), x.dtype),
        grid=(M // tm, N // tn),
        in_specs=[
            pl.BlockSpec((tm, K), lambda i, j: (i, 0)),
            pl.BlockSpec((1, K), lambda i, j: (0, 0)),
            pl.BlockSpec((1, K), lambda i, j: (0, 0)),
            pl.BlockSpec((K, tn), lambda i, j: (0, j)),
            pl.BlockSpec((1, tn), lambda i, j: (0, j)),
        ],
        out_specs=pl.BlockSpec((tm, tn), lambda i, j: (i, j)),
        compiler_params=pltpu.CompilerParams(
            dimension_semantics=("parallel", "parallel")),
    )(x, gamma.reshape(1, K), beta.reshape(1, K), w, b.reshape(1, N))


def _layernorm_kernel(x_ref, g_ref, b_ref, o_ref, *, eps):
    x = x_ref[...].astype(jnp.float32)
    mean = jnp.mean(x, axis=-1, keepdims=True)
    var = jnp.mean(jnp.square(x - mean), axis=-1, keepdims=True)
    y = (x - mean) * jax.lax.rsqrt(var + eps)
    y = y * g_ref[...].astype(jnp.float32) + b_ref[...].astype(jnp.float32)
    o_ref[...] = y.astype(o_ref.dtype)


def layernorm(x, gamma, beta, eps=1e-5, tm_target=512):
    M, H = x.shape
    tm = _pick_tile(M, tm_target, 8)
    return pl.pallas_call(
        functools.partial(_layernorm_kernel, eps=eps),
        out_shape=jax.ShapeDtypeStruct((M, H), x.dtype),
        grid=(M // tm,),
        in_specs=[
            pl.BlockSpec((tm, H), lambda i: (i, 0)),
            pl.BlockSpec((1, H), lambda i: (0, 0)),
            pl.BlockSpec((1, H), lambda i: (0, 0)),
        ],
        out_specs=pl.BlockSpec((tm, H), lambda i: (i, 0)),
        compiler_params=pltpu.CompilerParams(dimension_semantics=("parallel",)),
    )(x, gamma.reshape(1, H), beta.reshape(1, H))


def _attn_kernel(qkv_ref, o_ref, *, heads, scale):
    """All heads of one crop per grid step; output is a lane-dense (S, H) slab."""
    qkv = qkv_ref[0].astype(jnp.float32)              # (S, 3H)
    H3 = qkv.shape[-1]
    H = H3 // 3
    dh = H // heads
    q = qkv[:, :H] * scale
    k = qkv[:, H:2 * H]
    v = qkv[:, 2 * H:]
    outs = []
    for h in range(heads):                            # static unroll over heads
        qh = q[:, h * dh:(h + 1) * dh].astype(MXU_DTYPE)
        kh = k[:, h * dh:(h + 1) * dh].astype(MXU_DTYPE)
        vh = v[:, h * dh:(h + 1) * dh].astype(MXU_DTYPE)
        # contract last dims directly: no explicit k.T transpose through the XLU
        s = jax.lax.dot_general(qh, kh, (((1,), (1,)), ((), ())),
                                preferred_element_type=jnp.float32)   # (S, S)
        s = s - jnp.max(s, axis=-1, keepdims=True)
        p = jnp.exp(s)
        p = p * pl.reciprocal(jnp.sum(p, axis=-1, keepdims=True), approx=True)
        outs.append(jnp.dot(p.astype(MXU_DTYPE), vh,
                            preferred_element_type=jnp.float32))
    o_ref[0] = jnp.concatenate(outs, axis=-1).astype(o_ref.dtype)


def attention(qkv, heads, scale):
    """qkv: (B, S, 3H) packed projections -> (B, S, H) attention output."""
    B, S, H3 = qkv.shape
    H = H3 // 3
    return pl.pallas_call(
        functools.partial(_attn_kernel, heads=heads, scale=scale),
        out_shape=jax.ShapeDtypeStruct((B, S, H), qkv.dtype),
        grid=(B,),
        in_specs=[pl.BlockSpec((1, S, H3), lambda i: (i, 0, 0))],
        out_specs=pl.BlockSpec((1, S, H), lambda i: (i, 0, 0)),
        compiler_params=pltpu.CompilerParams(dimension_semantics=("parallel",)),
    )(qkv)


# ----------------------------------------------------------------------------
# Synthetic CLIP vision model (forward_feature)
# ----------------------------------------------------------------------------

def init_params(key, cfg):
    H, C, P = cfg["hidden"], cfg["channels"], cfg["patch_size"]
    I, L = cfg["intermediate"], cfg["num_layers"]
    S = (cfg["split_size"] // P) ** 2 + 1            # patches per crop + cls
    keys = jax.random.split(key, 4 + L)

    def nrm(k, shape, dt=MXU_DTYPE):
        return (0.02 * jax.random.normal(k, shape)).astype(dt)

    params = {
        "patch_w": nrm(keys[0], (P * P * C, H)),      # conv(C,H,P,P,stride=P) as matmul (NHWC feature order)
        "patch_b": jnp.zeros((H,), jnp.float32),      # bias=False in CLIP; kept zero
        "cls": nrm(keys[1], (H,), jnp.float32),
        "pos": nrm(keys[2], (S, H), jnp.float32),
        "pre_ln_g": jnp.ones((H,), jnp.float32),
        "pre_ln_b": jnp.zeros((H,), jnp.float32),
        "layers": [],
    }
    for l in range(L):
        lk = jax.random.split(keys[4 + l], 6)
        qkv_w = jnp.concatenate(
            [nrm(lk[0], (H, H)), nrm(lk[1], (H, H)), nrm(lk[2], (H, H))], axis=1)
        params["layers"].append({
            "ln1_g": jnp.ones((H,), jnp.float32), "ln1_b": jnp.zeros((H,), jnp.float32),
            "qkv_w": qkv_w, "qkv_b": jnp.zeros((3 * H,), jnp.float32),
            "o_w": nrm(lk[3], (H, H)), "o_b": jnp.zeros((H,), jnp.float32),
            "ln2_g": jnp.ones((H,), jnp.float32), "ln2_b": jnp.zeros((H,), jnp.float32),
            "fc1_w": nrm(lk[4], (H, I)), "fc1_b": jnp.zeros((I,), jnp.float32),
            "fc2_w": nrm(lk[5], (I, H)), "fc2_b": jnp.zeros((H,), jnp.float32),
        })
    return params


def encoder_layer(x, p, cfg):
    B, S, H = x.shape
    nh = cfg["heads"]
    eps = cfg["eps"]
    x2d = x.reshape(B * S, H)

    # LN1 -> packed QKV projection (one fused kernel)
    qkv = ln_matmul_bias(x2d, p["ln1_g"], p["ln1_b"], p["qkv_w"], p["qkv_b"], eps=eps)
    # multi-head attention, all heads per grid step, no host-side head transposes
    a = attention(qkv.reshape(B, S, 3 * H), heads=nh, scale=(H // nh) ** -0.5)
    # out-projection + residual add (fused epilogue)
    x2d = matmul_bias(a.reshape(B * S, H), p["o_w"], p["o_b"], residual=x2d)

    # LN2 -> fc1 with quick_gelu (fused), then fc2 + residual (fused)
    h = ln_matmul_bias(x2d, p["ln2_g"], p["ln2_b"], p["fc1_w"], p["fc1_b"],
                       activation="quick_gelu", eps=eps)
    x2d = matmul_bias(h, p["fc2_w"], p["fc2_b"], residual=x2d)
    return x2d.reshape(B, S, H)


def clip_forward_feature(params, cfg, images):
    """images: (B, C, crop, crop) NCHW -> patch features (B, num_patches, hidden)."""
    B, C, Himg, Wimg = images.shape
    P, H = cfg["patch_size"], cfg["hidden"]
    Hp, Wp = Himg // P, Wimg // P

    # Pad the crop batch ONCE to a multiple of 8 so every (B*S, H) slab tiles exactly
    # (padded crops are fully independent -- attention is per-crop -- and sliced off).
    Bp = ((B + 7) // 8) * 8
    if Bp != B:
        images = jnp.concatenate(
            [images, jnp.zeros((Bp - B, C, Himg, Wimg), images.dtype)], axis=0)

    # patch-embed conv (stride = kernel = P) as one matmul; NHWC so features are (P,P,C)
    x = images.transpose(0, 2, 3, 1)                                   # NHWC
    patches = x.reshape(Bp, Hp, P, Wp, P, C).transpose(0, 1, 3, 2, 4, 5)
    patches = patches.reshape(Bp * Hp * Wp, P * P * C)
    emb = matmul_bias(patches, params["patch_w"], params["patch_b"],
                      tm_target=256).reshape(Bp, Hp * Wp, H)

    cls = jnp.broadcast_to(params["cls"].reshape(1, 1, H).astype(emb.dtype), (Bp, 1, H))
    z = jnp.concatenate([cls, emb], axis=1) + params["pos"][None].astype(emb.dtype)
    S = z.shape[1]
    z = layernorm(z.reshape(Bp * S, H), params["pre_ln_g"], params["pre_ln_b"],
                  cfg["eps"]).reshape(Bp, S, H)

    hidden_states = [z]
    for p in params["layers"]:
        z = encoder_layer(z, p, cfg)
        hidden_states.append(z)

    feats = hidden_states[cfg["select_layer"]]   # mm_vision_select_layer
    return feats[:B, 1:]                         # select_feature == 'patch': drop cls


# ----------------------------------------------------------------------------
# s2wrapper.forward (multiscale_forward) glue
# ----------------------------------------------------------------------------

def split_chessboard(x, n):
    B, C, Hh, Ww = x.shape
    h, w = Hh // n, Ww // n
    return (x.reshape(B, C, n, h, n, w)
             .transpose(2, 4, 0, 1, 3, 5)
             .reshape(n * n * B, C, h, w))


def merge_chessboard(x, n):
    BB, C, h, w = x.shape
    B = BB // (n * n)
    return (x.reshape(n, n, B, C, h, w)
             .transpose(2, 3, 0, 4, 1, 5)
             .reshape(B, C, n * h, n * w))


def area_downsample(x, out_size):
    B, C, Hh, Ww = x.shape
    fh, fw = Hh // out_size, Ww // out_size
    return x.reshape(B, C, out_size, fh, out_size, fw).mean(axis=(3, 5))


def multiscale_forward(model_fn, images, img_sizes, max_split_size):
    B, C, _, _ = images.shape
    num_splits = [int(math.ceil(s / max_split_size)) for s in img_sizes]

    # Resize to each scale, chessboard-split, and batch ALL crops (same crop size)
    # through ONE CLIP forward.
    crops = []
    for s, n in zip(img_sizes, num_splits):
        # TODO(synk): jax 'cubic' resize uses Keys a=-0.5 (+antialias on downscale);
        # PyTorch bicubic uses a=-0.75, antialias=False -> small numeric mismatch.
        x = jax.image.resize(images.astype(jnp.float32), (B, C, s, s),
                             method="cubic").astype(images.dtype)
        crops.append(split_chessboard(x, n))                    # (n*n*B, C, split, split)
    counts = [c.shape[0] for c in crops]
    all_feats = model_fn(jnp.concatenate(crops, axis=0))        # (sum, hw*hw, hidden)

    hw = int(round(all_feats.shape[1] ** 0.5))
    Hdim = all_feats.shape[2]
    outs, off = [], 0
    for n, cnt in zip(num_splits, counts):
        f = all_feats[off:off + cnt]
        off += cnt
        f = f.transpose(0, 2, 1).reshape(cnt, Hdim, hw, hw)
        outs.append(merge_chessboard(f, n))                     # (B, hidden, n*hw, n*hw)
    out_size = outs[0].shape[-2]
    outs = [area_downsample(o.astype(jnp.float32), out_size).astype(o.dtype) for o in outs]
    out = jnp.concatenate(outs, axis=1)                         # (B, hidden*len(scales), hw, hw)
    return out.reshape(B, out.shape[1], -1).transpose(0, 2, 1)  # b (h w) c


def clip_vision_tower_s2_forward(params, cfg, images):
    """Equivalent of CLIPVisionTowerS2.forward."""
    fn = lambda crops: clip_forward_feature(params, cfg, crops)
    if isinstance(images, (list, tuple)):
        return [multiscale_forward(fn, img[None], cfg["scales"], cfg["split_size"])
                for img in images]
    return multiscale_forward(fn, images, cfg["scales"], cfg["split_size"])


# ----------------------------------------------------------------------------
if __name__ == "__main__":
    cfg = dict(
        channels=3, patch_size=4,
        split_size=16, scales=[16, 32, 48],      # s2_scales sorted; split = smallest
        hidden=32, heads=4, intermediate=64, num_layers=2,
        select_layer=-2, eps=1e-5,
    )
    key = jax.random.PRNGKey(0)
    pkey, xkey = jax.random.split(key)
    params = init_params(pkey, cfg)

    # images arrive at the largest S2 scale (image_processor crop = s2_image_size)
    images = jax.random.normal(xkey, (2, cfg["channels"], 48, 48), dtype=jnp.float32)

    forward = jax.jit(lambda imgs: clip_vision_tower_s2_forward(params, cfg, imgs))
    feats = jax.block_until_ready(forward(images))

    expected = (2, (cfg["split_size"] // cfg["patch_size"]) ** 2,
                cfg["hidden"] * len(cfg["scales"]))              # (2, 16, 96)
    assert feats.shape == expected, feats.shape
    assert bool(jnp.all(jnp.isfinite(feats)))
    print("KERNEL_OK")
</pallas_src>

<mosaic_0001>
module attributes {stable_mosaic.version = 11 : i64} {
  func.func @_mm_kernel(%arg0: i32, %arg1: i32, %arg2: i32, %arg3: memref<256x48xf32, #tpu.memory_space<vmem>>, %arg4: memref<48x32xbf16, #tpu.memory_space<vmem>>, %arg5: memref<1x32xf32, #tpu.memory_space<vmem>>, %arg6: memref<256x32xf32, #tpu.memory_space<vmem>>, %arg7: memref<256x32xf32, #tpu.memory_space<vmem>>) attributes {dimension_semantics = [#tpu.dimension_semantics<parallel>, #tpu.dimension_semantics<parallel>, #tpu.dimension_semantics<arbitrary>], iteration_bounds = array<i64: 2, 1, 1>, scalar_prefetch = 0 : i64, scratch_operands = 1 : i64, tpu.core_type = #tpu.core_type<tc>, window_params = [{transform_indices = @transform_0, window_bounds = array<i64: 256, 48>}, {transform_indices = @transform_1, window_bounds = array<i64: 48, 32>}, {transform_indices = @transform_2, window_bounds = array<i64: 1, 32>}, {transform_indices = @transform_3, window_bounds = array<i64: 256, 32>}]} {
    %c0_i32 = arith.constant 0 : i32
    %0 = arith.cmpi eq, %arg2, %c0_i32 : i32
    %1 = arith.extui %0 : i1 to i32
    %c0_i32_0 = arith.constant 0 : i32
    %2 = arith.cmpi ne, %1, %c0_i32_0 : i32
    scf.if %2 {
      %cst_10 = arith.constant 0.000000e+00 : f32
      %13 = vector.broadcast %cst_10 : f32 to vector<256x32xf32>
      %c0_11 = arith.constant 0 : index
      %c0_12 = arith.constant 0 : index
      %14 = vector.load %arg7[%c0_11, %c0_12] : memref<256x32xf32, #tpu.memory_space<vmem>>, vector<256x32xf32>
      tpu.vector_store %arg7[%c0_11, %c0_12], %13 {strides = array<i32>} : memref<256x32xf32, #tpu.memory_space<vmem>>, vector<256x32xf32>,
    } else {
    }
    %c0 = arith.constant 0 : index
    %c0_1 = arith.constant 0 : index
    %3 = vector.load %arg7[%c0, %c0_1] : memref<256x32xf32, #tpu.memory_space<vmem>>, vector<256x32xf32>
    %c0_2 = arith.constant 0 : index
    %c0_3 = arith.constant 0 : index
    %4 = vector.load %arg3[%c0_2, %c0_3] : memref<256x48xf32, #tpu.memory_space<vmem>>, vector<256x48xf32>
    %5 = arith.truncf %4 : vector<256x48xf32> to vector<256x48xbf16>
    %c0_4 = arith.constant 0 : index
    %c0_5 = arith.constant 0 : index
    %6 = vector.load %arg4[%c0_4, %c0_5] : memref<48x32xbf16, #tpu.memory_space<vmem>>, vector<48x32xbf16>
    %cst = arith.constant dense<0.000000e+00> : vector<256x32xf32>
    %7 = tpu.matmul %5, %6, %cst {dimension_numbers = #tpu.dot_dimension_numbers<[1], [0], [0], [1], [0, 0, 1, 1], [], []>} : vector<256x48xbf16>, vector<48x32xbf16>, vector<256x32xf32> -> vector<256x32xf32>
    %8 = arith.addf %3, %7 : vector<256x32xf32>
    %c0_6 = arith.constant 0 : index
    %c0_7 = arith.constant 0 : index
    %9 = vector.load %arg7[%c0_6, %c0_7] : memref<256x32xf32, #tpu.memory_space<vmem>>, vector<256x32xf32>
    tpu.vector_store %arg7[%c0_6, %c0_7], %8 {strides = array<i32>} : memref<256x32xf32, #tpu.memory_space<vmem>>, vector<256x32xf32>,
    %c0_i32_8 = arith.constant 0 : i32
    %10 = arith.cmpi eq, %arg2, %c0_i32_8 : i32
    %11 = arith.extui %10 : i1 to i32
    %c0_i32_9 = arith.constant 0 : i32
    %12 = arith.cmpi ne, %11, %c0_i32_9 : i32
    scf.if %12 {
      %c0_10 = arith.constant 0 : index
      %c0_11 = arith.constant 0 : index
      %13 = vector.load %arg7[%c0_10, %c0_11] : memref<256x32xf32, #tpu.memory_space<vmem>>, vector<256x32xf32>
      %c0_12 = arith.constant 0 : index
      %c0_13 = arith.constant 0 : index
      %14 = vector.load %arg5[%c0_12, %c0_13] : memref<1x32xf32, #tpu.memory_space<vmem>>, vector<1x32xf32>
      %15 = vector.broadcast %14 : vector<1x32xf32> to vector<256x32xf32>
      %16 = arith.addf %13, %15 : vector<256x32xf32>
      %c0_14 = arith.constant 0 : index
      %c0_15 = arith.constant 0 : index
      %17 = vector.load %arg6[%c0_14, %c0_15] : memref<256x32xf32, #tpu.memory_space<vmem>>, vector<256x32xf32>
      tpu.vector_store %arg6[%c0_14, %c0_15], %16 {strides = array<i32>} : memref<256x32xf32, #tpu.memory_space<vmem>>, vector<256x32xf32>,
    } else {
    }
    return
  }
  func.func @transform_0(%arg0: i32, %arg1: i32, %arg2: i32) -> (i32, i32) {
    %c0_i32 = arith.constant 0 : i32
    return %arg0, %arg2 : i32, i32
  }
  func.func @transform_1(%arg0: i32, %arg1: i32, %arg2: i32) -> (i32, i32) {
    %c0_i32 = arith.constant 0 : i32
    return %arg2, %arg1 : i32, i32
  }
  func.func @transform_2(%arg0: i32, %arg1: i32, %arg2: i32) -> (i32, i32) {
    %c0_i32 = arith.constant 0 : i32
    %c0_i32_0 = arith.constant 0 : i32
    return %c0_i32, %arg1 : i32, i32
  }
  func.func @transform_3(%arg0: i32, %arg1: i32, %arg2: i32) -> (i32, i32) {
    %c0_i32 = arith.constant 0 : i32
    return %arg0, %arg1 : i32, i32
  }
}

module attributes {stable_mosaic.version = 11 : i64} {
  func.func @_layernorm_kernel(%arg0: i32, %arg1: memref<272x32xf32, #tpu.memory_space<vmem>>, %arg2: memref<1x32xf32, #tpu.memory_space<vmem>>, %arg3: memref<1x32xf32, #tpu.memory_space<vmem>>, %arg4: memref<272x32xf32, #tpu.memory_space<vmem>>) attributes {dimension_semantics = [#tpu.dimension_semantics<parallel>], iteration_bounds = array<i64: 2>, scalar_prefetch = 0 : i64, scratch_operands = 0 : i64, tpu.core_type = #tpu.core_type<tc>, window_params = [{transform_indices = @transform_0, window_bounds = array<i64: 272, 32>}, {pipeline_mode = #tpu.pipeline_mode<synchronous>, transform_indices = @transform_1, window_bounds = array<i64: 1, 32>}, {pipeline_mode = #tpu.pipeline_mode<synchronous>, transform_indices = @transform_2, window_bounds = array<i64: 1, 32>}, {transform_indices = @transform_3, window_bounds = array<i64: 272, 32>}]} {
    %c0 = arith.constant 0 : index
    %c0_0 = arith.constant 0 : index
    %0 = vector.load %arg1[%c0, %c0_0] : memref<272x32xf32, #tpu.memory_space<vmem>>, vector<272x32xf32>
    %cst = arith.constant dense<0.000000e+00> : vector<272xf32>
    %1 = vector.multi_reduction <add>, %0, %cst [1] : vector<272x32xf32> to vector<272xf32>
    %2 = vector.shape_cast %1 : vector<272xf32> to vector<272x1xf32>
    %cst_1 = arith.constant 3.200000e+01 : f32
    %3 = vector.broadcast %cst_1 : f32 to vector<272x1xf32>
    %4 = arith.divf %2, %3 : vector<272x1xf32>
    %5 = vector.broadcast %4 : vector<272x1xf32> to vector<272x32xf32>
    %6 = arith.subf %0, %5 : vector<272x32xf32>
    %7 = arith.mulf %6, %6 : vector<272x32xf32>
    %cst_2 = arith.constant dense<0.000000e+00> : vector<272xf32>
    %8 = vector.multi_reduction <add>, %7, %cst_2 [1] : vector<272x32xf32> to vector<272xf32>
    %9 = vector.shape_cast %8 : vector<272xf32> to vector<272x1xf32>
    %cst_3 = arith.constant 3.200000e+01 : f32
    %10 = vector.broadcast %cst_3 : f32 to vector<272x1xf32>
    %11 = arith.divf %9, %10 : vector<272x1xf32>
    %12 = vector.broadcast %4 : vector<272x1xf32> to vector<272x32xf32>
    %13 = arith.subf %0, %12 : vector<272x32xf32>
    %cst_4 = arith.constant 9.99999974E-6 : f32
    %14 = vector.broadcast %cst_4 : f32 to vector<272x1xf32>
    %15 = arith.addf %11, %14 : vector<272x1xf32>
    %16 = math.rsqrt %15 : vector<272x1xf32>
    %17 = vector.broadcast %16 : vector<272x1xf32> to vector<272x32xf32>
    %18 = arith.mulf %13, %17 : vector<272x32xf32>
    %c0_5 = arith.constant 0 : index
    %c0_6 = arith.constant 0 : index
    %19 = vector.load %arg2[%c0_5, %c0_6] : memref<1x32xf32, #tpu.memory_space<vmem>>, vector<1x32xf32>
    %20 = vector.broadcast %19 : vector<1x32xf32> to vector<272x32xf32>
    %21 = arith.mulf %18, %20 : vector<272x32xf32>
    %c0_7 = arith.constant 0 : index
    %c0_8 = arith.constant 0 : index
    %22 = vector.load %arg3[%c0_7, %c0_8] : memref<1x32xf32, #tpu.memory_space<vmem>>, vector<1x32xf32>
    %23 = vector.broadcast %22 : vector<1x32xf32> to vector<272x32xf32>
    %24 = arith.addf %21, %23 : vector<272x32xf32>
    %c0_9 = arith.constant 0 : index
    %c0_10 = arith.constant 0 : index
    %25 = vector.load %arg4[%c0_9, %c0_10] : memref<272x32xf32, #tpu.memory_space<vmem>>, vector<272x32xf32>
    tpu.vector_store %arg4[%c0_9, %c0_10], %24 {strides = array<i32>} : memref<272x32xf32, #tpu.memory_space<vmem>>, vector<272x32xf32>,
    return
  }
  func.func @transform_0(%arg0: i32) -> (i32, i32) {
    %c0_i32 = arith.constant 0 : i32
    %c0_i32_0 = arith.constant 0 : i32
    return %arg0, %c0_i32 : i32, i32
  }
  func.func @transform_1(%arg0: i32) -> (i32, i32) {
    %c0_i32 = arith.constant 0 : i32
    %c0_i32_0 = arith.constant 0 : i32
    %c0_i32_1 = arith.constant 0 : i32
    return %c0_i32, %c0_i32_0 : i32, i32
  }
  func.func @transform_2(%arg0: i32) -> (i32, i32) {
    %c0_i32 = arith.constant 0 : i32
    %c0_i32_0 = arith.constant 0 : i32
    %c0_i32_1 = arith.constant 0 : i32
    return %c0_i32, %c0_i32_0 : i32, i32
  }
  func.func @transform_3(%arg0: i32) -> (i32, i32) {
    %c0_i32 = arith.constant 0 : i32
    %c0_i32_0 = arith.constant 0 : i32
    return %arg0, %c0_i32 : i32, i32
  }
}

module attributes {stable_mosaic.version = 11 : i64} {
  func.func @_ln_mm_kernel(%arg0: i32, %arg1: i32, %arg2: memref<272x32xf32, #tpu.memory_space<vmem>>, %arg3: memref<1x32xf32, #tpu.memory_space<vmem>>, %arg4: memref<1x32xf32, #tpu.memory_space<vmem>>, %arg5: memref<32x96xbf16, #tpu.memory_space<vmem>>, %arg6: memref<1x96xf32, #tpu.memory_space<vmem>>, %arg7: memref<272x96xf32, #tpu.memory_space<vmem>>) attributes {dimension_semantics = [#tpu.dimension_semantics<parallel>, #tpu.dimension_semantics<parallel>], iteration_bounds = array<i64: 2, 1>, scalar_prefetch = 0 : i64, scratch_operands = 0 : i64, tpu.core_type = #tpu.core_type<tc>, window_params = [{transform_indices = @transform_0, window_bounds = array<i64: 272, 32>}, {pipeline_mode = #tpu.pipeline_mode<synchronous>, transform_indices = @transform_1, window_bounds = array<i64: 1, 32>}, {pipeline_mode = #tpu.pipeline_mode<synchronous>, transform_indices = @transform_2, window_bounds = array<i64: 1, 32>}, {transform_indices = @transform_3, window_bounds = array<i64: 32, 96>}, {transform_indices = @transform_4, window_bounds = array<i64: 1, 96>}, {transform_indices = @transform_5, window_bounds = array<i64: 272, 96>}]} {
    %c0 = arith.constant 0 : index
    %c0_0 = arith.constant 0 : index
    %0 = vector.load %arg2[%c0, %c0_0] : memref<272x32xf32, #tpu.memory_space<vmem>>, vector<272x32xf32>
    %cst = arith.constant dense<0.000000e+00> : vector<272xf32>
    %1 = vector.multi_reduction <add>, %0, %cst [1] : vector<272x32xf32> to vector<272xf32>
    %2 = vector.shape_cast %1 : vector<272xf32> to vector<272x1xf32>
    %cst_1 = arith.constant 3.200000e+01 : f32
    %3 = vector.broadcast %cst_1 : f32 to vector<272x1xf32>
    %4 = arith.divf %2, %3 : vector<272x1xf32>
    %5 = vector.broadcast %4 : vector<272x1xf32> to vector<272x32xf32>
    %6 = arith.subf %0, %5 : vector<272x32xf32>
    %7 = arith.mulf %6, %6 : vector<272x32xf32>
    %cst_2 = arith.constant dense<0.000000e+00> : vector<272xf32>
    %8 = vector.multi_reduction <add>, %7, %cst_2 [1] : vector<272x32xf32> to vector<272xf32>
    %9 = vector.shape_cast %8 : vector<272xf32> to vector<272x1xf32>
    %cst_3 = arith.constant 3.200000e+01 : f32
    %10 = vector.broadcast %cst_3 : f32 to vector<272x1xf32>
    %11 = arith.divf %9, %10 : vector<272x1xf32>
    %12 = vector.broadcast %4 : vector<272x1xf32> to vector<272x32xf32>
    %13 = arith.subf %0, %12 : vector<272x32xf32>
    %cst_4 = arith.constant 9.99999974E-6 : f32
    %14 = vector.broadcast %cst_4 : f32 to vector<272x1xf32>
    %15 = arith.addf %11, %14 : vector<272x1xf32>
    %16 = math.rsqrt %15 : vector<272x1xf32>
    %17 = vector.broadcast %16 : vector<272x1xf32> to vector<272x32xf32>
    %18 = arith.mulf %13, %17 : vector<272x32xf32>
    %c0_5 = arith.constant 0 : index
    %c0_6 = arith.constant 0 : index
    %19 = vector.load %arg3[%c0_5, %c0_6] : memref<1x32xf32, #tpu.memory_space<vmem>>, vector<1x32xf32>
    %20 = vector.broadcast %19 : vector<1x32xf32> to vector<272x32xf32>
    %21 = arith.mulf %18, %20 : vector<272x32xf32>
    %c0_7 = arith.constant 0 : index
    %c0_8 = arith.constant 0 : index
    %22 = vector.load %arg4[%c0_7, %c0_8] : memref<1x32xf32, #tpu.memory_space<vmem>>, vector<1x32xf32>
    %23 = vector.broadcast %22 : vector<1x32xf32> to vector<272x32xf32>
    %24 = arith.addf %21, %23 : vector<272x32xf32>
    %25 = arith.truncf %24 : vector<272x32xf32> to vector<272x32xbf16>
    %c0_9 = arith.constant 0 : index
    %c0_10 = arith.constant 0 : index
    %26 = vector.load %arg5[%c0_9, %c0_10] : memref<32x96xbf16, #tpu.memory_space<vmem>>, vector<32x96xbf16>
    %cst_11 = arith.constant dense<0.000000e+00> : vector<272x96xf32>
    %27 = tpu.matmul %25, %26, %cst_11 {dimension_numbers = #tpu.dot_dimension_numbers<[1], [0], [0], [1], [0, 0, 1, 1], [], []>} : vector<272x32xbf16>, vector<32x96xbf16>, vector<272x96xf32> -> vector<272x96xf32>
    %c0_12 = arith.constant 0 : index
    %c0_13 = arith.constant 0 : index
    %28 = vector.load %arg6[%c0_12, %c0_13] : memref<1x96xf32, #tpu.memory_space<vmem>>, vector<1x96xf32>
    %29 = vector.broadcast %28 : vector<1x96xf32> to vector<272x96xf32>
    %30 = arith.addf %27, %29 : vector<272x96xf32>
    %c0_14 = arith.constant 0 : index
    %c0_15 = arith.constant 0 : index
    %31 = vector.load %arg7[%c0_14, %c0_15] : memref<272x96xf32, #tpu.memory_space<vmem>>, vector<272x96xf32>
    tpu.vector_store %arg7[%c0_14, %c0_15], %30 {strides = array<i32>} : memref<272x96xf32, #tpu.memory_space<vmem>>, vector<272x96xf32>,
    return
  }
  func.func @transform_0(%arg0: i32, %arg1: i32) -> (i32, i32) {
    %c0_i32 = arith.constant 0 : i32
    %c0_i32_0 = arith.constant 0 : i32
    return %arg0, %c0_i32 : i32, i32
  }
  func.func @transform_1(%arg0: i32, %arg1: i32) -> (i32, i32) {
    %c0_i32 = arith.constant 0 : i32
    %c0_i32_0 = arith.constant 0 : i32
    %c0_i32_1 = arith.constant 0 : i32
    return %c0_i32, %c0_i32_0 : i32, i32
  }
  func.func @transform_2(%arg0: i32, %arg1: i32) -> (i32, i32) {
    %c0_i32 = arith.constant 0 : i32
    %c0_i32_0 = arith.constant 0 : i32
    %c0_i32_1 = arith.constant 0 : i32
    return %c0_i32, %c0_i32_0 : i32, i32
  }
  func.func @transform_3(%arg0: i32, %arg1: i32) -> (i32, i32) {
    %c0_i32 = arith.constant 0 : i32
    %c0_i32_0 = arith.constant 0 : i32
    return %c0_i32, %arg1 : i32, i32
  }
  func.func @transform_4(%arg0: i32, %arg1: i32) -> (i32, i32) {
    %c0_i32 = arith.constant 0 : i32
    %c0_i32_0 = arith.constant 0 : i32
    return %c0_i32, %arg1 : i32, i32
  }
  func.func @transform_5(%arg0: i32, %arg1: i32) -> (i32, i32) {
    %c0_i32 = arith.constant 0 : i32
    return %arg0, %arg1 : i32, i32
  }
}

module attributes {stable_mosaic.version = 11 : i64} {
  func.func @_attn_kernel(%arg0: i32, %arg1: memref<1x17x96xf32, #tpu.memory_space<vmem>>, %arg2: memref<1x17x32xf32, #tpu.memory_space<vmem>>) attributes {dimension_semantics = [#tpu.dimension_semantics<parallel>], iteration_bounds = array<i64: 32>, scalar_prefetch = 0 : i64, scratch_operands = 0 : i64, tpu.core_type = #tpu.core_type<tc>, window_params = [{transform_indices = @transform_0, window_bounds = array<i64: 1, 17, 96>}, {transform_indices = @transform_1, window_bounds = array<i64: 1, 17, 32>}]} {
    %c0 = arith.constant 0 : index
    %c0_0 = arith.constant 0 : index
    %c0_1 = arith.constant 0 : index
    %0 = vector.load %arg1[%c0, %c0_0, %c0_1] : memref<1x17x96xf32, #tpu.memory_space<vmem>>, vector<1x17x96xf32>
    %1 = vector.shape_cast %0 : vector<1x17x96xf32> to vector<17x96xf32>
    %2 = vector.extract_strided_slice %1 {offsets = [0, 0], sizes = [17, 32], strides = [1, 1]} : vector<17x96xf32> to vector<17x32xf32>
    %cst = arith.constant 0.353553385 : f32
    %3 = vector.broadcast %cst : f32 to vector<17x32xf32>
    %4 = arith.mulf %2, %3 : vector<17x32xf32>
    %5 = vector.extract_strided_slice %1 {offsets = [0, 32], sizes = [17, 32], strides = [1, 1]} : vector<17x96xf32> to vector<17x32xf32>
    %6 = vector.extract_strided_slice %1 {offsets = [0, 64], sizes = [17, 32], strides = [1, 1]} : vector<17x96xf32> to vector<17x32xf32>
    %7 = vector.extract_strided_slice %4 {offsets = [0, 0], sizes = [17, 8], strides = [1, 1]} : vector<17x32xf32> to vector<17x8xf32>
    %8 = arith.truncf %7 : vector<17x8xf32> to vector<17x8xbf16>
    %9 = vector.extract_strided_slice %5 {offsets = [0, 0], sizes = [17, 8], strides = [1, 1]} : vector<17x32xf32> to vector<17x8xf32>
    %10 = arith.truncf %9 : vector<17x8xf32> to vector<17x8xbf16>
    %11 = vector.extract_strided_slice %6 {offsets = [0, 0], sizes = [17, 8], strides = [1, 1]} : vector<17x32xf32> to vector<17x8xf32>
    %12 = arith.truncf %11 : vector<17x8xf32> to vector<17x8xbf16>
    %cst_2 = arith.constant dense<0.000000e+00> : vector<17x17xf32>
    %13 = tpu.matmul %8, %10, %cst_2 {dimension_numbers = #tpu.dot_dimension_numbers<[1], [1], [0], [0], [0, 0, 1, 0], [], []>} : vector<17x8xbf16>, vector<17x8xbf16>, vector<17x17xf32> -> vector<17x17xf32>
    %cst_3 = arith.constant dense<0xFF800000> : vector<17xf32>
    %14 = vector.multi_reduction <maximumf>, %13, %cst_3 [1] : vector<17x17xf32> to vector<17xf32>
    %15 = vector.shape_cast %14 : vector<17xf32> to vector<17x1xf32>
    %16 = vector.broadcast %15 : vector<17x1xf32> to vector<17x17xf32>
    %17 = arith.subf %13, %16 : vector<17x17xf32>
    %18 = math.exp %17 : vector<17x17xf32>
    %cst_4 = arith.constant dense<0.000000e+00> : vector<17xf32>
    %19 = vector.multi_reduction <add>, %18, %cst_4 [1] : vector<17x17xf32> to vector<17xf32>
    %20 = vector.shape_cast %19 : vector<17xf32> to vector<17x1xf32>
    %21 = tpu.reciprocal %20 {approx = true} : vector<17x1xf32> -> vector<17x1xf32>
    %22 = vector.broadcast %21 : vector<17x1xf32> to vector<17x17xf32>
    %23 = arith.mulf %18, %22 : vector<17x17xf32>
    %24 = arith.truncf %23 : vector<17x17xf32> to vector<17x17xbf16>
    %cst_5 = arith.constant dense<0.000000e+00> : vector<17x8xf32>
    %25 = tpu.matmul %24, %12, %cst_5 {dimension_numbers = #tpu.dot_dimension_numbers<[1], [0], [0], [1], [0, 0, 1, 1], [], []>} : vector<17x17xbf16>, vector<17x8xbf16>, vector<17x8xf32> -> vector<17x8xf32>
    %26 = vector.extract_strided_slice %4 {offsets = [0, 8], sizes = [17, 8], strides = [1, 1]} : vector<17x32xf32> to vector<17x8xf32>
    %27 = arith.truncf %26 : vector<17x8xf32> to vector<17x8xbf16>
    %28 = vector.extract_strided_slice %5 {offsets = [0, 8], sizes = [17, 8], strides = [1, 1]} : vector<17x32xf32> to vector<17x8xf32>
    %29 = arith.truncf %28 : vector<17x8xf32> to vector<17x8xbf16>
    %30 = vector.extract_strided_slice %6 {offsets = [0, 8], sizes = [17, 8], strides = [1, 1]} : vector<17x32xf32> to vector<17x8xf32>
    %31 = arith.truncf %30 : vector<17x8xf32> to vector<17x8xbf16>
    %cst_6 = arith.constant dense<0.000000e+00> : vector<17x17xf32>
    %32 = tpu.matmul %27, %29, %cst_6 {dimension_numbers = #tpu.dot_dimension_numbers<[1], [1], [0], [0], [0, 0, 1, 0], [], []>} : vector<17x8xbf16>, vector<17x8xbf16>, vector<17x17xf32> -> vector<17x17xf32>
    %cst_7 = arith.constant dense<0xFF800000> : vector<17xf32>
    %33 = vector.multi_reduction <maximumf>, %32, %cst_7 [1] : vector<17x17xf32> to vector<17xf32>
    %34 = vector.shape_cast %33 : vector<17xf32> to vector<17x1xf32>
    %35 = vector.broadcast %34 : vector<17x1xf32> to vector<17x17xf32>
    %36 = arith.subf %32, %35 : vector<17x17xf32>
    %37 = math.exp %36 : vector<17x17xf32>
    %cst_8 = arith.constant dense<0.000000e+00> : vector<17xf32>
    %38 = vector.multi_reduction <add>, %37, %cst_8 [1] : vector<17x17xf32> to vector<17xf32>
    %39 = vector.shape_cast %38 : vector<17xf32> to vector<17x1xf32>
    %40 = tpu.reciprocal %39 {approx = true} : vector<17x1xf32> -> vector<17x1xf32>
    %41 = vector.broadcast %40 : vector<17x1xf32> to vector<17x17xf32>
    %42 = arith.mulf %37, %41 : vector<17x17xf32>
    %43 = arith.truncf %42 : vector<17x17xf32> to vector<17x17xbf16>
    %cst_9 = arith.constant dense<0.000000e+00> : vector<17x8xf32>
    %44 = tpu.matmul %43, %31, %cst_9 {dimension_numbers = #tpu.dot_dimension_numbers<[1], [0], [0], [1], [0, 0, 1, 1], [], []>} : vector<17x17xbf16>, vector<17x8xbf16>, vector<17x8xf32> -> vector<17x8xf32>
    %45 = vector.extract_strided_slice %4 {offsets = [0, 16], sizes = [17, 8], strides = [1, 1]} : vector<17x32xf32> to vector<17x8xf32>
    %46 = arith.truncf %45 : vector<17x8xf32> to vector<17x8xbf16>
    %47 = vector.extract_strided_slice %5 {offsets = [0, 16], sizes = [17, 8], strides = [1, 1]} : vector<17x32xf32> to vector<17x8xf32>
    %48 = arith.truncf %47 : vector<17x8xf32> to vector<17x8xbf16>
    %49 = vector.extract_strided_slice %6 {offsets = [0, 16], sizes = [17, 8], strides = [1, 1]} : vector<17x32xf32> to vector<17x8xf32>
    %50 = arith.truncf %49 : vector<17x8xf32> to vector<17x8xbf16>
    %cst_10 = arith.constant dense<0.000000e+00> : vector<17x17xf32>
    %51 = tpu.matmul %46, %48, %cst_10 {dimension_numbers = #tpu.dot_dimension_numbers<[1], [1], [0], [0], [0, 0, 1, 0], [], []>} : vector<17x8xbf16>, vector<17x8xbf16>, vector<17x17xf32> -> vector<17x17xf32>
    %cst_11 = arith.constant dense<0xFF800000> : vector<17xf32>
    %52 = vector.multi_reduction <maximumf>, %51, %cst_11 [1] : vector<17x17xf32> to vector<17xf32>
    %53 = vector.shape_cast %52 : vector<17xf32> to vector<17x1xf32>
    %54 = vector.broadcast %53 : vector<17x1xf32> to vector<17x17xf32>
    %55 = arith.subf %51, %54 : vector<17x17xf32>
    %56 = math.exp %55 : vector<17x17xf32>
    %cst_12 = arith.constant dense<0.000000e+00> : vector<17xf32>
    %57 = vector.multi_reduction <add>, %56, %cst_12 [1] : vector<17x17xf32> to vector<17xf32>
    %58 = vector.shape_cast %57 : vector<17xf32> to vector<17x1xf32>
    %59 = tpu.reciprocal %58 {approx = true} : vector<17x1xf32> -> vector<17x1xf32>
    %60 = vector.broadcast %59 : vector<17x1xf32> to vector<17x17xf32>
    %61 = arith.mulf %56, %60 : vector<17x17xf32>
    %62 = arith.truncf %61 : vector<17x17xf32> to vector<17x17xbf16>
    %cst_13 = arith.constant dense<0.000000e+00> : vector<17x8xf32>
    %63 = tpu.matmul %62, %50, %cst_13 {dimension_numbers = #tpu.dot_dimension_numbers<[1], [0], [0], [1], [0, 0, 1, 1], [], []>} : vector<17x17xbf16>, vector<17x8xbf16>, vector<17x8xf32> -> vector<17x8xf32>
    %64 = vector.extract_strided_slice %4 {offsets = [0, 24], sizes = [17, 8], strides = [1, 1]} : vector<17x32xf32> to vector<17x8xf32>
    %65 = arith.truncf %64 : vector<17x8xf32> to vector<17x8xbf16>
    %66 = vector.extract_strided_slice %5 {offsets = [0, 24], sizes = [17, 8], strides = [1, 1]} : vector<17x32xf32> to vector<17x8xf32>
    %67 = arith.truncf %66 : vector<17x8xf32> to vector<17x8xbf16>
    %68 = vector.extract_strided_slice %6 {offsets = [0, 24], sizes = [17, 8], strides = [1, 1]} : vector<17x32xf32> to vector<17x8xf32>
    %69 = arith.truncf %68 : vector<17x8xf32> to vector<17x8xbf16>
    %cst_14 = arith.constant dense<0.000000e+00> : vector<17x17xf32>
    %70 = tpu.matmul %65, %67, %cst_14 {dimension_numbers = #tpu.dot_dimension_numbers<[1], [1], [0], [0], [0, 0, 1, 0], [], []>} : vector<17x8xbf16>, vector<17x8xbf16>, vector<17x17xf32> -> vector<17x17xf32>
    %cst_15 = arith.constant dense<0xFF800000> : vector<17xf32>
    %71 = vector.multi_reduction <maximumf>, %70, %cst_15 [1] : vector<17x17xf32> to vector<17xf32>
    %72 = vector.shape_cast %71 : vector<17xf32> to vector<17x1xf32>
    %73 = vector.broadcast %72 : vector<17x1xf32> to vector<17x17xf32>
    %74 = arith.subf %70, %73 : vector<17x17xf32>
    %75 = math.exp %74 : vector<17x17xf32>
    %cst_16 = arith.constant dense<0.000000e+00> : vector<17xf32>
    %76 = vector.multi_reduction <add>, %75, %cst_16 [1] : vector<17x17xf32> to vector<17xf32>
    %77 = vector.shape_cast %76 : vector<17xf32> to vector<17x1xf32>
    %78 = tpu.reciprocal %77 {approx = true} : vector<17x1xf32> -> vector<17x1xf32>
    %79 = vector.broadcast %78 : vector<17x1xf32> to vector<17x17xf32>
    %80 = arith.mulf %75, %79 : vector<17x17xf32>
    %81 = arith.truncf %80 : vector<17x17xf32> to vector<17x17xbf16>
    %cst_17 = arith.constant dense<0.000000e+00> : vector<17x8xf32>
    %82 = tpu.matmul %81, %69, %cst_17 {dimension_numbers = #tpu.dot_dimension_numbers<[1], [0], [0], [1], [0, 0, 1, 1], [], []>} : vector<17x17xbf16>, vector<17x8xbf16>, vector<17x8xf32> -> vector<17x8xf32>
    %83 = tpu.concatenate %25, %44, %63, %82 in 1 : vector<17x8xf32>, vector<17x8xf32>, vector<17x8xf32>, vector<17x8xf32> -> vector<17x32xf32>
    %c0_18 = arith.constant 0 : index
    %c0_19 = arith.constant 0 : index
    %c0_20 = arith.constant 0 : index
    %84 = vector.load %arg2[%c0_18, %c0_19, %c0_20] : memref<1x17x32xf32, #tpu.memory_space<vmem>>, vector<1x17x32xf32>
    %85 = vector.shape_cast %84 : vector<1x17x32xf32> to vector<17x32xf32>
    %86 = vector.shape_cast %83 : vector<17x32xf32> to vector<1x17x32xf32>
    tpu.vector_store %arg2[%c0_18, %c0_19, %c0_20], %86 {strides = array<i32>} : memref<1x17x32xf32, #tpu.memory_space<vmem>>, vector<1x17x32xf32>,
    return
  }
  func.func @transform_0(%arg0: i32) -> (i32, i32, i32) {
    %c0_i32 = arith.constant 0 : i32
    %c0_i32_0 = arith.constant 0 : i32
    %c0_i32_1 = arith.constant 0 : i32
    return %arg0, %c0_i32, %c0_i32_0 : i32, i32, i32
  }
  func.func @transform_1(%arg0: i32) -> (i32, i32, i32) {
    %c0_i32 = arith.constant 0 : i32
    %c0_i32_0 = arith.constant 0 : i32
    %c0_i32_1 = arith.constant 0 : i32
    return %arg0, %c0_i32, %c0_i32_0 : i32, i32, i32
  }
}

module attributes {stable_mosaic.version = 11 : i64} {
  func.func @_mm_kernel(%arg0: i32, %arg1: i32, %arg2: i32, %arg3: memref<272x32xf32, #tpu.memory_space<vmem>>, %arg4: memref<32x32xbf16, #tpu.memory_space<vmem>>, %arg5: memref<1x32xf32, #tpu.memory_space<vmem>>, %arg6: memref<272x32xf32, #tpu.memory_space<vmem>>, %arg7: memref<272x32xf32, #tpu.memory_space<vmem>>, %arg8: memref<272x32xf32, #tpu.memory_space<vmem>>) attributes {dimension_semantics = [#tpu.dimension_semantics<parallel>, #tpu.dimension_semantics<parallel>, #tpu.dimension_semantics<arbitrary>], iteration_bounds = array<i64: 2, 1, 1>, scalar_prefetch = 0 : i64, scratch_operands = 1 : i64, tpu.core_type = #tpu.core_type<tc>, window_params = [{transform_indices = @transform_0, window_bounds = array<i64: 272, 32>}, {transform_indices = @transform_1, window_bounds = array<i64: 32, 32>}, {transform_indices = @transform_2, window_bounds = array<i64: 1, 32>}, {transform_indices = @transform_3, window_bounds = array<i64: 272, 32>}, {transform_indices = @transform_4, window_bounds = array<i64: 272, 32>}]} {
    %c0_i32 = arith.constant 0 : i32
    %0 = arith.cmpi eq, %arg2, %c0_i32 : i32
    %1 = arith.extui %0 : i1 to i32
    %c0_i32_0 = arith.constant 0 : i32
    %2 = arith.cmpi ne, %1, %c0_i32_0 : i32
    scf.if %2 {
      %cst_10 = arith.constant 0.000000e+00 : f32
      %13 = vector.broadcast %cst_10 : f32 to vector<272x32xf32>
      %c0_11 = arith.constant 0 : index
      %c0_12 = arith.constant 0 : index
      %14 = vector.load %arg8[%c0_11, %c0_12] : memref<272x32xf32, #tpu.memory_space<vmem>>, vector<272x32xf32>
      tpu.vector_store %arg8[%c0_11, %c0_12], %13 {strides = array<i32>} : memref<272x32xf32, #tpu.memory_space<vmem>>, vector<272x32xf32>,
    } else {
    }
    %c0 = arith.constant 0 : index
    %c0_1 = arith.constant 0 : index
    %3 = vector.load %arg8[%c0, %c0_1] : memref<272x32xf32, #tpu.memory_space<vmem>>, vector<272x32xf32>
    %c0_2 = arith.constant 0 : index
    %c0_3 = arith.constant 0 : index
    %4 = vector.load %arg3[%c0_2, %c0_3] : memref<272x32xf32, #tpu.memory_space<vmem>>, vector<272x32xf32>
    %5 = arith.truncf %4 : vector<272x32xf32> to vector<272x32xbf16>
    %c0_4 = arith.constant 0 : index
    %c0_5 = arith.constant 0 : index
    %6 = vector.load %arg4[%c0_4, %c0_5] : memref<32x32xbf16, #tpu.memory_space<vmem>>, vector<32x32xbf16>
    %cst = arith.constant dense<0.000000e+00> : vector<272x32xf32>
    %7 = tpu.matmul %5, %6, %cst {dimension_numbers = #tpu.dot_dimension_numbers<[1], [0], [0], [1], [0, 0, 1, 1], [], []>} : vector<272x32xbf16>, vector<32x32xbf16>, vector<272x32xf32> -> vector<272x32xf32>
    %8 = arith.addf %3, %7 : vector<272x32xf32>
    %c0_6 = arith.constant 0 : index
    %c0_7 = arith.constant 0 : index
    %9 = vector.load %arg8[%c0_6, %c0_7] : memref<272x32xf32, #tpu.memory_space<vmem>>, vector<272x32xf32>
    tpu.vector_store %arg8[%c0_6, %c0_7], %8 {strides = array<i32>} : memref<272x32xf32, #tpu.memory_space<vmem>>, vector<272x32xf32>,
    %c0_i32_8 = arith.constant 0 : i32
    %10 = arith.cmpi eq, %arg2, %c0_i32_8 : i32
    %11 = arith.extui %10 : i1 to i32
    %c0_i32_9 = arith.constant 0 : i32
    %12 = arith.cmpi ne, %11, %c0_i32_9 : i32
    scf.if %12 {
      %c0_10 = arith.constant 0 : index
      %c0_11 = arith.constant 0 : index
      %13 = vector.load %arg8[%c0_10, %c0_11] : memref<272x32xf32, #tpu.memory_space<vmem>>, vector<272x32xf32>
      %c0_12 = arith.constant 0 : index
      %c0_13 = arith.constant 0 : index
      %14 = vector.load %arg5[%c0_12, %c0_13] : memref<1x32xf32, #tpu.memory_space<vmem>>, vector<1x32xf32>
      %15 = vector.broadcast %14 : vector<1x32xf32> to vector<272x32xf32>
      %16 = arith.addf %13, %15 : vector<272x32xf32>
      %c0_14 = arith.constant 0 : index
      %c0_15 = arith.constant 0 : index
      %17 = vector.load %arg6[%c0_14, %c0_15] : memref<272x32xf32, #tpu.memory_space<vmem>>, vector<272x32xf32>
      %18 = arith.addf %16, %17 : vector<272x32xf32>
      %c0_16 = arith.constant 0 : index
      %c0_17 = arith.constant 0 : index
      %19 = vector.load %arg7[%c0_16, %c0_17] : memref<272x32xf32, #tpu.memory_space<vmem>>, vector<272x32xf32>
      tpu.vector_store %arg7[%c0_16, %c0_17], %18 {strides = array<i32>} : memref<272x32xf32, #tpu.memory_space<vmem>>, vector<272x32xf32>,
    } else {
    }
    return
  }
  func.func @transform_0(%arg0: i32, %arg1: i32, %arg2: i32) -> (i32, i32) {
    %c0_i32 = arith.constant 0 : i32
    return %arg0, %arg2 : i32, i32
  }
  func.func @transform_1(%arg0: i32, %arg1: i32, %arg2: i32) -> (i32, i32) {
    %c0_i32 = arith.constant 0 : i32
    return %arg2, %arg1 : i32, i32
  }
  func.func @transform_2(%arg0: i32, %arg1: i32, %arg2: i32) -> (i32, i32) {
    %c0_i32 = arith.constant 0 : i32
    %c0_i32_0 = arith.constant 0 : i32
    return %c0_i32, %arg1 : i32, i32
  }
  func.func @transform_3(%arg0: i32, %arg1: i32, %arg2: i32) -> (i32, i32) {
    %c0_i32 = arith.constant 0 : i32
    return %arg0, %arg1 : i32, i32
  }
  func.func @transform_4(%arg0: i32, %arg1: i32, %arg2: i32) -> (i32, i32) {
    %c0_i32 = arith.constant 0 : i32
    return %arg0, %arg1 : i32, i32
  }
}

module attributes {stable_mosaic.version = 11 : i64} {
  func.func @_ln_mm_kernel(%arg0: i32, %arg1: i32, %arg2: memref<272x32xf32, #tpu.memory_space<vmem>>, %arg3: memref<1x32xf32, #tpu.memory_space<vmem>>, %arg4: memref<1x32xf32, #tpu.memory_space<vmem>>, %arg5: memref<32x64xbf16, #tpu.memory_space<vmem>>, %arg6: memref<1x64xf32, #tpu.memory_space<vmem>>, %arg7: memref<272x64xf32, #tpu.memory_space<vmem>>) attributes {dimension_semantics = [#tpu.dimension_semantics<parallel>, #tpu.dimension_semantics<parallel>], iteration_bounds = array<i64: 2, 1>, scalar_prefetch = 0 : i64, scratch_operands = 0 : i64, tpu.core_type = #tpu.core_type<tc>, window_params = [{transform_indices = @transform_0, window_bounds = array<i64: 272, 32>}, {pipeline_mode = #tpu.pipeline_mode<synchronous>, transform_indices = @transform_1, window_bounds = array<i64: 1, 32>}, {pipeline_mode = #tpu.pipeline_mode<synchronous>, transform_indices = @transform_2, window_bounds = array<i64: 1, 32>}, {transform_indices = @transform_3, window_bounds = array<i64: 32, 64>}, {transform_indices = @transform_4, window_bounds = array<i64: 1, 64>}, {transform_indices = @transform_5, window_bounds = array<i64: 272, 64>}]} {
    %c0 = arith.constant 0 : index
    %c0_0 = arith.constant 0 : index
    %0 = vector.load %arg2[%c0, %c0_0] : memref<272x32xf32, #tpu.memory_space<vmem>>, vector<272x32xf32>
    %cst = arith.constant dense<0.000000e+00> : vector<272xf32>
    %1 = vector.multi_reduction <add>, %0, %cst [1] : vector<272x32xf32> to vector<272xf32>
    %2 = vector.shape_cast %1 : vector<272xf32> to vector<272x1xf32>
    %cst_1 = arith.constant 3.200000e+01 : f32
    %3 = vector.broadcast %cst_1 : f32 to vector<272x1xf32>
    %4 = arith.divf %2, %3 : vector<272x1xf32>
    %5 = vector.broadcast %4 : vector<272x1xf32> to vector<272x32xf32>
    %6 = arith.subf %0, %5 : vector<272x32xf32>
    %7 = arith.mulf %6, %6 : vector<272x32xf32>
    %cst_2 = arith.constant dense<0.000000e+00> : vector<272xf32>
    %8 = vector.multi_reduction <add>, %7, %cst_2 [1] : vector<272x32xf32> to vector<272xf32>
    %9 = vector.shape_cast %8 : vector<272xf32> to vector<272x1xf32>
    %cst_3 = arith.constant 3.200000e+01 : f32
    %10 = vector.broadcast %cst_3 : f32 to vector<272x1xf32>
    %11 = arith.divf %9, %10 : vector<272x1xf32>
    %12 = vector.broadcast %4 : vector<272x1xf32> to vector<272x32xf32>
    %13 = arith.subf %0, %12 : vector<272x32xf32>
    %cst_4 = arith.constant 9.99999974E-6 : f32
    %14 = vector.broadcast %cst_4 : f32 to vector<272x1xf32>
    %15 = arith.addf %11, %14 : vector<272x1xf32>
    %16 = math.rsqrt %15 : vector<272x1xf32>
    %17 = vector.broadcast %16 : vector<272x1xf32> to vector<272x32xf32>
    %18 = arith.mulf %13, %17 : vector<272x32xf32>
    %c0_5 = arith.constant 0 : index
    %c0_6 = arith.constant 0 : index
    %19 = vector.load %arg3[%c0_5, %c0_6] : memref<1x32xf32, #tpu.memory_space<vmem>>, vector<1x32xf32>
    %20 = vector.broadcast %19 : vector<1x32xf32> to vector<272x32xf32>
    %21 = arith.mulf %18, %20 : vector<272x32xf32>
    %c0_7 = arith.constant 0 : index
    %c0_8 = arith.constant 0 : index
    %22 = vector.load %arg4[%c0_7, %c0_8] : memref<1x32xf32, #tpu.memory_space<vmem>>, vector<1x32xf32>
    %23 = vector.broadcast %22 : vector<1x32xf32> to vector<272x32xf32>
    %24 = arith.addf %21, %23 : vector<272x32xf32>
    %25 = arith.truncf %24 : vector<272x32xf32> to vector<272x32xbf16>
    %c0_9 = arith.constant 0 : index
    %c0_10 = arith.constant 0 : index
    %26 = vector.load %arg5[%c0_9, %c0_10] : memref<32x64xbf16, #tpu.memory_space<vmem>>, vector<32x64xbf16>
    %cst_11 = arith.constant dense<0.000000e+00> : vector<272x64xf32>
    %27 = tpu.matmul %25, %26, %cst_11 {dimension_numbers = #tpu.dot_dimension_numbers<[1], [0], [0], [1], [0, 0, 1, 1], [], []>} : vector<272x32xbf16>, vector<32x64xbf16>, vector<272x64xf32> -> vector<272x64xf32>
    %c0_12 = arith.constant 0 : index
    %c0_13 = arith.constant 0 : index
    %28 = vector.load %arg6[%c0_12, %c0_13] : memref<1x64xf32, #tpu.memory_space<vmem>>, vector<1x64xf32>
    %29 = vector.broadcast %28 : vector<1x64xf32> to vector<272x64xf32>
    %30 = arith.addf %27, %29 : vector<272x64xf32>
    %cst_14 = arith.constant 1.702000e+00 : f32
    %31 = vector.broadcast %cst_14 : f32 to vector<272x64xf32>
    %32 = arith.mulf %31, %30 : vector<272x64xf32>
    %33 = arith.negf %32 : vector<272x64xf32>
    %34 = math.exp %33 : vector<272x64xf32>
    %cst_15 = arith.constant 1.000000e+00 : f32
    %35 = vector.broadcast %cst_15 : f32 to vector<272x64xf32>
    %36 = arith.addf %35, %34 : vector<272x64xf32>
    %37 = arith.divf %35, %36 : vector<272x64xf32>
    %38 = arith.mulf %30, %37 : vector<272x64xf32>
    %c0_16 = arith.constant 0 : index
    %c0_17 = arith.constant 0 : index
    %39 = vector.load %arg7[%c0_16, %c0_17] : memref<272x64xf32, #tpu.memory_space<vmem>>, vector<272x64xf32>
    tpu.vector_store %arg7[%c0_16, %c0_17], %38 {strides = array<i32>} : memref<272x64xf32, #tpu.memory_space<vmem>>, vector<272x64xf32>,
    return
  }
  func.func @transform_0(%arg0: i32, %arg1: i32) -> (i32, i32) {
    %c0_i32 = arith.constant 0 : i32
    %c0_i32_0 = arith.constant 0 : i32
    return %arg0, %c0_i32 : i32, i32
  }
  func.func @transform_1(%arg0: i32, %arg1: i32) -> (i32, i32) {
    %c0_i32 = arith.constant 0 : i32
    %c0_i32_0 = arith.constant 0 : i32
    %c0_i32_1 = arith.constant 0 : i32
    return %c0_i32, %c0_i32_0 : i32, i32
  }
  func.func @transform_2(%arg0: i32, %arg1: i32) -> (i32, i32) {
    %c0_i32 = arith.constant 0 : i32
    %c0_i32_0 = arith.constant 0 : i32
    %c0_i32_1 = arith.constant 0 : i32
    return %c0_i32, %c0_i32_0 : i32, i32
  }
  func.func @transform_3(%arg0: i32, %arg1: i32) -> (i32, i32) {
    %c0_i32 = arith.constant 0 : i32
    %c0_i32_0 = arith.constant 0 : i32
    return %c0_i32, %arg1 : i32, i32
  }
  func.func @transform_4(%arg0: i32, %arg1: i32) -> (i32, i32) {
    %c0_i32 = arith.constant 0 : i32
    %c0_i32_0 = arith.constant 0 : i32
    return %c0_i32, %arg1 : i32, i32
  }
  func.func @transform_5(%arg0: i32, %arg1: i32) -> (i32, i32) {
    %c0_i32 = arith.constant 0 : i32
    return %arg0, %arg1 : i32, i32
  }
}

module attributes {stable_mosaic.version = 11 : i64} {
  func.func @_mm_kernel(%arg0: i32, %arg1: i32, %arg2: i32, %arg3: memref<272x64xf32, #tpu.memory_space<vmem>>, %arg4: memref<64x32xbf16, #tpu.memory_space<vmem>>, %arg5: memref<1x32xf32, #tpu.memory_space<vmem>>, %arg6: memref<272x32xf32, #tpu.memory_space<vmem>>, %arg7: memref<272x32xf32, #tpu.memory_space<vmem>>, %arg8: memref<272x32xf32, #tpu.memory_space<vmem>>) attributes {dimension_semantics = [#tpu.dimension_semantics<parallel>, #tpu.dimension_semantics<parallel>, #tpu.dimension_semantics<arbitrary>], iteration_bounds = array<i64: 2, 1, 1>, scalar_prefetch = 0 : i64, scratch_operands = 1 : i64, tpu.core_type = #tpu.core_type<tc>, window_params = [{transform_indices = @transform_0, window_bounds = array<i64: 272, 64>}, {transform_indices = @transform_1, window_bounds = array<i64: 64, 32>}, {transform_indices = @transform_2, window_bounds = array<i64: 1, 32>}, {transform_indices = @transform_3, window_bounds = array<i64: 272, 32>}, {transform_indices = @transform_4, window_bounds = array<i64: 272, 32>}]} {
    %c0_i32 = arith.constant 0 : i32
    %0 = arith.cmpi eq, %arg2, %c0_i32 : i32
    %1 = arith.extui %0 : i1 to i32
    %c0_i32_0 = arith.constant 0 : i32
    %2 = arith.cmpi ne, %1, %c0_i32_0 : i32
    scf.if %2 {
      %cst_10 = arith.constant 0.000000e+00 : f32
      %13 = vector.broadcast %cst_10 : f32 to vector<272x32xf32>
      %c0_11 = arith.constant 0 : index
      %c0_12 = arith.constant 0 : index
      %14 = vector.load %arg8[%c0_11, %c0_12] : memref<272x32xf32, #tpu.memory_space<vmem>>, vector<272x32xf32>
      tpu.vector_store %arg8[%c0_11, %c0_12], %13 {strides = array<i32>} : memref<272x32xf32, #tpu.memory_space<vmem>>, vector<272x32xf32>,
    } else {
    }
    %c0 = arith.constant 0 : index
    %c0_1 = arith.constant 0 : index
    %3 = vector.load %arg8[%c0, %c0_1] : memref<272x32xf32, #tpu.memory_space<vmem>>, vector<272x32xf32>
    %c0_2 = arith.constant 0 : index
    %c0_3 = arith.constant 0 : index
    %4 = vector.load %arg3[%c0_2, %c0_3] : memref<272x64xf32, #tpu.memory_space<vmem>>, vector<272x64xf32>
    %5 = arith.truncf %4 : vector<272x64xf32> to vector<272x64xbf16>
    %c0_4 = arith.constant 0 : index
    %c0_5 = arith.constant 0 : index
    %6 = vector.load %arg4[%c0_4, %c0_5] : memref<64x32xbf16, #tpu.memory_space<vmem>>, vector<64x32xbf16>
    %cst = arith.constant dense<0.000000e+00> : vector<272x32xf32>
    %7 = tpu.matmul %5, %6, %cst {dimension_numbers = #tpu.dot_dimension_numbers<[1], [0], [0], [1], [0, 0, 1, 1], [], []>} : vector<272x64xbf16>, vector<64x32xbf16>, vector<272x32xf32> -> vector<272x32xf32>
    %8 = arith.addf %3, %7 : vector<272x32xf32>
    %c0_6 = arith.constant 0 : index
    %c0_7 = arith.constant 0 : index
    %9 = vector.load %arg8[%c0_6, %c0_7] : memref<272x32xf32, #tpu.memory_space<vmem>>, vector<272x32xf32>
    tpu.vector_store %arg8[%c0_6, %c0_7], %8 {strides = array<i32>} : memref<272x32xf32, #tpu.memory_space<vmem>>, vector<272x32xf32>,
    %c0_i32_8 = arith.constant 0 : i32
    %10 = arith.cmpi eq, %arg2, %c0_i32_8 : i32
    %11 = arith.extui %10 : i1 to i32
    %c0_i32_9 = arith.constant 0 : i32
    %12 = arith.cmpi ne, %11, %c0_i32_9 : i32
    scf.if %12 {
      %c0_10 = arith.constant 0 : index
      %c0_11 = arith.constant 0 : index
      %13 = vector.load %arg8[%c0_10, %c0_11] : memref<272x32xf32, #tpu.memory_space<vmem>>, vector<272x32xf32>
      %c0_12 = arith.constant 0 : index
      %c0_13 = arith.constant 0 : index
      %14 = vector.load %arg5[%c0_12, %c0_13] : memref<1x32xf32, #tpu.memory_space<vmem>>, vector<1x32xf32>
      %15 = vector.broadcast %14 : vector<1x32xf32> to vector<272x32xf32>
      %16 = arith.addf %13, %15 : vector<272x32xf32>
      %c0_14 = arith.constant 0 : index
      %c0_15 = arith.constant 0 : index
      %17 = vector.load %arg6[%c0_14, %c0_15] : memref<272x32xf32, #tpu.memory_space<vmem>>, vector<272x32xf32>
      %18 = arith.addf %16, %17 : vector<272x32xf32>
      %c0_16 = arith.constant 0 : index
      %c0_17 = arith.constant 0 : index
      %19 = vector.load %arg7[%c0_16, %c0_17] : memref<272x32xf32, #tpu.memory_space<vmem>>, vector<272x32xf32>
      tpu.vector_store %arg7[%c0_16, %c0_17], %18 {strides = array<i32>} : memref<272x32xf32, #tpu.memory_space<vmem>>, vector<272x32xf32>,
    } else {
    }
    return
  }
  func.func @transform_0(%arg0: i32, %arg1: i32, %arg2: i32) -> (i32, i32) {
    %c0_i32 = arith.constant 0 : i32
    return %arg0, %arg2 : i32, i32
  }
  func.func @transform_1(%arg0: i32, %arg1: i32, %arg2: i32) -> (i32, i32) {
    %c0_i32 = arith.constant 0 : i32
    return %arg2, %arg1 : i32, i32
  }
  func.func @transform_2(%arg0: i32, %arg1: i32, %arg2: i32) -> (i32, i32) {
    %c0_i32 = arith.constant 0 : i32
    %c0_i32_0 = arith.constant 0 : i32
    return %c0_i32, %arg1 : i32, i32
  }
  func.func @transform_3(%arg0: i32, %arg1: i32, %arg2: i32) -> (i32, i32) {
    %c0_i32 = arith.constant 0 : i32
    return %arg0, %arg1 : i32, i32
  }
  func.func @transform_4(%arg0: i32, %arg1: i32, %arg2: i32) -> (i32, i32) {
    %c0_i32 = arith.constant 0 : i32
    return %arg0, %arg1 : i32, i32
  }
}

</mosaic_0001>

<bundles_post_ra>
// kernel: _lambda_.7
= control target key start
LH: loop header
LB: loop body
LE: loop exit
PB: predicated region body
PF: predicated region fallthrough
CT: control target
= control target key end

     0   :  { %s1062_s12 = smov 0   ;;  %s1064_s13 = smov 0   ;;  %s1328_s0 = inlined_call_operand.vmem [shape: f32[512,48], index: 0, kind: input, shape index: {}]   ;;  %s1329_s1 = inlined_call_operand.vmem [shape: bf16[48,32], index: 1, kind: input, shape index: {}]   ;;  %s1330_s2 = inlined_call_operand.vmem [shape: f32[1,32], index: 2, kind: input, shape index: {}]   ;;  %s1331_s3 = inlined_call_operand.vmem [shape: f32[512,32], index: 3, kind: output, shape index: {}]  }
   0x1   :  { %s1066_s14 = smov 0  }
   0x2 LB: > { %s32_s15 = sadd.s32 1, %s1035_s13  ;;  %p899_p0 = scmp.ge.s32.totalorder %s1039_s14, 1  ;;  %s1039_s14 = sphi %s1066_s14, %s13_s14   ;;  %s1035_s13 = sphi %s1064_s13, %s1333_s13   ;;  %s1031_s12 = sphi %s1062_s12, %s1332_s12  }
   0x3   : > { %p34_p1 = scmp.ge.s32.totalorder %s32_s15, 2  ;;  %p188_p2 = scmp.lt.s32.totalorder %s1039_s14, 3 }
   0x5   : > { %s1335_s15 = smov (%p34_p1, %s32_s15), 0  ;;  %p189_p3 = pnand %p899_p0, %p188_p2 }
   0x6   : > { %s900_s18 = sshll.u32 (!%p189_p3), %s1031_s12, 5 }
   0x7   : > { %192 = sbr.rel (%p189_p3) target bundleno = 262 (0x106), region = 32  ;;  %p230_p4 = scmp.lt.s32.totalorder (!%p189_p3), %s900_s18, 63 }
   0xc   : > { %v1014_v0 = vld [vmem:[%s1329_s1 + $0x10] sm:$0xff]   ;;  %v1015_v1 = vld [vmem:[%s1329_s1 + $0x8] sm:$0xff]   ;;  %s1337_s18 = smov (!%p230_p4, %s900_s18), 63  ;;  %vm264_vm0 = vcmask 261120   ;;  %v1016_v2 = vld [vmem:[%s1329_s1] sm:$0xff]   ;;  %v1041_v3 = vmov 0.0  }
   0xd   : > { %945 = vmatprep.subr.bf16.mxu0 %v1014_v0  ;;  %983 = vmatprep.subr.bf16.mxu1 %v1014_v0  ;;  %267 = vst.msk [vmem:[#allocation2 + $0x10] sm:$0xff] %vm264_vm0, %v1041_v3  ;;  %265 = vst.msk [vmem:[#allocation2] sm:$0xff] %vm264_vm0, %v1041_v3  ;;  %s901_s23 = sshll.u32 %s1337_s18, 3  ;;  %vm401_vm1 = vcmask 392192  }
   0xe   : > { %946 = vmatpush3.bf16.msra.mxu0 %v1014_v0  ;;  %986 = vmatpush3.bf16.msra.mxu1 %v1014_v0  ;;  %266 = vst.msk [vmem:[#allocation2 + $0x8] sm:$0xff] %vm264_vm0, %v1041_v3  ;;  %268 = vst.msk [vmem:[#allocation2 + $0x18] sm:$0xff] %vm264_vm0, %v1041_v3  ;;  %s1129_s26 = scalar_lea.vmem %s1328_s0, %s901_s23  ;;  %s1197_s4 = scalar_lea.vmem %s1331_s3, %s901_s23 }
   0xf   : > { %947 = vmatprep.subr.bf16.mxu0 %v1015_v1  ;;  %984 = vmatprep.subr.bf16.mxu1 %v1015_v1  ;;  %269 = vst.msk [vmem:[#allocation2 + $0x20] sm:$0xff] %vm264_vm0, %v1041_v3  ;;  %270 = vst.msk [vmem:[#allocation2 + $0x28] sm:$0xff] %vm264_vm0, %v1041_v3  ;;  %v329_v4 = vld [vmem:[%s1129_s26] sm:$0xff]  ;;  %v330_v5 = vld [vmem:[%s1129_s26 + $0x8] sm:$0xff] }
  0x10   : > { %271 = vst.msk [vmem:[#allocation2 + $0x30] sm:$0xff] %vm264_vm0, %v1041_v3  ;;  %272 = vst.msk [vmem:[#allocation2 + $0x38] sm:$0xff] %vm264_vm0, %v1041_v3  ;;  %v345_v6 = vld [vmem:[%s1129_s26 + $0x80] sm:$0xff]  ;;  %v361_v7 = vpack.c.bf16 %v330_v5, %v329_v4  ;;  %v346_v8 = vld [vmem:[%s1129_s26 + $0x88] sm:$0xff] }
  0x11   : > { %273 = vst.msk [vmem:[#allocation2 + $0x40] sm:$0xff] %vm264_vm0, %v1041_v3  ;;  %274 = vst.msk [vmem:[#allocation2 + $0x48] sm:$0xff] %vm264_vm0, %v1041_v3  ;;  %v331_v9 = vld [vmem:[%s1129_s26 + $0x10] sm:$0xff]  ;;  %v332_v10 = vld [vmem:[%s1129_s26 + $0x18] sm:$0xff]  ;;  %v369_v11 = vpack.c.bf16 %v346_v8, %v345_v6 }
  0x12   : > { %275 = vst.msk [vmem:[#allocation2 + $0x50] sm:$0xff] %vm264_vm0, %v1041_v3  ;;  %276 = vst.msk [vmem:[#allocation2 + $0x58] sm:$0xff] %vm264_vm0, %v1041_v3  ;;  %948 = vmatpush3.bf16.msra.mxu0 %v1015_v1  ;;  %987 = vmatpush3.bf16.msra.mxu1 %v1015_v1  ;;  %v347_v12 = vld [vmem:[%s1129_s26 + $0x90] sm:$0xff]  ;;  %v348_v13 = vld [vmem:[%s1129_s26 + $0x98] sm:$0xff]  ;;  %v362_v15 = vpack.c.bf16 %v332_v10, %v331_v9 }
  0x13   : > { %277 = vst.msk [vmem:[#allocation2 + $0x60] sm:$0xff] %vm264_vm0, %v1041_v3  ;;  %278 = vst.msk [vmem:[#allocation2 + $0x68] sm:$0xff] %vm264_vm0, %v1041_v3  ;;  %949 = vmatprep.subr.bf16.mxu0 %v1016_v2  ;;  %985 = vmatprep.subr.bf16.mxu1 %v1016_v2  ;;  %v333_v14 = vld [vmem:[%s1129_s26 + $0x20] sm:$0xff]  ;;  %v370_v16 = vpack.c.bf16 %v348_v13, %v347_v12  ;;  %v334_v17 = vld [vmem:[%s1129_s26 + $0x28] sm:$0xff] }
  0x14   : > { %279 = vst.msk [vmem:[#allocation2 + $0x70] sm:$0xff] %vm264_vm0, %v1041_v3  ;;  %280 = vst.msk [vmem:[#allocation2 + $0x78] sm:$0xff] %vm264_vm0, %v1041_v3  ;;  %951 = vmatprep.mubr.msk.bf16.mxu0 %vm401_vm1, %v361_v7  ;;  %v349_v18 = vld [vmem:[%s1129_s26 + $0xa0] sm:$0xff]  ;;  %v350_v19 = vld [vmem:[%s1129_s26 + $0xa8] sm:$0xff]  ;;  %v363_v20 = vpack.c.bf16 %v334_v17, %v333_v14  ;;  %967 = vmatprep.mubr.msk.bf16.mxu1 %vm401_vm1, %v369_v11 }
  0x15   : > { %281 = vst.msk [vmem:[#allocation2 + $0x80] sm:$0xff] %vm264_vm0, %v1041_v3  ;;  %282 = vst.msk [vmem:[#allocation2 + $0x88] sm:$0xff] %vm264_vm0, %v1041_v3  ;;  %v371_v21 = vpack.c.bf16 %v350_v19, %v349_v18  ;;  %v335_v22 = vld [vmem:[%s1129_s26 + $0x30] sm:$0xff]  ;;  %v336_v23 = vld [vmem:[%s1129_s26 + $0x38] sm:$0xff] }
  0x16   : > { %283 = vst.msk [vmem:[#allocation2 + $0x90] sm:$0xff] %vm264_vm0, %v1041_v3  ;;  %284 = vst.msk [vmem:[#allocation2 + $0x98] sm:$0xff] %vm264_vm0, %v1041_v3  ;;  %950 = vmatpush3.bf16.msra.mxu0 %v1016_v2  ;;  %988 = vmatpush3.bf16.msra.mxu1 %v1016_v2  ;;  %v351_v24 = vld [vmem:[%s1129_s26 + $0xb0] sm:$0xff]  ;;  %v352_v25 = vld [vmem:[%s1129_s26 + $0xb8] sm:$0xff]  ;;  %v364_v30 = vpack.c.bf16 %v336_v23, %v335_v22 }
  0x17   : > { %285 = vst.msk [vmem:[#allocation2 + $0xa0] sm:$0xff] %vm264_vm0, %v1041_v3  ;;  %286 = vst.msk [vmem:[#allocation2 + $0xa8] sm:$0xff] %vm264_vm0, %v1041_v3  ;;  %v337_v26 = vld [vmem:[%s1129_s26 + $0x40] sm:$0xff]  ;;  %v338_v27 = vld [vmem:[%s1129_s26 + $0x48] sm:$0xff]  ;;  %v372_v31 = vpack.c.bf16 %v352_v25, %v351_v24 }
  0x18   : > { %287 = vst.msk [vmem:[#allocation2 + $0xb0] sm:$0xff] %vm264_vm0, %v1041_v3  ;;  %288 = vst.msk [vmem:[#allocation2 + $0xb8] sm:$0xff] %vm264_vm0, %v1041_v3  ;;  %v353_v28 = vld [vmem:[%s1129_s26 + $0xc0] sm:$0xff]  ;;  %v354_v29 = vld [vmem:[%s1129_s26 + $0xc8] sm:$0xff]  ;;  %v365_v32 = vpack.c.bf16 %v338_v27, %v337_v26 }
  0x19   : > { %289 = vst.msk [vmem:[#allocation2 + $0xc0] sm:$0xff] %vm264_vm0, %v1041_v3  ;;  %290 = vst.msk [vmem:[#allocation2 + $0xc8] sm:$0xff] %vm264_vm0, %v1041_v3  ;;  %952 = vmatmul.mubr.msk.bf16.vlgmr.msra.gmra.mxu0 %vm401_vm1, %v362_v15  ;;  %968 = vmatmul.mubr.msk.bf16.vlgmr.msra.gmra.mxu1 %vm401_vm1, %v370_v16  ;;  %v373_v33 = vpack.c.bf16 %v354_v29, %v353_v28  ;;  %v339_v34 = vld [vmem:[%s1129_s26 + $0x50] sm:$0xff]  ;;  %v340_v35 = vld [vmem:[%s1129_s26 + $0x58] sm:$0xff] }
  0x1a   : > { %291 = vst.msk [vmem:[#allocation2 + $0xd0] sm:$0xff] %vm264_vm0, %v1041_v3  ;;  %292 = vst.msk [vmem:[#allocation2 + $0xd8] sm:$0xff] %vm264_vm0, %v1041_v3  ;;  %955 = vmatprep.mubr.msk.bf16.mxu0 %vm401_vm1, %v363_v20  ;;  %971 = vmatprep.mubr.msk.bf16.mxu1 %vm401_vm1, %v371_v21  ;;  %v355_v36 = vld [vmem:[%s1129_s26 + $0xd0] sm:$0xff]  ;;  %v356_v37 = vld [vmem:[%s1129_s26 + $0xd8] sm:$0xff]  ;;  %v366_v42 = vpack.c.bf16 %v340_v35, %v339_v34 }
  0x1b   : > { %293 = vst.msk [vmem:[#allocation2 + $0xe0] sm:$0xff] %vm264_vm0, %v1041_v3  ;;  %294 = vst.msk [vmem:[#allocation2 + $0xe8] sm:$0xff] %vm264_vm0, %v1041_v3  ;;  %v341_v38 = vld [vmem:[%s1129_s26 + $0x60] sm:$0xff]  ;;  %v342_v39 = vld [vmem:[%s1129_s26 + $0x68] sm:$0xff]  ;;  %v374_v43 = vpack.c.bf16 %v356_v37, %v355_v36 }
  0x1c   : > { %295 = vst.msk [vmem:[#allocation2 + $0xf0] sm:$0xff] %vm264_vm0, %v1041_v3  ;;  %296 = vst.msk [vmem:[#allocation2 + $0xf8] sm:$0xff] %vm264_vm0, %v1041_v3  ;;  %v357_v40 = vld [vmem:[%s1129_s26 + $0xe0] sm:$0xff]  ;;  %v358_v41 = vld [vmem:[%s1129_s26 + $0xe8] sm:$0xff]  ;;  %v367_v44 = vpack.c.bf16 %v342_v39, %v341_v38 }
  0x1d   : > { %v375_v45 = vpack.c.bf16 %v358_v41, %v357_v40  ;;  %v343_v46 = vld [vmem:[%s1129_s26 + $0x70] sm:$0xff]  ;;  %v344_v47 = vld [vmem:[%s1129_s26 + $0x78] sm:$0xff]  ;;  %v297_v56 = vld [vmem:[#allocation2] sm:$0xff] }
  0x1e   : > { %v359_v48 = vld [vmem:[%s1129_s26 + $0xf0] sm:$0xff]  ;;  %v360_v49 = vld [vmem:[%s1129_s26 + $0xf8] sm:$0xff]  ;;  %v368_v50 = vpack.c.bf16 %v344_v47, %v343_v46  ;;  %v313_v57 = vld [vmem:[#allocation2 + $0x80] sm:$0xff] }
  0x1f   : > { %v376_v51 = vpack.c.bf16 %v360_v49, %v359_v48  ;;  %v299_v52 = vld [vmem:[#allocation2 + $0x10] sm:$0xff]  ;;  %v300_v62 = vld [vmem:[#allocation2 + $0x18] sm:$0xff]  ;;  %v298_v4 = vld [vmem:[#allocation2 + $0x8] sm:$0xff] }
  0x20   : > { %v315_v53 = vld [vmem:[#allocation2 + $0x90] sm:$0xff]  ;;  %v316_v63 = vld [vmem:[#allocation2 + $0x98] sm:$0xff]  ;;  %v314_v5 = vld [vmem:[#allocation2 + $0x88] sm:$0xff] }
  0x21   : > { %956 = vmatmul.mubr.msk.bf16.gmra.mxu0 %vm401_vm1, %v364_v30  ;;  %972 = vmatmul.mubr.msk.bf16.gmra.mxu1 %vm401_vm1, %v372_v31  ;;  %v303_v10 = vld [vmem:[#allocation2 + $0x30] sm:$0xff]  ;;  %v1188_v14 = vld [vmem:[%s1330_s2] ss:$0 sm:$0xff]  ;;  %v304_v21 = vld [vmem:[#allocation2 + $0x38] sm:$0xff] }
  0x22   : > { %959 = vmatprep.mubr.msk.bf16.mxu0 %vm401_vm1, %v365_v32  ;;  %975 = vmatprep.mubr.msk.bf16.mxu1 %vm401_vm1, %v373_v33  ;;  %v319_v11 = vld [vmem:[#allocation2 + $0xb0] sm:$0xff]  ;;  %v301_v17 = vld [vmem:[#allocation2 + $0x20] sm:$0xff]  ;;  %v320_v26 = vld [vmem:[#allocation2 + $0xb8] sm:$0xff] }
  0x23   : > { %v317_v18 = vld [vmem:[#allocation2 + $0xa0] sm:$0xff]  ;;  %v302_v31 = vld [vmem:[#allocation2 + $0x28] sm:$0xff]  ;;  %v307_v41 = vld [vmem:[#allocation2 + $0x50] sm:$0xff] }
  0x24   : > { %v318_v36 = vld [vmem:[#allocation2 + $0xa8] sm:$0xff]  ;;  %v323_v46 = vld [vmem:[#allocation2 + $0xd0] sm:$0xff] }
  0x29   : > { %960 = vmatmul.mubr.msk.bf16.gmra.mxu0 %vm401_vm1, %v366_v42  ;;  %976 = vmatmul.mubr.msk.bf16.gmra.mxu1 %vm401_vm1, %v374_v43 }
  0x2a   : > { %963 = vmatprep.mubr.msk.bf16.mxu0 %vm401_vm1, %v367_v44  ;;  %979 = vmatprep.mubr.msk.bf16.mxu1 %vm401_vm1, %v375_v45 }
  0x31   : > { %964 = vmatmul.mubr.msk.bf16.gmra.mxu0 %vm401_vm1, %v368_v50  ;;  %980 = vmatmul.mubr.msk.bf16.gmra.mxu1 %vm401_vm1, %v376_v51  ;;  %v305_v51 = vld [vmem:[#allocation2 + $0x40] sm:$0xff] }
  0xd9   : > { %v953_v54 = vpop.f32.mrf.mxu0  ;;  %v969_v55 = vpop.f32.mrf.mxu1 }
  0xda   : > { %v613_v58 = vadd.f32 %v953_v54, %v299_v52  ;;  %v629_v59 = vadd.f32 %v969_v55, %v315_v53 }
  0xdb   : > { %v484_v60 = vpop.f32.mrf.mxu0  ;;  %v548_v61 = vpop.f32.mrf.mxu1 }
  0xdc   : > { %646 = vst.msk [vmem:[#allocation2 + $0x10] sm:$0xff] %vm264_vm0, %v613_v58  ;;  %662 = vst.msk [vmem:[#allocation2 + $0x90] sm:$0xff] %vm264_vm0, %v629_v59  ;;  %v611_v0 = vadd.f32 %v484_v60, %v297_v56  ;;  %v627_v1 = vadd.f32 %v548_v61, %v313_v57  ;;  %v321_v56 = vld [vmem:[#allocation2 + $0xc0] sm:$0xff]  ;;  %v308_v61 = vld [vmem:[#allocation2 + $0x58] sm:$0xff] }
  0xdd   : > { %v954_v2 = vpop.f32.mrf.mxu0  ;;  %v970_v3 = vpop.f32.mrf.mxu1 }
  0xde   : > { %644 = vst.msk [vmem:[#allocation2] sm:$0xff] %vm264_vm0, %v611_v0  ;;  %660 = vst.msk [vmem:[#allocation2 + $0x80] sm:$0xff] %vm264_vm0, %v627_v1  ;;  %v614_v6 = vadd.f32 %v954_v2, %v300_v62  ;;  %v630_v7 = vadd.f32 %v970_v3, %v316_v63  ;;  %v324_v2 = vld [vmem:[#allocation2 + $0xd8] sm:$0xff] }
  0xdf   : > { %v487_v8 = vpop.f32.mrf.mxu0  ;;  %v551_v9 = vpop.f32.mrf.mxu1 }
  0xe0   : > { %647 = vst.msk [vmem:[#allocation2 + $0x18] sm:$0xff] %vm264_vm0, %v614_v6  ;;  %663 = vst.msk [vmem:[#allocation2 + $0x98] sm:$0xff] %vm264_vm0, %v630_v7  ;;  %v612_v12 = vadd.f32 %v487_v8, %v298_v4  ;;  %v628_v13 = vadd.f32 %v551_v9, %v314_v5  ;;  %v306_v7 = vld [vmem:[#allocation2 + $0x48] sm:$0xff] }
  0xe1   : > { %v957_v15 = vpop.f32.mrf.mxu0  ;;  %v973_v16 = vpop.f32.mrf.mxu1 }
  0xe2   : > { %645 = vst.msk [vmem:[#allocation2 + $0x8] sm:$0xff] %vm264_vm0, %v612_v12  ;;  %661 = vst.msk [vmem:[#allocation2 + $0x88] sm:$0xff] %vm264_vm0, %v628_v13  ;;  %v617_v19 = vadd.f32 %v957_v15, %v303_v10  ;;  %v633_v20 = vadd.f32 %v973_v16, %v319_v11  ;;  %v322_v12 = vld [vmem:[#allocation2 + $0xc8] sm:$0xff] }
  0xe3   : > { %v681_v22 = vld [vmem:[#allocation2 + $0x10] sm:$0xff]  ;;  %v500_v24 = vpop.f32.mrf.mxu0  ;;  %v564_v25 = vpop.f32.mrf.mxu1 }
  0xe4   : > { %v697_v23 = vld [vmem:[#allocation2 + $0x90] sm:$0xff]  ;;  %v720_v27 = vadd.f32 %v1188_v14, %v681_v22  ;;  %650 = vst.msk [vmem:[#allocation2 + $0x30] sm:$0xff] %vm264_vm0, %v617_v19  ;;  %666 = vst.msk [vmem:[#allocation2 + $0xb0] sm:$0xff] %vm264_vm0, %v633_v20  ;;  %v615_v29 = vadd.f32 %v500_v24, %v301_v17  ;;  %v631_v30 = vadd.f32 %v564_v25, %v317_v18 }
  0xe5   : > { %v736_v28 = vadd.f32 %v1188_v14, %v697_v23  ;;  %v679_v32 = vld [vmem:[#allocation2] sm:$0xff]  ;;  %v958_v34 = vpop.f32.mrf.mxu0  ;;  %v974_v35 = vpop.f32.mrf.mxu1  ;;  %v311_v18 = vld [vmem:[#allocation2 + $0x70] sm:$0xff] }
  0xe6   : > { %v695_v33 = vld [vmem:[#allocation2 + $0x80] sm:$0xff]  ;;  %752 = vst.msk [vmem:[%s1197_s4 + $0x10] sm:$0xff] %vm264_vm0, %v720_v27  ;;  %v718_v37 = vadd.f32 %v1188_v14, %v679_v32  ;;  %648 = vst.msk [vmem:[#allocation2 + $0x20] sm:$0xff] %vm264_vm0, %v615_v29  ;;  %v618_v39 = vadd.f32 %v958_v34, %v304_v21  ;;  %v634_v40 = vadd.f32 %v974_v35, %v320_v26  ;;  %v327_v23 = vld [vmem:[#allocation2 + $0xf0] sm:$0xff] }
  0xe7   : > { %768 = vst.msk [vmem:[%s1197_s4 + $0x90] sm:$0xff] %vm264_vm0, %v736_v28  ;;  %v734_v38 = vadd.f32 %v1188_v14, %v695_v33  ;;  %664 = vst.msk [vmem:[#allocation2 + $0xa0] sm:$0xff] %vm264_vm0, %v631_v30  ;;  %v682_v42 = vld [vmem:[#allocation2 + $0x18] sm:$0xff]  ;;  %v503_v44 = vpop.f32.mrf.mxu0  ;;  %v567_v45 = vpop.f32.mrf.mxu1  ;;  %v309_v28 = vld [vmem:[#allocation2 + $0x60] sm:$0xff] }
  0xe8   : > { %v698_v43 = vld [vmem:[#allocation2 + $0x98] sm:$0xff]  ;;  %750 = vst.msk [vmem:[%s1197_s4] sm:$0xff] %vm264_vm0, %v718_v37  ;;  %v721_v47 = vadd.f32 %v1188_v14, %v682_v42  ;;  %651 = vst.msk [vmem:[#allocation2 + $0x38] sm:$0xff] %vm264_vm0, %v618_v39  ;;  %v616_v49 = vadd.f32 %v503_v44, %v302_v31  ;;  %v632_v50 = vadd.f32 %v567_v45, %v318_v36  ;;  %v325_v33 = vld [vmem:[#allocation2 + $0xe0] sm:$0xff] }
  0xe9   : > { %766 = vst.msk [vmem:[%s1197_s4 + $0x80] sm:$0xff] %vm264_vm0, %v734_v38  ;;  %v737_v48 = vadd.f32 %v1188_v14, %v698_v43  ;;  %667 = vst.msk [vmem:[#allocation2 + $0xb8] sm:$0xff] %vm264_vm0, %v634_v40  ;;  %v680_v52 = vld [vmem:[#allocation2 + $0x8] sm:$0xff]  ;;  %v961_v54 = vpop.f32.mrf.mxu0  ;;  %v977_v55 = vpop.f32.mrf.mxu1  ;;  %v312_v38 = vld [vmem:[#allocation2 + $0x78] sm:$0xff] }
  0xea   : > { %v696_v53 = vld [vmem:[#allocation2 + $0x88] sm:$0xff]  ;;  %753 = vst.msk [vmem:[%s1197_s4 + $0x18] sm:$0xff] %vm264_vm0, %v721_v47  ;;  %v719_v57 = vadd.f32 %v1188_v14, %v680_v52  ;;  %649 = vst.msk [vmem:[#allocation2 + $0x28] sm:$0xff] %vm264_vm0, %v616_v49  ;;  %v621_v59 = vadd.f32 %v961_v54, %v307_v41  ;;  %v637_v60 = vadd.f32 %v977_v55, %v323_v46  ;;  %v328_v43 = vld [vmem:[#allocation2 + $0xf8] sm:$0xff] }
  0xeb   : > { %769 = vst.msk [vmem:[%s1197_s4 + $0x98] sm:$0xff] %vm264_vm0, %v737_v48  ;;  %v735_v58 = vadd.f32 %v1188_v14, %v696_v53  ;;  %665 = vst.msk [vmem:[#allocation2 + $0xa8] sm:$0xff] %vm264_vm0, %v632_v50  ;;  %v685_v62 = vld [vmem:[#allocation2 + $0x30] sm:$0xff]  ;;  %v516_v0 = vpop.f32.mrf.mxu0  ;;  %v580_v1 = vpop.f32.mrf.mxu1  ;;  %v310_v48 = vld [vmem:[#allocation2 + $0x68] sm:$0xff] }
  0xec   : > { %v701_v63 = vld [vmem:[#allocation2 + $0xb0] sm:$0xff]  ;;  %751 = vst.msk [vmem:[%s1197_s4 + $0x8] sm:$0xff] %vm264_vm0, %v719_v57  ;;  %v724_v3 = vadd.f32 %v1188_v14, %v685_v62  ;;  %654 = vst.msk [vmem:[#allocation2 + $0x50] sm:$0xff] %vm264_vm0, %v621_v59  ;;  %v619_v5 = vadd.f32 %v516_v0, %v305_v51  ;;  %v635_v6 = vadd.f32 %v580_v1, %v321_v56  ;;  %v326_v53 = vld [vmem:[#allocation2 + $0xe8] sm:$0xff] }
  0xed   : > { %767 = vst.msk [vmem:[%s1197_s4 + $0x88] sm:$0xff] %vm264_vm0, %v735_v58  ;;  %v740_v4 = vadd.f32 %v1188_v14, %v701_v63  ;;  %670 = vst.msk [vmem:[#allocation2 + $0xd0] sm:$0xff] %vm264_vm0, %v637_v60  ;;  %v683_v8 = vld [vmem:[#allocation2 + $0x20] sm:$0xff]  ;;  %v962_v10 = vpop.f32.mrf.mxu0  ;;  %v978_v11 = vpop.f32.mrf.mxu1 }
  0xee   : > { %v699_v9 = vld [vmem:[#allocation2 + $0xa0] sm:$0xff]  ;;  %756 = vst.msk [vmem:[%s1197_s4 + $0x30] sm:$0xff] %vm264_vm0, %v724_v3  ;;  %v722_v13 = vadd.f32 %v1188_v14, %v683_v8  ;;  %652 = vst.msk [vmem:[#allocation2 + $0x40] sm:$0xff] %vm264_vm0, %v619_v5  ;;  %v622_v16 = vadd.f32 %v962_v10, %v308_v61  ;;  %v638_v17 = vadd.f32 %v978_v11, %v324_v2 }
  0xef   : > { %772 = vst.msk [vmem:[%s1197_s4 + $0xb0] sm:$0xff] %vm264_vm0, %v740_v4  ;;  %v738_v15 = vadd.f32 %v1188_v14, %v699_v9  ;;  %668 = vst.msk [vmem:[#allocation2 + $0xc0] sm:$0xff] %vm264_vm0, %v635_v6  ;;  %v686_v19 = vld [vmem:[#allocation2 + $0x38] sm:$0xff]  ;;  %v519_v21 = vpop.f32.mrf.mxu0  ;;  %v583_v22 = vpop.f32.mrf.mxu1 }
  0xf0   : > { %v702_v20 = vld [vmem:[#allocation2 + $0xb8] sm:$0xff]  ;;  %754 = vst.msk [vmem:[%s1197_s4 + $0x20] sm:$0xff] %vm264_vm0, %v722_v13  ;;  %v725_v24 = vadd.f32 %v1188_v14, %v686_v19  ;;  %655 = vst.msk [vmem:[#allocation2 + $0x58] sm:$0xff] %vm264_vm0, %v622_v16  ;;  %v620_v26 = vadd.f32 %v519_v21, %v306_v7  ;;  %v636_v27 = vadd.f32 %v583_v22, %v322_v12 }
  0xf1   : > { %770 = vst.msk [vmem:[%s1197_s4 + $0xa0] sm:$0xff] %vm264_vm0, %v738_v15  ;;  %v741_v25 = vadd.f32 %v1188_v14, %v702_v20  ;;  %671 = vst.msk [vmem:[#allocation2 + $0xd8] sm:$0xff] %vm264_vm0, %v638_v17  ;;  %v684_v29 = vld [vmem:[#allocation2 + $0x28] sm:$0xff]  ;;  %v965_v31 = vpop.f32.mrf.mxu0  ;;  %v981_v32 = vpop.f32.mrf.mxu1 }
  0xf2   : > { %v700_v30 = vld [vmem:[#allocation2 + $0xa8] sm:$0xff]  ;;  %757 = vst.msk [vmem:[%s1197_s4 + $0x38] sm:$0xff] %vm264_vm0, %v725_v24  ;;  %v723_v34 = vadd.f32 %v1188_v14, %v684_v29  ;;  %653 = vst.msk [vmem:[#allocation2 + $0x48] sm:$0xff] %vm264_vm0, %v620_v26  ;;  %v625_v36 = vadd.f32 %v965_v31, %v311_v18  ;;  %v641_v37 = vadd.f32 %v981_v32, %v327_v23 }
  0xf3   : > { %773 = vst.msk [vmem:[%s1197_s4 + $0xb8] sm:$0xff] %vm264_vm0, %v741_v25  ;;  %v739_v35 = vadd.f32 %v1188_v14, %v700_v30  ;;  %669 = vst.msk [vmem:[#allocation2 + $0xc8] sm:$0xff] %vm264_vm0, %v636_v27  ;;  %v689_v39 = vld [vmem:[#allocation2 + $0x50] sm:$0xff]  ;;  %v532_v41 = vpop.f32.mrf.mxu0  ;;  %v596_v42 = vpop.f32.mrf.mxu1 }
  0xf4   : > { %v705_v40 = vld [vmem:[#allocation2 + $0xd0] sm:$0xff]  ;;  %755 = vst.msk [vmem:[%s1197_s4 + $0x28] sm:$0xff] %vm264_vm0, %v723_v34  ;;  %v728_v44 = vadd.f32 %v1188_v14, %v689_v39  ;;  %658 = vst.msk [vmem:[#allocation2 + $0x70] sm:$0xff] %vm264_vm0, %v625_v36  ;;  %v623_v46 = vadd.f32 %v532_v41, %v309_v28  ;;  %v639_v47 = vadd.f32 %v596_v42, %v325_v33 }
  0xf5   : > { %771 = vst.msk [vmem:[%s1197_s4 + $0xa8] sm:$0xff] %vm264_vm0, %v739_v35  ;;  %v744_v45 = vadd.f32 %v1188_v14, %v705_v40  ;;  %674 = vst.msk [vmem:[#allocation2 + $0xf0] sm:$0xff] %vm264_vm0, %v641_v37  ;;  %v687_v49 = vld [vmem:[#allocation2 + $0x40] sm:$0xff]  ;;  %v966_v51 = vpop.f32.mrf.mxu0  ;;  %v982_v52 = vpop.f32.mrf.mxu1 }
  0xf6   : > { %v703_v50 = vld [vmem:[#allocation2 + $0xc0] sm:$0xff]  ;;  %760 = vst.msk [vmem:[%s1197_s4 + $0x50] sm:$0xff] %vm264_vm0, %v728_v44  ;;  %v726_v54 = vadd.f32 %v1188_v14, %v687_v49  ;;  %656 = vst.msk [vmem:[#allocation2 + $0x60] sm:$0xff] %vm264_vm0, %v623_v46  ;;  %v626_v56 = vadd.f32 %v966_v51, %v312_v38  ;;  %v642_v57 = vadd.f32 %v982_v52, %v328_v43 }
  0xf7   : > { %776 = vst.msk [vmem:[%s1197_s4 + $0xd0] sm:$0xff] %vm264_vm0, %v744_v45  ;;  %v742_v55 = vadd.f32 %v1188_v14, %v703_v50  ;;  %672 = vst.msk [vmem:[#allocation2 + $0xe0] sm:$0xff] %vm264_vm0, %v639_v47  ;;  %v690_v58 = vld [vmem:[#allocation2 + $0x58] sm:$0xff]  ;;  %v535_v60 = vpop.f32.mrf.mxu0  ;;  %v599_v61 = vpop.f32.mrf.mxu1 }
  0xf8   : > { %v706_v59 = vld [vmem:[#allocation2 + $0xd8] sm:$0xff]  ;;  %758 = vst.msk [vmem:[%s1197_s4 + $0x40] sm:$0xff] %vm264_vm0, %v726_v54  ;;  %v729_v62 = vadd.f32 %v1188_v14, %v690_v58  ;;  %659 = vst.msk [vmem:[#allocation2 + $0x78] sm:$0xff] %vm264_vm0, %v626_v56  ;;  %v624_v0 = vadd.f32 %v535_v60, %v310_v48  ;;  %v640_v1 = vadd.f32 %v599_v61, %v326_v53 }
  0xf9   : > { %774 = vst.msk [vmem:[%s1197_s4 + $0xc0] sm:$0xff] %vm264_vm0, %v742_v55  ;;  %v745_v63 = vadd.f32 %v1188_v14, %v706_v59  ;;  %675 = vst.msk [vmem:[#allocation2 + $0xf8] sm:$0xff] %vm264_vm0, %v642_v57  ;;  %v688_v2 = vld [vmem:[#allocation2 + $0x48] sm:$0xff] }
  0xfa   : > { %v704_v3 = vld [vmem:[#allocation2 + $0xc8] sm:$0xff]  ;;  %761 = vst.msk [vmem:[%s1197_s4 + $0x58] sm:$0xff] %vm264_vm0, %v729_v62  ;;  %v727_v4 = vadd.f32 %v1188_v14, %v688_v2  ;;  %657 = vst.msk [vmem:[#allocation2 + $0x68] sm:$0xff] %vm264_vm0, %v624_v0 }
  0xfb   : > { %777 = vst.msk [vmem:[%s1197_s4 + $0xd8] sm:$0xff] %vm264_vm0, %v745_v63  ;;  %v743_v5 = vadd.f32 %v1188_v14, %v704_v3  ;;  %673 = vst.msk [vmem:[#allocation2 + $0xe8] sm:$0xff] %vm264_vm0, %v640_v1  ;;  %v693_v6 = vld [vmem:[#allocation2 + $0x70] sm:$0xff] }
  0xfc   : > { %v709_v7 = vld [vmem:[#allocation2 + $0xf0] sm:$0xff]  ;;  %759 = vst.msk [vmem:[%s1197_s4 + $0x48] sm:$0xff] %vm264_vm0, %v727_v4  ;;  %v732_v8 = vadd.f32 %v1188_v14, %v693_v6 }
  0xfd   : > { %775 = vst.msk [vmem:[%s1197_s4 + $0xc8] sm:$0xff] %vm264_vm0, %v743_v5  ;;  %v748_v9 = vadd.f32 %v1188_v14, %v709_v7  ;;  %v691_v10 = vld [vmem:[#allocation2 + $0x60] sm:$0xff] }
  0xfe   : > { %v707_v11 = vld [vmem:[#allocation2 + $0xe0] sm:$0xff]  ;;  %764 = vst.msk [vmem:[%s1197_s4 + $0x70] sm:$0xff] %vm264_vm0, %v732_v8  ;;  %v730_v12 = vadd.f32 %v1188_v14, %v691_v10 }
  0xff   : > { %780 = vst.msk [vmem:[%s1197_s4 + $0xf0] sm:$0xff] %vm264_vm0, %v748_v9  ;;  %v746_v13 = vadd.f32 %v1188_v14, %v707_v11  ;;  %v694_v15 = vld [vmem:[#allocation2 + $0x78] sm:$0xff] }
 0x100   : > { %v710_v16 = vld [vmem:[#allocation2 + $0xf8] sm:$0xff]  ;;  %762 = vst.msk [vmem:[%s1197_s4 + $0x60] sm:$0xff] %vm264_vm0, %v730_v12  ;;  %v733_v17 = vadd.f32 %v1188_v14, %v694_v15 }
 0x101   : > { %778 = vst.msk [vmem:[%s1197_s4 + $0xe0] sm:$0xff] %vm264_vm0, %v746_v13  ;;  %v749_v18 = vadd.f32 %v1188_v14, %v710_v16  ;;  %v692_v19 = vld [vmem:[#allocation2 + $0x68] sm:$0xff] }
 0x102   : > { %v708_v20 = vld [vmem:[#allocation2 + $0xe8] sm:$0xff]  ;;  %765 = vst.msk [vmem:[%s1197_s4 + $0x78] sm:$0xff] %vm264_vm0, %v733_v17  ;;  %v731_v21 = vadd.f32 %v1188_v14, %v692_v19 }
 0x103   : > { %781 = vst.msk [vmem:[%s1197_s4 + $0xf8] sm:$0xff] %vm264_vm0, %v749_v18  ;;  %v747_v22 = vadd.f32 %v1188_v14, %v708_v20 }
 0x104   : > { %763 = vst.msk [vmem:[%s1197_s4 + $0x68] sm:$0xff] %vm264_vm0, %v731_v21 }
 0x105   : > { %779 = vst.msk [vmem:[%s1197_s4 + $0xe8] sm:$0xff] %vm264_vm0, %v747_v22 }
 0x106 PF: > { %s13_s14 = sadd.s32 1, %s1039_s14   ;;  %s1332_s12 = smov %s1035_s13 }
 0x107   : > { %p10_p5 = scmp.ge.s32.totalorder %s13_s14, 4   ;;  %s1333_s13 = smov %s1335_s15 }
 0x109   :  { %12 = sbr.rel (!%p10_p5) target bundleno = 2 (0x2), region = 76 }

// kernel: _lambda_.8
= control target key start
LH: loop header
LB: loop body
LE: loop exit
PB: predicated region body
PF: predicated region fallthrough
CT: control target
= control target key end

     0   :  { %s939_s12 = smov 0   ;;  %s1521_s0 = inlined_call_operand.vmem [shape: f32[544,32], index: 0, kind: input, shape index: {}]   ;;  %s1522_s1 = inlined_call_operand.vmem [shape: f32[1,32], index: 1, kind: input, shape index: {}]   ;;  %s1523_s2 = inlined_call_operand.vmem [shape: f32[1,32], index: 2, kind: input, shape index: {}]   ;;  %s1524_s3 = inlined_call_operand.vmem [shape: f32[544,32], index: 3, kind: output, shape index: {}]  }
   0x1 LB: > { %s824_s13 = sadd.s32 4294967295, %s917_s12   ;;  %p828_p0 = scmp.ge.s32.totalorder %s917_s12, 1  ;;  %s917_s12 = sphi %s939_s12, %s13_s12  }
   0x2   : > { %p138_p1 = scmp.lt.s32.totalorder %s917_s12, 3 }
   0x4   : > { %p139_p2 = pnand %p828_p0, %p138_p1 }
   0x5   : > { %s162_s14 = smul.u32 (!%p139_p2), 34, %s824_s13 }
   0x6   : > { %142 = sbr.rel (%p139_p2) target bundleno = 392 (0x188), region = 32 }
   0x7   : > { %p163_p3 = scmp.lt.s32.totalorder (!%p139_p2), %s162_s14, 67 }
   0xb   : > { %s1526_s14 = smov (!%p163_p3, %s162_s14), 67  ;;  %vm208_vm0 = vcmask 261120  }
   0xc   : > { %s829_s15 = sshll.u32 %s1526_s14, 3 }
   0xd   : > { %s955_s18 = scalar_lea.vmem %s1521_s0, %s829_s15  ;;  %s1348_s25 = scalar_lea.vmem %s1524_s3, %s829_s15 }
   0xe   : > { %v958_v0 = vld [vmem:[%s955_s18] sm:$0xff]  ;;  %v961_v1 = vld [vmem:[%s955_s18 + $0x10] sm:$0xff]  ;;  %v964_v2 = vld [vmem:[%s955_s18 + $0x8] sm:$0xff] }
   0xf   : > { %v209_v3 = vsel %vm208_vm0, %v958_v0, 0.0  ;;  %v215_v4 = vsel %vm208_vm0, %v961_v1, 0.0  ;;  %v971_v5 = vld [vmem:[%s955_s18 + $0x18] sm:$0xff]  ;;  %v212_v6 = vsel %vm208_vm0, %v964_v2, 0.0  ;;  %v978_v8 = vld [vmem:[%s955_s18 + $0x20] sm:$0xff]  ;;  %v981_v9 = vld [vmem:[%s955_s18 + $0x28] sm:$0xff] }
  0x10   : > { %210 = vadd.xlane.f32.xlu0 %v209_v3  ;;  %216 = vadd.xlane.f32.xlu1 %v215_v4  ;;  %v218_v7 = vsel %vm208_vm0, %v971_v5, 0.0  ;;  %v221_v10 = vsel %vm208_vm0, %v978_v8, 0.0  ;;  %v224_v11 = vsel %vm208_vm0, %v981_v9, 0.0  ;;  %v988_v12 = vld [vmem:[%s955_s18 + $0x30] sm:$0xff]  ;;  %v991_v13 = vld [vmem:[%s955_s18 + $0x38] sm:$0xff]  ;;  %v998_v16 = vld [vmem:[%s955_s18 + $0x40] sm:$0xff] }
  0x11   : > { %v227_v14 = vsel %vm208_vm0, %v988_v12, 0.0  ;;  %v230_v15 = vsel %vm208_vm0, %v991_v13, 0.0  ;;  %v1001_v17 = vld [vmem:[%s955_s18 + $0x48] sm:$0xff]  ;;  %v233_v18 = vsel %vm208_vm0, %v998_v16, 0.0  ;;  %v1008_v20 = vld [vmem:[%s955_s18 + $0x50] sm:$0xff]  ;;  %v1011_v21 = vld [vmem:[%s955_s18 + $0x58] sm:$0xff] }
  0x12   : > { %v236_v19 = vsel %vm208_vm0, %v1001_v17, 0.0  ;;  %v239_v22 = vsel %vm208_vm0, %v1008_v20, 0.0  ;;  %v242_v23 = vsel %vm208_vm0, %v1011_v21, 0.0  ;;  %v1018_v24 = vld [vmem:[%s955_s18 + $0x60] sm:$0xff]  ;;  %v1021_v25 = vld [vmem:[%s955_s18 + $0x68] sm:$0xff]  ;;  %v1028_v28 = vld [vmem:[%s955_s18 + $0x70] sm:$0xff] }
  0x13   : > { %v245_v26 = vsel %vm208_vm0, %v1018_v24, 0.0  ;;  %v248_v27 = vsel %vm208_vm0, %v1021_v25, 0.0  ;;  %v1031_v29 = vld [vmem:[%s955_s18 + $0x78] sm:$0xff]  ;;  %v251_v30 = vsel %vm208_vm0, %v1028_v28, 0.0  ;;  %v1038_v32 = vld [vmem:[%s955_s18 + $0x80] sm:$0xff]  ;;  %v1041_v33 = vld [vmem:[%s955_s18 + $0x88] sm:$0xff] }
  0x14   : > { %213 = vadd.xlane.f32.xlu0 %v212_v6  ;;  %219 = vadd.xlane.f32.xlu1 %v218_v7  ;;  %v254_v31 = vsel %vm208_vm0, %v1031_v29, 0.0  ;;  %v257_v34 = vsel %vm208_vm0, %v1038_v32, 0.0  ;;  %v260_v35 = vsel %vm208_vm0, %v1041_v33, 0.0  ;;  %v1048_v36 = vld [vmem:[%s955_s18 + $0x90] sm:$0xff]  ;;  %v1051_v37 = vld [vmem:[%s955_s18 + $0x98] sm:$0xff]  ;;  %v1058_v40 = vld [vmem:[%s955_s18 + $0xa0] sm:$0xff] }
  0x15   : > { %v263_v38 = vsel %vm208_vm0, %v1048_v36, 0.0  ;;  %v266_v39 = vsel %vm208_vm0, %v1051_v37, 0.0  ;;  %v1061_v41 = vld [vmem:[%s955_s18 + $0xa8] sm:$0xff]  ;;  %v269_v42 = vsel %vm208_vm0, %v1058_v40, 0.0  ;;  %v1068_v44 = vld [vmem:[%s955_s18 + $0xb0] sm:$0xff]  ;;  %v1071_v45 = vld [vmem:[%s955_s18 + $0xb8] sm:$0xff] }
  0x16   : > { %v272_v43 = vsel %vm208_vm0, %v1061_v41, 0.0  ;;  %v275_v46 = vsel %vm208_vm0, %v1068_v44, 0.0  ;;  %v278_v47 = vsel %vm208_vm0, %v1071_v45, 0.0  ;;  %v1078_v48 = vld [vmem:[%s955_s18 + $0xc0] sm:$0xff]  ;;  %v1081_v49 = vld [vmem:[%s955_s18 + $0xc8] sm:$0xff]  ;;  %v1088_v52 = vld [vmem:[%s955_s18 + $0xd0] sm:$0xff] }
  0x17   : > { %v281_v50 = vsel %vm208_vm0, %v1078_v48, 0.0  ;;  %v284_v51 = vsel %vm208_vm0, %v1081_v49, 0.0  ;;  %v1091_v53 = vld [vmem:[%s955_s18 + $0xd8] sm:$0xff]  ;;  %v287_v54 = vsel %vm208_vm0, %v1088_v52, 0.0  ;;  %v1098_v56 = vld [vmem:[%s955_s18 + $0xe0] sm:$0xff]  ;;  %v1101_v57 = vld [vmem:[%s955_s18 + $0xe8] sm:$0xff] }
  0x18   : > { %222 = vadd.xlane.f32.xlu0 %v221_v10  ;;  %225 = vadd.xlane.f32.xlu1 %v224_v11  ;;  %v290_v55 = vsel %vm208_vm0, %v1091_v53, 0.0  ;;  %v293_v58 = vsel %vm208_vm0, %v1098_v56, 0.0  ;;  %v296_v59 = vsel %vm208_vm0, %v1101_v57, 0.0  ;;  %v1108_v60 = vld [vmem:[%s955_s18 + $0xf0] sm:$0xff]  ;;  %v1111_v61 = vld [vmem:[%s955_s18 + $0xf8] sm:$0xff]  ;;  %v1118_v3 = vld [vmem:[%s955_s18 + $0x100] sm:$0xff] }
  0x19   : > { %v299_v62 = vsel %vm208_vm0, %v1108_v60, 0.0  ;;  %v302_v63 = vsel %vm208_vm0, %v1111_v61, 0.0  ;;  %v1121_v4 = vld [vmem:[%s955_s18 + $0x108] sm:$0xff]  ;;  %v305_v6 = vsel %vm208_vm0, %v1118_v3, 0.0 }
  0x1a   : > { %v308_v7 = vsel %vm208_vm0, %v1121_v4, 0.0 }
  0x1c   : > { %228 = vadd.xlane.f32.xlu0 %v227_v14  ;;  %231 = vadd.xlane.f32.xlu1 %v230_v15 }
  0x20   : > { %234 = vadd.xlane.f32.xlu0 %v233_v18  ;;  %237 = vadd.xlane.f32.xlu1 %v236_v19 }
  0x24   : > { %240 = vadd.xlane.f32.xlu0 %v239_v22  ;;  %243 = vadd.xlane.f32.xlu1 %v242_v23 }
  0x28   : > { %246 = vadd.xlane.f32.xlu0 %v245_v26  ;;  %249 = vadd.xlane.f32.xlu1 %v248_v27 }
  0x2c   : > { %252 = vadd.xlane.f32.xlu0 %v251_v30  ;;  %255 = vadd.xlane.f32.xlu1 %v254_v31 }
  0x30   : > { %258 = vadd.xlane.f32.xlu0 %v257_v34  ;;  %261 = vadd.xlane.f32.xlu1 %v260_v35 }
  0x34   : > { %264 = vadd.xlane.f32.xlu0 %v263_v38  ;;  %267 = vadd.xlane.f32.xlu1 %v266_v39 }
  0x38   : > { %270 = vadd.xlane.f32.xlu0 %v269_v42  ;;  %273 = vadd.xlane.f32.xlu1 %v272_v43 }
  0x3c   : > { %276 = vadd.xlane.f32.xlu0 %v275_v46  ;;  %279 = vadd.xlane.f32.xlu1 %v278_v47 }
  0x40   : > { %282 = vadd.xlane.f32.xlu0 %v281_v50  ;;  %285 = vadd.xlane.f32.xlu1 %v284_v51 }
  0x44   : > { %288 = vadd.xlane.f32.xlu0 %v287_v54  ;;  %291 = vadd.xlane.f32.xlu1 %v290_v55 }
  0x48   : > { %294 = vadd.xlane.f32.xlu0 %v293_v58  ;;  %297 = vadd.xlane.f32.xlu1 %v296_v59 }
  0x4c   : > { %300 = vadd.xlane.f32.xlu0 %v299_v62  ;;  %303 = vadd.xlane.f32.xlu1 %v302_v63 }
  0x50   : > { %306 = vadd.xlane.f32.xlu0 %v305_v6  ;;  %309 = vadd.xlane.f32.xlu1 %v308_v7 }
  0x99   : > { %v211_v10 = vpop.xlane.xlu0 %210  ;;  %v217_v11 = vpop.xlane.xlu1 %216 }
  0x9a   : > { %v312_v14 = vmul.f32 0.03125, %v211_v10  ;;  %v314_v15 = vmul.f32 0.03125, %v217_v11 }
  0x9c   : > { %v1128_v18 = vsub.f32 %v958_v0, %v312_v14  ;;  %v1131_v19 = vsub.f32 %v961_v1, %v314_v15 }
  0x9d   : > { %v214_v22 = vpop.xlane.xlu0 %213  ;;  %v220_v23 = vpop.xlane.xlu1 %219 }
  0x9e   : > { %v313_v26 = vmul.f32 0.03125, %v214_v22  ;;  %v315_v27 = vmul.f32 0.03125, %v220_v23  ;;  %v380_v30 = vmul.f32 %v1128_v18, %v1128_v18  ;;  %v382_v31 = vmul.f32 %v1131_v19, %v1131_v19 }
  0xa0   : > { %v1138_v34 = vsub.f32 %v964_v2, %v313_v26  ;;  %v1141_v35 = vsub.f32 %v971_v5, %v315_v27  ;;  %v414_v0 = vsel %vm208_vm0, %v380_v30, 0.0  ;;  %v420_v39 = vsel %vm208_vm0, %v382_v31, 0.0 }
  0xa1   : > { %415 = vadd.xlane.f32.xlu0 %v414_v0  ;;  %v223_v1 = vpop.xlane.xlu0 %222  ;;  %v226_v38 = vpop.xlane.xlu1 %225 }
  0xa2   : > { %v316_v42 = vmul.f32 0.03125, %v223_v1  ;;  %v317_v43 = vmul.f32 0.03125, %v226_v38  ;;  %v381_v46 = vmul.f32 %v1138_v34, %v1138_v34  ;;  %v383_v47 = vmul.f32 %v1141_v35, %v1141_v35 }
  0xa4   : > { %v1150_v2 = vsub.f32 %v978_v8, %v316_v42  ;;  %v1153_v5 = vsub.f32 %v981_v9, %v317_v43  ;;  %v417_v50 = vsel %vm208_vm0, %v381_v46, 0.0  ;;  %v423_v55 = vsel %vm208_vm0, %v383_v47, 0.0 }
  0xa5   : > { %421 = vadd.xlane.f32.xlu0 %v420_v39  ;;  %418 = vadd.xlane.f32.xlu1 %v417_v50  ;;  %v229_v51 = vpop.xlane.xlu0 %228  ;;  %v232_v54 = vpop.xlane.xlu1 %231 }
  0xa6   : > { %v318_v58 = vmul.f32 0.03125, %v229_v51  ;;  %v319_v59 = vmul.f32 0.03125, %v232_v54  ;;  %v384_v62 = vmul.f32 %v1150_v2, %v1150_v2  ;;  %v385_v8 = vmul.f32 %v1153_v5, %v1153_v5 }
  0xa8   : > { %v1162_v63 = vsub.f32 %v988_v12, %v318_v58  ;;  %v1165_v9 = vsub.f32 %v991_v13, %v319_v59  ;;  %v426_v6 = vsel %vm208_vm0, %v384_v62, 0.0  ;;  %v429_v11 = vsel %vm208_vm0, %v385_v8, 0.0 }
  0xa9   : > { %424 = vadd.xlane.f32.xlu1 %v423_v55  ;;  %427 = vadd.xlane.f32.xlu0 %v426_v6  ;;  %v235_v7 = vpop.xlane.xlu0 %234  ;;  %v238_v10 = vpop.xlane.xlu1 %237 }
  0xaa   : > { %v320_v14 = vmul.f32 0.03125, %v235_v7  ;;  %v321_v15 = vmul.f32 0.03125, %v238_v10  ;;  %v386_v22 = vmul.f32 %v1162_v63, %v1162_v63  ;;  %v387_v12 = vmul.f32 %v1165_v9, %v1165_v9 }
  0xac   : > { %v1174_v23 = vsub.f32 %v998_v16, %v320_v14  ;;  %v1177_v13 = vsub.f32 %v1001_v17, %v321_v15  ;;  %v432_v26 = vsel %vm208_vm0, %v386_v22, 0.0  ;;  %v435_v31 = vsel %vm208_vm0, %v387_v12, 0.0 }
  0xad   : > { %430 = vadd.xlane.f32.xlu1 %v429_v11  ;;  %433 = vadd.xlane.f32.xlu0 %v432_v26  ;;  %v241_v27 = vpop.xlane.xlu0 %240  ;;  %v244_v30 = vpop.xlane.xlu1 %243 }
  0xae   : > { %v322_v0 = vmul.f32 0.03125, %v241_v27  ;;  %v323_v1 = vmul.f32 0.03125, %v244_v30  ;;  %v388_v38 = vmul.f32 %v1174_v23, %v1174_v23  ;;  %v389_v16 = vmul.f32 %v1177_v13, %v1177_v13 }
  0xb0   : > { %v1186_v39 = vsub.f32 %v1008_v20, %v322_v0  ;;  %v1189_v17 = vsub.f32 %v1011_v21, %v323_v1  ;;  %v438_v42 = vsel %vm208_vm0, %v388_v38, 0.0  ;;  %v441_v47 = vsel %vm208_vm0, %v389_v16, 0.0 }
  0xb1   : > { %436 = vadd.xlane.f32.xlu1 %v435_v31  ;;  %439 = vadd.xlane.f32.xlu0 %v438_v42  ;;  %v247_v43 = vpop.xlane.xlu0 %246  ;;  %v250_v46 = vpop.xlane.xlu1 %249 }
  0xb2   : > { %v324_v50 = vmul.f32 0.03125, %v247_v43  ;;  %v325_v51 = vmul.f32 0.03125, %v250_v46  ;;  %v390_v54 = vmul.f32 %v1186_v39, %v1186_v39  ;;  %v391_v20 = vmul.f32 %v1189_v17, %v1189_v17 }
  0xb4   : > { %v1198_v55 = vsub.f32 %v1018_v24, %v324_v50  ;;  %v1201_v21 = vsub.f32 %v1021_v25, %v325_v51  ;;  %v444_v58 = vsel %vm208_vm0, %v390_v54, 0.0  ;;  %v447_v8 = vsel %vm208_vm0, %v391_v20, 0.0 }
  0xb5   : > { %442 = vadd.xlane.f32.xlu1 %v441_v47  ;;  %445 = vadd.xlane.f32.xlu0 %v444_v58  ;;  %v253_v59 = vpop.xlane.xlu0 %252  ;;  %v256_v62 = vpop.xlane.xlu1 %255 }
  0xb6   : > { %v326_v6 = vmul.f32 0.03125, %v253_v59  ;;  %v327_v7 = vmul.f32 0.03125, %v256_v62  ;;  %v392_v10 = vmul.f32 %v1198_v55, %v1198_v55  ;;  %v393_v24 = vmul.f32 %v1201_v21, %v1201_v21 }
  0xb8   : > { %v1210_v11 = vsub.f32 %v1028_v28, %v326_v6  ;;  %v1213_v25 = vsub.f32 %v1031_v29, %v327_v7  ;;  %v450_v14 = vsel %vm208_vm0, %v392_v10, 0.0  ;;  %v453_v12 = vsel %vm208_vm0, %v393_v24, 0.0 }
  0xb9   : > { %448 = vadd.xlane.f32.xlu1 %v447_v8  ;;  %451 = vadd.xlane.f32.xlu0 %v450_v14  ;;  %v259_v15 = vpop.xlane.xlu0 %258  ;;  %v262_v22 = vpop.xlane.xlu1 %261 }
  0xba   : > { %v328_v26 = vmul.f32 0.03125, %v259_v15  ;;  %v329_v27 = vmul.f32 0.03125, %v262_v22  ;;  %v394_v30 = vmul.f32 %v1210_v11, %v1210_v11  ;;  %v395_v28 = vmul.f32 %v1213_v25, %v1213_v25 }
  0xbc   : > { %v1222_v31 = vsub.f32 %v1038_v32, %v328_v26  ;;  %v1225_v29 = vsub.f32 %v1041_v33, %v329_v27  ;;  %v456_v0 = vsel %vm208_vm0, %v394_v30, 0.0  ;;  %v459_v16 = vsel %vm208_vm0, %v395_v28, 0.0 }
  0xbd   : > { %454 = vadd.xlane.f32.xlu1 %v453_v12  ;;  %457 = vadd.xlane.f32.xlu0 %v456_v0  ;;  %v265_v1 = vpop.xlane.xlu0 %264  ;;  %v268_v38 = vpop.xlane.xlu1 %267 }
  0xbe   : > { %v330_v42 = vmul.f32 0.03125, %v265_v1  ;;  %v331_v43 = vmul.f32 0.03125, %v268_v38  ;;  %v396_v46 = vmul.f32 %v1222_v31, %v1222_v31  ;;  %v397_v32 = vmul.f32 %v1225_v29, %v1225_v29 }
  0xc0   : > { %v1234_v47 = vsub.f32 %v1048_v36, %v330_v42  ;;  %v1237_v33 = vsub.f32 %v1051_v37, %v331_v43  ;;  %v462_v50 = vsel %vm208_vm0, %v396_v46, 0.0  ;;  %v465_v20 = vsel %vm208_vm0, %v397_v32, 0.0 }
  0xc1   : > { %460 = vadd.xlane.f32.xlu1 %v459_v16  ;;  %463 = vadd.xlane.f32.xlu0 %v462_v50  ;;  %v271_v51 = vpop.xlane.xlu0 %270  ;;  %v274_v54 = vpop.xlane.xlu1 %273 }
  0xc2   : > { %v332_v58 = vmul.f32 0.03125, %v271_v51  ;;  %v333_v59 = vmul.f32 0.03125, %v274_v54  ;;  %v398_v62 = vmul.f32 %v1234_v47, %v1234_v47  ;;  %v399_v36 = vmul.f32 %v1237_v33, %v1237_v33 }
  0xc4   : > { %v1246_v8 = vsub.f32 %v1058_v40, %v332_v58  ;;  %v1249_v37 = vsub.f32 %v1061_v41, %v333_v59  ;;  %v468_v6 = vsel %vm208_vm0, %v398_v62, 0.0  ;;  %v471_v24 = vsel %vm208_vm0, %v399_v36, 0.0 }
  0xc5   : > { %466 = vadd.xlane.f32.xlu1 %v465_v20  ;;  %469 = vadd.xlane.f32.xlu0 %v468_v6  ;;  %v277_v7 = vpop.xlane.xlu0 %276  ;;  %v280_v10 = vpop.xlane.xlu1 %279 }
  0xc6   : > { %v334_v14 = vmul.f32 0.03125, %v277_v7  ;;  %v335_v15 = vmul.f32 0.03125, %v280_v10  ;;  %v400_v22 = vmul.f32 %v1246_v8, %v1246_v8  ;;  %v401_v40 = vmul.f32 %v1249_v37, %v1249_v37 }
  0xc8   : > { %v1258_v12 = vsub.f32 %v1068_v44, %v334_v14  ;;  %v1261_v41 = vsub.f32 %v1071_v45, %v335_v15  ;;  %v474_v26 = vsel %vm208_vm0, %v400_v22, 0.0  ;;  %v477_v28 = vsel %vm208_vm0, %v401_v40, 0.0 }
  0xc9   : > { %472 = vadd.xlane.f32.xlu1 %v471_v24  ;;  %475 = vadd.xlane.f32.xlu0 %v474_v26  ;;  %v283_v27 = vpop.xlane.xlu0 %282  ;;  %v286_v30 = vpop.xlane.xlu1 %285 }
  0xca   : > { %v336_v0 = vmul.f32 0.03125, %v283_v27  ;;  %v337_v1 = vmul.f32 0.03125, %v286_v30  ;;  %v402_v38 = vmul.f32 %v1258_v12, %v1258_v12  ;;  %v403_v44 = vmul.f32 %v1261_v41, %v1261_v41 }
  0xcc   : > { %v1270_v16 = vsub.f32 %v1078_v48, %v336_v0  ;;  %v1273_v45 = vsub.f32 %v1081_v49, %v337_v1  ;;  %v480_v42 = vsel %vm208_vm0, %v402_v38, 0.0  ;;  %v483_v32 = vsel %vm208_vm0, %v403_v44, 0.0 }
  0xcd   : > { %478 = vadd.xlane.f32.xlu1 %v477_v28  ;;  %481 = vadd.xlane.f32.xlu0 %v480_v42  ;;  %v289_v43 = vpop.xlane.xlu0 %288  ;;  %v292_v46 = vpop.xlane.xlu1 %291 }
  0xce   : > { %v338_v50 = vmul.f32 0.03125, %v289_v43  ;;  %v339_v51 = vmul.f32 0.03125, %v292_v46  ;;  %v404_v54 = vmul.f32 %v1270_v16, %v1270_v16  ;;  %v405_v48 = vmul.f32 %v1273_v45, %v1273_v45 }
  0xd0   : > { %v1282_v20 = vsub.f32 %v1088_v52, %v338_v50  ;;  %v1285_v49 = vsub.f32 %v1091_v53, %v339_v51  ;;  %v486_v58 = vsel %vm208_vm0, %v404_v54, 0.0  ;;  %v489_v36 = vsel %vm208_vm0, %v405_v48, 0.0 }
  0xd1   : > { %484 = vadd.xlane.f32.xlu1 %v483_v32  ;;  %487 = vadd.xlane.f32.xlu0 %v486_v58  ;;  %v295_v59 = vpop.xlane.xlu0 %294  ;;  %v298_v62 = vpop.xlane.xlu1 %297 }
  0xd2   : > { %v340_v6 = vmul.f32 0.03125, %v295_v59  ;;  %v341_v7 = vmul.f32 0.03125, %v298_v62  ;;  %v406_v10 = vmul.f32 %v1282_v20, %v1282_v20  ;;  %v407_v52 = vmul.f32 %v1285_v49, %v1285_v49 }
  0xd4   : > { %v1294_v24 = vsub.f32 %v1098_v56, %v340_v6  ;;  %v1297_v53 = vsub.f32 %v1101_v57, %v341_v7  ;;  %v492_v14 = vsel %vm208_vm0, %v406_v10, 0.0  ;;  %v495_v40 = vsel %vm208_vm0, %v407_v52, 0.0 }
  0xd5   : > { %490 = vadd.xlane.f32.xlu1 %v489_v36  ;;  %493 = vadd.xlane.f32.xlu0 %v492_v14  ;;  %v301_v15 = vpop.xlane.xlu0 %300  ;;  %v304_v22 = vpop.xlane.xlu1 %303 }
  0xd6   : > { %v342_v26 = vmul.f32 0.03125, %v301_v15  ;;  %v343_v27 = vmul.f32 0.03125, %v304_v22  ;;  %v408_v30 = vmul.f32 %v1294_v24, %v1294_v24  ;;  %v409_v56 = vmul.f32 %v1297_v53, %v1297_v53 }
  0xd8   : > { %v1306_v28 = vsub.f32 %v1108_v60, %v342_v26  ;;  %v1309_v57 = vsub.f32 %v1111_v61, %v343_v27  ;;  %v498_v0 = vsel %vm208_vm0, %v408_v30, 0.0  ;;  %v501_v44 = vsel %vm208_vm0, %v409_v56, 0.0 }
  0xd9   : > { %496 = vadd.xlane.f32.xlu1 %v495_v40  ;;  %499 = vadd.xlane.f32.xlu0 %v498_v0  ;;  %v307_v1 = vpop.xlane.xlu0 %306  ;;  %v310_v38 = vpop.xlane.xlu1 %309 }
  0xda   : > { %v344_v42 = vmul.f32 0.03125, %v307_v1  ;;  %v345_v43 = vmul.f32 0.03125, %v310_v38  ;;  %v410_v46 = vmul.f32 %v1306_v28, %v1306_v28  ;;  %v411_v60 = vmul.f32 %v1309_v57, %v1309_v57 }
  0xdc   : > { %v1318_v32 = vsub.f32 %v1118_v3, %v344_v42  ;;  %v1321_v61 = vsub.f32 %v1121_v4, %v345_v43  ;;  %v504_v50 = vsel %vm208_vm0, %v410_v46, 0.0  ;;  %v507_v51 = vsel %vm208_vm0, %v411_v60, 0.0 }
  0xdd   : > { %502 = vadd.xlane.f32.xlu1 %v501_v44  ;;  %505 = vadd.xlane.f32.xlu0 %v504_v50 }
  0xde   : > { %v412_v54 = vmul.f32 %v1318_v32, %v1318_v32  ;;  %v413_v48 = vmul.f32 %v1321_v61, %v1321_v61 }
  0xe0   : > { %v510_v58 = vsel %vm208_vm0, %v412_v54, 0.0  ;;  %v513_v3 = vsel %vm208_vm0, %v413_v48, 0.0  ;;  %v1334_v54 = vld [vmem:[%s1522_s1] ss:$0 sm:$0xff] }
  0xe1   : > { %508 = vadd.xlane.f32.xlu1 %v507_v51  ;;  %511 = vadd.xlane.f32.xlu0 %v510_v58 }
  0xe5   : > { %514 = vadd.xlane.f32.xlu1 %v513_v3 }
 0x12a   : > { %v416_v4 = vpop.xlane.xlu0 %415 }
 0x12b   : > { %v516_v59 = vmul.f32 0.03125, %v416_v4  ;;  %v1340_v4 = vld [vmem:[%s1523_s2] ss:$0 sm:$0xff] }
 0x12d   : > { %v550_v62 = vadd.f32 1e-05, %v516_v59 }
 0x12e   : > { %v419_v36 = vpop.xlane.xlu1 %418  ;;  %v422_v6 = vpop.xlane.xlu0 %421 }
 0x12f   : > { %843 = vrsqrt.f32 %v550_v62  ;;  %v517_v7 = vmul.f32 0.03125, %v419_v36  ;;  %v518_v10 = vmul.f32 0.03125, %v422_v6 }
 0x131   : > { %v551_v52 = vadd.f32 1e-05, %v517_v7  ;;  %v552_v14 = vadd.f32 1e-05, %v518_v10 }
 0x132   : > { %v425_v15 = vpop.xlane.xlu1 %424  ;;  %v428_v22 = vpop.xlane.xlu0 %427 }
 0x133   : > { %845 = vrsqrt.f32 %v551_v52  ;;  %v519_v40 = vmul.f32 0.03125, %v425_v15  ;;  %v520_v26 = vmul.f32 0.03125, %v428_v22 }
 0x134   : > { %847 = vrsqrt.f32 %v552_v14 }
 0x135   : > { %v553_v27 = vadd.f32 1e-05, %v519_v40  ;;  %v554_v30 = vadd.f32 1e-05, %v520_v26 }
 0x136   : > { %v431_v56 = vpop.xlane.xlu1 %430  ;;  %v434_v0 = vpop.xlane.xlu0 %433 }
 0x137   : > { %849 = vrsqrt.f32 %v553_v27  ;;  %v521_v1 = vmul.f32 0.03125, %v431_v56  ;;  %v522_v38 = vmul.f32 0.03125, %v434_v0 }
 0x138   : > { %851 = vrsqrt.f32 %v554_v30 }
 0x139   : > { %v555_v44 = vadd.f32 1e-05, %v521_v1  ;;  %v556_v42 = vadd.f32 1e-05, %v522_v38 }
 0x13a   : > { %v437_v43 = vpop.xlane.xlu1 %436  ;;  %v440_v46 = vpop.xlane.xlu0 %439 }
 0x13b   : > { %853 = vrsqrt.f32 %v555_v44  ;;  %v523_v60 = vmul.f32 0.03125, %v437_v43  ;;  %v524_v50 = vmul.f32 0.03125, %v440_v46 }
 0x13c   : > { %v844_v51 = vpop.eup %843  ;;  %855 = vrsqrt.f32 %v556_v42 }
 0x13d   : > { %v618_v48 = vmul.f32 %v844_v51, %v1128_v18  ;;  %v557_v58 = vadd.f32 1e-05, %v523_v60  ;;  %v558_v3 = vadd.f32 1e-05, %v524_v50 }
 0x13e   : > { %v443_v59 = vpop.xlane.xlu1 %442  ;;  %v446_v62 = vpop.xlane.xlu0 %445 }
 0x13f   : > { %v659_v36 = vmul.f32 %v1334_v54, %v618_v48  ;;  %857 = vrsqrt.f32 %v557_v58  ;;  %v525_v6 = vmul.f32 0.03125, %v443_v59  ;;  %v526_v7 = vmul.f32 0.03125, %v446_v62 }
 0x140   : > { %v846_v10 = vpop.eup %845  ;;  %859 = vrsqrt.f32 %v558_v3 }
 0x141   : > { %v848_v18 = vpop.eup %847  ;;  %v700_v52 = vadd.f32 %v1340_v4, %v659_v36  ;;  %v619_v14 = vmul.f32 %v846_v10, %v1138_v34  ;;  %v559_v15 = vadd.f32 1e-05, %v525_v6  ;;  %v560_v22 = vadd.f32 1e-05, %v526_v7 }
 0x142   : > { %v620_v40 = vmul.f32 %v848_v18, %v1131_v19  ;;  %v449_v26 = vpop.xlane.xlu1 %448  ;;  %v452_v27 = vpop.xlane.xlu0 %451 }
 0x143   : > { %734 = vst.msk [vmem:[%s1348_s25] sm:$0xff] %vm208_vm0, %v700_v52  ;;  %v660_v30 = vmul.f32 %v1334_v54, %v619_v14  ;;  %861 = vrsqrt.f32 %v559_v15  ;;  %v527_v56 = vmul.f32 0.03125, %v449_v26  ;;  %v528_v0 = vmul.f32 0.03125, %v452_v27 }
 0x144   : > { %v850_v1 = vpop.eup %849  ;;  %v661_v38 = vmul.f32 %v1334_v54, %v620_v40  ;;  %863 = vrsqrt.f32 %v560_v22 }
 0x145   : > { %v852_v34 = vpop.eup %851  ;;  %v701_v44 = vadd.f32 %v1340_v4, %v660_v30  ;;  %v621_v19 = vmul.f32 %v850_v1, %v1141_v35  ;;  %v561_v42 = vadd.f32 1e-05, %v527_v56  ;;  %v562_v43 = vadd.f32 1e-05, %v528_v0 }
 0x146   : > { %v702_v46 = vadd.f32 %v1340_v4, %v661_v38  ;;  %v622_v60 = vmul.f32 %v852_v34, %v1150_v2  ;;  %v455_v50 = vpop.xlane.xlu1 %454  ;;  %v458_v51 = vpop.xlane.xlu0 %457 }
 0x147   : > { %735 = vst.msk [vmem:[%s1348_s25 + $0x8] sm:$0xff] %vm208_vm0, %v701_v44  ;;  %v662_v48 = vmul.f32 %v1334_v54, %v621_v19  ;;  %865 = vrsqrt.f32 %v561_v42  ;;  %v529_v58 = vmul.f32 0.03125, %v455_v50  ;;  %v530_v3 = vmul.f32 0.03125, %v458_v51 }
 0x148   : > { %v854_v59 = vpop.eup %853  ;;  %736 = vst.msk [vmem:[%s1348_s25 + $0x10] sm:$0xff] %vm208_vm0, %v702_v46  ;;  %v663_v35 = vmul.f32 %v1334_v54, %v622_v60  ;;  %867 = vrsqrt.f32 %v562_v43 }
 0x149   : > { %v856_v62 = vpop.eup %855  ;;  %v703_v2 = vadd.f32 %v1340_v4, %v662_v48  ;;  %v623_v36 = vmul.f32 %v854_v59, %v1153_v5  ;;  %v563_v6 = vadd.f32 1e-05, %v529_v58  ;;  %v564_v7 = vadd.f32 1e-05, %v530_v3 }
 0x14a   : > { %v704_v10 = vadd.f32 %v1340_v4, %v663_v35  ;;  %v624_v18 = vmul.f32 %v856_v62, %v1162_v63  ;;  %v461_v52 = vpop.xlane.xlu1 %460  ;;  %v464_v14 = vpop.xlane.xlu0 %463 }
 0x14b   : > { %737 = vst.msk [vmem:[%s1348_s25 + $0x18] sm:$0xff] %vm208_vm0, %v703_v2  ;;  %v664_v15 = vmul.f32 %v1334_v54, %v623_v36  ;;  %869 = vrsqrt.f32 %v563_v6  ;;  %v531_v22 = vmul.f32 0.03125, %v461_v52  ;;  %v532_v40 = vmul.f32 0.03125, %v464_v14 }
 0x14c   : > { %v858_v26 = vpop.eup %857  ;;  %738 = vst.msk [vmem:[%s1348_s25 + $0x20] sm:$0xff] %vm208_vm0, %v704_v10  ;;  %v665_v5 = vmul.f32 %v1334_v54, %v624_v18  ;;  %871 = vrsqrt.f32 %v564_v7 }
 0x14d   : > { %v860_v27 = vpop.eup %859  ;;  %v705_v63 = vadd.f32 %v1340_v4, %v664_v15  ;;  %v625_v30 = vmul.f32 %v858_v26, %v1165_v9  ;;  %v565_v56 = vadd.f32 1e-05, %v531_v22  ;;  %v566_v0 = vadd.f32 1e-05, %v532_v40 }
 0x14e   : > { %v706_v1 = vadd.f32 %v1340_v4, %v665_v5  ;;  %v626_v38 = vmul.f32 %v860_v27, %v1174_v23  ;;  %v467_v34 = vpop.xlane.xlu1 %466  ;;  %v470_v44 = vpop.xlane.xlu0 %469 }
 0x14f   : > { %739 = vst.msk [vmem:[%s1348_s25 + $0x28] sm:$0xff] %vm208_vm0, %v705_v63  ;;  %v666_v19 = vmul.f32 %v1334_v54, %v625_v30  ;;  %873 = vrsqrt.f32 %v565_v56  ;;  %v533_v42 = vmul.f32 0.03125, %v467_v34  ;;  %v534_v43 = vmul.f32 0.03125, %v470_v44 }
 0x150   : > { %v862_v46 = vpop.eup %861  ;;  %740 = vst.msk [vmem:[%s1348_s25 + $0x30] sm:$0xff] %vm208_vm0, %v706_v1  ;;  %v667_v9 = vmul.f32 %v1334_v54, %v626_v38  ;;  %875 = vrsqrt.f32 %v566_v0 }
 0x151   : > { %v864_v60 = vpop.eup %863  ;;  %v707_v23 = vadd.f32 %v1340_v4, %v666_v19  ;;  %v627_v50 = vmul.f32 %v862_v46, %v1177_v13  ;;  %v567_v51 = vadd.f32 1e-05, %v533_v42  ;;  %v568_v48 = vadd.f32 1e-05, %v534_v43 }
 0x152   : > { %v708_v58 = vadd.f32 %v1340_v4, %v667_v9  ;;  %v628_v3 = vmul.f32 %v864_v60, %v1186_v39  ;;  %v473_v59 = vpop.xlane.xlu1 %472  ;;  %v476_v35 = vpop.xlane.xlu0 %475 }
 0x153   : > { %741 = vst.msk [vmem:[%s1348_s25 + $0x38] sm:$0xff] %vm208_vm0, %v707_v23  ;;  %v668_v62 = vmul.f32 %v1334_v54, %v627_v50  ;;  %877 = vrsqrt.f32 %v567_v51  ;;  %v535_v2 = vmul.f32 0.03125, %v473_v59  ;;  %v536_v36 = vmul.f32 0.03125, %v476_v35 }
 0x154   : > { %v866_v6 = vpop.eup %865  ;;  %742 = vst.msk [vmem:[%s1348_s25 + $0x40] sm:$0xff] %vm208_vm0, %v708_v58  ;;  %v669_v13 = vmul.f32 %v1334_v54, %v628_v3  ;;  %879 = vrsqrt.f32 %v568_v48 }
 0x155   : > { %v868_v7 = vpop.eup %867  ;;  %v709_v39 = vadd.f32 %v1340_v4, %v668_v62  ;;  %v629_v10 = vmul.f32 %v866_v6, %v1189_v17  ;;  %v569_v18 = vadd.f32 1e-05, %v535_v2  ;;  %v570_v52 = vadd.f32 1e-05, %v536_v36 }
 0x156   : > { %v710_v14 = vadd.f32 %v1340_v4, %v669_v13  ;;  %v630_v15 = vmul.f32 %v868_v7, %v1198_v55  ;;  %v479_v22 = vpop.xlane.xlu1 %478  ;;  %v482_v40 = vpop.xlane.xlu0 %481 }
 0x157   : > { %743 = vst.msk [vmem:[%s1348_s25 + $0x48] sm:$0xff] %vm208_vm0, %v709_v39  ;;  %v670_v26 = vmul.f32 %v1334_v54, %v629_v10  ;;  %881 = vrsqrt.f32 %v569_v18  ;;  %v537_v5 = vmul.f32 0.03125, %v479_v22  ;;  %v538_v27 = vmul.f32 0.03125, %v482_v40 }
 0x158   : > { %v870_v63 = vpop.eup %869  ;;  %744 = vst.msk [vmem:[%s1348_s25 + $0x50] sm:$0xff] %vm208_vm0, %v710_v14  ;;  %v671_v17 = vmul.f32 %v1334_v54, %v630_v15  ;;  %883 = vrsqrt.f32 %v570_v52 }
 0x159   : > { %v872_v30 = vpop.eup %871  ;;  %v711_v55 = vadd.f32 %v1340_v4, %v670_v26  ;;  %v631_v56 = vmul.f32 %v870_v63, %v1201_v21  ;;  %v571_v0 = vadd.f32 1e-05, %v537_v5  ;;  %v572_v1 = vadd.f32 1e-05, %v538_v27 }
 0x15a   : > { %v712_v38 = vadd.f32 %v1340_v4, %v671_v17  ;;  %v632_v34 = vmul.f32 %v872_v30, %v1210_v11  ;;  %v485_v44 = vpop.xlane.xlu1 %484  ;;  %v488_v19 = vpop.xlane.xlu0 %487 }
 0x15b   : > { %745 = vst.msk [vmem:[%s1348_s25 + $0x58] sm:$0xff] %vm208_vm0, %v711_v55  ;;  %v672_v42 = vmul.f32 %v1334_v54, %v631_v56  ;;  %885 = vrsqrt.f32 %v571_v0  ;;  %v539_v43 = vmul.f32 0.03125, %v485_v44  ;;  %v540_v46 = vmul.f32 0.03125, %v488_v19 }
 0x15c   : > { %v874_v9 = vpop.eup %873  ;;  %746 = vst.msk [vmem:[%s1348_s25 + $0x60] sm:$0xff] %vm208_vm0, %v712_v38  ;;  %v673_v21 = vmul.f32 %v1334_v54, %v632_v34  ;;  %887 = vrsqrt.f32 %v572_v1 }
 0x15d   : > { %v876_v60 = vpop.eup %875  ;;  %v713_v11 = vadd.f32 %v1340_v4, %v672_v42  ;;  %v633_v23 = vmul.f32 %v874_v9, %v1213_v25  ;;  %v573_v50 = vadd.f32 1e-05, %v539_v43  ;;  %v574_v51 = vadd.f32 1e-05, %v540_v46 }
 0x15e   : > { %v714_v48 = vadd.f32 %v1340_v4, %v673_v21  ;;  %v634_v58 = vmul.f32 %v876_v60, %v1222_v31  ;;  %v491_v3 = vpop.xlane.xlu1 %490  ;;  %v494_v59 = vpop.xlane.xlu0 %493 }
 0x15f   : > { %747 = vst.msk [vmem:[%s1348_s25 + $0x68] sm:$0xff] %vm208_vm0, %v713_v11  ;;  %v674_v35 = vmul.f32 %v1334_v54, %v633_v23  ;;  %889 = vrsqrt.f32 %v573_v50  ;;  %v541_v62 = vmul.f32 0.03125, %v491_v3  ;;  %v542_v2 = vmul.f32 0.03125, %v494_v59 }
 0x160   : > { %v878_v36 = vpop.eup %877  ;;  %748 = vst.msk [vmem:[%s1348_s25 + $0x70] sm:$0xff] %vm208_vm0, %v714_v48  ;;  %v675_v25 = vmul.f32 %v1334_v54, %v634_v58  ;;  %891 = vrsqrt.f32 %v574_v51 }
 0x161   : > { %v880_v6 = vpop.eup %879  ;;  %v715_v31 = vadd.f32 %v1340_v4, %v674_v35  ;;  %v635_v13 = vmul.f32 %v878_v36, %v1225_v29  ;;  %v575_v7 = vadd.f32 1e-05, %v541_v62  ;;  %v576_v39 = vadd.f32 1e-05, %v542_v2 }
 0x162   : > { %v716_v10 = vadd.f32 %v1340_v4, %v675_v25  ;;  %v636_v18 = vmul.f32 %v880_v6, %v1234_v47  ;;  %v497_v52 = vpop.xlane.xlu1 %496  ;;  %v500_v14 = vpop.xlane.xlu0 %499 }
 0x163   : > { %749 = vst.msk [vmem:[%s1348_s25 + $0x78] sm:$0xff] %vm208_vm0, %v715_v31  ;;  %v676_v15 = vmul.f32 %v1334_v54, %v635_v13  ;;  %893 = vrsqrt.f32 %v575_v7  ;;  %v543_v22 = vmul.f32 0.03125, %v497_v52  ;;  %v544_v40 = vmul.f32 0.03125, %v500_v14 }
 0x164   : > { %v882_v26 = vpop.eup %881  ;;  %750 = vst.msk [vmem:[%s1348_s25 + $0x80] sm:$0xff] %vm208_vm0, %v716_v10  ;;  %v677_v29 = vmul.f32 %v1334_v54, %v636_v18  ;;  %895 = vrsqrt.f32 %v576_v39 }
 0x165   : > { %v884_v5 = vpop.eup %883  ;;  %v717_v47 = vadd.f32 %v1340_v4, %v676_v15  ;;  %v637_v27 = vmul.f32 %v882_v26, %v1237_v33  ;;  %v577_v63 = vadd.f32 1e-05, %v543_v22  ;;  %v578_v17 = vadd.f32 1e-05, %v544_v40 }
 0x166   : > { %v718_v30 = vadd.f32 %v1340_v4, %v677_v29  ;;  %v638_v55 = vmul.f32 %v884_v5, %v1246_v8  ;;  %v503_v56 = vpop.xlane.xlu1 %502  ;;  %v506_v0 = vpop.xlane.xlu0 %505 }
 0x167   : > { %751 = vst.msk [vmem:[%s1348_s25 + $0x88] sm:$0xff] %vm208_vm0, %v717_v47  ;;  %v678_v1 = vmul.f32 %v1334_v54, %v637_v27  ;;  %897 = vrsqrt.f32 %v577_v63  ;;  %v545_v38 = vmul.f32 0.03125, %v503_v56  ;;  %v546_v34 = vmul.f32 0.03125, %v506_v0 }
 0x168   : > { %v886_v44 = vpop.eup %885  ;;  %752 = vst.msk [vmem:[%s1348_s25 + $0x90] sm:$0xff] %vm208_vm0, %v718_v30  ;;  %v679_v33 = vmul.f32 %v1334_v54, %v638_v55  ;;  %899 = vrsqrt.f32 %v578_v17 }
 0x169   : > { %v888_v19 = vpop.eup %887  ;;  %v719_v8 = vadd.f32 %v1340_v4, %v678_v1  ;;  %v639_v42 = vmul.f32 %v886_v44, %v1249_v37  ;;  %v579_v43 = vadd.f32 1e-05, %v545_v38  ;;  %v580_v46 = vadd.f32 1e-05, %v546_v34 }
 0x16a   : > { %v720_v9 = vadd.f32 %v1340_v4, %v679_v33  ;;  %v640_v21 = vmul.f32 %v888_v19, %v1258_v12  ;;  %v509_v60 = vpop.xlane.xlu1 %508  ;;  %v512_v11 = vpop.xlane.xlu0 %511 }
 0x16b   : > { %753 = vst.msk [vmem:[%s1348_s25 + $0x98] sm:$0xff] %vm208_vm0, %v719_v8  ;;  %v680_v23 = vmul.f32 %v1334_v54, %v639_v42  ;;  %901 = vrsqrt.f32 %v579_v43  ;;  %v547_v50 = vmul.f32 0.03125, %v509_v60  ;;  %v548_v51 = vmul.f32 0.03125, %v512_v11 }
 0x16c   : > { %v890_v48 = vpop.eup %889  ;;  %754 = vst.msk [vmem:[%s1348_s25 + $0xa0] sm:$0xff] %vm208_vm0, %v720_v9  ;;  %v681_v37 = vmul.f32 %v1334_v54, %v640_v21  ;;  %903 = vrsqrt.f32 %v580_v46 }
 0x16d   : > { %v892_v58 = vpop.eup %891  ;;  %v721_v12 = vadd.f32 %v1340_v4, %v680_v23  ;;  %v641_v3 = vmul.f32 %v890_v48, %v1261_v41  ;;  %v581_v59 = vadd.f32 1e-05, %v547_v50  ;;  %v582_v35 = vadd.f32 1e-05, %v548_v51 }
 0x16e   : > { %v722_v62 = vadd.f32 %v1340_v4, %v681_v37  ;;  %v642_v2 = vmul.f32 %v892_v58, %v1270_v16  ;;  %v515_v36 = vpop.xlane.xlu1 %514 }
 0x16f   : > { %755 = vst.msk [vmem:[%s1348_s25 + $0xa8] sm:$0xff] %vm208_vm0, %v721_v12  ;;  %v682_v25 = vmul.f32 %v1334_v54, %v641_v3  ;;  %905 = vrsqrt.f32 %v581_v59  ;;  %v549_v6 = vmul.f32 0.03125, %v515_v36 }
 0x170   : > { %v894_v31 = vpop.eup %893  ;;  %756 = vst.msk [vmem:[%s1348_s25 + $0xb0] sm:$0xff] %vm208_vm0, %v722_v62  ;;  %v683_v41 = vmul.f32 %v1334_v54, %v642_v2  ;;  %907 = vrsqrt.f32 %v582_v35 }
 0x171   : > { %v896_v13 = vpop.eup %895  ;;  %v723_v7 = vadd.f32 %v1340_v4, %v682_v25  ;;  %v643_v16 = vmul.f32 %v894_v31, %v1273_v45  ;;  %v583_v39 = vadd.f32 1e-05, %v549_v6 }
 0x172   : > { %v724_v10 = vadd.f32 %v1340_v4, %v683_v41  ;;  %v644_v18 = vmul.f32 %v896_v13, %v1282_v20 }
 0x173   : > { %757 = vst.msk [vmem:[%s1348_s25 + $0xb8] sm:$0xff] %vm208_vm0, %v723_v7  ;;  %v684_v52 = vmul.f32 %v1334_v54, %v643_v16  ;;  %909 = vrsqrt.f32 %v583_v39 }
 0x174   : > { %v898_v14 = vpop.eup %897  ;;  %758 = vst.msk [vmem:[%s1348_s25 + $0xc0] sm:$0xff] %vm208_vm0, %v724_v10  ;;  %v685_v15 = vmul.f32 %v1334_v54, %v644_v18 }
 0x175   : > { %v900_v22 = vpop.eup %899  ;;  %v725_v45 = vadd.f32 %v1340_v4, %v684_v52  ;;  %v645_v40 = vmul.f32 %v898_v14, %v1285_v49 }
 0x176   : > { %v726_v26 = vadd.f32 %v1340_v4, %v685_v15  ;;  %v646_v20 = vmul.f32 %v900_v22, %v1294_v24 }
 0x177   : > { %759 = vst.msk [vmem:[%s1348_s25 + $0xc8] sm:$0xff] %vm208_vm0, %v725_v45  ;;  %v686_v29 = vmul.f32 %v1334_v54, %v645_v40 }
 0x178   : > { %v902_v5 = vpop.eup %901  ;;  %760 = vst.msk [vmem:[%s1348_s25 + $0xd0] sm:$0xff] %vm208_vm0, %v726_v26  ;;  %v687_v47 = vmul.f32 %v1334_v54, %v646_v20 }
 0x179   : > { %v904_v27 = vpop.eup %903  ;;  %v727_v63 = vadd.f32 %v1340_v4, %v686_v29  ;;  %v647_v49 = vmul.f32 %v902_v5, %v1297_v53 }
 0x17a   : > { %v728_v17 = vadd.f32 %v1340_v4, %v687_v47  ;;  %v648_v24 = vmul.f32 %v904_v27, %v1306_v28 }
 0x17b   : > { %761 = vst.msk [vmem:[%s1348_s25 + $0xd8] sm:$0xff] %vm208_vm0, %v727_v63  ;;  %v688_v30 = vmul.f32 %v1334_v54, %v647_v49 }
 0x17c   : > { %v906_v55 = vpop.eup %905  ;;  %762 = vst.msk [vmem:[%s1348_s25 + $0xe0] sm:$0xff] %vm208_vm0, %v728_v17  ;;  %v689_v56 = vmul.f32 %v1334_v54, %v648_v24 }
 0x17d   : > { %v908_v0 = vpop.eup %907  ;;  %v729_v1 = vadd.f32 %v1340_v4, %v688_v30  ;;  %v649_v53 = vmul.f32 %v906_v55, %v1309_v57 }
 0x17e   : > { %v730_v38 = vadd.f32 %v1340_v4, %v689_v56  ;;  %v650_v28 = vmul.f32 %v908_v0, %v1318_v32 }
 0x17f   : > { %763 = vst.msk [vmem:[%s1348_s25 + $0xe8] sm:$0xff] %vm208_vm0, %v729_v1  ;;  %v690_v34 = vmul.f32 %v1334_v54, %v649_v53 }
 0x180   : > { %v910_v44 = vpop.eup %909  ;;  %764 = vst.msk [vmem:[%s1348_s25 + $0xf0] sm:$0xff] %vm208_vm0, %v730_v38  ;;  %v691_v33 = vmul.f32 %v1334_v54, %v650_v28 }
 0x181   : > { %v731_v19 = vadd.f32 %v1340_v4, %v690_v34  ;;  %v651_v8 = vmul.f32 %v910_v44, %v1321_v61 }
 0x182   : > { %v732_v42 = vadd.f32 %v1340_v4, %v691_v33 }
 0x183   : > { %765 = vst.msk [vmem:[%s1348_s25 + $0xf8] sm:$0xff] %vm208_vm0, %v731_v19  ;;  %v692_v57 = vmul.f32 %v1334_v54, %v651_v8 }
 0x184   : > { %766 = vst.msk [vmem:[%s1348_s25 + $0x100] sm:$0xff] %vm208_vm0, %v732_v42 }
 0x185   : > { %v733_v32 = vadd.f32 %v1340_v4, %v692_v57 }
 0x187   : > { %767 = vst.msk [vmem:[%s1348_s25 + $0x108] sm:$0xff] %vm208_vm0, %v733_v32 }
 0x188 PF: > { %s13_s12 = sadd.s32 1, %s917_s12  }
 0x189   : > { %p10_p4 = scmp.ge.s32.totalorder %s13_s12, 4  }
 0x18b   :  { %12 = sbr.rel (!%p10_p4) target bundleno = 1 (0x1), region = 62 }

// kernel: _lambda_.9
= control target key start
LH: loop header
LB: loop body
LE: loop exit
PB: predicated region body
PF: predicated region fallthrough
CT: control target
= control target key end

     0   :  { %s1517_s18 = smov 0   ;;  %s1519_s19 = smov 0   ;;  %s2215_s0 = inlined_call_operand.vmem [shape: f32[544,32], index: 0, kind: input, shape index: {}]   ;;  %s2216_s1 = inlined_call_operand.vmem [shape: f32[1,32], index: 1, kind: input, shape index: {}]   ;;  %s2217_s2 = inlined_call_operand.vmem [shape: f32[1,32], index: 2, kind: input, shape index: {}]   ;;  %s2218_s3 = inlined_call_operand.vmem [shape: bf16[32,96], index: 3, kind: input, shape index: {}]   ;;  %s2219_s4 = inlined_call_operand.vmem [shape: f32[1,96], index: 4, kind: input, shape index: {}]   ;;  %s2220_s5 = inlined_call_operand.vmem [shape: f32[544,96], index: 5, kind: output, shape index: {}]  }
   0x1   :  { %s1521_s20 = smov 0  }
   0x2 LB: > { %s27_s21 = sadd.s32 1, %s1479_s19  ;;  %p1243_p0 = scmp.ge.s32.totalorder %s1483_s20, 1  ;;  %s1483_s20 = sphi %s1521_s20, %s15_s20   ;;  %s1479_s19 = sphi %s1519_s19, %s2222_s19   ;;  %s1475_s18 = sphi %s1517_s18, %s2221_s18  }
   0x3   : > { %p29_p1 = scmp.ge.s32.totalorder %s27_s21, 2  ;;  %p219_p2 = scmp.lt.s32.totalorder %s1483_s20, 3 }
   0x5   : > { %s2224_s21 = smov (%p29_p1, %s27_s21), 0  ;;  %p220_p3 = pnand %p1243_p0, %p219_p2 }
   0x6   : > { %s257_s22 = smul.u32 (!%p220_p3), 34, %s1475_s18 }
   0x7   : > { %223 = sbr.rel (%p220_p3) target bundleno = 594 (0x252), region = 40 }
   0x8   : > { %p258_p4 = scmp.lt.s32.totalorder (!%p220_p3), %s257_s22, 67 }
   0xc   : > { %s2226_s22 = smov (!%p258_p4, %s257_s22), 67  ;;  %vm314_vm0 = vcmask 261120   ;;  %vm1486_vm1 = vmmov 0   ;;  %vm1100_vm2 = vcmask 785408  }
   0xd   : > { %s1244_s23 = sshll.u32 %s2226_s22, 3 }
   0xe   : > { %s1543_s26 = scalar_lea.vmem %s2215_s0, %s1244_s23  ;;  %s2102_s14 = scalar_lea.vmem %s2220_s5, %s1244_s23 }
   0xf   : > { %v1546_v0 = vld [vmem:[%s1543_s26] sm:$0xff]  ;;  %v1549_v1 = vld [vmem:[%s1543_s26 + $0x10] sm:$0xff]  ;;  %v1552_v2 = vld [vmem:[%s1543_s26 + $0x8] sm:$0xff] }
  0x10   : > { %v315_v3 = vsel %vm314_vm0, %v1546_v0, 0.0  ;;  %v321_v4 = vsel %vm314_vm0, %v1549_v1, 0.0  ;;  %v1559_v5 = vld [vmem:[%s1543_s26 + $0x18] sm:$0xff]  ;;  %v318_v6 = vsel %vm314_vm0, %v1552_v2, 0.0  ;;  %v1566_v8 = vld [vmem:[%s1543_s26 + $0x90] sm:$0xff]  ;;  %v1576_v12 = vld [vmem:[%s1543_s26 + $0x20] sm:$0xff] }
  0x11   : > { %316 = vadd.xlane.f32.xlu0 %v315_v3  ;;  %322 = vadd.xlane.f32.xlu1 %v321_v4  ;;  %v324_v7 = vsel %vm314_vm0, %v1559_v5, 0.0  ;;  %v1569_v9 = vld [vmem:[%s1543_s26 + $0x98] sm:$0xff]  ;;  %v369_v10 = vsel %vm314_vm0, %v1566_v8, 0.0  ;;  %v1579_v13 = vld [vmem:[%s1543_s26 + $0x28] sm:$0xff]  ;;  %v327_v14 = vsel %vm314_vm0, %v1576_v12, 0.0  ;;  %v1586_v16 = vld [vmem:[%s1543_s26 + $0xa0] sm:$0xff] }
  0x12   : > { %v372_v11 = vsel %vm314_vm0, %v1569_v9, 0.0  ;;  %v330_v15 = vsel %vm314_vm0, %v1579_v13, 0.0  ;;  %v1589_v17 = vld [vmem:[%s1543_s26 + $0xa8] sm:$0xff]  ;;  %v375_v18 = vsel %vm314_vm0, %v1586_v16, 0.0  ;;  %v1596_v20 = vld [vmem:[%s1543_s26 + $0x30] sm:$0xff]  ;;  %v1599_v21 = vld [vmem:[%s1543_s26 + $0x38] sm:$0xff] }
  0x13   : > { %v378_v19 = vsel %vm314_vm0, %v1589_v17, 0.0  ;;  %v333_v22 = vsel %vm314_vm0, %v1596_v20, 0.0  ;;  %v336_v23 = vsel %vm314_vm0, %v1599_v21, 0.0  ;;  %v1606_v24 = vld [vmem:[%s1543_s26 + $0xb0] sm:$0xff]  ;;  %v1609_v25 = vld [vmem:[%s1543_s26 + $0xb8] sm:$0xff]  ;;  %v1616_v28 = vld [vmem:[%s1543_s26 + $0x40] sm:$0xff] }
  0x14   : > { %v381_v26 = vsel %vm314_vm0, %v1606_v24, 0.0  ;;  %v384_v27 = vsel %vm314_vm0, %v1609_v25, 0.0  ;;  %v1619_v29 = vld [vmem:[%s1543_s26 + $0x48] sm:$0xff]  ;;  %v339_v30 = vsel %vm314_vm0, %v1616_v28, 0.0  ;;  %v1626_v32 = vld [vmem:[%s1543_s26 + $0xc0] sm:$0xff]  ;;  %v1636_v36 = vld [vmem:[%s1543_s26 + $0x50] sm:$0xff] }
  0x15   : > { %319 = vadd.xlane.f32.xlu0 %v318_v6  ;;  %325 = vadd.xlane.f32.xlu1 %v324_v7  ;;  %v342_v31 = vsel %vm314_vm0, %v1619_v29, 0.0  ;;  %v1629_v33 = vld [vmem:[%s1543_s26 + $0xc8] sm:$0xff]  ;;  %v387_v34 = vsel %vm314_vm0, %v1626_v32, 0.0  ;;  %v1639_v37 = vld [vmem:[%s1543_s26 + $0x58] sm:$0xff]  ;;  %v345_v38 = vsel %vm314_vm0, %v1636_v36, 0.0  ;;  %v1646_v40 = vld [vmem:[%s1543_s26 + $0xd0] sm:$0xff] }
  0x16   : > { %v390_v35 = vsel %vm314_vm0, %v1629_v33, 0.0  ;;  %v348_v39 = vsel %vm314_vm0, %v1639_v37, 0.0  ;;  %v1649_v41 = vld [vmem:[%s1543_s26 + $0xd8] sm:$0xff]  ;;  %v393_v42 = vsel %vm314_vm0, %v1646_v40, 0.0  ;;  %v1656_v44 = vld [vmem:[%s1543_s26 + $0x60] sm:$0xff]  ;;  %v1659_v45 = vld [vmem:[%s1543_s26 + $0x68] sm:$0xff] }
  0x17   : > { %v396_v43 = vsel %vm314_vm0, %v1649_v41, 0.0  ;;  %v351_v46 = vsel %vm314_vm0, %v1656_v44, 0.0  ;;  %v354_v47 = vsel %vm314_vm0, %v1659_v45, 0.0  ;;  %v1666_v48 = vld [vmem:[%s1543_s26 + $0xe0] sm:$0xff]  ;;  %v1669_v49 = vld [vmem:[%s1543_s26 + $0xe8] sm:$0xff]  ;;  %v1676_v52 = vld [vmem:[%s1543_s26 + $0x70] sm:$0xff] }
  0x18   : > { %v399_v50 = vsel %vm314_vm0, %v1666_v48, 0.0  ;;  %v402_v51 = vsel %vm314_vm0, %v1669_v49, 0.0  ;;  %v1679_v53 = vld [vmem:[%s1543_s26 + $0x78] sm:$0xff]  ;;  %v357_v54 = vsel %vm314_vm0, %v1676_v52, 0.0  ;;  %v1686_v56 = vld [vmem:[%s1543_s26 + $0xf0] sm:$0xff]  ;;  %v1696_v60 = vld [vmem:[%s1543_s26 + $0x80] sm:$0xff] }
  0x19   : > { %370 = vadd.xlane.f32.xlu0 %v369_v10  ;;  %373 = vadd.xlane.f32.xlu1 %v372_v11  ;;  %v360_v55 = vsel %vm314_vm0, %v1679_v53, 0.0  ;;  %v1689_v57 = vld [vmem:[%s1543_s26 + $0xf8] sm:$0xff]  ;;  %v405_v58 = vsel %vm314_vm0, %v1686_v56, 0.0  ;;  %v1699_v61 = vld [vmem:[%s1543_s26 + $0x88] sm:$0xff]  ;;  %v363_v62 = vsel %vm314_vm0, %v1696_v60, 0.0  ;;  %v1706_v3 = vld [vmem:[%s1543_s26 + $0x100] sm:$0xff] }
  0x1a   : > { %v408_v59 = vsel %vm314_vm0, %v1689_v57, 0.0  ;;  %v366_v63 = vsel %vm314_vm0, %v1699_v61, 0.0  ;;  %v1709_v4 = vld [vmem:[%s1543_s26 + $0x108] sm:$0xff]  ;;  %v411_v6 = vsel %vm314_vm0, %v1706_v3, 0.0 }
  0x1b   : > { %v414_v7 = vsel %vm314_vm0, %v1709_v4, 0.0 }
  0x1d   : > { %328 = vadd.xlane.f32.xlu0 %v327_v14  ;;  %331 = vadd.xlane.f32.xlu1 %v330_v15 }
  0x21   : > { %376 = vadd.xlane.f32.xlu0 %v375_v18  ;;  %379 = vadd.xlane.f32.xlu1 %v378_v19 }
  0x25   : > { %334 = vadd.xlane.f32.xlu0 %v333_v22  ;;  %337 = vadd.xlane.f32.xlu1 %v336_v23 }
  0x29   : > { %382 = vadd.xlane.f32.xlu0 %v381_v26  ;;  %385 = vadd.xlane.f32.xlu1 %v384_v27 }
  0x2d   : > { %340 = vadd.xlane.f32.xlu0 %v339_v30  ;;  %343 = vadd.xlane.f32.xlu1 %v342_v31 }
  0x31   : > { %388 = vadd.xlane.f32.xlu0 %v387_v34  ;;  %391 = vadd.xlane.f32.xlu1 %v390_v35 }
  0x35   : > { %346 = vadd.xlane.f32.xlu0 %v345_v38  ;;  %349 = vadd.xlane.f32.xlu1 %v348_v39 }
  0x39   : > { %394 = vadd.xlane.f32.xlu0 %v393_v42  ;;  %397 = vadd.xlane.f32.xlu1 %v396_v43 }
  0x3d   : > { %352 = vadd.xlane.f32.xlu0 %v351_v46  ;;  %355 = vadd.xlane.f32.xlu1 %v354_v47 }
  0x41   : > { %400 = vadd.xlane.f32.xlu0 %v399_v50  ;;  %403 = vadd.xlane.f32.xlu1 %v402_v51 }
  0x45   : > { %358 = vadd.xlane.f32.xlu0 %v357_v54  ;;  %361 = vadd.xlane.f32.xlu1 %v360_v55 }
  0x49   : > { %406 = vadd.xlane.f32.xlu0 %v405_v58  ;;  %409 = vadd.xlane.f32.xlu1 %v408_v59 }
  0x4d   : > { %364 = vadd.xlane.f32.xlu0 %v363_v62  ;;  %367 = vadd.xlane.f32.xlu1 %v366_v63 }
  0x51   : > { %412 = vadd.xlane.f32.xlu0 %v411_v6  ;;  %415 = vadd.xlane.f32.xlu1 %v414_v7 }
  0x9a   : > { %v317_v10 = vpop.xlane.xlu0 %316  ;;  %v323_v11 = vpop.xlane.xlu1 %322 }
  0x9b   : > { %v418_v14 = vmul.f32 0.03125, %v317_v10  ;;  %v420_v15 = vmul.f32 0.03125, %v323_v11 }
  0x9d   : > { %v1716_v18 = vsub.f32 %v1546_v0, %v418_v14  ;;  %v1719_v19 = vsub.f32 %v1549_v1, %v420_v15 }
  0x9e   : > { %v320_v22 = vpop.xlane.xlu0 %319  ;;  %v326_v23 = vpop.xlane.xlu1 %325 }
  0x9f   : > { %v419_v26 = vmul.f32 0.03125, %v320_v22  ;;  %v421_v27 = vmul.f32 0.03125, %v326_v23  ;;  %v486_v30 = vmul.f32 %v1716_v18, %v1716_v18  ;;  %v488_v31 = vmul.f32 %v1719_v19, %v1719_v19 }
  0xa1   : > { %v1726_v34 = vsub.f32 %v1552_v2, %v419_v26  ;;  %v1729_v35 = vsub.f32 %v1559_v5, %v421_v27  ;;  %v520_v0 = vsel %vm314_vm0, %v486_v30, 0.0  ;;  %v526_v39 = vsel %vm314_vm0, %v488_v31, 0.0 }
  0xa2   : > { %521 = vadd.xlane.f32.xlu0 %v520_v0  ;;  %v371_v1 = vpop.xlane.xlu0 %370  ;;  %v374_v38 = vpop.xlane.xlu1 %373 }
  0xa3   : > { %v436_v42 = vmul.f32 0.03125, %v371_v1  ;;  %v437_v43 = vmul.f32 0.03125, %v374_v38  ;;  %v487_v46 = vmul.f32 %v1726_v34, %v1726_v34  ;;  %v489_v47 = vmul.f32 %v1729_v35, %v1729_v35 }
  0xa5   : > { %v1738_v2 = vsub.f32 %v1566_v8, %v436_v42  ;;  %v1741_v5 = vsub.f32 %v1569_v9, %v437_v43  ;;  %v523_v50 = vsel %vm314_vm0, %v487_v46, 0.0  ;;  %v529_v55 = vsel %vm314_vm0, %v489_v47, 0.0 }
  0xa6   : > { %527 = vadd.xlane.f32.xlu0 %v526_v39  ;;  %524 = vadd.xlane.f32.xlu1 %v523_v50  ;;  %v329_v51 = vpop.xlane.xlu0 %328  ;;  %v332_v54 = vpop.xlane.xlu1 %331 }
  0xa7   : > { %v422_v58 = vmul.f32 0.03125, %v329_v51  ;;  %v423_v59 = vmul.f32 0.03125, %v332_v54  ;;  %v504_v62 = vmul.f32 %v1738_v2, %v1738_v2  ;;  %v505_v8 = vmul.f32 %v1741_v5, %v1741_v5 }
  0xa9   : > { %v1750_v63 = vsub.f32 %v1576_v12, %v422_v58  ;;  %v1753_v9 = vsub.f32 %v1579_v13, %v423_v59  ;;  %v574_v6 = vsel %vm314_vm0, %v504_v62, 0.0  ;;  %v577_v11 = vsel %vm314_vm0, %v505_v8, 0.0 }
  0xaa   : > { %530 = vadd.xlane.f32.xlu1 %v529_v55  ;;  %575 = vadd.xlane.f32.xlu0 %v574_v6  ;;  %v377_v7 = vpop.xlane.xlu0 %376  ;;  %v380_v10 = vpop.xlane.xlu1 %379 }
  0xab   : > { %v438_v14 = vmul.f32 0.03125, %v377_v7  ;;  %v439_v15 = vmul.f32 0.03125, %v380_v10  ;;  %v490_v22 = vmul.f32 %v1750_v63, %v1750_v63  ;;  %v491_v12 = vmul.f32 %v1753_v9, %v1753_v9 }
  0xad   : > { %v1762_v23 = vsub.f32 %v1586_v16, %v438_v14  ;;  %v1765_v13 = vsub.f32 %v1589_v17, %v439_v15  ;;  %v532_v26 = vsel %vm314_vm0, %v490_v22, 0.0  ;;  %v535_v31 = vsel %vm314_vm0, %v491_v12, 0.0 }
  0xae   : > { %578 = vadd.xlane.f32.xlu1 %v577_v11  ;;  %533 = vadd.xlane.f32.xlu0 %v532_v26  ;;  %v335_v27 = vpop.xlane.xlu0 %334  ;;  %v338_v30 = vpop.xlane.xlu1 %337 }
  0xaf   : > { %v424_v0 = vmul.f32 0.03125, %v335_v27  ;;  %v425_v1 = vmul.f32 0.03125, %v338_v30  ;;  %v506_v38 = vmul.f32 %v1762_v23, %v1762_v23  ;;  %v507_v16 = vmul.f32 %v1765_v13, %v1765_v13 }
  0xb1   : > { %v1774_v39 = vsub.f32 %v1596_v20, %v424_v0  ;;  %v1777_v17 = vsub.f32 %v1599_v21, %v425_v1  ;;  %v580_v42 = vsel %vm314_vm0, %v506_v38, 0.0  ;;  %v583_v47 = vsel %vm314_vm0, %v507_v16, 0.0 }
  0xb2   : > { %536 = vadd.xlane.f32.xlu1 %v535_v31  ;;  %581 = vadd.xlane.f32.xlu0 %v580_v42  ;;  %v383_v43 = vpop.xlane.xlu0 %382  ;;  %v386_v46 = vpop.xlane.xlu1 %385 }
  0xb3   : > { %v440_v50 = vmul.f32 0.03125, %v383_v43  ;;  %v441_v51 = vmul.f32 0.03125, %v386_v46  ;;  %v492_v54 = vmul.f32 %v1774_v39, %v1774_v39  ;;  %v493_v20 = vmul.f32 %v1777_v17, %v1777_v17 }
  0xb5   : > { %v1786_v55 = vsub.f32 %v1606_v24, %v440_v50  ;;  %v1789_v21 = vsub.f32 %v1609_v25, %v441_v51  ;;  %v538_v58 = vsel %vm314_vm0, %v492_v54, 0.0  ;;  %v541_v8 = vsel %vm314_vm0, %v493_v20, 0.0 }
  0xb6   : > { %584 = vadd.xlane.f32.xlu1 %v583_v47  ;;  %539 = vadd.xlane.f32.xlu0 %v538_v58  ;;  %v341_v59 = vpop.xlane.xlu0 %340  ;;  %v344_v62 = vpop.xlane.xlu1 %343  ;;  %v1391_v58 = vld [vmem:[%s2218_s3 + $0x8] sm:$0xff]  }
  0xb7   : > { %v426_v6 = vmul.f32 0.03125, %v341_v59  ;;  %v427_v7 = vmul.f32 0.03125, %v344_v62  ;;  %v508_v10 = vmul.f32 %v1786_v55, %v1786_v55  ;;  %v509_v24 = vmul.f32 %v1789_v21, %v1789_v21 }
  0xb9   : > { %v1798_v11 = vsub.f32 %v1616_v28, %v426_v6  ;;  %v1801_v25 = vsub.f32 %v1619_v29, %v427_v7  ;;  %v586_v14 = vsel %vm314_vm0, %v508_v10, 0.0  ;;  %v589_v12 = vsel %vm314_vm0, %v509_v24, 0.0 }
  0xba   : > { %542 = vadd.xlane.f32.xlu1 %v541_v8  ;;  %587 = vadd.xlane.f32.xlu0 %v586_v14  ;;  %v389_v15 = vpop.xlane.xlu0 %388  ;;  %v392_v22 = vpop.xlane.xlu1 %391  ;;  %v1485_v8 = vmov 0.0  }
  0xbb   : > { %v442_v26 = vmul.f32 0.03125, %v389_v15  ;;  %v443_v27 = vmul.f32 0.03125, %v392_v22  ;;  %v494_v30 = vmul.f32 %v1798_v11, %v1798_v11  ;;  %v495_v28 = vmul.f32 %v1801_v25, %v1801_v25  ;;  %1289 = vmatprep.subr.bf16.mxu0 %v1485_v8  ;;  %1361 = vmatprep.subr.bf16.mxu1 %v1485_v8 }
  0xbc   : > { %1290 = vmatpush3.bf16.msra.mxu0 %v1391_v58  ;;  %1363 = vmatpush3.bf16.msra.mxu1 %v1391_v58 }
  0xbd   : > { %v1810_v31 = vsub.f32 %v1626_v32, %v442_v26  ;;  %v1813_v29 = vsub.f32 %v1629_v33, %v443_v27  ;;  %v544_v0 = vsel %vm314_vm0, %v494_v30, 0.0  ;;  %v547_v16 = vsel %vm314_vm0, %v495_v28, 0.0  ;;  %1291 = vmatprep.subr.bf16.mxu0 %v1485_v8  ;;  %1362 = vmatprep.subr.bf16.mxu1 %v1485_v8 }
  0xbe   : > { %590 = vadd.xlane.f32.xlu1 %v589_v12  ;;  %545 = vadd.xlane.f32.xlu0 %v544_v0  ;;  %v347_v1 = vpop.xlane.xlu0 %346  ;;  %v350_v38 = vpop.xlane.xlu1 %349 }
  0xbf   : > { %v428_v42 = vmul.f32 0.03125, %v347_v1  ;;  %v429_v43 = vmul.f32 0.03125, %v350_v38  ;;  %v510_v46 = vmul.f32 %v1810_v31, %v1810_v31  ;;  %v511_v32 = vmul.f32 %v1813_v29, %v1813_v29  ;;  %1293 = vmatprep.mubr.msk.bf16.mxu0 %vm1486_vm1, %v1485_v8  ;;  %1329 = vmatprep.mubr.msk.bf16.mxu1 %vm1486_vm1, %v1485_v8 }
  0xc1   : > { %v1822_v47 = vsub.f32 %v1636_v36, %v428_v42  ;;  %v1825_v33 = vsub.f32 %v1639_v37, %v429_v43  ;;  %v592_v50 = vsel %vm314_vm0, %v510_v46, 0.0  ;;  %v595_v20 = vsel %vm314_vm0, %v511_v32, 0.0 }
  0xc2   : > { %548 = vadd.xlane.f32.xlu1 %v547_v16  ;;  %593 = vadd.xlane.f32.xlu0 %v592_v50  ;;  %v395_v51 = vpop.xlane.xlu0 %394  ;;  %v398_v54 = vpop.xlane.xlu1 %397 }
  0xc3   : > { %v444_v59 = vmul.f32 0.03125, %v395_v51  ;;  %v445_v62 = vmul.f32 0.03125, %v398_v54  ;;  %v496_v36 = vmul.f32 %v1822_v47, %v1822_v47  ;;  %v497_v37 = vmul.f32 %v1825_v33, %v1825_v33 }
  0xc5   : > { %v1839_v6 = vsub.f32 %v1646_v40, %v444_v59  ;;  %v1842_v7 = vsub.f32 %v1649_v41, %v445_v62  ;;  %v550_v10 = vsel %vm314_vm0, %v496_v36, 0.0  ;;  %v553_v15 = vsel %vm314_vm0, %v497_v37, 0.0  ;;  %v1392_v40 = vld [vmem:[%s2218_s3] sm:$0xff]  }
  0xc6   : > { %596 = vadd.xlane.f32.xlu1 %v595_v20  ;;  %551 = vadd.xlane.f32.xlu0 %v550_v10  ;;  %v353_v24 = vpop.xlane.xlu0 %352  ;;  %v356_v14 = vpop.xlane.xlu1 %355 }
  0xc7   : > { %v430_v22 = vmul.f32 0.03125, %v353_v24  ;;  %v431_v12 = vmul.f32 0.03125, %v356_v14  ;;  %v512_v41 = vmul.f32 %v1839_v6, %v1839_v6  ;;  %v513_v26 = vmul.f32 %v1842_v7, %v1842_v7  ;;  %1292 = vmatpush3.bf16.msra.mxu0 %v1392_v40  ;;  %1364 = vmatpush3.bf16.msra.mxu1 %v1392_v40 }
  0xc9   : > { %v1856_v27 = vsub.f32 %v1656_v44, %v430_v22  ;;  %v1859_v30 = vsub.f32 %v1659_v45, %v431_v12  ;;  %v598_v28 = vsel %vm314_vm0, %v512_v41, 0.0  ;;  %v601_v38 = vsel %vm314_vm0, %v513_v26, 0.0 }
  0xca   : > { %554 = vadd.xlane.f32.xlu1 %v553_v15  ;;  %599 = vadd.xlane.f32.xlu0 %v598_v28  ;;  %v401_v0 = vpop.xlane.xlu0 %400  ;;  %v404_v1 = vpop.xlane.xlu1 %403 }
  0xcb   : > { %v446_v16 = vmul.f32 0.03125, %v401_v0  ;;  %v447_v42 = vmul.f32 0.03125, %v404_v1  ;;  %v498_v43 = vmul.f32 %v1856_v27, %v1856_v27  ;;  %v499_v44 = vmul.f32 %v1859_v30, %v1859_v30 }
  0xcd   : > { %v1872_v45 = vsub.f32 %v1666_v48, %v446_v16  ;;  %v1875_v46 = vsub.f32 %v1669_v49, %v447_v42  ;;  %v556_v32 = vsel %vm314_vm0, %v498_v43, 0.0  ;;  %v559_v54 = vsel %vm314_vm0, %v499_v44, 0.0 }
  0xce   : > { %602 = vadd.xlane.f32.xlu1 %v601_v38  ;;  %557 = vadd.xlane.f32.xlu0 %v556_v32  ;;  %v359_v50 = vpop.xlane.xlu0 %358  ;;  %v362_v51 = vpop.xlane.xlu1 %361 }
  0xcf   : > { %v432_v20 = vmul.f32 0.03125, %v359_v50  ;;  %v433_v58 = vmul.f32 0.03125, %v362_v51  ;;  %v514_v59 = vmul.f32 %v1872_v45, %v1872_v45  ;;  %v515_v48 = vmul.f32 %v1875_v46, %v1875_v46 }
  0xd1   : > { %v1884_v62 = vsub.f32 %v1676_v52, %v432_v20  ;;  %v1887_v49 = vsub.f32 %v1679_v53, %v433_v58  ;;  %v604_v36 = vsel %vm314_vm0, %v514_v59, 0.0  ;;  %v607_v24 = vsel %vm314_vm0, %v515_v48, 0.0 }
  0xd2   : > { %560 = vadd.xlane.f32.xlu1 %v559_v54  ;;  %605 = vadd.xlane.f32.xlu0 %v604_v36  ;;  %v407_v37 = vpop.xlane.xlu0 %406  ;;  %v410_v10 = vpop.xlane.xlu1 %409 }
  0xd3   : > { %v448_v14 = vmul.f32 0.03125, %v407_v37  ;;  %v449_v15 = vmul.f32 0.03125, %v410_v10  ;;  %v500_v40 = vmul.f32 %v1884_v62, %v1884_v62  ;;  %v501_v52 = vmul.f32 %v1887_v49, %v1887_v49 }
  0xd5   : > { %v1896_v22 = vsub.f32 %v1686_v56, %v448_v14  ;;  %v1899_v53 = vsub.f32 %v1689_v57, %v449_v15  ;;  %v562_v12 = vsel %vm314_vm0, %v500_v40, 0.0  ;;  %v565_v28 = vsel %vm314_vm0, %v501_v52, 0.0 }
  0xd6   : > { %608 = vadd.xlane.f32.xlu1 %v607_v24  ;;  %563 = vadd.xlane.f32.xlu0 %v562_v12  ;;  %v365_v41 = vpop.xlane.xlu0 %364  ;;  %v368_v26 = vpop.xlane.xlu1 %367 }
  0xd7   : > { %v434_v0 = vmul.f32 0.03125, %v365_v41  ;;  %v435_v1 = vmul.f32 0.03125, %v368_v26  ;;  %v516_v38 = vmul.f32 %v1896_v22, %v1896_v22  ;;  %v517_v56 = vmul.f32 %v1899_v53, %v1899_v53 }
  0xd9   : > { %v1908_v16 = vsub.f32 %v1696_v60, %v434_v0  ;;  %v1911_v57 = vsub.f32 %v1699_v61, %v435_v1  ;;  %v610_v42 = vsel %vm314_vm0, %v516_v38, 0.0  ;;  %v613_v32 = vsel %vm314_vm0, %v517_v56, 0.0 }
  0xda   : > { %566 = vadd.xlane.f32.xlu1 %v565_v28  ;;  %611 = vadd.xlane.f32.xlu0 %v610_v42  ;;  %v413_v43 = vpop.xlane.xlu0 %412  ;;  %v416_v44 = vpop.xlane.xlu1 %415 }
  0xdb   : > { %v450_v50 = vmul.f32 0.03125, %v413_v43  ;;  %v451_v51 = vmul.f32 0.03125, %v416_v44  ;;  %v502_v54 = vmul.f32 %v1908_v16, %v1908_v16  ;;  %v503_v60 = vmul.f32 %v1911_v57, %v1911_v57 }
  0xdd   : > { %v1920_v20 = vsub.f32 %v1706_v3, %v450_v50  ;;  %v1923_v61 = vsub.f32 %v1709_v4, %v451_v51  ;;  %v568_v58 = vsel %vm314_vm0, %v502_v54, 0.0  ;;  %v571_v59 = vsel %vm314_vm0, %v503_v60, 0.0 }
  0xde   : > { %614 = vadd.xlane.f32.xlu1 %v613_v32  ;;  %569 = vadd.xlane.f32.xlu0 %v568_v58 }
  0xdf   : > { %v518_v48 = vmul.f32 %v1920_v20, %v1920_v20  ;;  %v519_v36 = vmul.f32 %v1923_v61, %v1923_v61 }
  0xe1   : > { %v616_v37 = vsel %vm314_vm0, %v518_v48, 0.0  ;;  %v619_v3 = vsel %vm314_vm0, %v519_v36, 0.0 }
  0xe2   : > { %572 = vadd.xlane.f32.xlu1 %v571_v59  ;;  %617 = vadd.xlane.f32.xlu0 %v616_v37 }
  0xe6   : > { %620 = vadd.xlane.f32.xlu1 %v619_v3 }
 0x12b   : > { %v522_v4 = vpop.xlane.xlu0 %521 }
 0x12c   : > { %v622_v10 = vmul.f32 0.03125, %v522_v4  ;;  %v1937_v4 = vld [vmem:[%s2216_s1] ss:$0 sm:$0xff] }
 0x12e   : > { %v656_v24 = vadd.f32 1e-05, %v622_v10 }
 0x12f   : > { %v525_v14 = vpop.xlane.xlu1 %524  ;;  %v528_v15 = vpop.xlane.xlu0 %527 }
 0x130   : > { %1393 = vrsqrt.f32 %v656_v24  ;;  %v623_v40 = vmul.f32 0.03125, %v525_v14  ;;  %v624_v52 = vmul.f32 0.03125, %v528_v15 }
 0x132   : > { %v657_v12 = vadd.f32 1e-05, %v623_v40  ;;  %v658_v41 = vadd.f32 1e-05, %v624_v52 }
 0x133   : > { %v531_v26 = vpop.xlane.xlu1 %530  ;;  %v576_v28 = vpop.xlane.xlu0 %575 }
 0x134   : > { %1395 = vrsqrt.f32 %v657_v12  ;;  %v625_v0 = vmul.f32 0.03125, %v531_v26  ;;  %v640_v1 = vmul.f32 0.03125, %v576_v28 }
 0x135   : > { %1397 = vrsqrt.f32 %v658_v41 }
 0x136   : > { %v659_v38 = vadd.f32 1e-05, %v625_v0  ;;  %v674_v56 = vadd.f32 1e-05, %v640_v1 }
 0x137   : > { %v579_v42 = vpop.xlane.xlu1 %578  ;;  %v534_v43 = vpop.xlane.xlu0 %533 }
 0x138   : > { %1399 = vrsqrt.f32 %v659_v38  ;;  %v641_v44 = vmul.f32 0.03125, %v579_v42  ;;  %v626_v32 = vmul.f32 0.03125, %v534_v43 }
 0x139   : > { %1401 = vrsqrt.f32 %v674_v56 }
 0x13a   : > { %v675_v50 = vadd.f32 1e-05, %v641_v44  ;;  %v660_v51 = vadd.f32 1e-05, %v626_v32 }
 0x13b   : > { %v537_v54 = vpop.xlane.xlu1 %536  ;;  %v582_v60 = vpop.xlane.xlu0 %581 }
 0x13c   : > { %1403 = vrsqrt.f32 %v675_v50  ;;  %v627_v58 = vmul.f32 0.03125, %v537_v54  ;;  %v642_v59 = vmul.f32 0.03125, %v582_v60 }
 0x13d   : > { %v1394_v48 = vpop.eup %1393  ;;  %1405 = vrsqrt.f32 %v660_v51 }
 0x13e   : > { %v661_v36 = vadd.f32 1e-05, %v627_v58  ;;  %v676_v37 = vadd.f32 1e-05, %v642_v59  ;;  %v724_v3 = vmul.f32 %v1394_v48, %v1716_v18  ;;  %v1944_v18 = vld [vmem:[%s2217_s2] ss:$0 sm:$0xff] }
 0x13f   : > { %v585_v10 = vpop.xlane.xlu1 %584  ;;  %v540_v24 = vpop.xlane.xlu0 %539 }
 0x140   : > { %1407 = vrsqrt.f32 %v661_v36  ;;  %v643_v14 = vmul.f32 0.03125, %v585_v10  ;;  %v628_v15 = vmul.f32 0.03125, %v540_v24  ;;  %v765_v52 = vmul.f32 %v1937_v4, %v724_v3 }
 0x141   : > { %v1396_v40 = vpop.eup %1395  ;;  %1409 = vrsqrt.f32 %v676_v37 }
 0x142   : > { %v1398_v12 = vpop.eup %1397  ;;  %v677_v41 = vadd.f32 1e-05, %v643_v14  ;;  %v662_v26 = vadd.f32 1e-05, %v628_v15  ;;  %v725_v28 = vmul.f32 %v1396_v40, %v1726_v34  ;;  %v806_v44 = vadd.f32 %v1944_v18, %v765_v52 }
 0x143   : > { %v543_v0 = vpop.xlane.xlu1 %542  ;;  %v588_v1 = vpop.xlane.xlu0 %587  ;;  %v726_v32 = vmul.f32 %v1398_v12, %v1719_v19 }
 0x144   : > { %1411 = vrsqrt.f32 %v677_v41  ;;  %v629_v38 = vmul.f32 0.03125, %v543_v0  ;;  %v644_v56 = vmul.f32 0.03125, %v588_v1  ;;  %v766_v42 = vmul.f32 %v1937_v4, %v725_v28 }
 0x145   : > { %v1400_v43 = vpop.eup %1399  ;;  %1413 = vrsqrt.f32 %v662_v26  ;;  %v767_v24 = vmul.f32 %v1937_v4, %v726_v32 }
 0x146   : > { %v1402_v50 = vpop.eup %1401  ;;  %v663_v34 = vadd.f32 1e-05, %v629_v38  ;;  %v678_v51 = vadd.f32 1e-05, %v644_v56  ;;  %v807_v54 = vadd.f32 %v1944_v18, %v766_v42  ;;  %v727_v60 = vmul.f32 %v1400_v43, %v1729_v35 }
 0x147   : > { %v591_v58 = vpop.xlane.xlu1 %590  ;;  %v546_v59 = vpop.xlane.xlu0 %545  ;;  %v742_v48 = vmul.f32 %v1402_v50, %v1738_v2  ;;  %v808_v38 = vadd.f32 %v1944_v18, %v767_v24 }
 0x148   : > { %1415 = vrsqrt.f32 %v663_v34  ;;  %v645_v36 = vmul.f32 0.03125, %v591_v58  ;;  %v630_v37 = vmul.f32 0.03125, %v546_v59  ;;  %v840_v3 = vpack.c.bf16 %v807_v54, %v806_v44 }
 0x149   : > { %v1404_v10 = vpop.eup %1403  ;;  %1417 = vrsqrt.f32 %v678_v51  ;;  %v768_v19 = vmul.f32 %v1937_v4, %v727_v60  ;;  %v783_v14 = vmul.f32 %v1937_v4, %v742_v48 }
 0x14a   : > { %v1406_v15 = vpop.eup %1405  ;;  %v679_v40 = vadd.f32 1e-05, %v645_v36  ;;  %v664_v52 = vadd.f32 1e-05, %v630_v37  ;;  %1294 = vmatmul.mubr.msk.bf16.vlgmr.msra.gmra.mxu0 %vm314_vm0, %v840_v3  ;;  %v743_v35 = vmul.f32 %v1404_v10, %v1741_v5 }
 0x14b   : > { %v549_v2 = vpop.xlane.xlu1 %548  ;;  %v594_v12 = vpop.xlane.xlu0 %593  ;;  %1297 = vmatprep.mubr.msk.bf16.mxu0 %vm1486_vm1, %v1485_v8  ;;  %v809_v41 = vadd.f32 %v1944_v18, %v768_v19  ;;  %v824_v56 = vadd.f32 %v1944_v18, %v783_v14  ;;  %v728_v5 = vmul.f32 %v1406_v15, %v1750_v63 }
 0x14c   : > { %1419 = vrsqrt.f32 %v679_v40  ;;  %v631_v26 = vmul.f32 0.03125, %v549_v2  ;;  %v646_v28 = vmul.f32 0.03125, %v594_v12  ;;  %v784_v0 = vmul.f32 %v1937_v4, %v743_v35 }
 0x14d   : > { %v1408_v1 = vpop.eup %1407  ;;  %1421 = vrsqrt.f32 %v664_v52  ;;  %v841_v54 = vpack.c.bf16 %v809_v41, %v808_v38  ;;  %v769_v63 = vmul.f32 %v1937_v4, %v728_v5 }
 0x14e   : > { %v1410_v42 = vpop.eup %1409  ;;  %v665_v43 = vadd.f32 1e-05, %v631_v26  ;;  %v680_v44 = vadd.f32 1e-05, %v646_v28  ;;  %v825_v32 = vadd.f32 %v1944_v18, %v784_v0  ;;  %v729_v50 = vmul.f32 %v1408_v1, %v1753_v9 }
 0x14f   : > { %v597_v34 = vpop.xlane.xlu1 %596  ;;  %v552_v51 = vpop.xlane.xlu0 %551  ;;  %v744_v60 = vmul.f32 %v1410_v42, %v1762_v23  ;;  %v810_v12 = vadd.f32 %v1944_v18, %v769_v63 }
 0x150   : > { %1423 = vrsqrt.f32 %v665_v43  ;;  %v647_v58 = vmul.f32 0.03125, %v597_v34  ;;  %v632_v59 = vmul.f32 0.03125, %v552_v51  ;;  %v849_v48 = vpack.c.bf16 %v825_v32, %v824_v56 }
 0x151   : > { %v1412_v36 = vpop.eup %1411  ;;  %1425 = vrsqrt.f32 %v680_v44  ;;  %v770_v37 = vmul.f32 %v1937_v4, %v729_v50  ;;  %v785_v3 = vmul.f32 %v1937_v4, %v744_v60 }
 0x152   : > { %v1414_v10 = vpop.eup %1413  ;;  %v681_v24 = vadd.f32 1e-05, %v647_v58  ;;  %v666_v9 = vadd.f32 1e-05, %v632_v59  ;;  %1298 = vmatmul.mubr.msk.bf16.gmra.mxu0 %vm314_vm0, %v841_v54  ;;  %1330 = vmatmul.mubr.msk.bf16.vlgmr.msra.gmra.mxu1 %vm314_vm0, %v849_v48  ;;  %v745_v23 = vmul.f32 %v1412_v36, %v1765_v13 }
 0x153   : > { %v555_v19 = vpop.xlane.xlu1 %554  ;;  %v600_v14 = vpop.xlane.xlu0 %599  ;;  %1301 = vmatprep.mubr.msk.bf16.mxu0 %vm1486_vm1, %v1485_v8  ;;  %1333 = vmatprep.mubr.msk.bf16.mxu1 %vm1486_vm1, %v1485_v8  ;;  %v811_v15 = vadd.f32 %v1944_v18, %v770_v37  ;;  %v826_v13 = vadd.f32 %v1944_v18, %v785_v3  ;;  %v730_v41 = vmul.f32 %v1414_v10, %v1774_v39 }
 0x154   : > { %1427 = vrsqrt.f32 %v681_v24  ;;  %v633_v40 = vmul.f32 0.03125, %v555_v19  ;;  %v648_v52 = vmul.f32 0.03125, %v600_v14  ;;  %v786_v35 = vmul.f32 %v1937_v4, %v745_v23 }
 0x155   : > { %v1416_v2 = vpop.eup %1415  ;;  %1429 = vrsqrt.f32 %v666_v9  ;;  %v842_v42 = vpack.c.bf16 %v811_v15, %v810_v12  ;;  %v771_v39 = vmul.f32 %v1937_v4, %v730_v41 }
 0x156   : > { %v1418_v26 = vpop.eup %1417  ;;  %v667_v28 = vadd.f32 1e-05, %v633_v40  ;;  %v682_v0 = vadd.f32 1e-05, %v648_v52  ;;  %v827_v1 = vadd.f32 %v1944_v18, %v786_v35  ;;  %v731_v38 = vmul.f32 %v1416_v2, %v1777_v17 }
 0x157   : > { %v603_v56 = vpop.xlane.xlu1 %602  ;;  %v558_v5 = vpop.xlane.xlu0 %557  ;;  %v746_v43 = vmul.f32 %v1418_v26, %v1786_v55  ;;  %v812_v24 = vadd.f32 %v1944_v18, %v771_v39 }
 0x158   : > { %1431 = vrsqrt.f32 %v667_v28  ;;  %v649_v44 = vmul.f32 0.03125, %v603_v56  ;;  %v634_v32 = vmul.f32 0.03125, %v558_v5  ;;  %v850_v50 = vpack.c.bf16 %v827_v1, %v826_v13 }
 0x159   : > { %v1420_v34 = vpop.eup %1419  ;;  %1433 = vrsqrt.f32 %v682_v0  ;;  %v772_v51 = vmul.f32 %v1937_v4, %v731_v38  ;;  %v787_v54 = vmul.f32 %v1937_v4, %v746_v43 }
 0x15a   : > { %v1422_v60 = vpop.eup %1421  ;;  %v683_v58 = vadd.f32 1e-05, %v649_v44  ;;  %v668_v17 = vadd.f32 1e-05, %v634_v32  ;;  %1302 = vmatmul.mubr.msk.bf16.gmra.mxu0 %vm314_vm0, %v842_v42  ;;  %1334 = vmatmul.mubr.msk.bf16.gmra.mxu1 %vm314_vm0, %v850_v50  ;;  %v747_v55 = vmul.f32 %v1420_v34, %v1789_v21 }
 0x15b   : > { %v561_v59 = vpop.xlane.xlu1 %560  ;;  %v606_v48 = vpop.xlane.xlu0 %605  ;;  %1305 = vmatprep.mubr.msk.bf16.mxu0 %vm1486_vm1, %v1485_v8  ;;  %1337 = vmatprep.mubr.msk.bf16.mxu1 %vm1486_vm1, %v1485_v8  ;;  %v813_v36 = vadd.f32 %v1944_v18, %v772_v51  ;;  %v828_v21 = vadd.f32 %v1944_v18, %v787_v54  ;;  %v732_v9 = vmul.f32 %v1422_v60, %v1798_v11 }
 0x15c   : > { %1435 = vrsqrt.f32 %v683_v58  ;;  %v635_v63 = vmul.f32 0.03125, %v561_v59  ;;  %v650_v37 = vmul.f32 0.03125, %v606_v48  ;;  %v788_v3 = vmul.f32 %v1937_v4, %v747_v55 }
 0x15d   : > { %v1424_v10 = vpop.eup %1423  ;;  %1437 = vrsqrt.f32 %v668_v17  ;;  %v843_v2 = vpack.c.bf16 %v813_v36, %v812_v24  ;;  %v773_v11 = vmul.f32 %v1937_v4, %v732_v9 }
 0x15e   : > { %v1426_v23 = vpop.eup %1425  ;;  %v669_v19 = vadd.f32 1e-05, %v635_v63  ;;  %v684_v14 = vadd.f32 1e-05, %v650_v37  ;;  %v829_v15 = vadd.f32 %v1944_v18, %v788_v3  ;;  %v733_v40 = vmul.f32 %v1424_v10, %v1801_v25 }
 0x15f   : > { %v609_v52 = vpop.xlane.xlu1 %608  ;;  %v564_v35 = vpop.xlane.xlu0 %563  ;;  %v748_v12 = vmul.f32 %v1426_v23, %v1810_v31  ;;  %v814_v39 = vadd.f32 %v1944_v18, %v773_v11 }
 0x160   : > { %1439 = vrsqrt.f32 %v669_v19  ;;  %v651_v13 = vmul.f32 0.03125, %v609_v52  ;;  %v636_v41 = vmul.f32 0.03125, %v564_v35  ;;  %v851_v26 = vpack.c.bf16 %v829_v15, %v828_v21 }
 0x161   : > { %v1428_v28 = vpop.eup %1427  ;;  %1441 = vrsqrt.f32 %v684_v14  ;;  %v774_v0 = vmul.f32 %v1937_v4, %v733_v40  ;;  %v789_v1 = vmul.f32 %v1937_v4, %v748_v12 }
 0x162   : > { %v1430_v38 = vpop.eup %1429  ;;  %v685_v56 = vadd.f32 1e-05, %v651_v13  ;;  %v670_v25 = vadd.f32 1e-05, %v636_v41  ;;  %1306 = vmatmul.mubr.msk.bf16.gmra.mxu0 %vm314_vm0, %v843_v2  ;;  %1338 = vmatmul.mubr.msk.bf16.gmra.mxu1 %vm314_vm0, %v851_v26  ;;  %v749_v31 = vmul.f32 %v1428_v28, %v1813_v29 }
 0x163   : > { %v567_v5 = vpop.xlane.xlu1 %566  ;;  %v612_v42 = vpop.xlane.xlu0 %611  ;;  %1309 = vmatprep.mubr.msk.bf16.mxu0 %vm1486_vm1, %v1485_v8  ;;  %1341 = vmatprep.mubr.msk.bf16.mxu1 %vm1486_vm1, %v1485_v8  ;;  %v815_v43 = vadd.f32 %v1944_v18, %v774_v0  ;;  %v830_v29 = vadd.f32 %v1944_v18, %v789_v1  ;;  %v734_v51 = vmul.f32 %v1430_v38, %v1822_v47 }
 0x164   : > { %1443 = vrsqrt.f32 %v685_v56  ;;  %v637_v44 = vmul.f32 0.03125, %v567_v5  ;;  %v652_v32 = vmul.f32 0.03125, %v612_v42  ;;  %v790_v50 = vmul.f32 %v1937_v4, %v749_v31 }
 0x165   : > { %v1432_v34 = vpop.eup %1431  ;;  %1445 = vrsqrt.f32 %v670_v25  ;;  %v844_v36 = vpack.c.bf16 %v815_v43, %v814_v39  ;;  %v775_v47 = vmul.f32 %v1937_v4, %v734_v51 }
 0x166   : > { %v1434_v54 = vpop.eup %1433  ;;  %v671_v60 = vadd.f32 1e-05, %v637_v44  ;;  %v686_v58 = vadd.f32 1e-05, %v652_v32  ;;  %v831_v17 = vadd.f32 %v1944_v18, %v790_v50  ;;  %v735_v55 = vmul.f32 %v1432_v34, %v1825_v33 }
 0x167   : > { %v615_v59 = vpop.xlane.xlu1 %614  ;;  %v570_v48 = vpop.xlane.xlu0 %569  ;;  %v750_v63 = vmul.f32 %v1434_v54, %v1839_v6  ;;  %v816_v13 = vadd.f32 %v1944_v18, %v775_v47 }
 0x168   : > { %1447 = vrsqrt.f32 %v671_v60  ;;  %v653_v37 = vmul.f32 0.03125, %v615_v59  ;;  %v638_v3 = vmul.f32 0.03125, %v570_v48  ;;  %v852_v10 = vpack.c.bf16 %v831_v17, %v830_v29 }
 0x169   : > { %v1436_v24 = vpop.eup %1435  ;;  %1449 = vrsqrt.f32 %v686_v58  ;;  %v776_v21 = vmul.f32 %v1937_v4, %v735_v55  ;;  %v791_v9 = vmul.f32 %v1937_v4, %v750_v63 }
 0x16a   : > { %v1438_v23 = vpop.eup %1437  ;;  %v687_v19 = vadd.f32 1e-05, %v653_v37  ;;  %v672_v33 = vadd.f32 1e-05, %v638_v3  ;;  %1310 = vmatmul.mubr.msk.bf16.gmra.mxu0 %vm314_vm0, %v844_v36  ;;  %1342 = vmatmul.mubr.msk.bf16.gmra.mxu1 %vm314_vm0, %v852_v10  ;;  %v751_v6 = vmul.f32 %v1436_v24, %v1842_v7 }
 0x16b   : > { %v573_v14 = vpop.xlane.xlu1 %572  ;;  %v618_v15 = vpop.xlane.xlu0 %617  ;;  %1313 = vmatprep.mubr.msk.bf16.mxu0 %vm1486_vm1, %v1485_v8  ;;  %1345 = vmatprep.mubr.msk.bf16.mxu1 %vm1486_vm1, %v1485_v8  ;;  %v817_v40 = vadd.f32 %v1944_v18, %v776_v21  ;;  %v832_v7 = vadd.f32 %v1944_v18, %v791_v9  ;;  %v736_v41 = vmul.f32 %v1438_v23, %v1856_v27 }
 0x16c   : > { %1451 = vrsqrt.f32 %v687_v19  ;;  %v639_v52 = vmul.f32 0.03125, %v573_v14  ;;  %v654_v35 = vmul.f32 0.03125, %v618_v15  ;;  %v792_v2 = vmul.f32 %v1937_v4, %v751_v6 }
 0x16d   : > { %v1440_v12 = vpop.eup %1439  ;;  %1453 = vrsqrt.f32 %v672_v33  ;;  %v845_v56 = vpack.c.bf16 %v817_v40, %v816_v13  ;;  %v777_v27 = vmul.f32 %v1937_v4, %v736_v41 }
 0x16e   : > { %v1442_v26 = vpop.eup %1441  ;;  %v673_v28 = vadd.f32 1e-05, %v639_v52  ;;  %v688_v11 = vadd.f32 1e-05, %v654_v35  ;;  %v833_v0 = vadd.f32 %v1944_v18, %v792_v2  ;;  %v737_v1 = vmul.f32 %v1440_v12, %v1859_v30 }
 0x16f   : > { %v621_v38 = vpop.xlane.xlu1 %620  ;;  %v752_v25 = vmul.f32 %v1442_v26, %v1872_v45  ;;  %v818_v29 = vadd.f32 %v1944_v18, %v777_v27 }
 0x170   : > { %1455 = vrsqrt.f32 %v673_v28  ;;  %v655_v31 = vmul.f32 0.03125, %v621_v38  ;;  %v853_v5 = vpack.c.bf16 %v833_v0, %v832_v7  ;;  %v778_v42 = vmul.f32 %v1937_v4, %v737_v1 }
 0x171   : > { %v1444_v43 = vpop.eup %1443  ;;  %1457 = vrsqrt.f32 %v688_v11  ;;  %v793_v50 = vmul.f32 %v1937_v4, %v752_v25 }
 0x172   : > { %v1446_v44 = vpop.eup %1445  ;;  %v689_v32 = vadd.f32 1e-05, %v655_v31  ;;  %1314 = vmatmul.mubr.msk.bf16.gmra.mxu0 %vm314_vm0, %v845_v56  ;;  %1346 = vmatmul.mubr.msk.bf16.gmra.mxu1 %vm314_vm0, %v853_v5  ;;  %v753_v30 = vmul.f32 %v1444_v43, %v1875_v46  ;;  %v819_v45 = vadd.f32 %v1944_v18, %v778_v42 }
 0x173   : > { %1317 = vmatprep.mubr.msk.bf16.mxu0 %vm1486_vm1, %v1485_v8  ;;  %1349 = vmatprep.mubr.msk.bf16.mxu1 %vm1486_vm1, %v1485_v8  ;;  %v834_v54 = vadd.f32 %v1944_v18, %v793_v50  ;;  %v738_v60 = vmul.f32 %v1446_v44, %v1884_v62 }
 0x174   : > { %1459 = vrsqrt.f32 %v689_v32  ;;  %v794_v34 = vmul.f32 %v1937_v4, %v753_v30  ;;  %v846_v55 = vpack.c.bf16 %v819_v45, %v818_v29 }
 0x175   : > { %v1448_v39 = vpop.eup %1447  ;;  %v779_v37 = vmul.f32 %v1937_v4, %v738_v60 }
 0x176   : > { %v1450_v51 = vpop.eup %1449  ;;  %v835_v46 = vadd.f32 %v1944_v18, %v794_v34  ;;  %v739_v58 = vmul.f32 %v1448_v39, %v1887_v49 }
 0x177   : > { %v754_v17 = vmul.f32 %v1450_v51, %v1896_v22 }
 0x178   : > { %v854_v59 = vpack.c.bf16 %v835_v46, %v834_v54  ;;  %v780_v48 = vmul.f32 %v1937_v4, %v739_v58 }
 0x179   : > { %v1452_v36 = vpop.eup %1451  ;;  %v795_v62 = vmul.f32 %v1937_v4, %v754_v17 }
 0x17a   : > { %v1454_v63 = vpop.eup %1453  ;;  %1318 = vmatmul.mubr.msk.bf16.gmra.mxu0 %vm314_vm0, %v846_v55  ;;  %1350 = vmatmul.mubr.msk.bf16.gmra.mxu1 %vm314_vm0, %v854_v59  ;;  %v755_v3 = vmul.f32 %v1452_v36, %v1899_v53  ;;  %v821_v22 = vadd.f32 %v1944_v18, %v780_v48  ;;  %v820_v53 = vadd.f32 %v1944_v18, %v779_v37 }
 0x17b   : > { %1321 = vmatprep.mubr.msk.bf16.mxu0 %vm1486_vm1, %v1485_v8  ;;  %1353 = vmatprep.mubr.msk.bf16.mxu1 %vm1486_vm1, %v1485_v8  ;;  %v740_v49 = vmul.f32 %v1454_v63, %v1908_v16  ;;  %v836_v9 = vadd.f32 %v1944_v18, %v795_v62 }
 0x17c   : > { %v796_v10 = vmul.f32 %v1937_v4, %v755_v3  ;;  %v847_v6 = vpack.c.bf16 %v821_v22, %v820_v53 }
 0x17d   : > { %v1456_v24 = vpop.eup %1455  ;;  %v781_v47 = vmul.f32 %v1937_v4, %v740_v49 }
 0x17e   : > { %v1458_v21 = vpop.eup %1457  ;;  %v837_v23 = vadd.f32 %v1944_v18, %v796_v10  ;;  %v741_v19 = vmul.f32 %v1456_v24, %v1911_v57 }
 0x17f   : > { %v822_v33 = vadd.f32 %v1944_v18, %v781_v47  ;;  %v756_v16 = vmul.f32 %v1458_v21, %v1920_v20 }
 0x180   : > { %v855_v14 = vpack.c.bf16 %v837_v23, %v836_v9  ;;  %v782_v15 = vmul.f32 %v1937_v4, %v741_v19 }
 0x181   : > { %v1460_v40 = vpop.eup %1459  ;;  %v797_v52 = vmul.f32 %v1937_v4, %v756_v16 }
 0x182   : > { %1322 = vmatmul.mubr.msk.bf16.gmra.mxu0 %vm314_vm0, %v847_v6  ;;  %1354 = vmatmul.mubr.msk.bf16.gmra.mxu1 %vm314_vm0, %v855_v14  ;;  %v823_v35 = vadd.f32 %v1944_v18, %v782_v15  ;;  %v757_v57 = vmul.f32 %v1460_v40, %v1923_v61  ;;  %v2095_v61 = vld [vmem:[%s2219_s4] ss:$0 sm:$0xff] }
 0x183   : > { %1325 = vmatprep.mubr.msk.bf16.mxu0 %vm1486_vm1, %v1485_v8  ;;  %1357 = vmatprep.mubr.msk.bf16.mxu1 %vm1486_vm1, %v1485_v8  ;;  %v838_v20 = vadd.f32 %v1944_v18, %v797_v52 }
 0x184   : > { %v848_v2 = vpack.c.bf16 %v823_v35, %v822_v33  ;;  %v798_v12 = vmul.f32 %v1937_v4, %v757_v57 }
 0x186   : > { %v839_v13 = vadd.f32 %v1944_v18, %v798_v12 }
 0x188   : > { %v856_v7 = vpack.c.bf16 %v839_v13, %v838_v20 }
 0x18a   : > { %1326 = vmatmul.mubr.msk.bf16.gmra.mxu0 %vm314_vm0, %v848_v2  ;;  %1358 = vmatmul.mubr.msk.bf16.gmra.mxu1 %vm314_vm0, %v856_v7 }
 0x20a   : > { %v965_v8 = vpop.f32.mrf.mxu0 }
 0x20b   : > { %v966_v4 = vadd.f32 %v2095_v61, %v965_v8 }
 0x20c   : > { %v1295_v18 = vpop.f32.mrf.mxu0 }
 0x20d   : > { %1101 = vst.msk [vmem:[%s2102_s14] sm:$0xff] %vm1100_vm2, %v966_v4 }
 0x20e   : > { %v968_v41 = vpop.f32.mrf.mxu0 }
 0x20f   : > { %v969_v26 = vadd.f32 %v2095_v61, %v968_v41 }
 0x210   : > { %v1296_v28 = vpop.f32.mrf.mxu0 }
 0x211   : > { %1102 = vst.msk [vmem:[%s2102_s14 + $0x8] sm:$0xff] %vm1100_vm2, %v969_v26 }
 0x212   : > { %v973_v11 = vpop.f32.mrf.mxu0  ;;  %v1037_v0 = vpop.f32.mrf.mxu1 }
 0x213   : > { %v974_v1 = vadd.f32 %v2095_v61, %v973_v11  ;;  %v1038_v38 = vadd.f32 %v2095_v61, %v1037_v0 }
 0x214   : > { %v1299_v56 = vpop.f32.mrf.mxu0  ;;  %v1331_v25 = vpop.f32.mrf.mxu1 }
 0x215   : > { %1103 = vst.msk [vmem:[%s2102_s14 + $0x10] sm:$0xff] %vm1100_vm2, %v974_v1  ;;  %1119 = vst.msk [vmem:[%s2102_s14 + $0x90] sm:$0xff] %vm1100_vm2, %v1038_v38 }
 0x216   : > { %v976_v31 = vpop.f32.mrf.mxu0  ;;  %v1040_v5 = vpop.f32.mrf.mxu1 }
 0x217   : > { %v977_v42 = vadd.f32 %v2095_v61, %v976_v31  ;;  %v1041_v43 = vadd.f32 %v2095_v61, %v1040_v5 }
 0x218   : > { %v1300_v27 = vpop.f32.mrf.mxu0  ;;  %v1332_v44 = vpop.f32.mrf.mxu1 }
 0x219   : > { %1104 = vst.msk [vmem:[%s2102_s14 + $0x18] sm:$0xff] %vm1100_vm2, %v977_v42  ;;  %1120 = vst.msk [vmem:[%s2102_s14 + $0x98] sm:$0xff] %vm1100_vm2, %v1041_v43 }
 0x21a   : > { %v981_v32 = vpop.f32.mrf.mxu0  ;;  %v1045_v30 = vpop.f32.mrf.mxu1 }
 0x21b   : > { %v982_v50 = vadd.f32 %v2095_v61, %v981_v32  ;;  %v1046_v45 = vadd.f32 %v2095_v61, %v1045_v30 }
 0x21c   : > { %v1303_v34 = vpop.f32.mrf.mxu0  ;;  %v1335_v39 = vpop.f32.mrf.mxu1 }
 0x21d   : > { %1105 = vst.msk [vmem:[%s2102_s14 + $0x20] sm:$0xff] %vm1100_vm2, %v982_v50  ;;  %1121 = vst.msk [vmem:[%s2102_s14 + $0xa0] sm:$0xff] %vm1100_vm2, %v1046_v45 }
 0x21e   : > { %v984_v29 = vpop.f32.mrf.mxu0  ;;  %v1048_v51 = vpop.f32.mrf.mxu1 }
 0x21f   : > { %v985_v54 = vadd.f32 %v2095_v61, %v984_v29  ;;  %v1049_v46 = vadd.f32 %v2095_v61, %v1048_v51 }
 0x220   : > { %v1304_v60 = vpop.f32.mrf.mxu0  ;;  %v1336_v58 = vpop.f32.mrf.mxu1 }
 0x221   : > { %1106 = vst.msk [vmem:[%s2102_s14 + $0x28] sm:$0xff] %vm1100_vm2, %v985_v54  ;;  %1122 = vst.msk [vmem:[%s2102_s14 + $0xa8] sm:$0xff] %vm1100_vm2, %v1049_v46 }
 0x222   : > { %v989_v17 = vpop.f32.mrf.mxu0  ;;  %v1053_v55 = vpop.f32.mrf.mxu1 }
 0x223   : > { %v990_v59 = vadd.f32 %v2095_v61, %v989_v17  ;;  %v1054_v48 = vadd.f32 %v2095_v61, %v1053_v55 }
 0x224   : > { %v1307_v36 = vpop.f32.mrf.mxu0  ;;  %v1339_v63 = vpop.f32.mrf.mxu1 }
 0x225   : > { %1107 = vst.msk [vmem:[%s2102_s14 + $0x30] sm:$0xff] %vm1100_vm2, %v990_v59  ;;  %1123 = vst.msk [vmem:[%s2102_s14 + $0xb0] sm:$0xff] %vm1100_vm2, %v1054_v48 }
 0x226   : > { %v992_v37 = vpop.f32.mrf.mxu0  ;;  %v1056_v3 = vpop.f32.mrf.mxu1 }
 0x227   : > { %v993_v62 = vadd.f32 %v2095_v61, %v992_v37  ;;  %v1057_v49 = vadd.f32 %v2095_v61, %v1056_v3 }
 0x228   : > { %v1308_v22 = vpop.f32.mrf.mxu0  ;;  %v1340_v10 = vpop.f32.mrf.mxu1 }
 0x229   : > { %1108 = vst.msk [vmem:[%s2102_s14 + $0x38] sm:$0xff] %vm1100_vm2, %v993_v62  ;;  %1124 = vst.msk [vmem:[%s2102_s14 + $0xb8] sm:$0xff] %vm1100_vm2, %v1057_v49 }
 0x22a   : > { %v997_v24 = vpop.f32.mrf.mxu0  ;;  %v1061_v47 = vpop.f32.mrf.mxu1 }
 0x22b   : > { %v998_v21 = vadd.f32 %v2095_v61, %v997_v24  ;;  %v1062_v53 = vadd.f32 %v2095_v61, %v1061_v47 }
 0x22c   : > { %v1311_v9 = vpop.f32.mrf.mxu0  ;;  %v1343_v23 = vpop.f32.mrf.mxu1 }
 0x22d   : > { %1109 = vst.msk [vmem:[%s2102_s14 + $0x40] sm:$0xff] %vm1100_vm2, %v998_v21  ;;  %1125 = vst.msk [vmem:[%s2102_s14 + $0xc0] sm:$0xff] %vm1100_vm2, %v1062_v53 }
 0x22e   : > { %v1000_v19 = vpop.f32.mrf.mxu0  ;;  %v1064_v33 = vpop.f32.mrf.mxu1 }
 0x22f   : > { %v1001_v16 = vadd.f32 %v2095_v61, %v1000_v19  ;;  %v1065_v6 = vadd.f32 %v2095_v61, %v1064_v33 }
 0x230   : > { %v1312_v14 = vpop.f32.mrf.mxu0  ;;  %v1344_v15 = vpop.f32.mrf.mxu1 }
 0x231   : > { %1110 = vst.msk [vmem:[%s2102_s14 + $0x48] sm:$0xff] %vm1100_vm2, %v1001_v16  ;;  %1126 = vst.msk [vmem:[%s2102_s14 + $0xc8] sm:$0xff] %vm1100_vm2, %v1065_v6 }
 0x232   : > { %v1005_v40 = vpop.f32.mrf.mxu0  ;;  %v1069_v52 = vpop.f32.mrf.mxu1 }
 0x233   : > { %v1006_v35 = vadd.f32 %v2095_v61, %v1005_v40  ;;  %v1070_v57 = vadd.f32 %v2095_v61, %v1069_v52 }
 0x234   : > { %v1315_v20 = vpop.f32.mrf.mxu0  ;;  %v1347_v2 = vpop.f32.mrf.mxu1 }
 0x235   : > { %1111 = vst.msk [vmem:[%s2102_s14 + $0x50] sm:$0xff] %vm1100_vm2, %v1006_v35  ;;  %1127 = vst.msk [vmem:[%s2102_s14 + $0xd0] sm:$0xff] %vm1100_vm2, %v1070_v57 }
 0x236   : > { %v1008_v12 = vpop.f32.mrf.mxu0  ;;  %v1072_v13 = vpop.f32.mrf.mxu1 }
 0x237   : > { %v1009_v7 = vadd.f32 %v2095_v61, %v1008_v12  ;;  %v1073_v8 = vadd.f32 %v2095_v61, %v1072_v13 }
 0x238   : > { %v1316_v4 = vpop.f32.mrf.mxu0  ;;  %v1348_v18 = vpop.f32.mrf.mxu1 }
 0x239   : > { %1112 = vst.msk [vmem:[%s2102_s14 + $0x58] sm:$0xff] %vm1100_vm2, %v1009_v7  ;;  %1128 = vst.msk [vmem:[%s2102_s14 + $0xd8] sm:$0xff] %vm1100_vm2, %v1073_v8 }
 0x23a   : > { %v1013_v41 = vpop.f32.mrf.mxu0  ;;  %v1077_v26 = vpop.f32.mrf.mxu1 }
 0x23b   : > { %v1014_v28 = vadd.f32 %v2095_v61, %v1013_v41  ;;  %v1078_v11 = vadd.f32 %v2095_v61, %v1077_v26 }
 0x23c   : > { %v1319_v0 = vpop.f32.mrf.mxu0  ;;  %v1351_v1 = vpop.f32.mrf.mxu1 }
 0x23d   : > { %1113 = vst.msk [vmem:[%s2102_s14 + $0x60] sm:$0xff] %vm1100_vm2, %v1014_v28  ;;  %1129 = vst.msk [vmem:[%s2102_s14 + $0xe0] sm:$0xff] %vm1100_vm2, %v1078_v11 }
 0x23e   : > { %v1016_v38 = vpop.f32.mrf.mxu0  ;;  %v1080_v56 = vpop.f32.mrf.mxu1 }
 0x23f   : > { %v1017_v25 = vadd.f32 %v2095_v61, %v1016_v38  ;;  %v1081_v31 = vadd.f32 %v2095_v61, %v1080_v56 }
 0x240   : > { %v1320_v5 = vpop.f32.mrf.mxu0  ;;  %v1352_v42 = vpop.f32.mrf.mxu1 }
 0x241   : > { %1114 = vst.msk [vmem:[%s2102_s14 + $0x68] sm:$0xff] %vm1100_vm2, %v1017_v25  ;;  %1130 = vst.msk [vmem:[%s2102_s14 + $0xe8] sm:$0xff] %vm1100_vm2, %v1081_v31 }
 0x242   : > { %v1021_v43 = vpop.f32.mrf.mxu0  ;;  %v1085_v27 = vpop.f32.mrf.mxu1 }
 0x243   : > { %v1022_v44 = vadd.f32 %v2095_v61, %v1021_v43  ;;  %v1086_v32 = vadd.f32 %v2095_v61, %v1085_v27 }
 0x244   : > { %v1323_v30 = vpop.f32.mrf.mxu0  ;;  %v1355_v50 = vpop.f32.mrf.mxu1 }
 0x245   : > { %1115 = vst.msk [vmem:[%s2102_s14 + $0x70] sm:$0xff] %vm1100_vm2, %v1022_v44  ;;  %1131 = vst.msk [vmem:[%s2102_s14 + $0xf0] sm:$0xff] %vm1100_vm2, %v1086_v32 }
 0x246   : > { %v1024_v45 = vpop.f32.mrf.mxu0  ;;  %v1088_v34 = vpop.f32.mrf.mxu1 }
 0x247   : > { %v1025_v39 = vadd.f32 %v2095_v61, %v1024_v45  ;;  %v1089_v29 = vadd.f32 %v2095_v61, %v1088_v34 }
 0x248   : > { %v1324_v51 = vpop.f32.mrf.mxu0  ;;  %v1356_v54 = vpop.f32.mrf.mxu1 }
 0x249   : > { %1116 = vst.msk [vmem:[%s2102_s14 + $0x78] sm:$0xff] %vm1100_vm2, %v1025_v39  ;;  %1132 = vst.msk [vmem:[%s2102_s14 + $0xf8] sm:$0xff] %vm1100_vm2, %v1089_v29 }
 0x24a   : > { %v1029_v46 = vpop.f32.mrf.mxu0  ;;  %v1093_v60 = vpop.f32.mrf.mxu1 }
 0x24b   : > { %v1030_v58 = vadd.f32 %v2095_v61, %v1029_v46  ;;  %v1094_v17 = vadd.f32 %v2095_v61, %v1093_v60 }
 0x24c   : > { %v1327_v55 = vpop.f32.mrf.mxu0  ;;  %v1359_v59 = vpop.f32.mrf.mxu1 }
 0x24d   : > { %1117 = vst.msk [vmem:[%s2102_s14 + $0x80] sm:$0xff] %vm1100_vm2, %v1030_v58  ;;  %1133 = vst.msk [vmem:[%s2102_s14 + $0x100] sm:$0xff] %vm1100_vm2, %v1094_v17 }
 0x24e   : > { %v1032_v48 = vpop.f32.mrf.mxu0  ;;  %v1096_v36 = vpop.f32.mrf.mxu1 }
 0x24f   : > { %v1033_v63 = vadd.f32 %v2095_v61, %v1032_v48  ;;  %v1097_v37 = vadd.f32 %v2095_v61, %v1096_v36 }
 0x250   : > { %v1328_v3 = vpop.f32.mrf.mxu0  ;;  %v1360_v62 = vpop.f32.mrf.mxu1 }
 0x251   : > { %1118 = vst.msk [vmem:[%s2102_s14 + $0x88] sm:$0xff] %vm1100_vm2, %v1033_v63  ;;  %1134 = vst.msk [vmem:[%s2102_s14 + $0x108] sm:$0xff] %vm1100_vm2, %v1097_v37 }
 0x252 PF: > { %s15_s20 = sadd.s32 1, %s1483_s20   ;;  %s2221_s18 = smov %s1479_s19 }
 0x253   : > { %p12_p5 = scmp.ge.s32.totalorder %s15_s20, 4   ;;  %s2222_s19 = smov %s2224_s21 }
 0x255   :  { %14 = sbr.rel (!%p12_p5) target bundleno = 2 (0x2), region = 76 }

// kernel: _lambda_.10
= control target key start
LH: loop header
LB: loop body
LE: loop exit
PB: predicated region body
PF: predicated region fallthrough
CT: control target
= control target key end

     0   :  { %s1135_s6 = smov 0   ;;  %s1287_s0 = inlined_call_operand.vmem [shape: f32[32,17,96], index: 0, kind: input, shape index: {}]   ;;  %s1288_s1 = inlined_call_operand.vmem [shape: f32[32,17,32], index: 1, kind: output, shape index: {}]  }
   0x1 LB: > { %s901_s7 = sadd.s32 4294967295, %s1108_s6   ;;  %p905_p0 = scmp.ge.s32.totalorder %s1108_s6, 1  ;;  %s1108_s6 = sphi %s1135_s6, %s11_s6  }
   0x2   : > { %p87_p1 = scmp.lt.s32.totalorder %s1108_s6, 33 }
   0x4   : > { %p88_p2 = pnand %p905_p0, %p87_p1 }
   0x5   : > { %p107_p3 = scmp.lt.s32.totalorder (!%p88_p2), %s901_s7, 31  ;;  %s1110_s12 = smov (!%p88_p2), 96  }
   0x6   : > { %91 = sbr.rel (%p88_p2) target bundleno = 2584 (0xa18), region = 24  ;;  %s1111_s13 = smov (!%p88_p2), 64  }
   0x7   : > { %s1112_s14 = smov (!%p88_p2), 88   ;;  %s1114_s15 = smov (!%p88_p2), 120  }
   0x8   : > { %s1115_s16 = smov (!%p88_p2), 56   ;;  %s1116_s17 = smov (!%p88_p2), 80  }
   0x9   : > { %s1117_s18 = smov (!%p88_p2), 112   ;;  %s1118_s19 = smov (!%p88_p2), 48  }
   0xa   : > { %s1119_s20 = smov (!%p88_p2), 72   ;;  %s1120_s21 = smov (!%p88_p2), 104  }
   0xb   : > { %s1290_s7 = smov (!%p107_p3, %s901_s7), 31  ;;  %vm134_vm0 = vcmask 64512   ;;  %vm202_vm1 = vcmask 131072   ;;  %vm195_vm2 = vcmask 138240   ;;  %vm243_vm3 = vcmask 1040384   ;;  %s1121_s22 = smov 40  }
   0xc   : > { %s1030_s8 = smul.u32 24, %s1290_s7  ;;  %v1113_v29 = vmov 0   ;;  %s1122_s23 = smov 8   ;;  %vm833_vm4 = vcmask 130048   ;;  %vm837_vm5 = vcmask 195584   ;;  %vm841_vm6 = vcmask 261120  }
   0xd   : > { %v1176_v30 = vsel %vm243_vm3, 65535, %v1113_v29  ;;  %s1123_s24 = smov 16   ;;  %s1124_s25 = smov 24   ;;  %vm844_vm7 = vcmask 253952  }
   0xe   : > { %s111_s11 = scalar_lea.vmem %s1287_s0, %s1030_s8  ;;  %s116_s28 = scalar_lea.vmem %s1288_s1, %s1030_s8 }
   0xf   : > { %v120_v0 = vld [vmem:[%s111_s11 + $0x10] sm:$0x1]  ;;  %v118_v1 = vld [vmem:[%s111_s11] sm:$0xff]  ;;  %v119_v2 = vld [vmem:[%s111_s11 + $0x8] sm:$0xff] }
  0x10   : > { %v1151_v3 = vpack.c.bf16 %v120_v0, %v120_v0  ;;  %v121_v4 = vmul.f32 0.35355338, %v118_v1  ;;  %v122_v5 = vmul.f32 0.35355338, %v119_v2  ;;  %v1154_v6 = vpack.c.bf16 %v119_v2, %v118_v1 }
  0x11   : > { %v123_v12 = vmul.f32 0.35355338, %v120_v0 }
  0x12   : > { %132 = vrot.lane.b32.xlu0 %v1151_v3, %s1110_s12  ;;  %v1156_v7 = vpack.c.bf16 %v122_v5, %v121_v4 }
  0x13   : > { %v1165_v13 = vpack.c.bf16 %v123_v12, %v123_v12 }
  0x14   : > { %962 = vmatprep.mubr.msk.bf16.mxu0 %vm134_vm0, %v1156_v7 }
  0x16   : > { %130 = vrot.lane.b32.xlu0 %v1154_v6, %s1110_s12 }
  0x84   : > { %v133_v8 = vpop.permute.xlu0 %132 }
  0x85   : > { %1022 = vmatprep.subr.msk.bf16.mxu0 %vm134_vm0, %v133_v8  ;;  %v145_v9 = vsel %vm134_vm0, %v133_v8, 0 }
  0x86   : > { %959 = vmatpush3.bf16.xpose.msra.mxu0 %v145_v9 }
  0x88   : > { %v131_v10 = vpop.permute.xlu0 %130 }
  0x89   : > { %1023 = vmatprep.subr.msk.bf16.mxu0 %vm134_vm0, %v131_v10  ;;  %v142_v11 = vsel %vm134_vm0, %v131_v10, 0 }
  0x8e   : > { %961 = vmatpush3.bf16.xpose.msra.mxu0 %v142_v11 }
  0x95   : > { %963 = vmatmul.mubr.msk.bf16.vlgmr.msra.gmra.mxu0 %vm134_vm0, %v1165_v13 }
 0x155   : > { %v964_v14 = vpop.f32.mrf.mxu0 }
 0x156   : > { %v203_v15 = vsel %vm202_vm1, %v964_v14, -inf }
 0x157   : > { %204 = vmax.xlane.f32.xlu0 %v203_v15  ;;  %v181_v16 = vpop.f32.mrf.mxu0 }
 0x158   : > { %v196_v17 = vsel %vm195_vm2, %v181_v16, -inf }
 0x159   : > { %197 = vmax.xlane.f32.xlu1 %v196_v17  ;;  %v965_v18 = vpop.f32.mrf.mxu0 }
 0x15b   : > { %v184_v19 = vpop.f32.mrf.mxu0 }
 0x15c   : > { %v199_v20 = vsel %vm195_vm2, %v184_v19, -inf }
 0x15d   : > { %200 = vmax.xlane.f32.xlu1 %v199_v20 }
 0x16d   : > { %305 = vrot.lane.b32.xlu0 %v1151_v3, %s1112_s14 }
 0x16e   : > { %234 = vrot.lane.b32.xlu1 %v1151_v3, %s1111_s13 }
 0x1e0   : > { %v205_v21 = vpop.xlane.xlu0 %204 }
 0x1e1   : > { %v208_v22 = vsub.f32 %v964_v14, %v205_v21 }
 0x1e2   : > { %v198_v23 = vpop.xlane.xlu1 %197 }
 0x1e3   : > { %v213_v24 = vmul.f32 1.442695, %v208_v22  ;;  %v206_v25 = vsub.f32 %v181_v16, %v198_v23 }
 0x1e4   : > { %v306_v44 = vpop.permute.xlu0 %305 }
 0x1e5   : > { %1054 = vpow2.f32 %v213_v24  ;;  %v209_v26 = vmul.f32 1.442695, %v206_v25  ;;  %v317_v53 = vsel %vm134_vm0, %v306_v44, 0 }
 0x1e6   : > { %v201_v27 = vpop.xlane.xlu1 %200 }
 0x1e7   : > { %1056 = vpow2.f32 %v209_v26  ;;  %v207_v28 = vsub.f32 %v184_v19, %v201_v27 }
 0x1e9   : > { %v211_v31 = vmul.f32 1.442695, %v207_v28 }
 0x1ea   : > { %v235_v32 = vpop.permute.xlu1 %234 }
 0x1eb   : > { %1058 = vpow2.f32 %v211_v31  ;;  %v247_v33 = vand.u32 %v1176_v30, %v235_v32 }
 0x1ed   : > { %966 = vmatprep.subr.bf16.mxu1 %v247_v33 }
 0x1ee   : > { %967 = vmatpush3.bf16.msra.mxu1 %v247_v33 }
 0x1f2   : > { %v1055_v34 = vpop.eup %1054 }
 0x1f3   : > { %v221_v35 = vsel %vm202_vm1, %v1055_v34, 0.0 }
 0x1f4   : > { %v1057_v36 = vpop.eup %1056  ;;  %222 = vadd.xlane.f32.xlu1 %v221_v35 }
 0x1f5   : > { %v215_v37 = vsel %vm195_vm2, %v1057_v36, 0.0 }
 0x1f8   : > { %v1059_v38 = vpop.eup %1058  ;;  %216 = vadd.xlane.f32.xlu1 %v215_v37 }
 0x1f9   : > { %v218_v39 = vsel %vm195_vm2, %v1059_v38, 0.0 }
 0x1fc   : > { %219 = vadd.xlane.f32.xlu1 %v218_v39 }
 0x20d   : > { %232 = vrot.lane.b32.xlu1 %v1154_v6, %s1111_s13 }
 0x211   : > { %303 = vrot.lane.b32.xlu1 %v1154_v6, %s1112_s14 }
 0x215   : > { %299 = vrot.lane.b32.xlu1 %v1156_v7, %s1114_s15 }
 0x219   : > { %301 = vrot.lane.b32.xlu1 %v1165_v13, %s1114_s15 }
 0x27d   : > { %v223_v40 = vpop.xlane.xlu1 %222 }
 0x27e   : > { %1060 = vrcp.f32 %v223_v40 }
 0x281   : > { %v217_v41 = vpop.xlane.xlu1 %216 }
 0x282   : > { %1062 = vrcp.f32 %v217_v41 }
 0x285   : > { %v220_v42 = vpop.xlane.xlu1 %219 }
 0x286   : > { %1064 = vrcp.f32 %v220_v42 }
 0x289   : > { %v233_v43 = vpop.permute.xlu1 %232 }
 0x28a   : > { %968 = vmatprep.subr.bf16.mxu1 %v233_v43 }
 0x28b   : > { %969 = vmatpush3.bf16.msra.mxu1 %v233_v43  ;;  %v1061_v45 = vpop.eup %1060 }
 0x28c   : > { %1024 = vmatprep.subr.msk.bf16.mxu1 %vm134_vm0, %v306_v44  ;;  %v229_v49 = vmul.f32 %v1061_v45, %v1055_v34 }
 0x28d   : > { %v304_v47 = vpop.permute.xlu1 %303 }
 0x28e   : > { %v231_v54 = vpack.c.bf16 %v229_v49, %v229_v49  ;;  %v314_v56 = vsel %vm134_vm0, %v304_v47, 0 }
 0x28f   : > { %v1063_v46 = vpop.eup %1062 }
 0x290   : > { %v227_v50 = vmul.f32 %v1063_v46, %v1057_v36 }
 0x291   : > { %v300_v55 = vpop.permute.xlu1 %299 }
 0x293   : > { %v1065_v48 = vpop.eup %1064 }
 0x294   : > { %v228_v51 = vmul.f32 %v1065_v48, %v1059_v38 }
 0x295   : > { %v302_v57 = vpop.permute.xlu1 %301 }
 0x296   : > { %v230_v52 = vpack.c.bf16 %v228_v51, %v227_v50 }
 0x298   : > { %970 = vmatprep.mubr.msk.bf16.mxu1 %vm195_vm2, %v230_v52 }
 0x299   : > { %971 = vmatmul.mubr.msk.bf16.vlgmr.msra.gmra.mxu1 %vm195_vm2, %v231_v54 }
 0x29a   : > { %975 = vmatpush3.bf16.xpose.msra.mxu1 %v317_v53  ;;  %978 = vmatprep.mubr.msk.bf16.mxu1 %vm134_vm0, %v300_v55 }
 0x29b   : > { %1025 = vmatprep.subr.msk.bf16.mxu1 %vm134_vm0, %v304_v47 }
 0x2a2   : > { %977 = vmatpush3.bf16.xpose.msra.mxu1 %v314_v56 }
 0x2a9   : > { %979 = vmatmul.mubr.msk.bf16.vlgmr.msra.gmra.mxu1 %vm134_vm0, %v302_v57 }
 0x359   : > { %v1196_v58 = vpop.f32.mrf.mxu1 }
 0x35b   : > { %v1198_v59 = vpop.f32.mrf.mxu1 }
 0x35d   : > { %v973_v60 = vpop.f32.mrf.mxu1 }
 0x35f   : > { %v1200_v61 = vpop.f32.mrf.mxu1 }
 0x369   : > { %v980_v62 = vpop.f32.mrf.mxu1 }
 0x36a   : > { %v373_v4 = vsel %vm202_vm1, %v980_v62, -inf }
 0x36b   : > { %v353_v63 = vpop.f32.mrf.mxu1 }
 0x36c   : > { %v367_v0 = vsel %vm195_vm2, %v353_v63, -inf }
 0x36d   : > { %368 = vmax.xlane.f32.xlu1 %v367_v0  ;;  %v981_v1 = vpop.f32.mrf.mxu1 }
 0x36f   : > { %v356_v2 = vpop.f32.mrf.mxu1 }
 0x370   : > { %v370_v5 = vsel %vm195_vm2, %v356_v2, -inf }
 0x371   : > { %374 = vmax.xlane.f32.xlu1 %v373_v4  ;;  %371 = vmax.xlane.f32.xlu0 %v370_v5 }
 0x382   : > { %404 = vrot.lane.b32.xlu1 %v1151_v3, %s1115_s16 }
 0x3f6   : > { %v369_v8 = vpop.xlane.xlu1 %368 }
 0x3f7   : > { %v376_v9 = vsub.f32 %v353_v63, %v369_v8 }
 0x3f9   : > { %v379_v15 = vmul.f32 1.442695, %v376_v9 }
 0x3fa   : > { %v375_v10 = vpop.xlane.xlu1 %374  ;;  %v372_v11 = vpop.xlane.xlu0 %371 }
 0x3fb   : > { %v378_v12 = vsub.f32 %v980_v62, %v375_v10  ;;  %v377_v14 = vsub.f32 %v356_v2, %v372_v11 }
 0x3fd   : > { %v383_v16 = vmul.f32 1.442695, %v378_v12  ;;  %v381_v17 = vmul.f32 1.442695, %v377_v14 }
 0x3fe   : > { %v405_v18 = vpop.permute.xlu1 %404 }
 0x3ff   : > { %1066 = vpow2.f32 %v383_v16  ;;  %v414_v19 = vand.u32 %v405_v18, %v1176_v30 }
 0x400   : > { %1068 = vpow2.f32 %v381_v17 }
 0x401   : > { %1070 = vpow2.f32 %v379_v15  ;;  %982 = vmatprep.subr.bf16.mxu0 %v414_v19 }
 0x402   : > { %983 = vmatpush3.bf16.msra.mxu0 %v414_v19 }
 0x40c   : > { %v1067_v20 = vpop.eup %1066 }
 0x40d   : > { %v1069_v21 = vpop.eup %1068  ;;  %v391_v22 = vsel %vm202_vm1, %v1067_v20, 0.0 }
 0x40e   : > { %v1071_v23 = vpop.eup %1070  ;;  %392 = vadd.xlane.f32.xlu0 %v391_v22  ;;  %v388_v24 = vsel %vm195_vm2, %v1069_v21, 0.0 }
 0x40f   : > { %389 = vadd.xlane.f32.xlu1 %v388_v24  ;;  %v385_v25 = vsel %vm195_vm2, %v1071_v23, 0.0 }
 0x412   : > { %386 = vadd.xlane.f32.xlu0 %v385_v25 }
 0x420   : > { %470 = vrot.lane.b32.xlu1 %v1151_v3, %s1116_s17 }
 0x424   : > { %468 = vrot.lane.b32.xlu1 %v1154_v6, %s1116_s17 }
 0x428   : > { %402 = vrot.lane.b32.xlu0 %v1154_v6, %s1115_s16  ;;  %466 = vrot.lane.b32.xlu1 %v1165_v13, %s1117_s18 }
 0x42c   : > { %464 = vrot.lane.b32.xlu0 %v1156_v7, %s1117_s18 }
 0x497   : > { %v393_v26 = vpop.xlane.xlu0 %392 }
 0x498   : > { %v390_v27 = vpop.xlane.xlu1 %389  ;;  %1072 = vrcp.f32 %v393_v26 }
 0x499   : > { %1074 = vrcp.f32 %v390_v27 }
 0x49b   : > { %v387_v28 = vpop.xlane.xlu0 %386 }
 0x49c   : > { %1076 = vrcp.f32 %v387_v28  ;;  %v471_v31 = vpop.permute.xlu1 %470 }
 0x49d   : > { %v482_v39 = vsel %vm134_vm0, %v471_v31, 0 }
 0x49f   : > { %v403_v29 = vpop.permute.xlu0 %402 }
 0x4a0   : > { %984 = vmatprep.subr.bf16.mxu0 %v403_v29  ;;  %v469_v42 = vpop.permute.xlu1 %468 }
 0x4a1   : > { %985 = vmatpush3.bf16.msra.mxu0 %v403_v29  ;;  %v479_v43 = vsel %vm134_vm0, %v469_v42, 0 }
 0x4a2   : > { %1026 = vmatprep.subr.msk.bf16.mxu0 %vm134_vm0, %v471_v31 }
 0x4a3   : > { %v465_v41 = vpop.permute.xlu0 %464 }
 0x4a4   : > { %v467_v44 = vpop.permute.xlu1 %466 }
 0x4a5   : > { %v1073_v32 = vpop.eup %1072 }
 0x4a6   : > { %v1075_v33 = vpop.eup %1074  ;;  %v399_v35 = vmul.f32 %v1073_v32, %v1067_v20 }
 0x4a7   : > { %v398_v37 = vmul.f32 %v1075_v33, %v1069_v21 }
 0x4a8   : > { %v401_v40 = vpack.c.bf16 %v399_v35, %v399_v35 }
 0x4a9   : > { %v1077_v34 = vpop.eup %1076 }
 0x4aa   : > { %v397_v36 = vmul.f32 %v1077_v34, %v1071_v23 }
 0x4ac   : > { %v400_v38 = vpack.c.bf16 %v398_v37, %v397_v36 }
 0x4ae   : > { %986 = vmatprep.mubr.msk.bf16.mxu0 %vm195_vm2, %v400_v38 }
 0x4af   : > { %987 = vmatmul.mubr.msk.bf16.vlgmr.msra.gmra.mxu0 %vm195_vm2, %v401_v40 }
 0x4b0   : > { %991 = vmatpush3.bf16.xpose.msra.mxu0 %v482_v39  ;;  %994 = vmatprep.mubr.msk.bf16.mxu0 %vm134_vm0, %v465_v41 }
 0x4b1   : > { %1027 = vmatprep.subr.msk.bf16.mxu0 %vm134_vm0, %v469_v42 }
 0x4b8   : > { %993 = vmatpush3.bf16.xpose.msra.mxu0 %v479_v43 }
 0x4bf   : > { %995 = vmatmul.mubr.msk.bf16.vlgmr.msra.gmra.mxu0 %vm134_vm0, %v467_v44 }
 0x56f   : > { %v1225_v45 = vpop.f32.mrf.mxu0 }
 0x571   : > { %v1227_v46 = vpop.f32.mrf.mxu0 }
 0x573   : > { %v989_v47 = vpop.f32.mrf.mxu0 }
 0x575   : > { %v1229_v48 = vpop.f32.mrf.mxu0 }
 0x57f   : > { %v996_v49 = vpop.f32.mrf.mxu0 }
 0x580   : > { %v538_v54 = vsel %vm202_vm1, %v996_v49, -inf }
 0x581   : > { %v518_v50 = vpop.f32.mrf.mxu0 }
 0x582   : > { %v532_v51 = vsel %vm195_vm2, %v518_v50, -inf }
 0x583   : > { %533 = vmax.xlane.f32.xlu0 %v532_v51  ;;  %v997_v52 = vpop.f32.mrf.mxu0 }
 0x585   : > { %v521_v53 = vpop.f32.mrf.mxu0 }
 0x586   : > { %v535_v55 = vsel %vm195_vm2, %v521_v53, -inf }
 0x587   : > { %539 = vmax.xlane.f32.xlu0 %v538_v54  ;;  %536 = vmax.xlane.f32.xlu1 %v535_v55 }
 0x598   : > { %569 = vrot.lane.b32.xlu1 %v1151_v3, %s1118_s19 }
 0x60c   : > { %v534_v56 = vpop.xlane.xlu0 %533 }
 0x60d   : > { %v541_v57 = vsub.f32 %v518_v50, %v534_v56 }
 0x60f   : > { %v544_v1 = vmul.f32 1.442695, %v541_v57 }
 0x610   : > { %v540_v60 = vpop.xlane.xlu0 %539  ;;  %v537_v62 = vpop.xlane.xlu1 %536 }
 0x611   : > { %v543_v63 = vsub.f32 %v996_v49, %v540_v60  ;;  %v542_v0 = vsub.f32 %v521_v53, %v537_v62 }
 0x613   : > { %v548_v2 = vmul.f32 1.442695, %v543_v63  ;;  %v546_v4 = vmul.f32 1.442695, %v542_v0 }
 0x614   : > { %v570_v5 = vpop.permute.xlu1 %569 }
 0x615   : > { %1078 = vpow2.f32 %v548_v2  ;;  %v579_v8 = vand.u32 %v570_v5, %v1176_v30 }
 0x616   : > { %1080 = vpow2.f32 %v546_v4 }
 0x617   : > { %1082 = vpow2.f32 %v544_v1  ;;  %998 = vmatprep.subr.bf16.mxu1 %v579_v8 }
 0x618   : > { %999 = vmatpush3.bf16.msra.mxu1 %v579_v8 }
 0x622   : > { %v1079_v9 = vpop.eup %1078 }
 0x623   : > { %v1081_v10 = vpop.eup %1080  ;;  %v556_v11 = vsel %vm202_vm1, %v1079_v9, 0.0 }
 0x624   : > { %v1083_v12 = vpop.eup %1082  ;;  %557 = vadd.xlane.f32.xlu0 %v556_v11  ;;  %v553_v14 = vsel %vm195_vm2, %v1081_v10, 0.0 }
 0x625   : > { %554 = vadd.xlane.f32.xlu1 %v553_v14  ;;  %v550_v15 = vsel %vm195_vm2, %v1083_v12, 0.0 }
 0x628   : > { %551 = vadd.xlane.f32.xlu0 %v550_v15 }
 0x636   : > { %635 = vrot.lane.b32.xlu1 %v1151_v3, %s1119_s20 }
 0x63a   : > { %633 = vrot.lane.b32.xlu1 %v1154_v6, %s1119_s20 }
 0x63e   : > { %567 = vrot.lane.b32.xlu0 %v1154_v6, %s1118_s19  ;;  %631 = vrot.lane.b32.xlu1 %v1165_v13, %s1120_s21 }
 0x642   : > { %629 = vrot.lane.b32.xlu0 %v1156_v7, %s1120_s21 }
 0x6ad   : > { %v558_v16 = vpop.xlane.xlu0 %557 }
 0x6ae   : > { %v555_v17 = vpop.xlane.xlu1 %554  ;;  %1084 = vrcp.f32 %v558_v16 }
 0x6af   : > { %1086 = vrcp.f32 %v555_v17 }
 0x6b1   : > { %v552_v18 = vpop.xlane.xlu0 %551 }
 0x6b2   : > { %1088 = vrcp.f32 %v552_v18  ;;  %v636_v20 = vpop.permute.xlu1 %635 }
 0x6b3   : > { %v647_v7 = vsel %vm134_vm0, %v636_v20, 0 }
 0x6b5   : > { %v568_v19 = vpop.permute.xlu0 %567 }
 0x6b6   : > { %1000 = vmatprep.subr.bf16.mxu1 %v568_v19  ;;  %v634_v29 = vpop.permute.xlu1 %633 }
 0x6b7   : > { %1001 = vmatpush3.bf16.msra.mxu1 %v568_v19  ;;  %v644_v31 = vsel %vm134_vm0, %v634_v29, 0 }
 0x6b8   : > { %1028 = vmatprep.subr.msk.bf16.mxu1 %vm134_vm0, %v636_v20 }
 0x6b9   : > { %v630_v28 = vpop.permute.xlu0 %629 }
 0x6ba   : > { %v632_v32 = vpop.permute.xlu1 %631 }
 0x6bb   : > { %v1085_v21 = vpop.eup %1084 }
 0x6bc   : > { %v1087_v22 = vpop.eup %1086  ;;  %v564_v24 = vmul.f32 %v1085_v21, %v1079_v9 }
 0x6bd   : > { %v563_v13 = vmul.f32 %v1087_v22, %v1081_v10 }
 0x6be   : > { %v566_v27 = vpack.c.bf16 %v564_v24, %v564_v24 }
 0x6bf   : > { %v1089_v23 = vpop.eup %1088 }
 0x6c0   : > { %v562_v25 = vmul.f32 %v1089_v23, %v1083_v12 }
 0x6c2   : > { %v565_v26 = vpack.c.bf16 %v563_v13, %v562_v25 }
 0x6c4   : > { %1002 = vmatprep.mubr.msk.bf16.mxu1 %vm195_vm2, %v565_v26 }
 0x6c5   : > { %1003 = vmatmul.mubr.msk.bf16.vlgmr.msra.gmra.mxu1 %vm195_vm2, %v566_v27 }
 0x6c6   : > { %1007 = vmatpush3.bf16.xpose.msra.mxu1 %v647_v7  ;;  %1010 = vmatprep.mubr.msk.bf16.mxu1 %vm134_vm0, %v630_v28 }
 0x6c7   : > { %1029 = vmatprep.subr.msk.bf16.mxu1 %vm134_vm0, %v634_v29 }
 0x6ce   : > { %1009 = vmatpush3.bf16.xpose.msra.mxu1 %v644_v31 }
 0x6d5   : > { %1011 = vmatmul.mubr.msk.bf16.vlgmr.msra.gmra.mxu1 %vm134_vm0, %v632_v32 }
 0x785   : > { %v1004_v33 = vpop.f32.mrf.mxu1 }
 0x787   : > { %v615_v34 = vpop.f32.mrf.mxu1 }
 0x789   : > { %v1005_v35 = vpop.f32.mrf.mxu1 }
 0x78b   : > { %v618_v36 = vpop.f32.mrf.mxu1 }
 0x795   : > { %v1012_v37 = vpop.f32.mrf.mxu1 }
 0x796   : > { %v703_v42 = vsel %vm202_vm1, %v1012_v37, -inf }
 0x797   : > { %v683_v38 = vpop.f32.mrf.mxu1 }
 0x798   : > { %v697_v39 = vsel %vm195_vm2, %v683_v38, -inf }
 0x799   : > { %698 = vmax.xlane.f32.xlu0 %v697_v39  ;;  %v1013_v40 = vpop.f32.mrf.mxu1 }
 0x79b   : > { %v686_v41 = vpop.f32.mrf.mxu1 }
 0x79c   : > { %v700_v43 = vsel %vm195_vm2, %v686_v41, -inf }
 0x79d   : > { %704 = vmax.xlane.f32.xlu0 %v703_v42  ;;  %701 = vmax.xlane.f32.xlu1 %v700_v43 }
 0x822   : > { %v699_v44 = vpop.xlane.xlu0 %698 }
 0x823   : > { %v706_v47 = vsub.f32 %v683_v38, %v699_v44 }
 0x825   : > { %v709_v53 = vmul.f32 1.442695, %v706_v47 }
 0x826   : > { %v705_v49 = vpop.xlane.xlu0 %704  ;;  %v702_v50 = vpop.xlane.xlu1 %701 }
 0x827   : > { %v708_v51 = vsub.f32 %v1012_v37, %v705_v49  ;;  %v707_v52 = vsub.f32 %v686_v41, %v702_v50 }
 0x829   : > { %v713_v54 = vmul.f32 1.442695, %v708_v51  ;;  %v711_v55 = vmul.f32 1.442695, %v707_v52 }
 0x82b   : > { %1090 = vpow2.f32 %v713_v54 }
 0x82c   : > { %1092 = vpow2.f32 %v711_v55 }
 0x82d   : > { %1094 = vpow2.f32 %v709_v53 }
 0x838   : > { %v1091_v56 = vpop.eup %1090 }
 0x839   : > { %v1093_v57 = vpop.eup %1092  ;;  %v721_v60 = vsel %vm202_vm1, %v1091_v56, 0.0 }
 0x83a   : > { %v1095_v62 = vpop.eup %1094  ;;  %722 = vadd.xlane.f32.xlu0 %v721_v60  ;;  %v718_v63 = vsel %vm195_vm2, %v1093_v57, 0.0 }
 0x83b   : > { %719 = vadd.xlane.f32.xlu1 %v718_v63  ;;  %v715_v0 = vsel %vm195_vm2, %v1095_v62, 0.0 }
 0x83e   : > { %716 = vadd.xlane.f32.xlu0 %v715_v0 }
 0x84c   : > { %734 = vrot.lane.b32.xlu1 %v1151_v3, %s1121_s22 }
 0x850   : > { %797 = vrot.lane.b32.xlu1 %v1227_v46, %s1122_s23 }
 0x854   : > { %799 = vrot.lane.b32.xlu1 %v1229_v48, %s1122_s23  ;;  %732 = vrot.lane.b32.xlu0 %v1154_v6, %s1121_s22 }
 0x858   : > { %809 = vrot.lane.b32.xlu1 %v615_v34, %s1123_s24  ;;  %801 = vrot.lane.b32.xlu0 %v1225_v45, %s1122_s23 }
 0x85c   : > { %813 = vrot.lane.b32.xlu1 %v1004_v33, %s1123_s24  ;;  %811 = vrot.lane.b32.xlu0 %v618_v36, %s1123_s24 }
 0x8c3   : > { %v723_v1 = vpop.xlane.xlu0 %722 }
 0x8c4   : > { %v720_v2 = vpop.xlane.xlu1 %719  ;;  %1096 = vrcp.f32 %v723_v1 }
 0x8c5   : > { %1098 = vrcp.f32 %v720_v2 }
 0x8c7   : > { %v717_v4 = vpop.xlane.xlu0 %716 }
 0x8c8   : > { %1100 = vrcp.f32 %v717_v4  ;;  %v735_v3 = vpop.permute.xlu1 %734 }
 0x8c9   : > { %v744_v5 = vand.u32 %v735_v3, %v1176_v30 }
 0x8cb   : > { %1014 = vmatprep.subr.bf16.mxu0 %v744_v5  ;;  %v733_v46 = vpop.permute.xlu0 %732 }
 0x8cc   : > { %1015 = vmatpush3.bf16.msra.mxu0 %v744_v5  ;;  %v798_v17 = vpop.permute.xlu1 %797 }
 0x8cd   : > { %1016 = vmatprep.subr.bf16.mxu0 %v733_v46  ;;  %v830_v22 = vsel %vm134_vm0, %v1198_v59, %v798_v17 }
 0x8cf   : > { %v802_v19 = vpop.permute.xlu0 %801 }
 0x8d0   : > { %1017 = vmatpush3.bf16.msra.mxu0 %v733_v46  ;;  %v800_v18 = vpop.permute.xlu1 %799  ;;  %v832_v26 = vsel %vm134_vm0, %v1196_v58, %v802_v19 }
 0x8d1   : > { %v1097_v6 = vpop.eup %1096  ;;  %v831_v7 = vsel %vm134_vm0, %v1200_v61, %v800_v18 }
 0x8d2   : > { %v1099_v48 = vpop.eup %1098  ;;  %v729_v45 = vmul.f32 %v1097_v6, %v1091_v56 }
 0x8d3   : > { %v728_v10 = vmul.f32 %v1099_v48, %v1093_v57  ;;  %v812_v21 = vpop.permute.xlu0 %811 }
 0x8d4   : > { %v731_v12 = vpack.c.bf16 %v729_v45, %v729_v45  ;;  %v810_v20 = vpop.permute.xlu1 %809  ;;  %v835_v59 = vsel %vm833_vm4, %v831_v7, %v812_v21 }
 0x8d5   : > { %v1101_v8 = vpop.eup %1100  ;;  %v834_v23 = vsel %vm833_vm4, %v830_v22, %v810_v20 }
 0x8d6   : > { %v727_v9 = vmul.f32 %v1101_v8, %v1095_v62 }
 0x8d8   : > { %v730_v11 = vpack.c.bf16 %v728_v10, %v727_v9  ;;  %v814_v24 = vpop.permute.xlu1 %813 }
 0x8d9   : > { %v836_v27 = vsel %vm833_vm4, %v832_v26, %v814_v24 }
 0x8da   : > { %1018 = vmatprep.mubr.msk.bf16.mxu0 %vm195_vm2, %v730_v11 }
 0x8db   : > { %1019 = vmatmul.mubr.msk.bf16.vlgmr.msra.gmra.mxu0 %vm195_vm2, %v731_v12 }
 0x99b   : > { %v1020_v14 = vpop.f32.mrf.mxu0 }
 0x99d   : > { %v780_v30 = vpop.f32.mrf.mxu0 }
 0x99e   : > { %821 = vrot.lane.b32.xlu0 %v780_v30, %s1124_s25 }
 0x99f   : > { %v1021_v15 = vpop.f32.mrf.mxu0 }
 0x9a1   : > { %v783_v16 = vpop.f32.mrf.mxu0 }
 0x9a2   : > { %825 = vrot.lane.b32.xlu0 %v1020_v14, %s1124_s25  ;;  %823 = vrot.lane.b32.xlu1 %v783_v16, %s1124_s25 }
 0xa10   : > { %v822_v25 = vpop.permute.xlu0 %821 }
 0xa11   : > { %v838_v13 = vsel %vm837_vm5, %v834_v23, %v822_v25 }
 0xa12   : > { %842 = vst.msk [vmem:[%s116_s28] sm:$0xff] %vm841_vm6, %v838_v13 }
 0xa14   : > { %v826_v28 = vpop.permute.xlu0 %825  ;;  %v824_v29 = vpop.permute.xlu1 %823 }
 0xa15   : > { %v840_v31 = vsel %vm837_vm5, %v836_v27, %v826_v28  ;;  %v839_v32 = vsel %vm837_vm5, %v835_v59, %v824_v29 }
 0xa16   : > { %845 = vst.msk [vmem:[%s116_s28 + $0x10] sm:$0x1] %vm844_vm7, %v840_v31 }
 0xa17   : > { %843 = vst.msk [vmem:[%s116_s28 + $0x8] sm:$0xff] %vm841_vm6, %v839_v32 }
 0xa18 PF: > { %s11_s6 = sadd.s32 1, %s1108_s6  }
 0xa19   : > { %p8_p4 = scmp.ge.s32.totalorder %s11_s6, 34  }
 0xa1b   :  { %10 = sbr.rel (!%p8_p4) target bundleno = 1 (0x1), region = 54 }

// kernel: _lambda_.11
= control target key start
LH: loop header
LB: loop body
LE: loop exit
PB: predicated region body
PF: predicated region fallthrough
CT: control target
= control target key end

     0   :  { %s1261_s15 = smov 0   ;;  %s1263_s16 = smov 0   ;;  %s1653_s0 = inlined_call_operand.vmem [shape: f32[544,32], index: 0, kind: input, shape index: {}]   ;;  %s1654_s1 = inlined_call_operand.vmem [shape: bf16[32,32], index: 1, kind: input, shape index: {}]   ;;  %s1655_s2 = inlined_call_operand.vmem [shape: f32[1,32], index: 2, kind: input, shape index: {}]   ;;  %s1656_s3 = inlined_call_operand.vmem [shape: f32[544,32], index: 3, kind: input, shape index: {}]   ;;  %s1657_s4 = inlined_call_operand.vmem [shape: f32[544,32], index: 4, kind: output, shape index: {}]  }
   0x1   :  { %s1265_s17 = smov 0  }
   0x2 LB: > { %s33_s18 = sadd.s32 1, %s1228_s16  ;;  %p1061_p0 = scmp.ge.s32.totalorder %s1232_s17, 1  ;;  %s1232_s17 = sphi %s1265_s17, %s14_s17   ;;  %s1228_s16 = sphi %s1263_s16, %s1659_s16   ;;  %s1224_s15 = sphi %s1261_s15, %s1658_s15  }
   0x3   : > { %p35_p1 = scmp.ge.s32.totalorder %s33_s18, 2  ;;  %p229_p2 = scmp.lt.s32.totalorder %s1232_s17, 3 }
   0x5   : > { %s1661_s18 = smov (%p35_p1, %s33_s18), 0  ;;  %p230_p3 = pnand %p1061_p0, %p229_p2 }
   0x6   : > { %s280_s23 = smul.u32 (!%p230_p3), 34, %s1224_s15 }
   0x7   : > { %233 = sbr.rel (%p230_p3) target bundleno = 297 (0x129), region = 36 }
   0x8   : > { %p281_p4 = scmp.lt.s32.totalorder (!%p230_p3), %s280_s23, 67 }
   0xc   : > { %v1208_v0 = vld [vmem:[%s1654_s1 + $0x8] sm:$0xff]   ;;  %v1234_v1 = vmov 0.0   ;;  %v1209_v2 = vld [vmem:[%s1654_s1] sm:$0xff]   ;;  %vm324_vm0 = vcmask 261120   ;;  %vm1235_vm1 = vmmov 0   ;;  %s1663_s23 = smov (!%p281_p4, %s280_s23), 67 }
   0xd   : > { %1106 = vmatprep.subr.bf16.mxu0 %v1234_v1  ;;  %1178 = vmatprep.subr.bf16.mxu1 %v1234_v1  ;;  %325 = vst.msk [vmem:[#allocation2] sm:$0xff] %vm324_vm0, %v1234_v1  ;;  %326 = vst.msk [vmem:[#allocation2 + $0x8] sm:$0xff] %vm324_vm0, %v1234_v1  ;;  %s1368_s24 = sshll.u32 %s1663_s23, 3 }
   0xe   : > { %1107 = vmatpush3.bf16.msra.mxu0 %v1208_v0  ;;  %1180 = vmatpush3.bf16.msra.mxu1 %v1208_v0  ;;  %327 = vst.msk [vmem:[#allocation2 + $0x10] sm:$0xff] %vm324_vm0, %v1234_v1  ;;  %328 = vst.msk [vmem:[#allocation2 + $0x18] sm:$0xff] %vm324_vm0, %v1234_v1  ;;  %s1374_s27 = scalar_lea.vmem %s1653_s0, %s1368_s24  ;;  %s1463_s30 = scalar_lea.vmem %s1656_s3, %s1368_s24 }
   0xf   : > { %1108 = vmatprep.subr.bf16.mxu0 %v1234_v1  ;;  %1179 = vmatprep.subr.bf16.mxu1 %v1234_v1  ;;  %329 = vst.msk [vmem:[#allocation2 + $0x20] sm:$0xff] %vm324_vm0, %v1234_v1  ;;  %330 = vst.msk [vmem:[#allocation2 + $0x28] sm:$0xff] %vm324_vm0, %v1234_v1  ;;  %v393_v3 = vld [vmem:[%s1374_s27] sm:$0xff]  ;;  %v394_v4 = vld [vmem:[%s1374_s27 + $0x8] sm:$0xff]  ;;  %s1480_s9 = scalar_lea.vmem %s1657_s4, %s1368_s24 }
  0x10   : > { %331 = vst.msk [vmem:[#allocation2 + $0x30] sm:$0xff] %vm324_vm0, %v1234_v1  ;;  %332 = vst.msk [vmem:[#allocation2 + $0x38] sm:$0xff] %vm324_vm0, %v1234_v1  ;;  %1110 = vmatprep.mubr.msk.bf16.mxu0 %vm1235_vm1, %v1234_v1  ;;  %1146 = vmatprep.mubr.msk.bf16.mxu1 %vm1235_vm1, %v1234_v1  ;;  %v411_v5 = vld [vmem:[%s1374_s27 + $0x90] sm:$0xff]  ;;  %v427_v6 = vpack.c.bf16 %v394_v4, %v393_v3  ;;  %v412_v7 = vld [vmem:[%s1374_s27 + $0x98] sm:$0xff] }
  0x11   : > { %333 = vst.msk [vmem:[#allocation2 + $0x40] sm:$0xff] %vm324_vm0, %v1234_v1  ;;  %334 = vst.msk [vmem:[#allocation2 + $0x48] sm:$0xff] %vm324_vm0, %v1234_v1  ;;  %v436_v8 = vpack.c.bf16 %v412_v7, %v411_v5  ;;  %v395_v9 = vld [vmem:[%s1374_s27 + $0x10] sm:$0xff]  ;;  %v396_v10 = vld [vmem:[%s1374_s27 + $0x18] sm:$0xff] }
  0x12   : > { %335 = vst.msk [vmem:[#allocation2 + $0x50] sm:$0xff] %vm324_vm0, %v1234_v1  ;;  %336 = vst.msk [vmem:[#allocation2 + $0x58] sm:$0xff] %vm324_vm0, %v1234_v1  ;;  %1109 = vmatpush3.bf16.msra.mxu0 %v1209_v2  ;;  %1181 = vmatpush3.bf16.msra.mxu1 %v1209_v2  ;;  %v413_v11 = vld [vmem:[%s1374_s27 + $0xa0] sm:$0xff]  ;;  %v414_v12 = vld [vmem:[%s1374_s27 + $0xa8] sm:$0xff]  ;;  %v428_v13 = vpack.c.bf16 %v396_v10, %v395_v9 }
  0x13   : > { %337 = vst.msk [vmem:[#allocation2 + $0x60] sm:$0xff] %vm324_vm0, %v1234_v1  ;;  %338 = vst.msk [vmem:[#allocation2 + $0x68] sm:$0xff] %vm324_vm0, %v1234_v1  ;;  %v437_v14 = vpack.c.bf16 %v414_v12, %v413_v11  ;;  %v397_v15 = vld [vmem:[%s1374_s27 + $0x20] sm:$0xff]  ;;  %v398_v16 = vld [vmem:[%s1374_s27 + $0x28] sm:$0xff] }
  0x14   : > { %339 = vst.msk [vmem:[#allocation2 + $0x70] sm:$0xff] %vm324_vm0, %v1234_v1  ;;  %340 = vst.msk [vmem:[#allocation2 + $0x78] sm:$0xff] %vm324_vm0, %v1234_v1  ;;  %v415_v17 = vld [vmem:[%s1374_s27 + $0xb0] sm:$0xff]  ;;  %v416_v18 = vld [vmem:[%s1374_s27 + $0xb8] sm:$0xff]  ;;  %v429_v19 = vpack.c.bf16 %v398_v16, %v397_v15 }
  0x15   : > { %341 = vst.msk [vmem:[#allocation2 + $0x80] sm:$0xff] %vm324_vm0, %v1234_v1  ;;  %342 = vst.msk [vmem:[#allocation2 + $0x88] sm:$0xff] %vm324_vm0, %v1234_v1  ;;  %1111 = vmatmul.mubr.msk.bf16.vlgmr.msra.gmra.mxu0 %vm324_vm0, %v427_v6  ;;  %1147 = vmatmul.mubr.msk.bf16.vlgmr.msra.gmra.mxu1 %vm324_vm0, %v436_v8  ;;  %v438_v20 = vpack.c.bf16 %v416_v18, %v415_v17  ;;  %v399_v21 = vld [vmem:[%s1374_s27 + $0x30] sm:$0xff]  ;;  %v400_v22 = vld [vmem:[%s1374_s27 + $0x38] sm:$0xff] }
  0x16   : > { %343 = vst.msk [vmem:[#allocation2 + $0x90] sm:$0xff] %vm324_vm0, %v1234_v1  ;;  %344 = vst.msk [vmem:[#allocation2 + $0x98] sm:$0xff] %vm324_vm0, %v1234_v1  ;;  %1114 = vmatprep.mubr.msk.bf16.mxu0 %vm1235_vm1, %v1234_v1  ;;  %1150 = vmatprep.mubr.msk.bf16.mxu1 %vm1235_vm1, %v1234_v1  ;;  %v417_v23 = vld [vmem:[%s1374_s27 + $0xc0] sm:$0xff]  ;;  %v418_v24 = vld [vmem:[%s1374_s27 + $0xc8] sm:$0xff]  ;;  %v430_v25 = vpack.c.bf16 %v400_v22, %v399_v21 }
  0x17   : > { %345 = vst.msk [vmem:[#allocation2 + $0xa0] sm:$0xff] %vm324_vm0, %v1234_v1  ;;  %346 = vst.msk [vmem:[#allocation2 + $0xa8] sm:$0xff] %vm324_vm0, %v1234_v1  ;;  %v439_v26 = vpack.c.bf16 %v418_v24, %v417_v23  ;;  %v401_v27 = vld [vmem:[%s1374_s27 + $0x40] sm:$0xff]  ;;  %v402_v28 = vld [vmem:[%s1374_s27 + $0x48] sm:$0xff] }
  0x18   : > { %347 = vst.msk [vmem:[#allocation2 + $0xb0] sm:$0xff] %vm324_vm0, %v1234_v1  ;;  %348 = vst.msk [vmem:[#allocation2 + $0xb8] sm:$0xff] %vm324_vm0, %v1234_v1  ;;  %v419_v29 = vld [vmem:[%s1374_s27 + $0xd0] sm:$0xff]  ;;  %v420_v30 = vld [vmem:[%s1374_s27 + $0xd8] sm:$0xff]  ;;  %v431_v31 = vpack.c.bf16 %v402_v28, %v401_v27 }
  0x19   : > { %349 = vst.msk [vmem:[#allocation2 + $0xc0] sm:$0xff] %vm324_vm0, %v1234_v1  ;;  %350 = vst.msk [vmem:[#allocation2 + $0xc8] sm:$0xff] %vm324_vm0, %v1234_v1  ;;  %v440_v32 = vpack.c.bf16 %v420_v30, %v419_v29  ;;  %v403_v33 = vld [vmem:[%s1374_s27 + $0x50] sm:$0xff]  ;;  %v404_v34 = vld [vmem:[%s1374_s27 + $0x58] sm:$0xff] }
  0x1a   : > { %351 = vst.msk [vmem:[#allocation2 + $0xd0] sm:$0xff] %vm324_vm0, %v1234_v1  ;;  %352 = vst.msk [vmem:[#allocation2 + $0xd8] sm:$0xff] %vm324_vm0, %v1234_v1  ;;  %v421_v35 = vld [vmem:[%s1374_s27 + $0xe0] sm:$0xff]  ;;  %v422_v36 = vld [vmem:[%s1374_s27 + $0xe8] sm:$0xff]  ;;  %v432_v37 = vpack.c.bf16 %v404_v34, %v403_v33 }
  0x1b   : > { %353 = vst.msk [vmem:[#allocation2 + $0xe0] sm:$0xff] %vm324_vm0, %v1234_v1  ;;  %354 = vst.msk [vmem:[#allocation2 + $0xe8] sm:$0xff] %vm324_vm0, %v1234_v1  ;;  %v441_v38 = vpack.c.bf16 %v422_v36, %v421_v35  ;;  %v405_v39 = vld [vmem:[%s1374_s27 + $0x60] sm:$0xff]  ;;  %v406_v40 = vld [vmem:[%s1374_s27 + $0x68] sm:$0xff] }
  0x1c   : > { %355 = vst.msk [vmem:[#allocation2 + $0xf0] sm:$0xff] %vm324_vm0, %v1234_v1  ;;  %356 = vst.msk [vmem:[#allocation2 + $0xf8] sm:$0xff] %vm324_vm0, %v1234_v1  ;;  %v423_v41 = vld [vmem:[%s1374_s27 + $0xf0] sm:$0xff]  ;;  %v424_v42 = vld [vmem:[%s1374_s27 + $0xf8] sm:$0xff]  ;;  %v433_v43 = vpack.c.bf16 %v406_v40, %v405_v39 }
  0x1d   : > { %357 = vst.msk [vmem:[#allocation2 + $0x100] sm:$0xff] %vm324_vm0, %v1234_v1  ;;  %358 = vst.msk [vmem:[#allocation2 + $0x108] sm:$0xff] %vm324_vm0, %v1234_v1  ;;  %1115 = vmatmul.mubr.msk.bf16.gmra.mxu0 %vm324_vm0, %v428_v13  ;;  %1151 = vmatmul.mubr.msk.bf16.gmra.mxu1 %vm324_vm0, %v437_v14  ;;  %v442_v44 = vpack.c.bf16 %v424_v42, %v423_v41  ;;  %v407_v45 = vld [vmem:[%s1374_s27 + $0x70] sm:$0xff]  ;;  %v408_v46 = vld [vmem:[%s1374_s27 + $0x78] sm:$0xff] }
  0x1e   : > { %1118 = vmatprep.mubr.msk.bf16.mxu0 %vm1235_vm1, %v1234_v1  ;;  %1154 = vmatprep.mubr.msk.bf16.mxu1 %vm1235_vm1, %v1234_v1  ;;  %v425_v47 = vld [vmem:[%s1374_s27 + $0x100] sm:$0xff]  ;;  %v426_v48 = vld [vmem:[%s1374_s27 + $0x108] sm:$0xff]  ;;  %v434_v49 = vpack.c.bf16 %v408_v46, %v407_v45  ;;  %v377_v55 = vld [vmem:[#allocation2 + $0x90] sm:$0xff] }
  0x1f   : > { %v443_v50 = vpack.c.bf16 %v426_v48, %v425_v47  ;;  %v409_v51 = vld [vmem:[%s1374_s27 + $0x80] sm:$0xff]  ;;  %v410_v52 = vld [vmem:[%s1374_s27 + $0x88] sm:$0xff]  ;;  %v378_v63 = vld [vmem:[#allocation2 + $0x98] sm:$0xff] }
  0x20   : > { %v435_v53 = vpack.c.bf16 %v410_v52, %v409_v51  ;;  %v359_v54 = vld [vmem:[#allocation2] sm:$0xff]  ;;  %v360_v61 = vld [vmem:[#allocation2 + $0x8] sm:$0xff]  ;;  %v361_v5 = vld [vmem:[#allocation2 + $0x10] sm:$0xff] }
  0x21   : > { %v379_v7 = vld [vmem:[#allocation2 + $0xa0] sm:$0xff]  ;;  %v362_v16 = vld [vmem:[#allocation2 + $0x18] sm:$0xff]  ;;  %v380_v21 = vld [vmem:[#allocation2 + $0xa8] sm:$0xff] }
  0x22   : > { %v1469_v8 = vld [vmem:[%s1655_s2] ss:$0 sm:$0xff]  ;;  %v828_v29 = vld [vmem:[%s1463_s30 + $0x8] sm:$0xff]  ;;  %v846_v35 = vld [vmem:[%s1463_s30 + $0x98] sm:$0xff] }
  0x23   : > { %v827_v13 = vld [vmem:[%s1463_s30] sm:$0xff]  ;;  %v829_v45 = vld [vmem:[%s1463_s30 + $0x10] sm:$0xff]  ;;  %v364_v48 = vld [vmem:[#allocation2 + $0x28] sm:$0xff] }
  0x24   : > { %v847_v51 = vld [vmem:[%s1463_s30 + $0xa0] sm:$0xff] }
  0x25   : > { %1119 = vmatmul.mubr.msk.bf16.gmra.mxu0 %vm324_vm0, %v429_v19  ;;  %1155 = vmatmul.mubr.msk.bf16.gmra.mxu1 %vm324_vm0, %v438_v20  ;;  %v845_v19 = vld [vmem:[%s1463_s30 + $0x90] sm:$0xff] }
  0x26   : > { %1122 = vmatprep.mubr.msk.bf16.mxu0 %vm1235_vm1, %v1234_v1  ;;  %1158 = vmatprep.mubr.msk.bf16.mxu1 %vm1235_vm1, %v1234_v1 }
  0x2d   : > { %1123 = vmatmul.mubr.msk.bf16.gmra.mxu0 %vm324_vm0, %v430_v25  ;;  %1159 = vmatmul.mubr.msk.bf16.gmra.mxu1 %vm324_vm0, %v439_v26 }
  0x2e   : > { %1126 = vmatprep.mubr.msk.bf16.mxu0 %vm1235_vm1, %v1234_v1  ;;  %1162 = vmatprep.mubr.msk.bf16.mxu1 %vm1235_vm1, %v1234_v1 }
  0x35   : > { %1127 = vmatmul.mubr.msk.bf16.gmra.mxu0 %vm324_vm0, %v431_v31  ;;  %1163 = vmatmul.mubr.msk.bf16.gmra.mxu1 %vm324_vm0, %v440_v32  ;;  %v363_v32 = vld [vmem:[#allocation2 + $0x20] sm:$0xff] }
  0x36   : > { %1130 = vmatprep.mubr.msk.bf16.mxu0 %vm1235_vm1, %v1234_v1  ;;  %1166 = vmatprep.mubr.msk.bf16.mxu1 %vm1235_vm1, %v1234_v1 }
  0x3d   : > { %1131 = vmatmul.mubr.msk.bf16.gmra.mxu0 %vm324_vm0, %v432_v37  ;;  %1167 = vmatmul.mubr.msk.bf16.gmra.mxu1 %vm324_vm0, %v441_v38  ;;  %v381_v37 = vld [vmem:[#allocation2 + $0xb0] sm:$0xff] }
  0x3e   : > { %1134 = vmatprep.mubr.msk.bf16.mxu0 %vm1235_vm1, %v1234_v1  ;;  %1170 = vmatprep.mubr.msk.bf16.mxu1 %vm1235_vm1, %v1234_v1 }
  0x45   : > { %1135 = vmatmul.mubr.msk.bf16.gmra.mxu0 %vm324_vm0, %v433_v43  ;;  %1171 = vmatmul.mubr.msk.bf16.gmra.mxu1 %vm324_vm0, %v442_v44 }
  0x46   : > { %1138 = vmatprep.mubr.msk.bf16.mxu0 %vm1235_vm1, %v1234_v1  ;;  %1174 = vmatprep.mubr.msk.bf16.mxu1 %vm1235_vm1, %v1234_v1 }
  0x4d   : > { %1139 = vmatmul.mubr.msk.bf16.gmra.mxu0 %vm324_vm0, %v434_v49  ;;  %1175 = vmatmul.mubr.msk.bf16.gmra.mxu1 %vm324_vm0, %v443_v50 }
  0x4e   : > { %1142 = vmatprep.mubr.msk.bf16.mxu0 %vm1235_vm1, %v1234_v1 }
  0x55   : > { %1143 = vmatmul.mubr.msk.bf16.gmra.mxu0 %vm324_vm0, %v435_v53  ;;  %v382_v53 = vld [vmem:[#allocation2 + $0xb8] sm:$0xff] }
  0xd5   : > { %v546_v56 = vpop.f32.mrf.mxu0  ;;  %v618_v58 = vpop.f32.mrf.mxu1 }
  0xd6   : > { %v681_v57 = vadd.f32 %v546_v56, %v359_v54  ;;  %v699_v60 = vadd.f32 %v618_v58, %v377_v55 }
  0xd7   : > { %v1112_v59 = vpop.f32.mrf.mxu0  ;;  %v1148_v62 = vpop.f32.mrf.mxu1 }
  0xd8   : > { %715 = vst.msk [vmem:[#allocation2] sm:$0xff] %vm324_vm0, %v681_v57  ;;  %733 = vst.msk [vmem:[#allocation2 + $0x90] sm:$0xff] %vm324_vm0, %v699_v60 }
  0xd9   : > { %v549_v0 = vpop.f32.mrf.mxu0  ;;  %v621_v2 = vpop.f32.mrf.mxu1 }
  0xda   : > { %v682_v1 = vadd.f32 %v549_v0, %v360_v61  ;;  %v700_v4 = vadd.f32 %v621_v2, %v378_v63  ;;  %v830_v61 = vld [vmem:[%s1463_s30 + $0x18] sm:$0xff]  ;;  %v365_v0 = vld [vmem:[#allocation2 + $0x30] sm:$0xff] }
  0xdb   : > { %v1113_v3 = vpop.f32.mrf.mxu0  ;;  %v1149_v6 = vpop.f32.mrf.mxu1 }
  0xdc   : > { %716 = vst.msk [vmem:[#allocation2 + $0x8] sm:$0xff] %vm324_vm0, %v682_v1  ;;  %734 = vst.msk [vmem:[#allocation2 + $0x98] sm:$0xff] %vm324_vm0, %v700_v4  ;;  %v848_v3 = vld [vmem:[%s1463_s30 + $0xa8] sm:$0xff] }
  0xdd   : > { %v554_v9 = vpop.f32.mrf.mxu0  ;;  %v626_v11 = vpop.f32.mrf.mxu1 }
  0xde   : > { %v683_v10 = vadd.f32 %v554_v9, %v361_v5  ;;  %v701_v15 = vadd.f32 %v626_v11, %v379_v7  ;;  %v383_v5 = vld [vmem:[#allocation2 + $0xc0] sm:$0xff] }
  0xdf   : > { %v752_v12 = vld [vmem:[#allocation2] sm:$0xff]  ;;  %v1116_v14 = vpop.f32.mrf.mxu0  ;;  %v770_v18 = vld [vmem:[#allocation2 + $0x90] sm:$0xff]  ;;  %v1152_v20 = vpop.f32.mrf.mxu1 }
  0xe0   : > { %v793_v17 = vadd.f32 %v1469_v8, %v752_v12  ;;  %717 = vst.msk [vmem:[#allocation2 + $0x10] sm:$0xff] %vm324_vm0, %v683_v10  ;;  %v811_v22 = vadd.f32 %v1469_v8, %v770_v18  ;;  %735 = vst.msk [vmem:[#allocation2 + $0xa0] sm:$0xff] %vm324_vm0, %v701_v15  ;;  %v831_v14 = vld [vmem:[%s1463_s30 + $0x20] sm:$0xff]  ;;  %v849_v20 = vld [vmem:[%s1463_s30 + $0xb0] sm:$0xff] }
  0xe1   : > { %v557_v23 = vpop.f32.mrf.mxu0  ;;  %v629_v26 = vpop.f32.mrf.mxu1 }
  0xe2   : > { %v861_v24 = vadd.f32 %v827_v13, %v793_v17  ;;  %v684_v25 = vadd.f32 %v557_v23, %v362_v16  ;;  %v879_v27 = vadd.f32 %v845_v19, %v811_v22  ;;  %v702_v31 = vadd.f32 %v629_v26, %v380_v21  ;;  %v366_v17 = vld [vmem:[#allocation2 + $0x38] sm:$0xff]  ;;  %v384_v22 = vld [vmem:[#allocation2 + $0xc8] sm:$0xff] }
  0xe3   : > { %v753_v28 = vld [vmem:[#allocation2 + $0x8] sm:$0xff]  ;;  %v1117_v30 = vpop.f32.mrf.mxu0  ;;  %v771_v34 = vld [vmem:[#allocation2 + $0x98] sm:$0xff]  ;;  %v1153_v36 = vpop.f32.mrf.mxu1 }
  0xe4   : > { %895 = vst.msk [vmem:[%s1480_s9] sm:$0xff] %vm324_vm0, %v861_v24  ;;  %v794_v33 = vadd.f32 %v1469_v8, %v753_v28  ;;  %718 = vst.msk [vmem:[#allocation2 + $0x18] sm:$0xff] %vm324_vm0, %v684_v25  ;;  %v812_v38 = vadd.f32 %v1469_v8, %v771_v34  ;;  %v832_v30 = vld [vmem:[%s1463_s30 + $0x28] sm:$0xff]  ;;  %v850_v36 = vld [vmem:[%s1463_s30 + $0xb8] sm:$0xff] }
  0xe5   : > { %913 = vst.msk [vmem:[%s1480_s9 + $0x90] sm:$0xff] %vm324_vm0, %v879_v27  ;;  %736 = vst.msk [vmem:[#allocation2 + $0xa8] sm:$0xff] %vm324_vm0, %v702_v31  ;;  %v562_v39 = vpop.f32.mrf.mxu0  ;;  %v634_v42 = vpop.f32.mrf.mxu1 }
  0xe6   : > { %v862_v40 = vadd.f32 %v828_v29, %v794_v33  ;;  %v685_v41 = vadd.f32 %v562_v39, %v363_v32  ;;  %v880_v43 = vadd.f32 %v846_v35, %v812_v38  ;;  %v703_v47 = vadd.f32 %v634_v42, %v381_v37  ;;  %v367_v33 = vld [vmem:[#allocation2 + $0x40] sm:$0xff]  ;;  %v385_v38 = vld [vmem:[#allocation2 + $0xd0] sm:$0xff] }
  0xe7   : > { %v754_v44 = vld [vmem:[#allocation2 + $0x10] sm:$0xff]  ;;  %v1120_v46 = vpop.f32.mrf.mxu0  ;;  %v772_v50 = vld [vmem:[#allocation2 + $0xa0] sm:$0xff]  ;;  %v1156_v52 = vpop.f32.mrf.mxu1 }
  0xe8   : > { %896 = vst.msk [vmem:[%s1480_s9 + $0x8] sm:$0xff] %vm324_vm0, %v862_v40  ;;  %v795_v49 = vadd.f32 %v1469_v8, %v754_v44  ;;  %719 = vst.msk [vmem:[#allocation2 + $0x20] sm:$0xff] %vm324_vm0, %v685_v41  ;;  %v813_v54 = vadd.f32 %v1469_v8, %v772_v50  ;;  %v833_v46 = vld [vmem:[%s1463_s30 + $0x30] sm:$0xff]  ;;  %v851_v52 = vld [vmem:[%s1463_s30 + $0xc0] sm:$0xff] }
  0xe9   : > { %914 = vst.msk [vmem:[%s1480_s9 + $0x98] sm:$0xff] %vm324_vm0, %v880_v43  ;;  %737 = vst.msk [vmem:[#allocation2 + $0xb0] sm:$0xff] %vm324_vm0, %v703_v47  ;;  %v565_v55 = vpop.f32.mrf.mxu0  ;;  %v637_v58 = vpop.f32.mrf.mxu1 }
  0xea   : > { %v863_v56 = vadd.f32 %v829_v45, %v795_v49  ;;  %v686_v57 = vadd.f32 %v565_v55, %v364_v48  ;;  %v881_v59 = vadd.f32 %v847_v51, %v813_v54  ;;  %v704_v63 = vadd.f32 %v637_v58, %v382_v53  ;;  %v368_v49 = vld [vmem:[#allocation2 + $0x48] sm:$0xff]  ;;  %v386_v54 = vld [vmem:[#allocation2 + $0xd8] sm:$0xff] }
  0xeb   : > { %v755_v60 = vld [vmem:[#allocation2 + $0x18] sm:$0xff]  ;;  %v1121_v62 = vpop.f32.mrf.mxu0  ;;  %v1157_v4 = vpop.f32.mrf.mxu1 }
  0xec   : > { %897 = vst.msk [vmem:[%s1480_s9 + $0x10] sm:$0xff] %vm324_vm0, %v863_v56  ;;  %v796_v1 = vadd.f32 %v1469_v8, %v755_v60  ;;  %v773_v2 = vld [vmem:[#allocation2 + $0xa8] sm:$0xff]  ;;  %720 = vst.msk [vmem:[#allocation2 + $0x28] sm:$0xff] %vm324_vm0, %v686_v57  ;;  %v834_v62 = vld [vmem:[%s1463_s30 + $0x38] sm:$0xff] }
  0xed   : > { %915 = vst.msk [vmem:[%s1480_s9 + $0xa0] sm:$0xff] %vm324_vm0, %v881_v59  ;;  %v814_v6 = vadd.f32 %v1469_v8, %v773_v2  ;;  %738 = vst.msk [vmem:[#allocation2 + $0xb8] sm:$0xff] %vm324_vm0, %v704_v63  ;;  %v570_v7 = vpop.f32.mrf.mxu0  ;;  %v642_v11 = vpop.f32.mrf.mxu1  ;;  %v852_v4 = vld [vmem:[%s1463_s30 + $0xc8] sm:$0xff] }
  0xee   : > { %v864_v9 = vadd.f32 %v830_v61, %v796_v1  ;;  %v687_v10 = vadd.f32 %v570_v7, %v365_v0  ;;  %v705_v16 = vadd.f32 %v642_v11, %v383_v5  ;;  %v369_v1 = vld [vmem:[#allocation2 + $0x50] sm:$0xff] }
  0xef   : > { %v882_v12 = vadd.f32 %v848_v3, %v814_v6  ;;  %v756_v13 = vld [vmem:[#allocation2 + $0x20] sm:$0xff]  ;;  %v1124_v15 = vpop.f32.mrf.mxu0  ;;  %v1160_v21 = vpop.f32.mrf.mxu1 }
  0xf0   : > { %898 = vst.msk [vmem:[%s1480_s9 + $0x18] sm:$0xff] %vm324_vm0, %v864_v9  ;;  %v797_v18 = vadd.f32 %v1469_v8, %v756_v13  ;;  %v774_v19 = vld [vmem:[#allocation2 + $0xb0] sm:$0xff]  ;;  %721 = vst.msk [vmem:[#allocation2 + $0x30] sm:$0xff] %vm324_vm0, %v687_v10  ;;  %v387_v6 = vld [vmem:[#allocation2 + $0xe0] sm:$0xff] }
  0xf1   : > { %916 = vst.msk [vmem:[%s1480_s9 + $0xa8] sm:$0xff] %vm324_vm0, %v882_v12  ;;  %v815_v23 = vadd.f32 %v1469_v8, %v774_v19  ;;  %739 = vst.msk [vmem:[#allocation2 + $0xc0] sm:$0xff] %vm324_vm0, %v705_v16  ;;  %v573_v24 = vpop.f32.mrf.mxu0  ;;  %v645_v27 = vpop.f32.mrf.mxu1  ;;  %v835_v15 = vld [vmem:[%s1463_s30 + $0x40] sm:$0xff]  ;;  %v853_v21 = vld [vmem:[%s1463_s30 + $0xd0] sm:$0xff] }
  0xf2   : > { %v865_v25 = vadd.f32 %v831_v14, %v797_v18  ;;  %v688_v26 = vadd.f32 %v573_v24, %v366_v17  ;;  %v706_v32 = vadd.f32 %v645_v27, %v384_v22  ;;  %v370_v18 = vld [vmem:[#allocation2 + $0x58] sm:$0xff] }
  0xf3   : > { %v883_v28 = vadd.f32 %v849_v20, %v815_v23  ;;  %v757_v29 = vld [vmem:[#allocation2 + $0x28] sm:$0xff]  ;;  %v1125_v31 = vpop.f32.mrf.mxu0  ;;  %v1161_v37 = vpop.f32.mrf.mxu1 }
  0xf4   : > { %899 = vst.msk [vmem:[%s1480_s9 + $0x20] sm:$0xff] %vm324_vm0, %v865_v25  ;;  %v798_v34 = vadd.f32 %v1469_v8, %v757_v29  ;;  %v775_v35 = vld [vmem:[#allocation2 + $0xb8] sm:$0xff]  ;;  %722 = vst.msk [vmem:[#allocation2 + $0x38] sm:$0xff] %vm324_vm0, %v688_v26  ;;  %v388_v23 = vld [vmem:[#allocation2 + $0xe8] sm:$0xff] }
  0xf5   : > { %917 = vst.msk [vmem:[%s1480_s9 + $0xb0] sm:$0xff] %vm324_vm0, %v883_v28  ;;  %v816_v39 = vadd.f32 %v1469_v8, %v775_v35  ;;  %740 = vst.msk [vmem:[#allocation2 + $0xc8] sm:$0xff] %vm324_vm0, %v706_v32  ;;  %v578_v40 = vpop.f32.mrf.mxu0  ;;  %v650_v43 = vpop.f32.mrf.mxu1  ;;  %v836_v31 = vld [vmem:[%s1463_s30 + $0x48] sm:$0xff]  ;;  %v854_v37 = vld [vmem:[%s1463_s30 + $0xd8] sm:$0xff] }
  0xf6   : > { %v866_v41 = vadd.f32 %v832_v30, %v798_v34  ;;  %v689_v42 = vadd.f32 %v578_v40, %v367_v33  ;;  %v707_v48 = vadd.f32 %v650_v43, %v385_v38  ;;  %v371_v34 = vld [vmem:[#allocation2 + $0x60] sm:$0xff] }
  0xf7   : > { %v884_v44 = vadd.f32 %v850_v36, %v816_v39  ;;  %v758_v45 = vld [vmem:[#allocation2 + $0x30] sm:$0xff]  ;;  %v1128_v47 = vpop.f32.mrf.mxu0  ;;  %v1164_v53 = vpop.f32.mrf.mxu1 }
  0xf8   : > { %900 = vst.msk [vmem:[%s1480_s9 + $0x28] sm:$0xff] %vm324_vm0, %v866_v41  ;;  %v799_v50 = vadd.f32 %v1469_v8, %v758_v45  ;;  %v776_v51 = vld [vmem:[#allocation2 + $0xc0] sm:$0xff]  ;;  %723 = vst.msk [vmem:[#allocation2 + $0x40] sm:$0xff] %vm324_vm0, %v689_v42  ;;  %v389_v39 = vld [vmem:[#allocation2 + $0xf0] sm:$0xff] }
  0xf9   : > { %918 = vst.msk [vmem:[%s1480_s9 + $0xb8] sm:$0xff] %vm324_vm0, %v884_v44  ;;  %v817_v55 = vadd.f32 %v1469_v8, %v776_v51  ;;  %741 = vst.msk [vmem:[#allocation2 + $0xd0] sm:$0xff] %vm324_vm0, %v707_v48  ;;  %v581_v56 = vpop.f32.mrf.mxu0  ;;  %v653_v59 = vpop.f32.mrf.mxu1  ;;  %v837_v47 = vld [vmem:[%s1463_s30 + $0x50] sm:$0xff]  ;;  %v855_v53 = vld [vmem:[%s1463_s30 + $0xe0] sm:$0xff] }
  0xfa   : > { %v867_v57 = vadd.f32 %v833_v46, %v799_v50  ;;  %v690_v58 = vadd.f32 %v581_v56, %v368_v49  ;;  %v708_v0 = vadd.f32 %v653_v59, %v386_v54  ;;  %v372_v50 = vld [vmem:[#allocation2 + $0x68] sm:$0xff] }
  0xfb   : > { %v885_v60 = vadd.f32 %v851_v52, %v817_v55  ;;  %v759_v61 = vld [vmem:[#allocation2 + $0x38] sm:$0xff]  ;;  %v1129_v63 = vpop.f32.mrf.mxu0  ;;  %v1165_v5 = vpop.f32.mrf.mxu1 }
  0xfc   : > { %901 = vst.msk [vmem:[%s1480_s9 + $0x30] sm:$0xff] %vm324_vm0, %v867_v57  ;;  %v800_v2 = vadd.f32 %v1469_v8, %v759_v61  ;;  %v777_v3 = vld [vmem:[#allocation2 + $0xc8] sm:$0xff]  ;;  %724 = vst.msk [vmem:[#allocation2 + $0x48] sm:$0xff] %vm324_vm0, %v690_v58  ;;  %v390_v55 = vld [vmem:[#allocation2 + $0xf8] sm:$0xff] }
  0xfd   : > { %919 = vst.msk [vmem:[%s1480_s9 + $0xc0] sm:$0xff] %vm324_vm0, %v885_v60  ;;  %v818_v7 = vadd.f32 %v1469_v8, %v777_v3  ;;  %742 = vst.msk [vmem:[#allocation2 + $0xd8] sm:$0xff] %vm324_vm0, %v708_v0  ;;  %v586_v9 = vpop.f32.mrf.mxu0  ;;  %v658_v12 = vpop.f32.mrf.mxu1  ;;  %v838_v63 = vld [vmem:[%s1463_s30 + $0x58] sm:$0xff]  ;;  %v856_v5 = vld [vmem:[%s1463_s30 + $0xe8] sm:$0xff] }
  0xfe   : > { %v868_v10 = vadd.f32 %v834_v62, %v800_v2  ;;  %v691_v11 = vadd.f32 %v586_v9, %v369_v1  ;;  %v709_v17 = vadd.f32 %v658_v12, %v387_v6  ;;  %v373_v2 = vld [vmem:[#allocation2 + $0x70] sm:$0xff] }
  0xff   : > { %v886_v13 = vadd.f32 %v852_v4, %v818_v7  ;;  %v760_v14 = vld [vmem:[#allocation2 + $0x40] sm:$0xff]  ;;  %v1132_v16 = vpop.f32.mrf.mxu0  ;;  %v1168_v22 = vpop.f32.mrf.mxu1 }
 0x100   : > { %902 = vst.msk [vmem:[%s1480_s9 + $0x38] sm:$0xff] %vm324_vm0, %v868_v10  ;;  %v801_v19 = vadd.f32 %v1469_v8, %v760_v14  ;;  %v778_v20 = vld [vmem:[#allocation2 + $0xd0] sm:$0xff]  ;;  %725 = vst.msk [vmem:[#allocation2 + $0x50] sm:$0xff] %vm324_vm0, %v691_v11  ;;  %v391_v7 = vld [vmem:[#allocation2 + $0x100] sm:$0xff] }
 0x101   : > { %920 = vst.msk [vmem:[%s1480_s9 + $0xc8] sm:$0xff] %vm324_vm0, %v886_v13  ;;  %v819_v24 = vadd.f32 %v1469_v8, %v778_v20  ;;  %743 = vst.msk [vmem:[#allocation2 + $0xe0] sm:$0xff] %vm324_vm0, %v709_v17  ;;  %v589_v25 = vpop.f32.mrf.mxu0  ;;  %v661_v28 = vpop.f32.mrf.mxu1  ;;  %v839_v16 = vld [vmem:[%s1463_s30 + $0x60] sm:$0xff]  ;;  %v857_v22 = vld [vmem:[%s1463_s30 + $0xf0] sm:$0xff] }
 0x102   : > { %v869_v26 = vadd.f32 %v835_v15, %v801_v19  ;;  %v692_v27 = vadd.f32 %v589_v25, %v370_v18  ;;  %v710_v33 = vadd.f32 %v661_v28, %v388_v23  ;;  %v374_v19 = vld [vmem:[#allocation2 + $0x78] sm:$0xff] }
 0x103   : > { %v887_v29 = vadd.f32 %v853_v21, %v819_v24  ;;  %v761_v30 = vld [vmem:[#allocation2 + $0x48] sm:$0xff]  ;;  %v1133_v32 = vpop.f32.mrf.mxu0  ;;  %v1169_v38 = vpop.f32.mrf.mxu1 }
 0x104   : > { %903 = vst.msk [vmem:[%s1480_s9 + $0x40] sm:$0xff] %vm324_vm0, %v869_v26  ;;  %v802_v35 = vadd.f32 %v1469_v8, %v761_v30  ;;  %v779_v36 = vld [vmem:[#allocation2 + $0xd8] sm:$0xff]  ;;  %726 = vst.msk [vmem:[#allocation2 + $0x58] sm:$0xff] %vm324_vm0, %v692_v27  ;;  %v392_v24 = vld [vmem:[#allocation2 + $0x108] sm:$0xff] }
 0x105   : > { %921 = vst.msk [vmem:[%s1480_s9 + $0xd0] sm:$0xff] %vm324_vm0, %v887_v29  ;;  %v820_v40 = vadd.f32 %v1469_v8, %v779_v36  ;;  %744 = vst.msk [vmem:[#allocation2 + $0xe8] sm:$0xff] %vm324_vm0, %v710_v33  ;;  %v594_v41 = vpop.f32.mrf.mxu0  ;;  %v666_v44 = vpop.f32.mrf.mxu1  ;;  %v840_v32 = vld [vmem:[%s1463_s30 + $0x68] sm:$0xff]  ;;  %v858_v38 = vld [vmem:[%s1463_s30 + $0xf8] sm:$0xff] }
 0x106   : > { %v870_v42 = vadd.f32 %v836_v31, %v802_v35  ;;  %v693_v43 = vadd.f32 %v594_v41, %v371_v34  ;;  %v711_v49 = vadd.f32 %v666_v44, %v389_v39  ;;  %v375_v35 = vld [vmem:[#allocation2 + $0x80] sm:$0xff] }
 0x107   : > { %v888_v45 = vadd.f32 %v854_v37, %v820_v40  ;;  %v762_v46 = vld [vmem:[#allocation2 + $0x50] sm:$0xff]  ;;  %v1136_v48 = vpop.f32.mrf.mxu0  ;;  %v1172_v54 = vpop.f32.mrf.mxu1 }
 0x108   : > { %904 = vst.msk [vmem:[%s1480_s9 + $0x48] sm:$0xff] %vm324_vm0, %v870_v42  ;;  %v803_v51 = vadd.f32 %v1469_v8, %v762_v46  ;;  %v780_v52 = vld [vmem:[#allocation2 + $0xe0] sm:$0xff]  ;;  %727 = vst.msk [vmem:[#allocation2 + $0x60] sm:$0xff] %vm324_vm0, %v693_v43  ;;  %v841_v46 = vld [vmem:[%s1463_s30 + $0x70] sm:$0xff] }
 0x109   : > { %922 = vst.msk [vmem:[%s1480_s9 + $0xd8] sm:$0xff] %vm324_vm0, %v888_v45  ;;  %v821_v56 = vadd.f32 %v1469_v8, %v780_v52  ;;  %745 = vst.msk [vmem:[#allocation2 + $0xf0] sm:$0xff] %vm324_vm0, %v711_v49  ;;  %v597_v57 = vpop.f32.mrf.mxu0  ;;  %v669_v60 = vpop.f32.mrf.mxu1  ;;  %v376_v48 = vld [vmem:[#allocation2 + $0x88] sm:$0xff] }
 0x10a   : > { %v871_v58 = vadd.f32 %v837_v47, %v803_v51  ;;  %v694_v59 = vadd.f32 %v597_v57, %v372_v50  ;;  %v712_v1 = vadd.f32 %v669_v60, %v390_v55  ;;  %v859_v51 = vld [vmem:[%s1463_s30 + $0x100] sm:$0xff] }
 0x10b   : > { %v889_v61 = vadd.f32 %v855_v53, %v821_v56  ;;  %v763_v62 = vld [vmem:[#allocation2 + $0x58] sm:$0xff]  ;;  %v1137_v0 = vpop.f32.mrf.mxu0  ;;  %v1173_v6 = vpop.f32.mrf.mxu1 }
 0x10c   : > { %905 = vst.msk [vmem:[%s1480_s9 + $0x50] sm:$0xff] %vm324_vm0, %v871_v58  ;;  %v804_v3 = vadd.f32 %v1469_v8, %v763_v62  ;;  %v781_v4 = vld [vmem:[#allocation2 + $0xe8] sm:$0xff]  ;;  %728 = vst.msk [vmem:[#allocation2 + $0x68] sm:$0xff] %vm324_vm0, %v694_v59  ;;  %v842_v58 = vld [vmem:[%s1463_s30 + $0x78] sm:$0xff] }
 0x10d   : > { %923 = vst.msk [vmem:[%s1480_s9 + $0xe0] sm:$0xff] %vm324_vm0, %v889_v61  ;;  %v822_v9 = vadd.f32 %v1469_v8, %v781_v4  ;;  %746 = vst.msk [vmem:[#allocation2 + $0xf8] sm:$0xff] %vm324_vm0, %v712_v1  ;;  %v602_v10 = vpop.f32.mrf.mxu0  ;;  %v674_v13 = vpop.f32.mrf.mxu1  ;;  %v860_v62 = vld [vmem:[%s1463_s30 + $0x108] sm:$0xff] }
 0x10e   : > { %v872_v11 = vadd.f32 %v838_v63, %v804_v3  ;;  %v695_v12 = vadd.f32 %v602_v10, %v373_v2  ;;  %v713_v18 = vadd.f32 %v674_v13, %v391_v7  ;;  %v843_v3 = vld [vmem:[%s1463_s30 + $0x80] sm:$0xff]  ;;  %v844_v7 = vld [vmem:[%s1463_s30 + $0x88] sm:$0xff] }
 0x10f   : > { %v890_v14 = vadd.f32 %v856_v5, %v822_v9  ;;  %v764_v15 = vld [vmem:[#allocation2 + $0x60] sm:$0xff]  ;;  %v1140_v17 = vpop.f32.mrf.mxu0  ;;  %v1176_v23 = vpop.f32.mrf.mxu1 }
 0x110   : > { %906 = vst.msk [vmem:[%s1480_s9 + $0x58] sm:$0xff] %vm324_vm0, %v872_v11  ;;  %v805_v20 = vadd.f32 %v1469_v8, %v764_v15  ;;  %v782_v21 = vld [vmem:[#allocation2 + $0xf0] sm:$0xff]  ;;  %729 = vst.msk [vmem:[#allocation2 + $0x70] sm:$0xff] %vm324_vm0, %v695_v12 }
 0x111   : > { %924 = vst.msk [vmem:[%s1480_s9 + $0xe8] sm:$0xff] %vm324_vm0, %v890_v14  ;;  %v823_v25 = vadd.f32 %v1469_v8, %v782_v21  ;;  %747 = vst.msk [vmem:[#allocation2 + $0x100] sm:$0xff] %vm324_vm0, %v713_v18  ;;  %v605_v26 = vpop.f32.mrf.mxu0  ;;  %v677_v29 = vpop.f32.mrf.mxu1 }
 0x112   : > { %v873_v27 = vadd.f32 %v839_v16, %v805_v20  ;;  %v696_v28 = vadd.f32 %v605_v26, %v374_v19  ;;  %v714_v34 = vadd.f32 %v677_v29, %v392_v24 }
 0x113   : > { %v891_v30 = vadd.f32 %v857_v22, %v823_v25  ;;  %v765_v31 = vld [vmem:[#allocation2 + $0x68] sm:$0xff]  ;;  %v1141_v33 = vpop.f32.mrf.mxu0  ;;  %v1177_v39 = vpop.f32.mrf.mxu1 }
 0x114   : > { %907 = vst.msk [vmem:[%s1480_s9 + $0x60] sm:$0xff] %vm324_vm0, %v873_v27  ;;  %v806_v36 = vadd.f32 %v1469_v8, %v765_v31  ;;  %v783_v37 = vld [vmem:[#allocation2 + $0xf8] sm:$0xff]  ;;  %730 = vst.msk [vmem:[#allocation2 + $0x78] sm:$0xff] %vm324_vm0, %v696_v28 }
 0x115   : > { %925 = vst.msk [vmem:[%s1480_s9 + $0xf0] sm:$0xff] %vm324_vm0, %v891_v30  ;;  %v824_v40 = vadd.f32 %v1469_v8, %v783_v37  ;;  %748 = vst.msk [vmem:[#allocation2 + $0x108] sm:$0xff] %vm324_vm0, %v714_v34  ;;  %v610_v41 = vpop.f32.mrf.mxu0 }
 0x116   : > { %v874_v42 = vadd.f32 %v840_v32, %v806_v36  ;;  %v697_v43 = vadd.f32 %v610_v41, %v375_v35 }
 0x117   : > { %v892_v44 = vadd.f32 %v858_v38, %v824_v40  ;;  %v766_v45 = vld [vmem:[#allocation2 + $0x70] sm:$0xff]  ;;  %v1144_v47 = vpop.f32.mrf.mxu0 }
 0x118   : > { %908 = vst.msk [vmem:[%s1480_s9 + $0x68] sm:$0xff] %vm324_vm0, %v874_v42  ;;  %v807_v49 = vadd.f32 %v1469_v8, %v766_v45  ;;  %v784_v50 = vld [vmem:[#allocation2 + $0x100] sm:$0xff]  ;;  %731 = vst.msk [vmem:[#allocation2 + $0x80] sm:$0xff] %vm324_vm0, %v697_v43 }
 0x119   : > { %926 = vst.msk [vmem:[%s1480_s9 + $0xf8] sm:$0xff] %vm324_vm0, %v892_v44  ;;  %v825_v52 = vadd.f32 %v1469_v8, %v784_v50  ;;  %v613_v53 = vpop.f32.mrf.mxu0 }
 0x11a   : > { %v875_v54 = vadd.f32 %v841_v46, %v807_v49  ;;  %v698_v55 = vadd.f32 %v613_v53, %v376_v48 }
 0x11b   : > { %v893_v56 = vadd.f32 %v859_v51, %v825_v52  ;;  %v767_v57 = vld [vmem:[#allocation2 + $0x78] sm:$0xff]  ;;  %v1145_v59 = vpop.f32.mrf.mxu0 }
 0x11c   : > { %909 = vst.msk [vmem:[%s1480_s9 + $0x70] sm:$0xff] %vm324_vm0, %v875_v54  ;;  %v808_v60 = vadd.f32 %v1469_v8, %v767_v57  ;;  %v785_v61 = vld [vmem:[#allocation2 + $0x108] sm:$0xff]  ;;  %732 = vst.msk [vmem:[#allocation2 + $0x88] sm:$0xff] %vm324_vm0, %v698_v55 }
 0x11d   : > { %927 = vst.msk [vmem:[%s1480_s9 + $0x100] sm:$0xff] %vm324_vm0, %v893_v56  ;;  %v826_v63 = vadd.f32 %v1469_v8, %v785_v61 }
 0x11e   : > { %v876_v0 = vadd.f32 %v842_v58, %v808_v60 }
 0x11f   : > { %v894_v1 = vadd.f32 %v860_v62, %v826_v63  ;;  %v768_v2 = vld [vmem:[#allocation2 + $0x80] sm:$0xff] }
 0x120   : > { %910 = vst.msk [vmem:[%s1480_s9 + $0x78] sm:$0xff] %vm324_vm0, %v876_v0  ;;  %v809_v4 = vadd.f32 %v1469_v8, %v768_v2 }
 0x121   : > { %928 = vst.msk [vmem:[%s1480_s9 + $0x108] sm:$0xff] %vm324_vm0, %v894_v1 }
 0x122   : > { %v877_v5 = vadd.f32 %v843_v3, %v809_v4 }
 0x123   : > { %v769_v6 = vld [vmem:[#allocation2 + $0x88] sm:$0xff] }
 0x124   : > { %911 = vst.msk [vmem:[%s1480_s9 + $0x80] sm:$0xff] %vm324_vm0, %v877_v5  ;;  %v810_v9 = vadd.f32 %v1469_v8, %v769_v6 }
 0x126   : > { %v878_v10 = vadd.f32 %v844_v7, %v810_v9 }
 0x128   : > { %912 = vst.msk [vmem:[%s1480_s9 + $0x88] sm:$0xff] %vm324_vm0, %v878_v10 }
 0x129 PF: > { %s14_s17 = sadd.s32 1, %s1232_s17   ;;  %s1658_s15 = smov %s1228_s16 }
 0x12a   : > { %p11_p5 = scmp.ge.s32.totalorder %s14_s17, 4   ;;  %s1659_s16 = smov %s1661_s18 }
 0x12c   :  { %13 = sbr.rel (!%p11_p5) target bundleno = 2 (0x2), region = 83 }

// kernel: _lambda_.12
= control target key start
LH: loop header
LB: loop body
LE: loop exit
PB: predicated region body
PF: predicated region fallthrough
CT: control target
= control target key end

     0   :  { %s1959_s18 = smov 0   ;;  %s1961_s19 = smov 0   ;;  %s2793_s0 = inlined_call_operand.vmem [shape: f32[544,32], index: 0, kind: input, shape index: {}]   ;;  %s2794_s1 = inlined_call_operand.vmem [shape: f32[1,32], index: 1, kind: input, shape index: {}]   ;;  %s2795_s2 = inlined_call_operand.vmem [shape: f32[1,32], index: 2, kind: input, shape index: {}]   ;;  %s2796_s3 = inlined_call_operand.vmem [shape: bf16[32,64], index: 3, kind: input, shape index: {}]   ;;  %s2797_s4 = inlined_call_operand.vmem [shape: f32[1,64], index: 4, kind: input, shape index: {}]   ;;  %s2798_s5 = inlined_call_operand.vmem [shape: f32[544,64], index: 5, kind: output, shape index: {}]  }
   0x1   :  { %s1963_s20 = smov 0  }
   0x2 LB: > { %s27_s21 = sadd.s32 1, %s1921_s19  ;;  %p1515_p0 = scmp.ge.s32.totalorder %s1925_s20, 1  ;;  %s1925_s20 = sphi %s1963_s20, %s15_s20   ;;  %s1921_s19 = sphi %s1961_s19, %s2800_s19   ;;  %s1917_s18 = sphi %s1959_s18, %s2799_s18  }
   0x3   : > { %p29_p1 = scmp.ge.s32.totalorder %s27_s21, 2  ;;  %p219_p2 = scmp.lt.s32.totalorder %s1925_s20, 3 }
   0x5   : > { %s2802_s21 = smov (%p29_p1, %s27_s21), 0  ;;  %p220_p3 = pnand %p1515_p0, %p219_p2 }
   0x6   : > { %s257_s22 = smul.u32 (!%p220_p3), 34, %s1917_s18 }
   0x7   : > { %223 = sbr.rel (%p220_p3) target bundleno = 633 (0x279), region = 40 }
   0x8   : > { %p258_p4 = scmp.lt.s32.totalorder (!%p220_p3), %s257_s22, 67 }
   0xc   : > { %s2804_s22 = smov (!%p258_p4, %s257_s22), 67  ;;  %vm314_vm0 = vcmask 261120   ;;  %vm1928_vm1 = vmmov 0   ;;  %vm1372_vm2 = vcmask 523264  }
   0xd   : > { %s1516_s23 = sshll.u32 %s2804_s22, 3 }
   0xe   : > { %s1985_s26 = scalar_lea.vmem %s2793_s0, %s1516_s23  ;;  %s2607_s14 = scalar_lea.vmem %s2798_s5, %s1516_s23 }
   0xf   : > { %v1988_v0 = vld [vmem:[%s1985_s26] sm:$0xff]  ;;  %v1991_v1 = vld [vmem:[%s1985_s26 + $0x10] sm:$0xff]  ;;  %v1994_v2 = vld [vmem:[%s1985_s26 + $0x8] sm:$0xff] }
  0x10   : > { %v315_v3 = vsel %vm314_vm0, %v1988_v0, 0.0  ;;  %v321_v4 = vsel %vm314_vm0, %v1991_v1, 0.0  ;;  %v2001_v5 = vld [vmem:[%s1985_s26 + $0x18] sm:$0xff]  ;;  %v318_v6 = vsel %vm314_vm0, %v1994_v2, 0.0  ;;  %v2008_v8 = vld [vmem:[%s1985_s26 + $0x90] sm:$0xff]  ;;  %v2018_v12 = vld [vmem:[%s1985_s26 + $0x20] sm:$0xff] }
  0x11   : > { %316 = vadd.xlane.f32.xlu0 %v315_v3  ;;  %322 = vadd.xlane.f32.xlu1 %v321_v4  ;;  %v324_v7 = vsel %vm314_vm0, %v2001_v5, 0.0  ;;  %v2011_v9 = vld [vmem:[%s1985_s26 + $0x98] sm:$0xff]  ;;  %v369_v10 = vsel %vm314_vm0, %v2008_v8, 0.0  ;;  %v2021_v13 = vld [vmem:[%s1985_s26 + $0x28] sm:$0xff]  ;;  %v327_v14 = vsel %vm314_vm0, %v2018_v12, 0.0  ;;  %v2028_v16 = vld [vmem:[%s1985_s26 + $0xa0] sm:$0xff] }
  0x12   : > { %v372_v11 = vsel %vm314_vm0, %v2011_v9, 0.0  ;;  %v330_v15 = vsel %vm314_vm0, %v2021_v13, 0.0  ;;  %v2031_v17 = vld [vmem:[%s1985_s26 + $0xa8] sm:$0xff]  ;;  %v375_v18 = vsel %vm314_vm0, %v2028_v16, 0.0  ;;  %v2038_v20 = vld [vmem:[%s1985_s26 + $0x30] sm:$0xff]  ;;  %v2041_v21 = vld [vmem:[%s1985_s26 + $0x38] sm:$0xff] }
  0x13   : > { %v378_v19 = vsel %vm314_vm0, %v2031_v17, 0.0  ;;  %v333_v22 = vsel %vm314_vm0, %v2038_v20, 0.0  ;;  %v336_v23 = vsel %vm314_vm0, %v2041_v21, 0.0  ;;  %v2048_v24 = vld [vmem:[%s1985_s26 + $0xb0] sm:$0xff]  ;;  %v2051_v25 = vld [vmem:[%s1985_s26 + $0xb8] sm:$0xff]  ;;  %v2058_v28 = vld [vmem:[%s1985_s26 + $0x40] sm:$0xff] }
  0x14   : > { %v381_v26 = vsel %vm314_vm0, %v2048_v24, 0.0  ;;  %v384_v27 = vsel %vm314_vm0, %v2051_v25, 0.0  ;;  %v2061_v29 = vld [vmem:[%s1985_s26 + $0x48] sm:$0xff]  ;;  %v339_v30 = vsel %vm314_vm0, %v2058_v28, 0.0  ;;  %v2068_v32 = vld [vmem:[%s1985_s26 + $0xc0] sm:$0xff]  ;;  %v2078_v36 = vld [vmem:[%s1985_s26 + $0x50] sm:$0xff] }
  0x15   : > { %319 = vadd.xlane.f32.xlu0 %v318_v6  ;;  %325 = vadd.xlane.f32.xlu1 %v324_v7  ;;  %v342_v31 = vsel %vm314_vm0, %v2061_v29, 0.0  ;;  %v2071_v33 = vld [vmem:[%s1985_s26 + $0xc8] sm:$0xff]  ;;  %v387_v34 = vsel %vm314_vm0, %v2068_v32, 0.0  ;;  %v2081_v37 = vld [vmem:[%s1985_s26 + $0x58] sm:$0xff]  ;;  %v345_v38 = vsel %vm314_vm0, %v2078_v36, 0.0  ;;  %v2088_v40 = vld [vmem:[%s1985_s26 + $0xd0] sm:$0xff] }
  0x16   : > { %v390_v35 = vsel %vm314_vm0, %v2071_v33, 0.0  ;;  %v348_v39 = vsel %vm314_vm0, %v2081_v37, 0.0  ;;  %v2091_v41 = vld [vmem:[%s1985_s26 + $0xd8] sm:$0xff]  ;;  %v393_v42 = vsel %vm314_vm0, %v2088_v40, 0.0  ;;  %v2098_v44 = vld [vmem:[%s1985_s26 + $0x60] sm:$0xff]  ;;  %v2101_v45 = vld [vmem:[%s1985_s26 + $0x68] sm:$0xff] }
  0x17   : > { %v396_v43 = vsel %vm314_vm0, %v2091_v41, 0.0  ;;  %v351_v46 = vsel %vm314_vm0, %v2098_v44, 0.0  ;;  %v354_v47 = vsel %vm314_vm0, %v2101_v45, 0.0  ;;  %v2108_v48 = vld [vmem:[%s1985_s26 + $0xe0] sm:$0xff]  ;;  %v2111_v49 = vld [vmem:[%s1985_s26 + $0xe8] sm:$0xff]  ;;  %v2118_v52 = vld [vmem:[%s1985_s26 + $0x70] sm:$0xff] }
  0x18   : > { %v399_v50 = vsel %vm314_vm0, %v2108_v48, 0.0  ;;  %v402_v51 = vsel %vm314_vm0, %v2111_v49, 0.0  ;;  %v2121_v53 = vld [vmem:[%s1985_s26 + $0x78] sm:$0xff]  ;;  %v357_v54 = vsel %vm314_vm0, %v2118_v52, 0.0  ;;  %v2128_v56 = vld [vmem:[%s1985_s26 + $0xf0] sm:$0xff]  ;;  %v2138_v60 = vld [vmem:[%s1985_s26 + $0x80] sm:$0xff] }
  0x19   : > { %370 = vadd.xlane.f32.xlu0 %v369_v10  ;;  %373 = vadd.xlane.f32.xlu1 %v372_v11  ;;  %v360_v55 = vsel %vm314_vm0, %v2121_v53, 0.0  ;;  %v2131_v57 = vld [vmem:[%s1985_s26 + $0xf8] sm:$0xff]  ;;  %v405_v58 = vsel %vm314_vm0, %v2128_v56, 0.0  ;;  %v2141_v61 = vld [vmem:[%s1985_s26 + $0x88] sm:$0xff]  ;;  %v363_v62 = vsel %vm314_vm0, %v2138_v60, 0.0  ;;  %v2148_v3 = vld [vmem:[%s1985_s26 + $0x100] sm:$0xff] }
  0x1a   : > { %v408_v59 = vsel %vm314_vm0, %v2131_v57, 0.0  ;;  %v366_v63 = vsel %vm314_vm0, %v2141_v61, 0.0  ;;  %v2151_v4 = vld [vmem:[%s1985_s26 + $0x108] sm:$0xff]  ;;  %v411_v6 = vsel %vm314_vm0, %v2148_v3, 0.0 }
  0x1b   : > { %v414_v7 = vsel %vm314_vm0, %v2151_v4, 0.0 }
  0x1d   : > { %328 = vadd.xlane.f32.xlu0 %v327_v14  ;;  %331 = vadd.xlane.f32.xlu1 %v330_v15 }
  0x21   : > { %376 = vadd.xlane.f32.xlu0 %v375_v18  ;;  %379 = vadd.xlane.f32.xlu1 %v378_v19 }
  0x25   : > { %334 = vadd.xlane.f32.xlu0 %v333_v22  ;;  %337 = vadd.xlane.f32.xlu1 %v336_v23 }
  0x29   : > { %382 = vadd.xlane.f32.xlu0 %v381_v26  ;;  %385 = vadd.xlane.f32.xlu1 %v384_v27 }
  0x2d   : > { %340 = vadd.xlane.f32.xlu0 %v339_v30  ;;  %343 = vadd.xlane.f32.xlu1 %v342_v31 }
  0x31   : > { %388 = vadd.xlane.f32.xlu0 %v387_v34  ;;  %391 = vadd.xlane.f32.xlu1 %v390_v35 }
  0x35   : > { %346 = vadd.xlane.f32.xlu0 %v345_v38  ;;  %349 = vadd.xlane.f32.xlu1 %v348_v39 }
  0x39   : > { %394 = vadd.xlane.f32.xlu0 %v393_v42  ;;  %397 = vadd.xlane.f32.xlu1 %v396_v43 }
  0x3d   : > { %352 = vadd.xlane.f32.xlu0 %v351_v46  ;;  %355 = vadd.xlane.f32.xlu1 %v354_v47 }
  0x41   : > { %400 = vadd.xlane.f32.xlu0 %v399_v50  ;;  %403 = vadd.xlane.f32.xlu1 %v402_v51 }
  0x45   : > { %358 = vadd.xlane.f32.xlu0 %v357_v54  ;;  %361 = vadd.xlane.f32.xlu1 %v360_v55 }
  0x49   : > { %406 = vadd.xlane.f32.xlu0 %v405_v58  ;;  %409 = vadd.xlane.f32.xlu1 %v408_v59 }
  0x4d   : > { %364 = vadd.xlane.f32.xlu0 %v363_v62  ;;  %367 = vadd.xlane.f32.xlu1 %v366_v63 }
  0x51   : > { %412 = vadd.xlane.f32.xlu0 %v411_v6  ;;  %415 = vadd.xlane.f32.xlu1 %v414_v7 }
  0x9a   : > { %v317_v10 = vpop.xlane.xlu0 %316  ;;  %v323_v11 = vpop.xlane.xlu1 %322 }
  0x9b   : > { %v418_v14 = vmul.f32 0.03125, %v317_v10  ;;  %v420_v15 = vmul.f32 0.03125, %v323_v11 }
  0x9d   : > { %v2158_v18 = vsub.f32 %v1988_v0, %v418_v14  ;;  %v2161_v19 = vsub.f32 %v1991_v1, %v420_v15 }
  0x9e   : > { %v320_v22 = vpop.xlane.xlu0 %319  ;;  %v326_v23 = vpop.xlane.xlu1 %325 }
  0x9f   : > { %v419_v26 = vmul.f32 0.03125, %v320_v22  ;;  %v421_v27 = vmul.f32 0.03125, %v326_v23  ;;  %v486_v30 = vmul.f32 %v2158_v18, %v2158_v18  ;;  %v488_v31 = vmul.f32 %v2161_v19, %v2161_v19 }
  0xa1   : > { %v2168_v34 = vsub.f32 %v1994_v2, %v419_v26  ;;  %v2171_v35 = vsub.f32 %v2001_v5, %v421_v27  ;;  %v520_v0 = vsel %vm314_vm0, %v486_v30, 0.0  ;;  %v526_v39 = vsel %vm314_vm0, %v488_v31, 0.0 }
  0xa2   : > { %521 = vadd.xlane.f32.xlu0 %v520_v0  ;;  %v371_v1 = vpop.xlane.xlu0 %370  ;;  %v374_v38 = vpop.xlane.xlu1 %373 }
  0xa3   : > { %v436_v42 = vmul.f32 0.03125, %v371_v1  ;;  %v437_v43 = vmul.f32 0.03125, %v374_v38  ;;  %v487_v46 = vmul.f32 %v2168_v34, %v2168_v34  ;;  %v489_v47 = vmul.f32 %v2171_v35, %v2171_v35 }
  0xa5   : > { %v2180_v2 = vsub.f32 %v2008_v8, %v436_v42  ;;  %v2183_v5 = vsub.f32 %v2011_v9, %v437_v43  ;;  %v523_v50 = vsel %vm314_vm0, %v487_v46, 0.0  ;;  %v529_v55 = vsel %vm314_vm0, %v489_v47, 0.0 }
  0xa6   : > { %527 = vadd.xlane.f32.xlu0 %v526_v39  ;;  %524 = vadd.xlane.f32.xlu1 %v523_v50  ;;  %v329_v51 = vpop.xlane.xlu0 %328  ;;  %v332_v54 = vpop.xlane.xlu1 %331 }
  0xa7   : > { %v422_v58 = vmul.f32 0.03125, %v329_v51  ;;  %v423_v59 = vmul.f32 0.03125, %v332_v54  ;;  %v504_v62 = vmul.f32 %v2180_v2, %v2180_v2  ;;  %v505_v8 = vmul.f32 %v2183_v5, %v2183_v5 }
  0xa9   : > { %v2192_v63 = vsub.f32 %v2018_v12, %v422_v58  ;;  %v2195_v9 = vsub.f32 %v2021_v13, %v423_v59  ;;  %v574_v6 = vsel %vm314_vm0, %v504_v62, 0.0  ;;  %v577_v11 = vsel %vm314_vm0, %v505_v8, 0.0 }
  0xaa   : > { %530 = vadd.xlane.f32.xlu1 %v529_v55  ;;  %575 = vadd.xlane.f32.xlu0 %v574_v6  ;;  %v377_v7 = vpop.xlane.xlu0 %376  ;;  %v380_v10 = vpop.xlane.xlu1 %379 }
  0xab   : > { %v438_v14 = vmul.f32 0.03125, %v377_v7  ;;  %v439_v15 = vmul.f32 0.03125, %v380_v10  ;;  %v490_v22 = vmul.f32 %v2192_v63, %v2192_v63  ;;  %v491_v12 = vmul.f32 %v2195_v9, %v2195_v9 }
  0xad   : > { %v2204_v23 = vsub.f32 %v2028_v16, %v438_v14  ;;  %v2207_v13 = vsub.f32 %v2031_v17, %v439_v15  ;;  %v532_v26 = vsel %vm314_vm0, %v490_v22, 0.0  ;;  %v535_v31 = vsel %vm314_vm0, %v491_v12, 0.0 }
  0xae   : > { %578 = vadd.xlane.f32.xlu1 %v577_v11  ;;  %533 = vadd.xlane.f32.xlu0 %v532_v26  ;;  %v335_v27 = vpop.xlane.xlu0 %334  ;;  %v338_v30 = vpop.xlane.xlu1 %337 }
  0xaf   : > { %v424_v0 = vmul.f32 0.03125, %v335_v27  ;;  %v425_v1 = vmul.f32 0.03125, %v338_v30  ;;  %v506_v38 = vmul.f32 %v2204_v23, %v2204_v23  ;;  %v507_v16 = vmul.f32 %v2207_v13, %v2207_v13 }
  0xb1   : > { %v2216_v39 = vsub.f32 %v2038_v20, %v424_v0  ;;  %v2219_v17 = vsub.f32 %v2041_v21, %v425_v1  ;;  %v580_v42 = vsel %vm314_vm0, %v506_v38, 0.0  ;;  %v583_v47 = vsel %vm314_vm0, %v507_v16, 0.0 }
  0xb2   : > { %536 = vadd.xlane.f32.xlu1 %v535_v31  ;;  %581 = vadd.xlane.f32.xlu0 %v580_v42  ;;  %v383_v43 = vpop.xlane.xlu0 %382  ;;  %v386_v46 = vpop.xlane.xlu1 %385 }
  0xb3   : > { %v440_v50 = vmul.f32 0.03125, %v383_v43  ;;  %v441_v51 = vmul.f32 0.03125, %v386_v46  ;;  %v492_v54 = vmul.f32 %v2216_v39, %v2216_v39  ;;  %v493_v20 = vmul.f32 %v2219_v17, %v2219_v17 }
  0xb5   : > { %v2228_v55 = vsub.f32 %v2048_v24, %v440_v50  ;;  %v2231_v21 = vsub.f32 %v2051_v25, %v441_v51  ;;  %v538_v58 = vsel %vm314_vm0, %v492_v54, 0.0  ;;  %v541_v8 = vsel %vm314_vm0, %v493_v20, 0.0 }
  0xb6   : > { %584 = vadd.xlane.f32.xlu1 %v583_v47  ;;  %539 = vadd.xlane.f32.xlu0 %v538_v58  ;;  %v341_v59 = vpop.xlane.xlu0 %340  ;;  %v344_v62 = vpop.xlane.xlu1 %343  ;;  %v1697_v58 = vld [vmem:[%s2796_s3 + $0x8] sm:$0xff]  }
  0xb7   : > { %v426_v6 = vmul.f32 0.03125, %v341_v59  ;;  %v427_v7 = vmul.f32 0.03125, %v344_v62  ;;  %v508_v10 = vmul.f32 %v2228_v55, %v2228_v55  ;;  %v509_v24 = vmul.f32 %v2231_v21, %v2231_v21 }
  0xb9   : > { %v2240_v11 = vsub.f32 %v2058_v28, %v426_v6  ;;  %v2243_v25 = vsub.f32 %v2061_v29, %v427_v7  ;;  %v586_v14 = vsel %vm314_vm0, %v508_v10, 0.0  ;;  %v589_v12 = vsel %vm314_vm0, %v509_v24, 0.0 }
  0xba   : > { %542 = vadd.xlane.f32.xlu1 %v541_v8  ;;  %587 = vadd.xlane.f32.xlu0 %v586_v14  ;;  %v389_v15 = vpop.xlane.xlu0 %388  ;;  %v392_v22 = vpop.xlane.xlu1 %391  ;;  %v1927_v8 = vmov 0.0  }
  0xbb   : > { %v442_v26 = vmul.f32 0.03125, %v389_v15  ;;  %v443_v27 = vmul.f32 0.03125, %v392_v22  ;;  %v494_v30 = vmul.f32 %v2240_v11, %v2240_v11  ;;  %v495_v28 = vmul.f32 %v2243_v25, %v2243_v25  ;;  %1595 = vmatprep.subr.bf16.mxu0 %v1927_v8  ;;  %1667 = vmatprep.subr.bf16.mxu1 %v1927_v8 }
  0xbc   : > { %1596 = vmatpush3.bf16.msra.mxu0 %v1697_v58  ;;  %1669 = vmatpush3.bf16.msra.mxu1 %v1697_v58 }
  0xbd   : > { %v2252_v31 = vsub.f32 %v2068_v32, %v442_v26  ;;  %v2255_v29 = vsub.f32 %v2071_v33, %v443_v27  ;;  %v544_v0 = vsel %vm314_vm0, %v494_v30, 0.0  ;;  %v547_v16 = vsel %vm314_vm0, %v495_v28, 0.0  ;;  %1597 = vmatprep.subr.bf16.mxu0 %v1927_v8  ;;  %1668 = vmatprep.subr.bf16.mxu1 %v1927_v8 }
  0xbe   : > { %590 = vadd.xlane.f32.xlu1 %v589_v12  ;;  %545 = vadd.xlane.f32.xlu0 %v544_v0  ;;  %v347_v1 = vpop.xlane.xlu0 %346  ;;  %v350_v38 = vpop.xlane.xlu1 %349 }
  0xbf   : > { %v428_v42 = vmul.f32 0.03125, %v347_v1  ;;  %v429_v43 = vmul.f32 0.03125, %v350_v38  ;;  %v510_v46 = vmul.f32 %v2252_v31, %v2252_v31  ;;  %v511_v32 = vmul.f32 %v2255_v29, %v2255_v29  ;;  %1599 = vmatprep.mubr.msk.bf16.mxu0 %vm1928_vm1, %v1927_v8  ;;  %1635 = vmatprep.mubr.msk.bf16.mxu1 %vm1928_vm1, %v1927_v8 }
  0xc1   : > { %v2264_v47 = vsub.f32 %v2078_v36, %v428_v42  ;;  %v2267_v33 = vsub.f32 %v2081_v37, %v429_v43  ;;  %v592_v50 = vsel %vm314_vm0, %v510_v46, 0.0  ;;  %v595_v20 = vsel %vm314_vm0, %v511_v32, 0.0 }
  0xc2   : > { %548 = vadd.xlane.f32.xlu1 %v547_v16  ;;  %593 = vadd.xlane.f32.xlu0 %v592_v50  ;;  %v395_v51 = vpop.xlane.xlu0 %394  ;;  %v398_v54 = vpop.xlane.xlu1 %397 }
  0xc3   : > { %v444_v59 = vmul.f32 0.03125, %v395_v51  ;;  %v445_v62 = vmul.f32 0.03125, %v398_v54  ;;  %v496_v36 = vmul.f32 %v2264_v47, %v2264_v47  ;;  %v497_v37 = vmul.f32 %v2267_v33, %v2267_v33 }
  0xc5   : > { %v2281_v6 = vsub.f32 %v2088_v40, %v444_v59  ;;  %v2284_v7 = vsub.f32 %v2091_v41, %v445_v62  ;;  %v550_v10 = vsel %vm314_vm0, %v496_v36, 0.0  ;;  %v553_v15 = vsel %vm314_vm0, %v497_v37, 0.0  ;;  %v1698_v40 = vld [vmem:[%s2796_s3] sm:$0xff]  }
  0xc6   : > { %596 = vadd.xlane.f32.xlu1 %v595_v20  ;;  %551 = vadd.xlane.f32.xlu0 %v550_v10  ;;  %v353_v24 = vpop.xlane.xlu0 %352  ;;  %v356_v14 = vpop.xlane.xlu1 %355 }
  0xc7   : > { %v430_v22 = vmul.f32 0.03125, %v353_v24  ;;  %v431_v12 = vmul.f32 0.03125, %v356_v14  ;;  %v512_v41 = vmul.f32 %v2281_v6, %v2281_v6  ;;  %v513_v26 = vmul.f32 %v2284_v7, %v2284_v7  ;;  %1598 = vmatpush3.bf16.msra.mxu0 %v1698_v40  ;;  %1670 = vmatpush3.bf16.msra.mxu1 %v1698_v40 }
  0xc9   : > { %v2298_v27 = vsub.f32 %v2098_v44, %v430_v22  ;;  %v2301_v30 = vsub.f32 %v2101_v45, %v431_v12  ;;  %v598_v28 = vsel %vm314_vm0, %v512_v41, 0.0  ;;  %v601_v38 = vsel %vm314_vm0, %v513_v26, 0.0 }
  0xca   : > { %554 = vadd.xlane.f32.xlu1 %v553_v15  ;;  %599 = vadd.xlane.f32.xlu0 %v598_v28  ;;  %v401_v0 = vpop.xlane.xlu0 %400  ;;  %v404_v1 = vpop.xlane.xlu1 %403 }
  0xcb   : > { %v446_v16 = vmul.f32 0.03125, %v401_v0  ;;  %v447_v42 = vmul.f32 0.03125, %v404_v1  ;;  %v498_v43 = vmul.f32 %v2298_v27, %v2298_v27  ;;  %v499_v44 = vmul.f32 %v2301_v30, %v2301_v30 }
  0xcd   : > { %v2314_v45 = vsub.f32 %v2108_v48, %v446_v16  ;;  %v2317_v46 = vsub.f32 %v2111_v49, %v447_v42  ;;  %v556_v32 = vsel %vm314_vm0, %v498_v43, 0.0  ;;  %v559_v54 = vsel %vm314_vm0, %v499_v44, 0.0 }
  0xce   : > { %602 = vadd.xlane.f32.xlu1 %v601_v38  ;;  %557 = vadd.xlane.f32.xlu0 %v556_v32  ;;  %v359_v50 = vpop.xlane.xlu0 %358  ;;  %v362_v51 = vpop.xlane.xlu1 %361 }
  0xcf   : > { %v432_v20 = vmul.f32 0.03125, %v359_v50  ;;  %v433_v58 = vmul.f32 0.03125, %v362_v51  ;;  %v514_v59 = vmul.f32 %v2314_v45, %v2314_v45  ;;  %v515_v48 = vmul.f32 %v2317_v46, %v2317_v46 }
  0xd1   : > { %v2326_v62 = vsub.f32 %v2118_v52, %v432_v20  ;;  %v2329_v49 = vsub.f32 %v2121_v53, %v433_v58  ;;  %v604_v36 = vsel %vm314_vm0, %v514_v59, 0.0  ;;  %v607_v24 = vsel %vm314_vm0, %v515_v48, 0.0 }
  0xd2   : > { %560 = vadd.xlane.f32.xlu1 %v559_v54  ;;  %605 = vadd.xlane.f32.xlu0 %v604_v36  ;;  %v407_v37 = vpop.xlane.xlu0 %406  ;;  %v410_v10 = vpop.xlane.xlu1 %409 }
  0xd3   : > { %v448_v14 = vmul.f32 0.03125, %v407_v37  ;;  %v449_v15 = vmul.f32 0.03125, %v410_v10  ;;  %v500_v40 = vmul.f32 %v2326_v62, %v2326_v62  ;;  %v501_v52 = vmul.f32 %v2329_v49, %v2329_v49 }
  0xd5   : > { %v2338_v22 = vsub.f32 %v2128_v56, %v448_v14  ;;  %v2341_v53 = vsub.f32 %v2131_v57, %v449_v15  ;;  %v562_v12 = vsel %vm314_vm0, %v500_v40, 0.0  ;;  %v565_v28 = vsel %vm314_vm0, %v501_v52, 0.0 }
  0xd6   : > { %608 = vadd.xlane.f32.xlu1 %v607_v24  ;;  %563 = vadd.xlane.f32.xlu0 %v562_v12  ;;  %v365_v41 = vpop.xlane.xlu0 %364  ;;  %v368_v26 = vpop.xlane.xlu1 %367 }
  0xd7   : > { %v434_v0 = vmul.f32 0.03125, %v365_v41  ;;  %v435_v1 = vmul.f32 0.03125, %v368_v26  ;;  %v516_v38 = vmul.f32 %v2338_v22, %v2338_v22  ;;  %v517_v56 = vmul.f32 %v2341_v53, %v2341_v53 }
  0xd9   : > { %v2350_v16 = vsub.f32 %v2138_v60, %v434_v0  ;;  %v2353_v57 = vsub.f32 %v2141_v61, %v435_v1  ;;  %v610_v42 = vsel %vm314_vm0, %v516_v38, 0.0  ;;  %v613_v32 = vsel %vm314_vm0, %v517_v56, 0.0 }
  0xda   : > { %566 = vadd.xlane.f32.xlu1 %v565_v28  ;;  %611 = vadd.xlane.f32.xlu0 %v610_v42  ;;  %v413_v43 = vpop.xlane.xlu0 %412  ;;  %v416_v44 = vpop.xlane.xlu1 %415 }
  0xdb   : > { %v450_v50 = vmul.f32 0.03125, %v413_v43  ;;  %v451_v51 = vmul.f32 0.03125, %v416_v44  ;;  %v502_v54 = vmul.f32 %v2350_v16, %v2350_v16  ;;  %v503_v60 = vmul.f32 %v2353_v57, %v2353_v57 }
  0xdd   : > { %v2362_v20 = vsub.f32 %v2148_v3, %v450_v50  ;;  %v2365_v61 = vsub.f32 %v2151_v4, %v451_v51  ;;  %v568_v58 = vsel %vm314_vm0, %v502_v54, 0.0  ;;  %v571_v59 = vsel %vm314_vm0, %v503_v60, 0.0 }
  0xde   : > { %614 = vadd.xlane.f32.xlu1 %v613_v32  ;;  %569 = vadd.xlane.f32.xlu0 %v568_v58 }
  0xdf   : > { %v518_v48 = vmul.f32 %v2362_v20, %v2362_v20  ;;  %v519_v36 = vmul.f32 %v2365_v61, %v2365_v61 }
  0xe1   : > { %v616_v37 = vsel %vm314_vm0, %v518_v48, 0.0  ;;  %v619_v3 = vsel %vm314_vm0, %v519_v36, 0.0 }
  0xe2   : > { %572 = vadd.xlane.f32.xlu1 %v571_v59  ;;  %617 = vadd.xlane.f32.xlu0 %v616_v37 }
  0xe6   : > { %620 = vadd.xlane.f32.xlu1 %v619_v3 }
 0x12b   : > { %v522_v4 = vpop.xlane.xlu0 %521 }
 0x12c   : > { %v622_v10 = vmul.f32 0.03125, %v522_v4  ;;  %v2379_v4 = vld [vmem:[%s2794_s1] ss:$0 sm:$0xff] }
 0x12e   : > { %v656_v24 = vadd.f32 1e-05, %v622_v10 }
 0x12f   : > { %v525_v14 = vpop.xlane.xlu1 %524  ;;  %v528_v15 = vpop.xlane.xlu0 %527 }
 0x130   : > { %1699 = vrsqrt.f32 %v656_v24  ;;  %v623_v40 = vmul.f32 0.03125, %v525_v14  ;;  %v624_v52 = vmul.f32 0.03125, %v528_v15 }
 0x132   : > { %v657_v12 = vadd.f32 1e-05, %v623_v40  ;;  %v658_v41 = vadd.f32 1e-05, %v624_v52 }
 0x133   : > { %v531_v26 = vpop.xlane.xlu1 %530  ;;  %v576_v28 = vpop.xlane.xlu0 %575 }
 0x134   : > { %1701 = vrsqrt.f32 %v657_v12  ;;  %v625_v0 = vmul.f32 0.03125, %v531_v26  ;;  %v640_v1 = vmul.f32 0.03125, %v576_v28 }
 0x135   : > { %1703 = vrsqrt.f32 %v658_v41 }
 0x136   : > { %v659_v38 = vadd.f32 1e-05, %v625_v0  ;;  %v674_v56 = vadd.f32 1e-05, %v640_v1 }
 0x137   : > { %v579_v42 = vpop.xlane.xlu1 %578  ;;  %v534_v43 = vpop.xlane.xlu0 %533 }
 0x138   : > { %1705 = vrsqrt.f32 %v659_v38  ;;  %v641_v44 = vmul.f32 0.03125, %v579_v42  ;;  %v626_v32 = vmul.f32 0.03125, %v534_v43 }
 0x139   : > { %1707 = vrsqrt.f32 %v674_v56 }
 0x13a   : > { %v675_v50 = vadd.f32 1e-05, %v641_v44  ;;  %v660_v51 = vadd.f32 1e-05, %v626_v32 }
 0x13b   : > { %v537_v54 = vpop.xlane.xlu1 %536  ;;  %v582_v60 = vpop.xlane.xlu0 %581 }
 0x13c   : > { %1709 = vrsqrt.f32 %v675_v50  ;;  %v627_v58 = vmul.f32 0.03125, %v537_v54  ;;  %v642_v59 = vmul.f32 0.03125, %v582_v60 }
 0x13d   : > { %v1700_v48 = vpop.eup %1699  ;;  %1711 = vrsqrt.f32 %v660_v51 }
 0x13e   : > { %v661_v36 = vadd.f32 1e-05, %v627_v58  ;;  %v676_v37 = vadd.f32 1e-05, %v642_v59  ;;  %v724_v3 = vmul.f32 %v1700_v48, %v2158_v18  ;;  %v2386_v18 = vld [vmem:[%s2795_s2] ss:$0 sm:$0xff] }
 0x13f   : > { %v585_v10 = vpop.xlane.xlu1 %584  ;;  %v540_v24 = vpop.xlane.xlu0 %539 }
 0x140   : > { %1713 = vrsqrt.f32 %v661_v36  ;;  %v643_v14 = vmul.f32 0.03125, %v585_v10  ;;  %v628_v15 = vmul.f32 0.03125, %v540_v24  ;;  %v765_v52 = vmul.f32 %v2379_v4, %v724_v3 }
 0x141   : > { %v1702_v40 = vpop.eup %1701  ;;  %1715 = vrsqrt.f32 %v676_v37 }
 0x142   : > { %v1704_v12 = vpop.eup %1703  ;;  %v677_v41 = vadd.f32 1e-05, %v643_v14  ;;  %v662_v26 = vadd.f32 1e-05, %v628_v15  ;;  %v725_v28 = vmul.f32 %v1702_v40, %v2168_v34  ;;  %v806_v44 = vadd.f32 %v2386_v18, %v765_v52 }
 0x143   : > { %v543_v0 = vpop.xlane.xlu1 %542  ;;  %v588_v1 = vpop.xlane.xlu0 %587  ;;  %v726_v32 = vmul.f32 %v1704_v12, %v2161_v19 }
 0x144   : > { %1717 = vrsqrt.f32 %v677_v41  ;;  %v629_v38 = vmul.f32 0.03125, %v543_v0  ;;  %v644_v56 = vmul.f32 0.03125, %v588_v1  ;;  %v766_v42 = vmul.f32 %v2379_v4, %v725_v28 }
 0x145   : > { %v1706_v43 = vpop.eup %1705  ;;  %1719 = vrsqrt.f32 %v662_v26  ;;  %v767_v24 = vmul.f32 %v2379_v4, %v726_v32 }
 0x146   : > { %v1708_v50 = vpop.eup %1707  ;;  %v663_v34 = vadd.f32 1e-05, %v629_v38  ;;  %v678_v51 = vadd.f32 1e-05, %v644_v56  ;;  %v807_v54 = vadd.f32 %v2386_v18, %v766_v42  ;;  %v727_v60 = vmul.f32 %v1706_v43, %v2171_v35 }
 0x147   : > { %v591_v58 = vpop.xlane.xlu1 %590  ;;  %v546_v59 = vpop.xlane.xlu0 %545  ;;  %v742_v48 = vmul.f32 %v1708_v50, %v2180_v2  ;;  %v808_v38 = vadd.f32 %v2386_v18, %v767_v24 }
 0x148   : > { %1721 = vrsqrt.f32 %v663_v34  ;;  %v645_v36 = vmul.f32 0.03125, %v591_v58  ;;  %v630_v37 = vmul.f32 0.03125, %v546_v59  ;;  %v840_v3 = vpack.c.bf16 %v807_v54, %v806_v44 }
 0x149   : > { %v1710_v10 = vpop.eup %1709  ;;  %1723 = vrsqrt.f32 %v678_v51  ;;  %v768_v19 = vmul.f32 %v2379_v4, %v727_v60  ;;  %v783_v14 = vmul.f32 %v2379_v4, %v742_v48 }
 0x14a   : > { %v1712_v15 = vpop.eup %1711  ;;  %v679_v40 = vadd.f32 1e-05, %v645_v36  ;;  %v664_v52 = vadd.f32 1e-05, %v630_v37  ;;  %1600 = vmatmul.mubr.msk.bf16.vlgmr.msra.gmra.mxu0 %vm314_vm0, %v840_v3  ;;  %v743_v35 = vmul.f32 %v1710_v10, %v2183_v5 }
 0x14b   : > { %v549_v2 = vpop.xlane.xlu1 %548  ;;  %v594_v12 = vpop.xlane.xlu0 %593  ;;  %1603 = vmatprep.mubr.msk.bf16.mxu0 %vm1928_vm1, %v1927_v8  ;;  %v809_v41 = vadd.f32 %v2386_v18, %v768_v19  ;;  %v824_v56 = vadd.f32 %v2386_v18, %v783_v14  ;;  %v728_v5 = vmul.f32 %v1712_v15, %v2192_v63 }
 0x14c   : > { %1725 = vrsqrt.f32 %v679_v40  ;;  %v631_v26 = vmul.f32 0.03125, %v549_v2  ;;  %v646_v28 = vmul.f32 0.03125, %v594_v12  ;;  %v784_v0 = vmul.f32 %v2379_v4, %v743_v35 }
 0x14d   : > { %v1714_v1 = vpop.eup %1713  ;;  %1727 = vrsqrt.f32 %v664_v52  ;;  %v841_v54 = vpack.c.bf16 %v809_v41, %v808_v38  ;;  %v769_v63 = vmul.f32 %v2379_v4, %v728_v5 }
 0x14e   : > { %v1716_v42 = vpop.eup %1715  ;;  %v665_v43 = vadd.f32 1e-05, %v631_v26  ;;  %v680_v44 = vadd.f32 1e-05, %v646_v28  ;;  %v825_v32 = vadd.f32 %v2386_v18, %v784_v0  ;;  %v729_v50 = vmul.f32 %v1714_v1, %v2195_v9 }
 0x14f   : > { %v597_v34 = vpop.xlane.xlu1 %596  ;;  %v552_v51 = vpop.xlane.xlu0 %551  ;;  %v744_v60 = vmul.f32 %v1716_v42, %v2204_v23  ;;  %v810_v12 = vadd.f32 %v2386_v18, %v769_v63 }
 0x150   : > { %1729 = vrsqrt.f32 %v665_v43  ;;  %v647_v58 = vmul.f32 0.03125, %v597_v34  ;;  %v632_v59 = vmul.f32 0.03125, %v552_v51  ;;  %v849_v48 = vpack.c.bf16 %v825_v32, %v824_v56 }
 0x151   : > { %v1718_v36 = vpop.eup %1717  ;;  %1731 = vrsqrt.f32 %v680_v44  ;;  %v770_v37 = vmul.f32 %v2379_v4, %v729_v50  ;;  %v785_v3 = vmul.f32 %v2379_v4, %v744_v60 }
 0x152   : > { %v1720_v10 = vpop.eup %1719  ;;  %v681_v24 = vadd.f32 1e-05, %v647_v58  ;;  %v666_v9 = vadd.f32 1e-05, %v632_v59  ;;  %1604 = vmatmul.mubr.msk.bf16.gmra.mxu0 %vm314_vm0, %v841_v54  ;;  %1636 = vmatmul.mubr.msk.bf16.vlgmr.msra.gmra.mxu1 %vm314_vm0, %v849_v48  ;;  %v745_v23 = vmul.f32 %v1718_v36, %v2207_v13 }
 0x153   : > { %v555_v19 = vpop.xlane.xlu1 %554  ;;  %v600_v14 = vpop.xlane.xlu0 %599  ;;  %1607 = vmatprep.mubr.msk.bf16.mxu0 %vm1928_vm1, %v1927_v8  ;;  %1639 = vmatprep.mubr.msk.bf16.mxu1 %vm1928_vm1, %v1927_v8  ;;  %v811_v15 = vadd.f32 %v2386_v18, %v770_v37  ;;  %v826_v13 = vadd.f32 %v2386_v18, %v785_v3  ;;  %v730_v41 = vmul.f32 %v1720_v10, %v2216_v39 }
 0x154   : > { %1733 = vrsqrt.f32 %v681_v24  ;;  %v633_v40 = vmul.f32 0.03125, %v555_v19  ;;  %v648_v52 = vmul.f32 0.03125, %v600_v14  ;;  %v786_v35 = vmul.f32 %v2379_v4, %v745_v23 }
 0x155   : > { %v1722_v2 = vpop.eup %1721  ;;  %1735 = vrsqrt.f32 %v666_v9  ;;  %v842_v42 = vpack.c.bf16 %v811_v15, %v810_v12  ;;  %v771_v39 = vmul.f32 %v2379_v4, %v730_v41 }
 0x156   : > { %v1724_v26 = vpop.eup %1723  ;;  %v667_v28 = vadd.f32 1e-05, %v633_v40  ;;  %v682_v0 = vadd.f32 1e-05, %v648_v52  ;;  %v827_v1 = vadd.f32 %v2386_v18, %v786_v35  ;;  %v731_v38 = vmul.f32 %v1722_v2, %v2219_v17 }
 0x157   : > { %v603_v56 = vpop.xlane.xlu1 %602  ;;  %v558_v5 = vpop.xlane.xlu0 %557  ;;  %v746_v43 = vmul.f32 %v1724_v26, %v2228_v55  ;;  %v812_v24 = vadd.f32 %v2386_v18, %v771_v39 }
 0x158   : > { %1737 = vrsqrt.f32 %v667_v28  ;;  %v649_v44 = vmul.f32 0.03125, %v603_v56  ;;  %v634_v32 = vmul.f32 0.03125, %v558_v5  ;;  %v850_v50 = vpack.c.bf16 %v827_v1, %v826_v13 }
 0x159   : > { %v1726_v34 = vpop.eup %1725  ;;  %1739 = vrsqrt.f32 %v682_v0  ;;  %v772_v51 = vmul.f32 %v2379_v4, %v731_v38  ;;  %v787_v54 = vmul.f32 %v2379_v4, %v746_v43 }
 0x15a   : > { %v1728_v60 = vpop.eup %1727  ;;  %v683_v58 = vadd.f32 1e-05, %v649_v44  ;;  %v668_v17 = vadd.f32 1e-05, %v634_v32  ;;  %1608 = vmatmul.mubr.msk.bf16.gmra.mxu0 %vm314_vm0, %v842_v42  ;;  %1640 = vmatmul.mubr.msk.bf16.gmra.mxu1 %vm314_vm0, %v850_v50  ;;  %v747_v55 = vmul.f32 %v1726_v34, %v2231_v21 }
 0x15b   : > { %v561_v59 = vpop.xlane.xlu1 %560  ;;  %v606_v48 = vpop.xlane.xlu0 %605  ;;  %1611 = vmatprep.mubr.msk.bf16.mxu0 %vm1928_vm1, %v1927_v8  ;;  %1643 = vmatprep.mubr.msk.bf16.mxu1 %vm1928_vm1, %v1927_v8  ;;  %v813_v36 = vadd.f32 %v2386_v18, %v772_v51  ;;  %v828_v21 = vadd.f32 %v2386_v18, %v787_v54  ;;  %v732_v9 = vmul.f32 %v1728_v60, %v2240_v11 }
 0x15c   : > { %1741 = vrsqrt.f32 %v683_v58  ;;  %v635_v63 = vmul.f32 0.03125, %v561_v59  ;;  %v650_v37 = vmul.f32 0.03125, %v606_v48  ;;  %v788_v3 = vmul.f32 %v2379_v4, %v747_v55 }
 0x15d   : > { %v1730_v10 = vpop.eup %1729  ;;  %1743 = vrsqrt.f32 %v668_v17  ;;  %v843_v2 = vpack.c.bf16 %v813_v36, %v812_v24  ;;  %v773_v11 = vmul.f32 %v2379_v4, %v732_v9 }
 0x15e   : > { %v1732_v23 = vpop.eup %1731  ;;  %v669_v19 = vadd.f32 1e-05, %v635_v63  ;;  %v684_v14 = vadd.f32 1e-05, %v650_v37  ;;  %v829_v15 = vadd.f32 %v2386_v18, %v788_v3  ;;  %v733_v40 = vmul.f32 %v1730_v10, %v2243_v25 }
 0x15f   : > { %v609_v52 = vpop.xlane.xlu1 %608  ;;  %v564_v35 = vpop.xlane.xlu0 %563  ;;  %v748_v12 = vmul.f32 %v1732_v23, %v2252_v31  ;;  %v814_v39 = vadd.f32 %v2386_v18, %v773_v11 }
 0x160   : > { %1745 = vrsqrt.f32 %v669_v19  ;;  %v651_v13 = vmul.f32 0.03125, %v609_v52  ;;  %v636_v41 = vmul.f32 0.03125, %v564_v35  ;;  %v851_v26 = vpack.c.bf16 %v829_v15, %v828_v21 }
 0x161   : > { %v1734_v28 = vpop.eup %1733  ;;  %1747 = vrsqrt.f32 %v684_v14  ;;  %v774_v0 = vmul.f32 %v2379_v4, %v733_v40  ;;  %v789_v1 = vmul.f32 %v2379_v4, %v748_v12 }
 0x162   : > { %v1736_v38 = vpop.eup %1735  ;;  %v685_v56 = vadd.f32 1e-05, %v651_v13  ;;  %v670_v25 = vadd.f32 1e-05, %v636_v41  ;;  %1612 = vmatmul.mubr.msk.bf16.gmra.mxu0 %vm314_vm0, %v843_v2  ;;  %1644 = vmatmul.mubr.msk.bf16.gmra.mxu1 %vm314_vm0, %v851_v26  ;;  %v749_v31 = vmul.f32 %v1734_v28, %v2255_v29 }
 0x163   : > { %v567_v5 = vpop.xlane.xlu1 %566  ;;  %v612_v42 = vpop.xlane.xlu0 %611  ;;  %1615 = vmatprep.mubr.msk.bf16.mxu0 %vm1928_vm1, %v1927_v8  ;;  %1647 = vmatprep.mubr.msk.bf16.mxu1 %vm1928_vm1, %v1927_v8  ;;  %v815_v43 = vadd.f32 %v2386_v18, %v774_v0  ;;  %v830_v29 = vadd.f32 %v2386_v18, %v789_v1  ;;  %v734_v51 = vmul.f32 %v1736_v38, %v2264_v47 }
 0x164   : > { %1749 = vrsqrt.f32 %v685_v56  ;;  %v637_v44 = vmul.f32 0.03125, %v567_v5  ;;  %v652_v32 = vmul.f32 0.03125, %v612_v42  ;;  %v790_v50 = vmul.f32 %v2379_v4, %v749_v31 }
 0x165   : > { %v1738_v34 = vpop.eup %1737  ;;  %1751 = vrsqrt.f32 %v670_v25  ;;  %v844_v36 = vpack.c.bf16 %v815_v43, %v814_v39  ;;  %v775_v47 = vmul.f32 %v2379_v4, %v734_v51 }
 0x166   : > { %v1740_v54 = vpop.eup %1739  ;;  %v671_v60 = vadd.f32 1e-05, %v637_v44  ;;  %v686_v58 = vadd.f32 1e-05, %v652_v32  ;;  %v831_v17 = vadd.f32 %v2386_v18, %v790_v50  ;;  %v735_v55 = vmul.f32 %v1738_v34, %v2267_v33 }
 0x167   : > { %v615_v59 = vpop.xlane.xlu1 %614  ;;  %v570_v48 = vpop.xlane.xlu0 %569  ;;  %v750_v63 = vmul.f32 %v1740_v54, %v2281_v6  ;;  %v816_v13 = vadd.f32 %v2386_v18, %v775_v47 }
 0x168   : > { %1753 = vrsqrt.f32 %v671_v60  ;;  %v653_v37 = vmul.f32 0.03125, %v615_v59  ;;  %v638_v3 = vmul.f32 0.03125, %v570_v48  ;;  %v852_v10 = vpack.c.bf16 %v831_v17, %v830_v29 }
 0x169   : > { %v1742_v24 = vpop.eup %1741  ;;  %1755 = vrsqrt.f32 %v686_v58  ;;  %v776_v21 = vmul.f32 %v2379_v4, %v735_v55  ;;  %v791_v9 = vmul.f32 %v2379_v4, %v750_v63 }
 0x16a   : > { %v1744_v23 = vpop.eup %1743  ;;  %v687_v19 = vadd.f32 1e-05, %v653_v37  ;;  %v672_v33 = vadd.f32 1e-05, %v638_v3  ;;  %1616 = vmatmul.mubr.msk.bf16.gmra.mxu0 %vm314_vm0, %v844_v36  ;;  %1648 = vmatmul.mubr.msk.bf16.gmra.mxu1 %vm314_vm0, %v852_v10  ;;  %v751_v6 = vmul.f32 %v1742_v24, %v2284_v7 }
 0x16b   : > { %v573_v14 = vpop.xlane.xlu1 %572  ;;  %v618_v15 = vpop.xlane.xlu0 %617  ;;  %1619 = vmatprep.mubr.msk.bf16.mxu0 %vm1928_vm1, %v1927_v8  ;;  %1651 = vmatprep.mubr.msk.bf16.mxu1 %vm1928_vm1, %v1927_v8  ;;  %v817_v40 = vadd.f32 %v2386_v18, %v776_v21  ;;  %v832_v7 = vadd.f32 %v2386_v18, %v791_v9  ;;  %v736_v41 = vmul.f32 %v1744_v23, %v2298_v27 }
 0x16c   : > { %1757 = vrsqrt.f32 %v687_v19  ;;  %v639_v52 = vmul.f32 0.03125, %v573_v14  ;;  %v654_v35 = vmul.f32 0.03125, %v618_v15  ;;  %v792_v2 = vmul.f32 %v2379_v4, %v751_v6 }
 0x16d   : > { %v1746_v12 = vpop.eup %1745  ;;  %1759 = vrsqrt.f32 %v672_v33  ;;  %v845_v56 = vpack.c.bf16 %v817_v40, %v816_v13  ;;  %v777_v27 = vmul.f32 %v2379_v4, %v736_v41 }
 0x16e   : > { %v1748_v26 = vpop.eup %1747  ;;  %v673_v28 = vadd.f32 1e-05, %v639_v52  ;;  %v688_v11 = vadd.f32 1e-05, %v654_v35  ;;  %v833_v0 = vadd.f32 %v2386_v18, %v792_v2  ;;  %v737_v1 = vmul.f32 %v1746_v12, %v2301_v30 }
 0x16f   : > { %v621_v38 = vpop.xlane.xlu1 %620  ;;  %v752_v25 = vmul.f32 %v1748_v26, %v2314_v45  ;;  %v818_v29 = vadd.f32 %v2386_v18, %v777_v27 }
 0x170   : > { %1761 = vrsqrt.f32 %v673_v28  ;;  %v655_v31 = vmul.f32 0.03125, %v621_v38  ;;  %v853_v5 = vpack.c.bf16 %v833_v0, %v832_v7  ;;  %v778_v42 = vmul.f32 %v2379_v4, %v737_v1 }
 0x171   : > { %v1750_v43 = vpop.eup %1749  ;;  %1763 = vrsqrt.f32 %v688_v11  ;;  %v793_v50 = vmul.f32 %v2379_v4, %v752_v25 }
 0x172   : > { %v1752_v44 = vpop.eup %1751  ;;  %v689_v32 = vadd.f32 1e-05, %v655_v31  ;;  %1620 = vmatmul.mubr.msk.bf16.gmra.mxu0 %vm314_vm0, %v845_v56  ;;  %1652 = vmatmul.mubr.msk.bf16.gmra.mxu1 %vm314_vm0, %v853_v5  ;;  %v753_v30 = vmul.f32 %v1750_v43, %v2317_v46  ;;  %v819_v45 = vadd.f32 %v2386_v18, %v778_v42 }
 0x173   : > { %1623 = vmatprep.mubr.msk.bf16.mxu0 %vm1928_vm1, %v1927_v8  ;;  %1655 = vmatprep.mubr.msk.bf16.mxu1 %vm1928_vm1, %v1927_v8  ;;  %v834_v54 = vadd.f32 %v2386_v18, %v793_v50  ;;  %v738_v60 = vmul.f32 %v1752_v44, %v2326_v62 }
 0x174   : > { %1765 = vrsqrt.f32 %v689_v32  ;;  %v794_v34 = vmul.f32 %v2379_v4, %v753_v30  ;;  %v846_v55 = vpack.c.bf16 %v819_v45, %v818_v29 }
 0x175   : > { %v1754_v39 = vpop.eup %1753  ;;  %v779_v37 = vmul.f32 %v2379_v4, %v738_v60 }
 0x176   : > { %v1756_v51 = vpop.eup %1755  ;;  %v835_v46 = vadd.f32 %v2386_v18, %v794_v34  ;;  %v739_v58 = vmul.f32 %v1754_v39, %v2329_v49 }
 0x177   : > { %v754_v17 = vmul.f32 %v1756_v51, %v2338_v22 }
 0x178   : > { %v854_v59 = vpack.c.bf16 %v835_v46, %v834_v54  ;;  %v780_v48 = vmul.f32 %v2379_v4, %v739_v58 }
 0x179   : > { %v1758_v36 = vpop.eup %1757  ;;  %v795_v62 = vmul.f32 %v2379_v4, %v754_v17 }
 0x17a   : > { %v1760_v63 = vpop.eup %1759  ;;  %1624 = vmatmul.mubr.msk.bf16.gmra.mxu0 %vm314_vm0, %v846_v55  ;;  %1656 = vmatmul.mubr.msk.bf16.gmra.mxu1 %vm314_vm0, %v854_v59  ;;  %v755_v3 = vmul.f32 %v1758_v36, %v2341_v53  ;;  %v821_v22 = vadd.f32 %v2386_v18, %v780_v48  ;;  %v820_v53 = vadd.f32 %v2386_v18, %v779_v37 }
 0x17b   : > { %1627 = vmatprep.mubr.msk.bf16.mxu0 %vm1928_vm1, %v1927_v8  ;;  %1659 = vmatprep.mubr.msk.bf16.mxu1 %vm1928_vm1, %v1927_v8  ;;  %v740_v49 = vmul.f32 %v1760_v63, %v2350_v16  ;;  %v836_v9 = vadd.f32 %v2386_v18, %v795_v62 }
 0x17c   : > { %v796_v10 = vmul.f32 %v2379_v4, %v755_v3  ;;  %v847_v6 = vpack.c.bf16 %v821_v22, %v820_v53 }
 0x17d   : > { %v1762_v24 = vpop.eup %1761  ;;  %v781_v47 = vmul.f32 %v2379_v4, %v740_v49 }
 0x17e   : > { %v1764_v21 = vpop.eup %1763  ;;  %v837_v23 = vadd.f32 %v2386_v18, %v796_v10  ;;  %v741_v19 = vmul.f32 %v1762_v24, %v2353_v57 }
 0x17f   : > { %v822_v33 = vadd.f32 %v2386_v18, %v781_v47  ;;  %v756_v16 = vmul.f32 %v1764_v21, %v2362_v20 }
 0x180   : > { %v855_v14 = vpack.c.bf16 %v837_v23, %v836_v9  ;;  %v782_v15 = vmul.f32 %v2379_v4, %v741_v19 }
 0x181   : > { %v1766_v40 = vpop.eup %1765  ;;  %v797_v52 = vmul.f32 %v2379_v4, %v756_v16 }
 0x182   : > { %1628 = vmatmul.mubr.msk.bf16.gmra.mxu0 %vm314_vm0, %v847_v6  ;;  %1660 = vmatmul.mubr.msk.bf16.gmra.mxu1 %vm314_vm0, %v855_v14  ;;  %v823_v35 = vadd.f32 %v2386_v18, %v782_v15  ;;  %v757_v2 = vmul.f32 %v1766_v40, %v2365_v61  ;;  %v2537_v61 = vld [vmem:[%s2797_s4] ss:$0 sm:$0xff] }
 0x183   : > { %1631 = vmatprep.mubr.msk.bf16.mxu0 %vm1928_vm1, %v1927_v8  ;;  %1663 = vmatprep.mubr.msk.bf16.mxu1 %vm1928_vm1, %v1927_v8  ;;  %v838_v57 = vadd.f32 %v2386_v18, %v797_v52 }
 0x184   : > { %v848_v20 = vpack.c.bf16 %v823_v35, %v822_v33  ;;  %v798_v12 = vmul.f32 %v2379_v4, %v757_v2 }
 0x186   : > { %v839_v13 = vadd.f32 %v2386_v18, %v798_v12 }
 0x188   : > { %v856_v7 = vpack.c.bf16 %v839_v13, %v838_v57 }
 0x18a   : > { %1632 = vmatmul.mubr.msk.bf16.gmra.mxu0 %vm314_vm0, %v848_v20  ;;  %1664 = vmatmul.mubr.msk.bf16.gmra.mxu1 %vm314_vm0, %v856_v7 }
 0x20a   : > { %v965_v41 = vpop.f32.mrf.mxu0 }
 0x20b   : > { %v2540_v8 = vadd.f32 %v2537_v61, %v965_v41 }
 0x20c   : > { %v1601_v26 = vpop.f32.mrf.mxu0 }
 0x20d   : > { %v1540_v28 = vmul.f32 -1.702, %v2540_v8 }
 0x20e   : > { %v968_v4 = vpop.f32.mrf.mxu0 }
 0x20f   : > { %v1168_v11 = vmul.f32 1.442695, %v1540_v28  ;;  %v2544_v18 = vadd.f32 %v2537_v61, %v968_v4 }
 0x210   : > { %v1602_v0 = vpop.f32.mrf.mxu0 }
 0x211   : > { %1767 = vpow2.f32 %v1168_v11  ;;  %v1541_v1 = vmul.f32 -1.702, %v2544_v18 }
 0x212   : > { %v973_v38 = vpop.f32.mrf.mxu0  ;;  %v1037_v56 = vpop.f32.mrf.mxu1 }
 0x213   : > { %v1170_v25 = vmul.f32 1.442695, %v1541_v1  ;;  %v2548_v31 = vadd.f32 %v2537_v61, %v973_v38  ;;  %v2551_v5 = vadd.f32 %v2537_v61, %v1037_v56 }
 0x214   : > { %v1605_v42 = vpop.f32.mrf.mxu0  ;;  %v1637_v43 = vpop.f32.mrf.mxu1 }
 0x215   : > { %1769 = vpow2.f32 %v1170_v25  ;;  %v1542_v27 = vmul.f32 -1.702, %v2548_v31  ;;  %v1558_v44 = vmul.f32 -1.702, %v2551_v5 }
 0x216   : > { %v976_v32 = vpop.f32.mrf.mxu0  ;;  %v1040_v30 = vpop.f32.mrf.mxu1 }
 0x217   : > { %v1172_v50 = vmul.f32 1.442695, %v1542_v27  ;;  %v1204_v45 = vmul.f32 1.442695, %v1558_v44  ;;  %v2556_v34 = vadd.f32 %v2537_v61, %v976_v32  ;;  %v2559_v39 = vadd.f32 %v2537_v61, %v1040_v30 }
 0x218   : > { %v1606_v29 = vpop.f32.mrf.mxu0  ;;  %v1638_v51 = vpop.f32.mrf.mxu1 }
 0x219   : > { %1771 = vpow2.f32 %v1172_v50  ;;  %v1543_v54 = vmul.f32 -1.702, %v2556_v34  ;;  %v1559_v46 = vmul.f32 -1.702, %v2559_v39 }
 0x21a   : > { %1773 = vpow2.f32 %v1204_v45  ;;  %v981_v60 = vpop.f32.mrf.mxu0  ;;  %v1045_v58 = vpop.f32.mrf.mxu1 }
 0x21b   : > { %v1174_v17 = vmul.f32 1.442695, %v1543_v54  ;;  %v1206_v55 = vmul.f32 1.442695, %v1559_v46  ;;  %v2564_v59 = vadd.f32 %v2537_v61, %v981_v60  ;;  %v2567_v48 = vadd.f32 %v2537_v61, %v1045_v58 }
 0x21c   : > { %v1609_v36 = vpop.f32.mrf.mxu0  ;;  %v1641_v63 = vpop.f32.mrf.mxu1 }
 0x21d   : > { %1775 = vpow2.f32 %v1174_v17  ;;  %v1544_v37 = vmul.f32 -1.702, %v2564_v59  ;;  %v1560_v3 = vmul.f32 -1.702, %v2567_v48 }
 0x21e   : > { %v1768_v62 = vpop.eup %1767  ;;  %1777 = vpow2.f32 %v1206_v55  ;;  %v984_v49 = vpop.f32.mrf.mxu0 }
 0x21f   : > { %v1048_v22 = vpop.f32.mrf.mxu1  ;;  %v1236_v10 = vadd.f32 1.0, %v1768_v62  ;;  %v1176_v24 = vmul.f32 1.442695, %v1544_v37  ;;  %v1208_v47 = vmul.f32 1.442695, %v1560_v3  ;;  %v2572_v21 = vadd.f32 %v2537_v61, %v984_v49 }
 0x220   : > { %v2575_v53 = vadd.f32 %v2537_v61, %v1048_v22  ;;  %v1610_v9 = vpop.f32.mrf.mxu0 }
 0x221   : > { %v1642_v23 = vpop.f32.mrf.mxu1  ;;  %1779 = vrcp.f32 %v1236_v10  ;;  %v1545_v19 = vmul.f32 -1.702, %v2572_v21 }
 0x222   : > { %v1770_v33 = vpop.eup %1769  ;;  %1781 = vpow2.f32 %v1176_v24  ;;  %v1561_v16 = vmul.f32 -1.702, %v2575_v53  ;;  %v989_v6 = vpop.f32.mrf.mxu0 }
 0x223   : > { %v1053_v14 = vpop.f32.mrf.mxu1  ;;  %v1237_v15 = vadd.f32 1.0, %v1770_v33  ;;  %1783 = vpow2.f32 %v1208_v47  ;;  %v1178_v40 = vmul.f32 1.442695, %v1545_v19  ;;  %v2580_v52 = vadd.f32 %v2537_v61, %v989_v6 }
 0x224   : > { %v1210_v35 = vmul.f32 1.442695, %v1561_v16  ;;  %v2583_v2 = vadd.f32 %v2537_v61, %v1053_v14  ;;  %v1613_v57 = vpop.f32.mrf.mxu0 }
 0x225   : > { %v1645_v20 = vpop.f32.mrf.mxu1  ;;  %1785 = vrcp.f32 %v1237_v15  ;;  %v1546_v12 = vmul.f32 -1.702, %v2580_v52 }
 0x226   : > { %v1772_v13 = vpop.eup %1771  ;;  %1787 = vpow2.f32 %v1178_v40  ;;  %v1562_v7 = vmul.f32 -1.702, %v2583_v2  ;;  %v992_v41 = vpop.f32.mrf.mxu0 }
 0x227   : > { %v1056_v26 = vpop.f32.mrf.mxu1  ;;  %v1774_v28 = vpop.eup %1773  ;;  %v1238_v4 = vadd.f32 1.0, %v1772_v13  ;;  %1789 = vpow2.f32 %v1210_v35  ;;  %v1180_v11 = vmul.f32 1.442695, %v1546_v12  ;;  %v2588_v0 = vadd.f32 %v2537_v61, %v992_v41 }
 0x228   : > { %v1254_v1 = vadd.f32 1.0, %v1774_v28  ;;  %v1212_v38 = vmul.f32 1.442695, %v1562_v7  ;;  %v2591_v56 = vadd.f32 %v2537_v61, %v1056_v26  ;;  %v1614_v25 = vpop.f32.mrf.mxu0 }
 0x229   : > { %v1646_v42 = vpop.f32.mrf.mxu1  ;;  %1791 = vrcp.f32 %v1238_v4  ;;  %v1547_v43 = vmul.f32 -1.702, %v2588_v0 }
 0x22a   : > { %v1776_v27 = vpop.eup %1775  ;;  %1793 = vrcp.f32 %v1254_v1  ;;  %v1563_v44 = vmul.f32 -1.702, %v2591_v56  ;;  %v997_v32 = vpop.f32.mrf.mxu0 }
 0x22b   : > { %v1061_v30 = vpop.f32.mrf.mxu1  ;;  %v1778_v50 = vpop.eup %1777  ;;  %v1239_v45 = vadd.f32 1.0, %v1776_v27  ;;  %1795 = vpow2.f32 %v1180_v11  ;;  %v1182_v29 = vmul.f32 1.442695, %v1547_v43  ;;  %v2596_v51 = vadd.f32 %v2537_v61, %v997_v32 }
 0x22c   : > { %v1255_v54 = vadd.f32 1.0, %v1778_v50  ;;  %1797 = vpow2.f32 %v1212_v38  ;;  %v1214_v46 = vmul.f32 1.442695, %v1563_v44  ;;  %v2599_v60 = vadd.f32 %v2537_v61, %v1061_v30  ;;  %v1617_v58 = vpop.f32.mrf.mxu0 }
 0x22d   : > { %v1649_v17 = vpop.f32.mrf.mxu1  ;;  %1799 = vrcp.f32 %v1239_v45  ;;  %v1548_v55 = vmul.f32 -1.702, %v2596_v51 }
 0x22e   : > { %v1780_v36 = vpop.eup %1779  ;;  %1801 = vrcp.f32 %v1255_v54  ;;  %v1564_v63 = vmul.f32 -1.702, %v2599_v60  ;;  %v1000_v37 = vpop.f32.mrf.mxu0 }
 0x22f   : > { %v1064_v3 = vpop.f32.mrf.mxu1  ;;  %v1782_v62 = vpop.eup %1781  ;;  %v1338_v49 = vmul.f32 %v1780_v36, %v2540_v8  ;;  %1803 = vpow2.f32 %v1182_v29  ;;  %v1184_v22 = vmul.f32 1.442695, %v1548_v55  ;;  %v2612_v10 = vadd.f32 %v2537_v61, %v1000_v37 }
 0x230   : > { %v1784_v24 = vpop.eup %1783  ;;  %v1240_v47 = vadd.f32 1.0, %v1782_v62  ;;  %1805 = vpow2.f32 %v1214_v46  ;;  %v1216_v9 = vmul.f32 1.442695, %v1564_v63  ;;  %v2615_v23 = vadd.f32 %v2537_v61, %v1064_v3  ;;  %v1618_v19 = vpop.f32.mrf.mxu0 }
 0x231   : > { %v1650_v33 = vpop.f32.mrf.mxu1  ;;  %1373 = vst.msk [vmem:[%s2607_s14] sm:$0xff] %vm1372_vm2, %v1338_v49  ;;  %v1256_v16 = vadd.f32 1.0, %v1784_v24  ;;  %1807 = vpow2.f32 %v1184_v22  ;;  %v1549_v8 = vmul.f32 -1.702, %v2612_v10 }
 0x232   : > { %v1786_v6 = vpop.eup %1785  ;;  %1809 = vrcp.f32 %v1240_v47  ;;  %v1565_v14 = vmul.f32 -1.702, %v2615_v23  ;;  %v1005_v15 = vpop.f32.mrf.mxu0 }
 0x233   : > { %v1069_v40 = vpop.f32.mrf.mxu1  ;;  %v1788_v35 = vpop.eup %1787  ;;  %v1339_v57 = vmul.f32 %v1786_v6, %v2544_v18  ;;  %1811 = vrcp.f32 %v1256_v16  ;;  %v1186_v20 = vmul.f32 1.442695, %v1549_v8  ;;  %v2623_v12 = vadd.f32 %v2537_v61, %v1005_v15 }
 0x234   : > { %v1790_v13 = vpop.eup %1789  ;;  %v1241_v7 = vadd.f32 1.0, %v1788_v35  ;;  %1813 = vpow2.f32 %v1216_v9  ;;  %v1218_v41 = vmul.f32 1.442695, %v1565_v14  ;;  %v2626_v26 = vadd.f32 %v2537_v61, %v1069_v40  ;;  %v1621_v28 = vpop.f32.mrf.mxu0 }
 0x235   : > { %v1653_v4 = vpop.f32.mrf.mxu1  ;;  %1374 = vst.msk [vmem:[%s2607_s14 + $0x8] sm:$0xff] %vm1372_vm2, %v1339_v57  ;;  %v1257_v11 = vadd.f32 1.0, %v1790_v13  ;;  %1815 = vpow2.f32 %v1186_v20  ;;  %v1550_v18 = vmul.f32 -1.702, %v2623_v12 }
 0x236   : > { %v1792_v1 = vpop.eup %1791  ;;  %1817 = vrcp.f32 %v1241_v7  ;;  %v1566_v38 = vmul.f32 -1.702, %v2626_v26  ;;  %v1008_v25 = vpop.f32.mrf.mxu0 }
 0x237   : > { %v1072_v42 = vpop.f32.mrf.mxu1  ;;  %v1794_v43 = vpop.eup %1793  ;;  %v1340_v27 = vmul.f32 %v1792_v1, %v2548_v31  ;;  %1819 = vrcp.f32 %v1257_v11  ;;  %v1188_v44 = vmul.f32 1.442695, %v1550_v18  ;;  %v2634_v32 = vadd.f32 %v2537_v61, %v1008_v25 }
 0x238   : > { %v1796_v30 = vpop.eup %1795  ;;  %v1356_v50 = vmul.f32 %v1794_v43, %v2551_v5  ;;  %1821 = vpow2.f32 %v1218_v41  ;;  %v1220_v45 = vmul.f32 1.442695, %v1566_v38  ;;  %v2638_v29 = vadd.f32 %v2537_v61, %v1072_v42  ;;  %v1622_v54 = vpop.f32.mrf.mxu0 }
 0x239   : > { %v1654_v46 = vpop.f32.mrf.mxu1  ;;  %v1798_v58 = vpop.eup %1797  ;;  %1375 = vst.msk [vmem:[%s2607_s14 + $0x10] sm:$0xff] %vm1372_vm2, %v1340_v27  ;;  %v1242_v31 = vadd.f32 1.0, %v1796_v30  ;;  %1823 = vpow2.f32 %v1188_v44  ;;  %v1551_v17 = vmul.f32 -1.702, %v2634_v32 }
 0x23a   : > { %v1800_v55 = vpop.eup %1799  ;;  %1391 = vst.msk [vmem:[%s2607_s14 + $0x90] sm:$0xff] %vm1372_vm2, %v1356_v50  ;;  %v1258_v36 = vadd.f32 1.0, %v1798_v58  ;;  %1825 = vpow2.f32 %v1220_v45  ;;  %v1567_v5 = vmul.f32 -1.702, %v2638_v29  ;;  %v1013_v63 = vpop.f32.mrf.mxu0 }
 0x23b   : > { %v1077_v37 = vpop.f32.mrf.mxu1  ;;  %v1802_v3 = vpop.eup %1801  ;;  %v1341_v62 = vmul.f32 %v1800_v55, %v2556_v34  ;;  %1827 = vrcp.f32 %v1242_v31  ;;  %v1190_v49 = vmul.f32 1.442695, %v1551_v17  ;;  %v2648_v22 = vadd.f32 %v2537_v61, %v1013_v63 }
 0x23c   : > { %v1804_v24 = vpop.eup %1803  ;;  %v1357_v47 = vmul.f32 %v1802_v3, %v2559_v39  ;;  %1829 = vrcp.f32 %v1258_v36  ;;  %v1222_v9 = vmul.f32 1.442695, %v1567_v5  ;;  %v2652_v19 = vadd.f32 %v2537_v61, %v1077_v37  ;;  %v1625_v33 = vpop.f32.mrf.mxu0 }
 0x23d   : > { %v1657_v16 = vpop.f32.mrf.mxu1  ;;  %v1806_v8 = vpop.eup %1805  ;;  %1376 = vst.msk [vmem:[%s2607_s14 + $0x18] sm:$0xff] %vm1372_vm2, %v1341_v62  ;;  %v1243_v34 = vadd.f32 1.0, %v1804_v24  ;;  %1831 = vpow2.f32 %v1190_v49  ;;  %v1552_v6 = vmul.f32 -1.702, %v2648_v22 }
 0x23e   : > { %v1808_v14 = vpop.eup %1807  ;;  %1392 = vst.msk [vmem:[%s2607_s14 + $0x98] sm:$0xff] %vm1372_vm2, %v1357_v47  ;;  %v1259_v15 = vadd.f32 1.0, %v1806_v8  ;;  %1833 = vpow2.f32 %v1222_v9  ;;  %v1568_v39 = vmul.f32 -1.702, %v2652_v19  ;;  %v1016_v40 = vpop.f32.mrf.mxu0 }
 0x23f   : > { %v1080_v35 = vpop.f32.mrf.mxu1  ;;  %v1810_v57 = vpop.eup %1809  ;;  %1835 = vrcp.f32 %v1243_v34  ;;  %v1244_v20 = vadd.f32 1.0, %v1808_v14  ;;  %v1192_v13 = vmul.f32 1.442695, %v1552_v6  ;;  %v2661_v7 = vadd.f32 %v2537_v61, %v1016_v40 }
 0x240   : > { %v1812_v41 = vpop.eup %1811  ;;  %v1342_v28 = vmul.f32 %v1810_v57, %v2564_v59  ;;  %1837 = vrcp.f32 %v1259_v15  ;;  %v1224_v4 = vmul.f32 1.442695, %v1568_v39  ;;  %v2665_v11 = vadd.f32 %v2537_v61, %v1080_v35  ;;  %v1626_v18 = vpop.f32.mrf.mxu0 }
 0x241   : > { %v1658_v1 = vpop.f32.mrf.mxu1  ;;  %v1814_v38 = vpop.eup %1813  ;;  %v1358_v25 = vmul.f32 %v1812_v41, %v2567_v48  ;;  %1839 = vrcp.f32 %v1244_v20  ;;  %v1553_v42 = vmul.f32 -1.702, %v2661_v7 }
 0x242   : > { %v1816_v43 = vpop.eup %1815  ;;  %1377 = vst.msk [vmem:[%s2607_s14 + $0x20] sm:$0xff] %vm1372_vm2, %v1342_v28  ;;  %v1260_v27 = vadd.f32 1.0, %v1814_v38  ;;  %1841 = vpow2.f32 %v1192_v13  ;;  %v1569_v59 = vmul.f32 -1.702, %v2665_v11  ;;  %v1021_v44 = vpop.f32.mrf.mxu0 }
 0x243   : > { %v1085_v30 = vpop.f32.mrf.mxu1  ;;  %v1818_v50 = vpop.eup %1817  ;;  %1393 = vst.msk [vmem:[%s2607_s14 + $0xa0] sm:$0xff] %vm1372_vm2, %v1358_v25  ;;  %v1245_v45 = vadd.f32 1.0, %v1816_v43  ;;  %1843 = vpow2.f32 %v1224_v4  ;;  %v1194_v54 = vmul.f32 1.442695, %v1553_v42  ;;  %v2675_v48 = vadd.f32 %v2537_v61, %v1021_v44 }
 0x244   : > { %v1820_v46 = vpop.eup %1819  ;;  %v1343_v58 = vmul.f32 %v1818_v50, %v2572_v21  ;;  %1845 = vrcp.f32 %v1260_v27  ;;  %v1226_v31 = vmul.f32 1.442695, %v1569_v59  ;;  %v2679_v17 = vadd.f32 %v2537_v61, %v1085_v30  ;;  %v1629_v55 = vpop.f32.mrf.mxu0 }
 0x245   : > { %v1661_v36 = vpop.f32.mrf.mxu1  ;;  %v1822_v5 = vpop.eup %1821  ;;  %v1359_v63 = vmul.f32 %v1820_v46, %v2575_v53  ;;  %1847 = vrcp.f32 %v1245_v45  ;;  %v1554_v37 = vmul.f32 -1.702, %v2675_v48 }
 0x246   : > { %v1824_v3 = vpop.eup %1823  ;;  %1378 = vst.msk [vmem:[%s2607_s14 + $0x28] sm:$0xff] %vm1372_vm2, %v1343_v58  ;;  %v1261_v62 = vadd.f32 1.0, %v1822_v5  ;;  %1849 = vpow2.f32 %v1194_v54  ;;  %v1570_v21 = vmul.f32 -1.702, %v2679_v17  ;;  %v1024_v49 = vpop.f32.mrf.mxu0 }
 0x247   : > { %v1088_v24 = vpop.f32.mrf.mxu1  ;;  %v1826_v47 = vpop.eup %1825  ;;  %1394 = vst.msk [vmem:[%s2607_s14 + $0xa8] sm:$0xff] %vm1372_vm2, %v1359_v63  ;;  %v1246_v9 = vadd.f32 1.0, %v1824_v3  ;;  %1851 = vpow2.f32 %v1226_v31  ;;  %v1196_v33 = vmul.f32 1.442695, %v1554_v37  ;;  %v2689_v53 = vadd.f32 %v2537_v61, %v1024_v49 }
 0x248   : > { %v1828_v16 = vpop.eup %1827  ;;  %1853 = vrcp.f32 %v1261_v62  ;;  %v1262_v8 = vadd.f32 1.0, %v1826_v47  ;;  %v1228_v34 = vmul.f32 1.442695, %v1570_v21  ;;  %v2692_v6 = vadd.f32 %v2537_v61, %v1088_v24  ;;  %v1630_v14 = vpop.f32.mrf.mxu0 }
 0x249   : > { %v1662_v15 = vpop.f32.mrf.mxu1  ;;  %v1830_v39 = vpop.eup %1829  ;;  %v1344_v40 = vmul.f32 %v1828_v16, %v2580_v52  ;;  %1855 = vrcp.f32 %v1246_v9  ;;  %v1555_v35 = vmul.f32 -1.702, %v2689_v53 }
 0x24a   : > { %v1832_v57 = vpop.eup %1831  ;;  %v1360_v20 = vmul.f32 %v1830_v39, %v2583_v2  ;;  %1857 = vrcp.f32 %v1262_v8  ;;  %v1571_v13 = vmul.f32 -1.702, %v2692_v6  ;;  %v1029_v41 = vpop.f32.mrf.mxu0 }
 0x24b   : > { %v1093_v28 = vpop.f32.mrf.mxu1  ;;  %v1834_v4 = vpop.eup %1833  ;;  %1379 = vst.msk [vmem:[%s2607_s14 + $0x30] sm:$0xff] %vm1372_vm2, %v1344_v40  ;;  %v1247_v18 = vadd.f32 1.0, %v1832_v57  ;;  %1859 = vpow2.f32 %v1196_v33  ;;  %v1198_v1 = vmul.f32 1.442695, %v1555_v35  ;;  %v2701_v52 = vadd.f32 %v2537_v61, %v1029_v41 }
 0x24c   : > { %v1836_v38 = vpop.eup %1835  ;;  %1395 = vst.msk [vmem:[%s2607_s14 + $0xb0] sm:$0xff] %vm1372_vm2, %v1360_v20  ;;  %v1263_v25 = vadd.f32 1.0, %v1834_v4  ;;  %1861 = vpow2.f32 %v1228_v34  ;;  %v1230_v2 = vmul.f32 1.442695, %v1571_v13  ;;  %v2706_v42 = vadd.f32 %v2537_v61, %v1093_v28  ;;  %v1633_v43 = vpop.f32.mrf.mxu0 }
 0x24d   : > { %v1665_v27 = vpop.f32.mrf.mxu1  ;;  %v1838_v59 = vpop.eup %1837  ;;  %v1345_v44 = vmul.f32 %v1836_v38, %v2588_v0  ;;  %1863 = vrcp.f32 %v1247_v18  ;;  %v1556_v30 = vmul.f32 -1.702, %v2701_v52 }
 0x24e   : > { %v1840_v50 = vpop.eup %1839  ;;  %v1361_v45 = vmul.f32 %v1838_v59, %v2591_v56  ;;  %1865 = vrcp.f32 %v1263_v25  ;;  %v1572_v54 = vmul.f32 -1.702, %v2706_v42  ;;  %v1032_v46 = vpop.f32.mrf.mxu0 }
 0x24f   : > { %v1096_v58 = vpop.f32.mrf.mxu1  ;;  %v1842_v31 = vpop.eup %1841  ;;  %1380 = vst.msk [vmem:[%s2607_s14 + $0x38] sm:$0xff] %vm1372_vm2, %v1345_v44  ;;  %v1346_v55 = vmul.f32 %v1840_v50, %v2596_v51  ;;  %1867 = vpow2.f32 %v1198_v1  ;;  %v1200_v0 = vmul.f32 1.442695, %v1556_v30  ;;  %v2716_v36 = vadd.f32 %v2537_v61, %v1032_v46 }
 0x250   : > { %v1844_v5 = vpop.eup %1843  ;;  %1396 = vst.msk [vmem:[%s2607_s14 + $0xb8] sm:$0xff] %vm1372_vm2, %v1361_v45  ;;  %v1248_v56 = vadd.f32 1.0, %v1842_v31  ;;  %1869 = vpow2.f32 %v1230_v2  ;;  %v1232_v63 = vmul.f32 1.442695, %v1572_v54  ;;  %v2721_v37 = vadd.f32 %v2537_v61, %v1096_v58  ;;  %v1634_v3 = vpop.f32.mrf.mxu0 }
 0x251   : > { %v1666_v62 = vpop.f32.mrf.mxu1  ;;  %v1846_v21 = vpop.eup %1845  ;;  %1381 = vst.msk [vmem:[%s2607_s14 + $0x40] sm:$0xff] %vm1372_vm2, %v1346_v55  ;;  %v1264_v51 = vadd.f32 1.0, %v1844_v5  ;;  %1871 = vpow2.f32 %v1200_v0  ;;  %v1557_v49 = vmul.f32 -1.702, %v2716_v36 }
 0x252   : > { %v1848_v24 = vpop.eup %1847  ;;  %v1362_v47 = vmul.f32 %v1846_v21, %v2599_v60  ;;  %1873 = vrcp.f32 %v1248_v56  ;;  %v1573_v9 = vmul.f32 -1.702, %v2721_v37 }
 0x253   : > { %v1850_v33 = vpop.eup %1849  ;;  %v1347_v61 = vmul.f32 %v1848_v24, %v2612_v10  ;;  %1875 = vrcp.f32 %v1264_v51  ;;  %v1202_v16 = vmul.f32 1.442695, %v1557_v49 }
 0x254   : > { %v1852_v8 = vpop.eup %1851  ;;  %1397 = vst.msk [vmem:[%s2607_s14 + $0xc0] sm:$0xff] %vm1372_vm2, %v1362_v47  ;;  %v1249_v34 = vadd.f32 1.0, %v1850_v33  ;;  %1877 = vpow2.f32 %v1232_v63  ;;  %v1234_v14 = vmul.f32 1.442695, %v1573_v9 }
 0x255   : > { %v1854_v15 = vpop.eup %1853  ;;  %1382 = vst.msk [vmem:[%s2607_s14 + $0x48] sm:$0xff] %vm1372_vm2, %v1347_v61  ;;  %v1265_v60 = vadd.f32 1.0, %v1852_v8  ;;  %1879 = vpow2.f32 %v1202_v16 }
 0x256   : > { %v1856_v39 = vpop.eup %1855  ;;  %v1363_v40 = vmul.f32 %v1854_v15, %v2615_v23  ;;  %1881 = vrcp.f32 %v1249_v34 }
 0x257   : > { %v1858_v10 = vpop.eup %1857  ;;  %v1348_v35 = vmul.f32 %v1856_v39, %v2623_v12  ;;  %1883 = vrcp.f32 %v1265_v60 }
 0x258   : > { %v1860_v57 = vpop.eup %1859  ;;  %1398 = vst.msk [vmem:[%s2607_s14 + $0xc8] sm:$0xff] %vm1372_vm2, %v1363_v40  ;;  %v1364_v20 = vmul.f32 %v1858_v10, %v2626_v26  ;;  %1885 = vpow2.f32 %v1234_v14 }
 0x259   : > { %v1862_v13 = vpop.eup %1861  ;;  %1383 = vst.msk [vmem:[%s2607_s14 + $0x50] sm:$0xff] %vm1372_vm2, %v1348_v35  ;;  %v1250_v41 = vadd.f32 1.0, %v1860_v57 }
 0x25a   : > { %v1864_v28 = vpop.eup %1863  ;;  %1399 = vst.msk [vmem:[%s2607_s14 + $0xd0] sm:$0xff] %vm1372_vm2, %v1364_v20  ;;  %v1266_v23 = vadd.f32 1.0, %v1862_v13 }
 0x25b   : > { %v1866_v4 = vpop.eup %1865  ;;  %v1349_v12 = vmul.f32 %v1864_v28, %v2634_v32  ;;  %1887 = vrcp.f32 %v1250_v41 }
 0x25c   : > { %v1868_v18 = vpop.eup %1867  ;;  %v1365_v1 = vmul.f32 %v1866_v4, %v2638_v29  ;;  %1889 = vrcp.f32 %v1266_v23 }
 0x25d   : > { %v1870_v38 = vpop.eup %1869  ;;  %1384 = vst.msk [vmem:[%s2607_s14 + $0x58] sm:$0xff] %vm1372_vm2, %v1349_v12  ;;  %v1251_v26 = vadd.f32 1.0, %v1868_v18 }
 0x25e   : > { %v1872_v25 = vpop.eup %1871  ;;  %1400 = vst.msk [vmem:[%s2607_s14 + $0xd8] sm:$0xff] %vm1372_vm2, %v1365_v1  ;;  %v1267_v2 = vadd.f32 1.0, %v1870_v38 }
 0x25f   : > { %v1874_v43 = vpop.eup %1873  ;;  %1891 = vrcp.f32 %v1251_v26  ;;  %v1252_v27 = vadd.f32 1.0, %v1872_v25 }
 0x260   : > { %v1876_v59 = vpop.eup %1875  ;;  %v1350_v32 = vmul.f32 %v1874_v43, %v2648_v22  ;;  %1893 = vrcp.f32 %v1267_v2 }
 0x261   : > { %v1878_v29 = vpop.eup %1877  ;;  %v1366_v44 = vmul.f32 %v1876_v59, %v2652_v19  ;;  %1895 = vrcp.f32 %v1252_v27 }
 0x262   : > { %v1880_v30 = vpop.eup %1879  ;;  %1385 = vst.msk [vmem:[%s2607_s14 + $0x60] sm:$0xff] %vm1372_vm2, %v1350_v32  ;;  %v1268_v50 = vadd.f32 1.0, %v1878_v29 }
 0x263   : > { %v1882_v45 = vpop.eup %1881  ;;  %1401 = vst.msk [vmem:[%s2607_s14 + $0xe0] sm:$0xff] %vm1372_vm2, %v1366_v44  ;;  %v1253_v54 = vadd.f32 1.0, %v1880_v30 }
 0x264   : > { %v1884_v46 = vpop.eup %1883  ;;  %v1351_v22 = vmul.f32 %v1882_v45, %v2661_v7  ;;  %1897 = vrcp.f32 %v1268_v50 }
 0x265   : > { %v1886_v58 = vpop.eup %1885  ;;  %v1367_v31 = vmul.f32 %v1884_v46, %v2665_v11  ;;  %1899 = vrcp.f32 %v1253_v54 }
 0x266   : > { %1386 = vst.msk [vmem:[%s2607_s14 + $0x68] sm:$0xff] %vm1372_vm2, %v1351_v22  ;;  %v1269_v19 = vadd.f32 1.0, %v1886_v58 }
 0x267   : > { %1402 = vst.msk [vmem:[%s2607_s14 + $0xe8] sm:$0xff] %vm1372_vm2, %v1367_v31 }
 0x268   : > { %v1888_v55 = vpop.eup %1887  ;;  %1901 = vrcp.f32 %v1269_v19 }
 0x269   : > { %v1890_v0 = vpop.eup %1889  ;;  %v1352_v5 = vmul.f32 %v1888_v55, %v2675_v48 }
 0x26a   : > { %v1368_v7 = vmul.f32 %v1890_v0, %v2679_v17 }
 0x26b   : > { %1387 = vst.msk [vmem:[%s2607_s14 + $0x70] sm:$0xff] %vm1372_vm2, %v1352_v5 }
 0x26c   : > { %v1892_v11 = vpop.eup %1891  ;;  %1403 = vst.msk [vmem:[%s2607_s14 + $0xf0] sm:$0xff] %vm1372_vm2, %v1368_v7 }
 0x26d   : > { %v1894_v56 = vpop.eup %1893  ;;  %v1353_v63 = vmul.f32 %v1892_v11, %v2689_v53 }
 0x26e   : > { %v1896_v3 = vpop.eup %1895  ;;  %v1369_v62 = vmul.f32 %v1894_v56, %v2692_v6 }
 0x26f   : > { %1388 = vst.msk [vmem:[%s2607_s14 + $0x78] sm:$0xff] %vm1372_vm2, %v1353_v63  ;;  %v1354_v48 = vmul.f32 %v1896_v3, %v2701_v52 }
 0x270   : > { %1404 = vst.msk [vmem:[%s2607_s14 + $0xf8] sm:$0xff] %vm1372_vm2, %v1369_v62 }
 0x271   : > { %v1898_v17 = vpop.eup %1897  ;;  %1389 = vst.msk [vmem:[%s2607_s14 + $0x80] sm:$0xff] %vm1372_vm2, %v1354_v48 }
 0x272   : > { %v1900_v21 = vpop.eup %1899  ;;  %v1370_v51 = vmul.f32 %v1898_v17, %v2706_v42 }
 0x273   : > { %v1355_v49 = vmul.f32 %v1900_v21, %v2716_v36 }
 0x274   : > { %1405 = vst.msk [vmem:[%s2607_s14 + $0x100] sm:$0xff] %vm1372_vm2, %v1370_v51 }
 0x275   : > { %v1902_v53 = vpop.eup %1901  ;;  %1390 = vst.msk [vmem:[%s2607_s14 + $0x88] sm:$0xff] %vm1372_vm2, %v1355_v49 }
 0x276   : > { %v1371_v6 = vmul.f32 %v1902_v53, %v2721_v37 }
 0x278   : > { %1406 = vst.msk [vmem:[%s2607_s14 + $0x108] sm:$0xff] %vm1372_vm2, %v1371_v6 }
 0x279 PF: > { %s15_s20 = sadd.s32 1, %s1925_s20   ;;  %s2799_s18 = smov %s1921_s19 }
 0x27a   : > { %p12_p5 = scmp.ge.s32.totalorder %s15_s20, 4   ;;  %s2800_s19 = smov %s2802_s21 }
 0x27c   :  { %14 = sbr.rel (!%p12_p5) target bundleno = 2 (0x2), region = 76 }

// kernel: _lambda_.13
= control target key start
LH: loop header
LB: loop body
LE: loop exit
PB: predicated region body
PF: predicated region fallthrough
CT: control target
= control target key end

     0   :  { %s1292_s15 = smov 0   ;;  %s1294_s16 = smov 0   ;;  %s1700_s0 = inlined_call_operand.vmem [shape: f32[544,64], index: 0, kind: input, shape index: {}]   ;;  %s1701_s1 = inlined_call_operand.vmem [shape: bf16[64,32], index: 1, kind: input, shape index: {}]   ;;  %s1702_s2 = inlined_call_operand.vmem [shape: f32[1,32], index: 2, kind: input, shape index: {}]   ;;  %s1703_s3 = inlined_call_operand.vmem [shape: f32[544,32], index: 3, kind: input, shape index: {}]   ;;  %s1704_s4 = inlined_call_operand.vmem [shape: f32[544,32], index: 4, kind: output, shape index: {}]  }
   0x1   :  { %s1296_s17 = smov 0  }
   0x2 LB: > { %s33_s18 = sadd.s32 1, %s1259_s16  ;;  %p1078_p0 = scmp.ge.s32.totalorder %s1263_s17, 1  ;;  %s1263_s17 = sphi %s1296_s17, %s14_s17   ;;  %s1259_s16 = sphi %s1294_s16, %s1707_s16   ;;  %s1255_s15 = sphi %s1292_s15, %s1706_s15  }
   0x3   : > { %p35_p1 = scmp.ge.s32.totalorder %s33_s18, 2  ;;  %p229_p2 = scmp.lt.s32.totalorder %s1263_s17, 3 }
   0x5   : > { %s1709_s18 = smov (%p35_p1, %s33_s18), 0  ;;  %p230_p3 = pnand %p1078_p0, %p229_p2 }
   0x6   : > { %s280_s23 = smul.u32 (!%p230_p3), 34, %s1255_s15 }
   0x7   : > { %233 = sbr.rel (%p230_p3) target bundleno = 306 (0x132), region = 36 }
   0x8   : > { %p1327_p4 = scmp.lt.s32.totalorder (!%p230_p3), %s280_s23, 67 }
   0xc   : > { %v1237_v0 = vld [vmem:[%s1701_s1 + $0x18] sm:$0xff]   ;;  %v1265_v1 = vmov 0.0   ;;  %v1238_v2 = vld [vmem:[%s1701_s1 + $0x10] sm:$0xff]   ;;  %vm1266_vm0 = vmmov 0   ;;  %vm324_vm1 = vcmask 261120   ;;  %v1239_v3 = vld [vmem:[%s1701_s1 + $0x8] sm:$0xff]  }
   0xd   : > { %1127 = vmatprep.subr.bf16.mxu0 %v1265_v1  ;;  %1203 = vmatprep.subr.bf16.mxu1 %v1265_v1  ;;  %325 = vst.msk [vmem:[#allocation2] sm:$0xff] %vm324_vm1, %v1265_v1  ;;  %326 = vst.msk [vmem:[#allocation2 + $0x8] sm:$0xff] %vm324_vm1, %v1265_v1  ;;  %s1711_s23 = smov (!%p1327_p4, %s280_s23), 67  ;;  %v1240_v4 = vld [vmem:[%s1701_s1] sm:$0xff]   ;;  %vm476_vm2 = vcmask 523264  }
   0xe   : > { %1128 = vmatpush3.bf16.msra.mxu0 %v1237_v0  ;;  %1207 = vmatpush3.bf16.msra.mxu1 %v1237_v0  ;;  %327 = vst.msk [vmem:[#allocation2 + $0x10] sm:$0xff] %vm324_vm1, %v1265_v1  ;;  %328 = vst.msk [vmem:[#allocation2 + $0x18] sm:$0xff] %vm324_vm1, %v1265_v1  ;;  %s1410_s27 = sshll.u32 %s1711_s23, 3 }
   0xf   : > { %1129 = vmatprep.subr.bf16.mxu0 %v1265_v1  ;;  %1204 = vmatprep.subr.bf16.mxu1 %v1265_v1  ;;  %329 = vst.msk [vmem:[#allocation2 + $0x20] sm:$0xff] %vm324_vm1, %v1265_v1  ;;  %330 = vst.msk [vmem:[#allocation2 + $0x28] sm:$0xff] %vm324_vm1, %v1265_v1  ;;  %s1419_s6 = scalar_lea.vmem %s1700_s0, %s1410_s27  ;;  %s1510_s9 = scalar_lea.vmem %s1703_s3, %s1410_s27 }
  0x10   : > { %1135 = vmatprep.mubr.msk.bf16.mxu0 %vm1266_vm0, %v1265_v1  ;;  %1171 = vmatprep.mubr.msk.bf16.mxu1 %vm1266_vm0, %v1265_v1  ;;  %331 = vst.msk [vmem:[#allocation2 + $0x30] sm:$0xff] %vm324_vm1, %v1265_v1  ;;  %332 = vst.msk [vmem:[#allocation2 + $0x38] sm:$0xff] %vm324_vm1, %v1265_v1  ;;  %v393_v5 = vld [vmem:[%s1419_s6] sm:$0xff]  ;;  %v394_v6 = vld [vmem:[%s1419_s6 + $0x8] sm:$0xff]  ;;  %s1529_s14 = scalar_lea.vmem %s1704_s4, %s1410_s27 }
  0x11   : > { %333 = vst.msk [vmem:[#allocation2 + $0x40] sm:$0xff] %vm324_vm1, %v1265_v1  ;;  %334 = vst.msk [vmem:[#allocation2 + $0x48] sm:$0xff] %vm324_vm1, %v1265_v1  ;;  %v411_v7 = vld [vmem:[%s1419_s6 + $0x90] sm:$0xff]  ;;  %v412_v8 = vld [vmem:[%s1419_s6 + $0x98] sm:$0xff]  ;;  %v427_v9 = vpack.c.bf16 %v394_v6, %v393_v5 }
  0x12   : > { %335 = vst.msk [vmem:[#allocation2 + $0x50] sm:$0xff] %vm324_vm1, %v1265_v1  ;;  %336 = vst.msk [vmem:[#allocation2 + $0x58] sm:$0xff] %vm324_vm1, %v1265_v1  ;;  %1130 = vmatpush3.bf16.msra.mxu0 %v1238_v2  ;;  %1208 = vmatpush3.bf16.msra.mxu1 %v1238_v2  ;;  %v436_v10 = vpack.c.bf16 %v412_v8, %v411_v7  ;;  %v395_v11 = vld [vmem:[%s1419_s6 + $0x10] sm:$0xff]  ;;  %v396_v12 = vld [vmem:[%s1419_s6 + $0x18] sm:$0xff] }
  0x13   : > { %337 = vst.msk [vmem:[#allocation2 + $0x60] sm:$0xff] %vm324_vm1, %v1265_v1  ;;  %338 = vst.msk [vmem:[#allocation2 + $0x68] sm:$0xff] %vm324_vm1, %v1265_v1  ;;  %1131 = vmatprep.subr.bf16.mxu0 %v1265_v1  ;;  %1205 = vmatprep.subr.bf16.mxu1 %v1265_v1  ;;  %v413_v13 = vld [vmem:[%s1419_s6 + $0xa0] sm:$0xff]  ;;  %v414_v14 = vld [vmem:[%s1419_s6 + $0xa8] sm:$0xff]  ;;  %v428_v15 = vpack.c.bf16 %v396_v12, %v395_v11 }
  0x14   : > { %339 = vst.msk [vmem:[#allocation2 + $0x70] sm:$0xff] %vm324_vm1, %v1265_v1  ;;  %340 = vst.msk [vmem:[#allocation2 + $0x78] sm:$0xff] %vm324_vm1, %v1265_v1  ;;  %v437_v16 = vpack.c.bf16 %v414_v14, %v413_v13  ;;  %v397_v17 = vld [vmem:[%s1419_s6 + $0x20] sm:$0xff]  ;;  %v398_v18 = vld [vmem:[%s1419_s6 + $0x28] sm:$0xff] }
  0x15   : > { %341 = vst.msk [vmem:[#allocation2 + $0x80] sm:$0xff] %vm324_vm1, %v1265_v1  ;;  %342 = vst.msk [vmem:[#allocation2 + $0x88] sm:$0xff] %vm324_vm1, %v1265_v1  ;;  %v415_v19 = vld [vmem:[%s1419_s6 + $0xb0] sm:$0xff]  ;;  %v416_v20 = vld [vmem:[%s1419_s6 + $0xb8] sm:$0xff]  ;;  %v429_v21 = vpack.c.bf16 %v398_v18, %v397_v17 }
  0x16   : > { %343 = vst.msk [vmem:[#allocation2 + $0x90] sm:$0xff] %vm324_vm1, %v1265_v1  ;;  %344 = vst.msk [vmem:[#allocation2 + $0x98] sm:$0xff] %vm324_vm1, %v1265_v1  ;;  %1132 = vmatpush3.bf16.msra.mxu0 %v1239_v3  ;;  %1209 = vmatpush3.bf16.msra.mxu1 %v1239_v3  ;;  %v438_v22 = vpack.c.bf16 %v416_v20, %v415_v19  ;;  %v399_v23 = vld [vmem:[%s1419_s6 + $0x30] sm:$0xff]  ;;  %v400_v24 = vld [vmem:[%s1419_s6 + $0x38] sm:$0xff] }
  0x17   : > { %345 = vst.msk [vmem:[#allocation2 + $0xa0] sm:$0xff] %vm324_vm1, %v1265_v1  ;;  %346 = vst.msk [vmem:[#allocation2 + $0xa8] sm:$0xff] %vm324_vm1, %v1265_v1  ;;  %1133 = vmatprep.subr.bf16.mxu0 %v1265_v1  ;;  %1206 = vmatprep.subr.bf16.mxu1 %v1265_v1  ;;  %v417_v25 = vld [vmem:[%s1419_s6 + $0xc0] sm:$0xff]  ;;  %v418_v26 = vld [vmem:[%s1419_s6 + $0xc8] sm:$0xff]  ;;  %v430_v27 = vpack.c.bf16 %v400_v24, %v399_v23 }
  0x18   : > { %347 = vst.msk [vmem:[#allocation2 + $0xb0] sm:$0xff] %vm324_vm1, %v1265_v1  ;;  %348 = vst.msk [vmem:[#allocation2 + $0xb8] sm:$0xff] %vm324_vm1, %v1265_v1  ;;  %v439_v28 = vpack.c.bf16 %v418_v26, %v417_v25  ;;  %v401_v29 = vld [vmem:[%s1419_s6 + $0x40] sm:$0xff]  ;;  %v402_v30 = vld [vmem:[%s1419_s6 + $0x48] sm:$0xff] }
  0x19   : > { %349 = vst.msk [vmem:[#allocation2 + $0xc0] sm:$0xff] %vm324_vm1, %v1265_v1  ;;  %350 = vst.msk [vmem:[#allocation2 + $0xc8] sm:$0xff] %vm324_vm1, %v1265_v1  ;;  %v419_v31 = vld [vmem:[%s1419_s6 + $0xd0] sm:$0xff]  ;;  %v420_v32 = vld [vmem:[%s1419_s6 + $0xd8] sm:$0xff]  ;;  %v431_v33 = vpack.c.bf16 %v402_v30, %v401_v29 }
  0x1a   : > { %351 = vst.msk [vmem:[#allocation2 + $0xd0] sm:$0xff] %vm324_vm1, %v1265_v1  ;;  %352 = vst.msk [vmem:[#allocation2 + $0xd8] sm:$0xff] %vm324_vm1, %v1265_v1  ;;  %1134 = vmatpush3.bf16.msra.mxu0 %v1240_v4  ;;  %1210 = vmatpush3.bf16.msra.mxu1 %v1240_v4  ;;  %v440_v34 = vpack.c.bf16 %v420_v32, %v419_v31  ;;  %v403_v35 = vld [vmem:[%s1419_s6 + $0x50] sm:$0xff]  ;;  %v404_v36 = vld [vmem:[%s1419_s6 + $0x58] sm:$0xff] }
  0x1b   : > { %353 = vst.msk [vmem:[#allocation2 + $0xe0] sm:$0xff] %vm324_vm1, %v1265_v1  ;;  %354 = vst.msk [vmem:[#allocation2 + $0xe8] sm:$0xff] %vm324_vm1, %v1265_v1  ;;  %v421_v37 = vld [vmem:[%s1419_s6 + $0xe0] sm:$0xff]  ;;  %v422_v38 = vld [vmem:[%s1419_s6 + $0xe8] sm:$0xff]  ;;  %v432_v39 = vpack.c.bf16 %v404_v36, %v403_v35 }
  0x1c   : > { %355 = vst.msk [vmem:[#allocation2 + $0xf0] sm:$0xff] %vm324_vm1, %v1265_v1  ;;  %356 = vst.msk [vmem:[#allocation2 + $0xf8] sm:$0xff] %vm324_vm1, %v1265_v1  ;;  %v441_v40 = vpack.c.bf16 %v422_v38, %v421_v37  ;;  %v405_v41 = vld [vmem:[%s1419_s6 + $0x60] sm:$0xff]  ;;  %v406_v42 = vld [vmem:[%s1419_s6 + $0x68] sm:$0xff] }
  0x1d   : > { %357 = vst.msk [vmem:[#allocation2 + $0x100] sm:$0xff] %vm324_vm1, %v1265_v1  ;;  %358 = vst.msk [vmem:[#allocation2 + $0x108] sm:$0xff] %vm324_vm1, %v1265_v1  ;;  %1136 = vmatmul.mubr.msk.bf16.vlgmr.msra.gmra.mxu0 %vm476_vm2, %v427_v9  ;;  %1172 = vmatmul.mubr.msk.bf16.vlgmr.msra.gmra.mxu1 %vm476_vm2, %v436_v10  ;;  %v423_v43 = vld [vmem:[%s1419_s6 + $0xf0] sm:$0xff]  ;;  %v424_v44 = vld [vmem:[%s1419_s6 + $0xf8] sm:$0xff]  ;;  %v433_v45 = vpack.c.bf16 %v406_v42, %v405_v41 }
  0x1e   : > { %1139 = vmatprep.mubr.msk.bf16.mxu0 %vm1266_vm0, %v1265_v1  ;;  %1175 = vmatprep.mubr.msk.bf16.mxu1 %vm1266_vm0, %v1265_v1  ;;  %v442_v46 = vpack.c.bf16 %v424_v44, %v423_v43  ;;  %v407_v47 = vld [vmem:[%s1419_s6 + $0x70] sm:$0xff]  ;;  %v408_v48 = vld [vmem:[%s1419_s6 + $0x78] sm:$0xff]  ;;  %v425_v49 = vld [vmem:[%s1419_s6 + $0x100] sm:$0xff] }
  0x1f   : > { %v426_v50 = vld [vmem:[%s1419_s6 + $0x108] sm:$0xff]  ;;  %v434_v51 = vpack.c.bf16 %v408_v48, %v407_v47  ;;  %v409_v53 = vld [vmem:[%s1419_s6 + $0x80] sm:$0xff]  ;;  %v377_v57 = vld [vmem:[#allocation2 + $0x90] sm:$0xff] }
  0x20   : > { %v443_v52 = vpack.c.bf16 %v426_v50, %v425_v49  ;;  %v410_v54 = vld [vmem:[%s1419_s6 + $0x88] sm:$0xff]  ;;  %v359_v56 = vld [vmem:[#allocation2] sm:$0xff]  ;;  %v378_v2 = vld [vmem:[#allocation2 + $0x98] sm:$0xff] }
  0x21   : > { %v435_v55 = vpack.c.bf16 %v410_v54, %v409_v53  ;;  %v360_v63 = vld [vmem:[#allocation2 + $0x8] sm:$0xff]  ;;  %v361_v7 = vld [vmem:[#allocation2 + $0x10] sm:$0xff]  ;;  %v379_v9 = vld [vmem:[#allocation2 + $0xa0] sm:$0xff] }
  0x22   : > { %v1517_v10 = vld [vmem:[%s1702_s2] ss:$0 sm:$0xff]  ;;  %v862_v14 = vld [vmem:[%s1510_s9 + $0x90] sm:$0xff]  ;;  %v362_v17 = vld [vmem:[#allocation2 + $0x18] sm:$0xff] }
  0x23   : > { %v844_v13 = vld [vmem:[%s1510_s9] sm:$0xff]  ;;  %v845_v29 = vld [vmem:[%s1510_s9 + $0x8] sm:$0xff]  ;;  %v863_v30 = vld [vmem:[%s1510_s9 + $0x98] sm:$0xff] }
  0x24   : > { %v381_v38 = vld [vmem:[#allocation2 + $0xb0] sm:$0xff]  ;;  %v364_v49 = vld [vmem:[#allocation2 + $0x28] sm:$0xff]  ;;  %v382_v54 = vld [vmem:[#allocation2 + $0xb8] sm:$0xff] }
  0x25   : > { %1140 = vmatmul.mubr.msk.bf16.gmra.mxu0 %vm476_vm2, %v428_v15  ;;  %1176 = vmatmul.mubr.msk.bf16.gmra.mxu1 %vm476_vm2, %v437_v16 }
  0x26   : > { %1143 = vmatprep.mubr.msk.bf16.mxu0 %vm1266_vm0, %v1265_v1  ;;  %1179 = vmatprep.mubr.msk.bf16.mxu1 %vm1266_vm0, %v1265_v1 }
  0x2d   : > { %1144 = vmatmul.mubr.msk.bf16.gmra.mxu0 %vm476_vm2, %v429_v21  ;;  %1180 = vmatmul.mubr.msk.bf16.gmra.mxu1 %vm476_vm2, %v438_v22  ;;  %v380_v22 = vld [vmem:[#allocation2 + $0xa8] sm:$0xff] }
  0x2e   : > { %1147 = vmatprep.mubr.msk.bf16.mxu0 %vm1266_vm0, %v1265_v1  ;;  %1183 = vmatprep.mubr.msk.bf16.mxu1 %vm1266_vm0, %v1265_v1 }
  0x35   : > { %1148 = vmatmul.mubr.msk.bf16.gmra.mxu0 %vm476_vm2, %v430_v27  ;;  %1184 = vmatmul.mubr.msk.bf16.gmra.mxu1 %vm476_vm2, %v439_v28 }
  0x36   : > { %1151 = vmatprep.mubr.msk.bf16.mxu0 %vm1266_vm0, %v1265_v1  ;;  %1187 = vmatprep.mubr.msk.bf16.mxu1 %vm1266_vm0, %v1265_v1 }
  0x3d   : > { %1152 = vmatmul.mubr.msk.bf16.gmra.mxu0 %vm476_vm2, %v431_v33  ;;  %1188 = vmatmul.mubr.msk.bf16.gmra.mxu1 %vm476_vm2, %v440_v34  ;;  %v363_v33 = vld [vmem:[#allocation2 + $0x20] sm:$0xff] }
  0x3e   : > { %1155 = vmatprep.mubr.msk.bf16.mxu0 %vm1266_vm0, %v1265_v1  ;;  %1191 = vmatprep.mubr.msk.bf16.mxu1 %vm1266_vm0, %v1265_v1 }
  0x45   : > { %1156 = vmatmul.mubr.msk.bf16.gmra.mxu0 %vm476_vm2, %v432_v39  ;;  %1192 = vmatmul.mubr.msk.bf16.gmra.mxu1 %vm476_vm2, %v441_v40 }
  0x46   : > { %1159 = vmatprep.mubr.msk.bf16.mxu0 %vm1266_vm0, %v1265_v1  ;;  %1195 = vmatprep.mubr.msk.bf16.mxu1 %vm1266_vm0, %v1265_v1 }
  0x4d   : > { %1160 = vmatmul.mubr.msk.bf16.gmra.mxu0 %vm476_vm2, %v433_v45  ;;  %1196 = vmatmul.mubr.msk.bf16.gmra.mxu1 %vm476_vm2, %v442_v46  ;;  %v846_v45 = vld [vmem:[%s1510_s9 + $0x10] sm:$0xff]  ;;  %v864_v46 = vld [vmem:[%s1510_s9 + $0xa0] sm:$0xff] }
  0x4e   : > { %1163 = vmatprep.mubr.msk.bf16.mxu0 %vm1266_vm0, %v1265_v1  ;;  %1199 = vmatprep.mubr.msk.bf16.mxu1 %vm1266_vm0, %v1265_v1 }
  0x55   : > { %1164 = vmatmul.mubr.msk.bf16.gmra.mxu0 %vm476_vm2, %v434_v51  ;;  %1200 = vmatmul.mubr.msk.bf16.gmra.mxu1 %vm476_vm2, %v443_v52 }
  0x56   : > { %1167 = vmatprep.mubr.msk.bf16.mxu0 %vm1266_vm0, %v1265_v1 }
  0x5d   : > { %1168 = vmatmul.mubr.msk.bf16.gmra.mxu0 %vm476_vm2, %v435_v55 }
  0xdd   : > { %v562_v58 = vpop.f32.mrf.mxu0  ;;  %v634_v59 = vpop.f32.mrf.mxu1 }
  0xde   : > { %v697_v60 = vadd.f32 %v562_v58, %v359_v56  ;;  %v715_v61 = vadd.f32 %v634_v59, %v377_v57 }
  0xdf   : > { %v1137_v62 = vpop.f32.mrf.mxu0  ;;  %v1173_v0 = vpop.f32.mrf.mxu1 }
  0xe0   : > { %732 = vst.msk [vmem:[#allocation2] sm:$0xff] %vm324_vm1, %v697_v60  ;;  %750 = vst.msk [vmem:[#allocation2 + $0x90] sm:$0xff] %vm324_vm1, %v715_v61  ;;  %v847_v61 = vld [vmem:[%s1510_s9 + $0x18] sm:$0xff]  ;;  %v865_v62 = vld [vmem:[%s1510_s9 + $0xa8] sm:$0xff] }
  0xe1   : > { %v565_v1 = vpop.f32.mrf.mxu0  ;;  %v637_v3 = vpop.f32.mrf.mxu1 }
  0xe2   : > { %v698_v4 = vadd.f32 %v565_v1, %v360_v63  ;;  %v716_v5 = vadd.f32 %v637_v3, %v378_v2  ;;  %v365_v2 = vld [vmem:[#allocation2 + $0x30] sm:$0xff] }
  0xe3   : > { %v1138_v6 = vpop.f32.mrf.mxu0  ;;  %v1174_v8 = vpop.f32.mrf.mxu1 }
  0xe4   : > { %733 = vst.msk [vmem:[#allocation2 + $0x8] sm:$0xff] %vm324_vm1, %v698_v4  ;;  %751 = vst.msk [vmem:[#allocation2 + $0x98] sm:$0xff] %vm324_vm1, %v716_v5  ;;  %v383_v6 = vld [vmem:[#allocation2 + $0xc0] sm:$0xff] }
  0xe5   : > { %v570_v11 = vpop.f32.mrf.mxu0  ;;  %v642_v12 = vpop.f32.mrf.mxu1 }
  0xe6   : > { %v699_v15 = vadd.f32 %v570_v11, %v361_v7  ;;  %v717_v16 = vadd.f32 %v642_v12, %v379_v9 }
  0xe7   : > { %v769_v18 = vld [vmem:[#allocation2] sm:$0xff]  ;;  %v787_v19 = vld [vmem:[#allocation2 + $0x90] sm:$0xff]  ;;  %v1141_v20 = vpop.f32.mrf.mxu0  ;;  %v1177_v21 = vpop.f32.mrf.mxu1 }
  0xe8   : > { %v810_v23 = vadd.f32 %v1517_v10, %v769_v18  ;;  %v828_v24 = vadd.f32 %v1517_v10, %v787_v19  ;;  %734 = vst.msk [vmem:[#allocation2 + $0x10] sm:$0xff] %vm324_vm1, %v699_v15  ;;  %752 = vst.msk [vmem:[#allocation2 + $0xa0] sm:$0xff] %vm324_vm1, %v717_v16  ;;  %v866_v15 = vld [vmem:[%s1510_s9 + $0xb0] sm:$0xff]  ;;  %v366_v18 = vld [vmem:[#allocation2 + $0x38] sm:$0xff] }
  0xe9   : > { %v573_v25 = vpop.f32.mrf.mxu0  ;;  %v645_v26 = vpop.f32.mrf.mxu1 }
  0xea   : > { %v878_v27 = vadd.f32 %v844_v13, %v810_v23  ;;  %v896_v28 = vadd.f32 %v862_v14, %v828_v24  ;;  %v700_v31 = vadd.f32 %v573_v25, %v362_v17  ;;  %v718_v32 = vadd.f32 %v645_v26, %v380_v22  ;;  %v848_v14 = vld [vmem:[%s1510_s9 + $0x20] sm:$0xff]  ;;  %v384_v23 = vld [vmem:[#allocation2 + $0xc8] sm:$0xff] }
  0xeb   : > { %v770_v34 = vld [vmem:[#allocation2 + $0x8] sm:$0xff]  ;;  %v788_v35 = vld [vmem:[#allocation2 + $0x98] sm:$0xff]  ;;  %v1142_v36 = vpop.f32.mrf.mxu0  ;;  %v1178_v37 = vpop.f32.mrf.mxu1 }
  0xec   : > { %912 = vst.msk [vmem:[%s1529_s14] sm:$0xff] %vm324_vm1, %v878_v27  ;;  %930 = vst.msk [vmem:[%s1529_s14 + $0x90] sm:$0xff] %vm324_vm1, %v896_v28  ;;  %v811_v39 = vadd.f32 %v1517_v10, %v770_v34  ;;  %v829_v40 = vadd.f32 %v1517_v10, %v788_v35  ;;  %v367_v34 = vld [vmem:[#allocation2 + $0x40] sm:$0xff] }
  0xed   : > { %735 = vst.msk [vmem:[#allocation2 + $0x18] sm:$0xff] %vm324_vm1, %v700_v31  ;;  %753 = vst.msk [vmem:[#allocation2 + $0xa8] sm:$0xff] %vm324_vm1, %v718_v32  ;;  %v578_v41 = vpop.f32.mrf.mxu0  ;;  %v650_v42 = vpop.f32.mrf.mxu1  ;;  %v867_v31 = vld [vmem:[%s1510_s9 + $0xb8] sm:$0xff] }
  0xee   : > { %v879_v43 = vadd.f32 %v845_v29, %v811_v39  ;;  %v897_v44 = vadd.f32 %v863_v30, %v829_v40  ;;  %v701_v47 = vadd.f32 %v578_v41, %v363_v33  ;;  %v719_v48 = vadd.f32 %v650_v42, %v381_v38  ;;  %v849_v30 = vld [vmem:[%s1510_s9 + $0x28] sm:$0xff]  ;;  %v385_v39 = vld [vmem:[#allocation2 + $0xd0] sm:$0xff] }
  0xef   : > { %v771_v50 = vld [vmem:[#allocation2 + $0x10] sm:$0xff]  ;;  %v789_v51 = vld [vmem:[#allocation2 + $0xa0] sm:$0xff]  ;;  %v1145_v52 = vpop.f32.mrf.mxu0  ;;  %v1181_v53 = vpop.f32.mrf.mxu1 }
  0xf0   : > { %913 = vst.msk [vmem:[%s1529_s14 + $0x8] sm:$0xff] %vm324_vm1, %v879_v43  ;;  %931 = vst.msk [vmem:[%s1529_s14 + $0x98] sm:$0xff] %vm324_vm1, %v897_v44  ;;  %v812_v55 = vadd.f32 %v1517_v10, %v771_v50  ;;  %v830_v56 = vadd.f32 %v1517_v10, %v789_v51  ;;  %v368_v50 = vld [vmem:[#allocation2 + $0x48] sm:$0xff] }
  0xf1   : > { %736 = vst.msk [vmem:[#allocation2 + $0x20] sm:$0xff] %vm324_vm1, %v701_v47  ;;  %754 = vst.msk [vmem:[#allocation2 + $0xb0] sm:$0xff] %vm324_vm1, %v719_v48  ;;  %v581_v57 = vpop.f32.mrf.mxu0  ;;  %v653_v58 = vpop.f32.mrf.mxu1  ;;  %v868_v47 = vld [vmem:[%s1510_s9 + $0xc0] sm:$0xff] }
  0xf2   : > { %v880_v59 = vadd.f32 %v846_v45, %v812_v55  ;;  %v898_v60 = vadd.f32 %v864_v46, %v830_v56  ;;  %v702_v63 = vadd.f32 %v581_v57, %v364_v49  ;;  %v720_v0 = vadd.f32 %v653_v58, %v382_v54  ;;  %v850_v46 = vld [vmem:[%s1510_s9 + $0x30] sm:$0xff]  ;;  %v386_v55 = vld [vmem:[#allocation2 + $0xd8] sm:$0xff] }
  0xf3   : > { %v1146_v4 = vpop.f32.mrf.mxu0  ;;  %v1182_v5 = vpop.f32.mrf.mxu1 }
  0xf4   : > { %v772_v1 = vld [vmem:[#allocation2 + $0x18] sm:$0xff]  ;;  %v790_v3 = vld [vmem:[#allocation2 + $0xa8] sm:$0xff]  ;;  %914 = vst.msk [vmem:[%s1529_s14 + $0x10] sm:$0xff] %vm324_vm1, %v880_v59  ;;  %932 = vst.msk [vmem:[%s1529_s14 + $0xa0] sm:$0xff] %vm324_vm1, %v898_v60 }
  0xf5   : > { %v813_v7 = vadd.f32 %v1517_v10, %v772_v1  ;;  %v831_v8 = vadd.f32 %v1517_v10, %v790_v3  ;;  %737 = vst.msk [vmem:[#allocation2 + $0x28] sm:$0xff] %vm324_vm1, %v702_v63  ;;  %755 = vst.msk [vmem:[#allocation2 + $0xb8] sm:$0xff] %vm324_vm1, %v720_v0  ;;  %v586_v9 = vpop.f32.mrf.mxu0  ;;  %v658_v11 = vpop.f32.mrf.mxu1  ;;  %v869_v63 = vld [vmem:[%s1510_s9 + $0xc8] sm:$0xff]  ;;  %v369_v1 = vld [vmem:[#allocation2 + $0x50] sm:$0xff] }
  0xf6   : > { %v703_v16 = vadd.f32 %v586_v9, %v365_v2  ;;  %v721_v17 = vadd.f32 %v658_v11, %v383_v6 }
  0xf7   : > { %v881_v12 = vadd.f32 %v847_v61, %v813_v7  ;;  %v899_v13 = vadd.f32 %v865_v62, %v831_v8  ;;  %v1149_v21 = vpop.f32.mrf.mxu0  ;;  %v1185_v22 = vpop.f32.mrf.mxu1  ;;  %v851_v62 = vld [vmem:[%s1510_s9 + $0x38] sm:$0xff]  ;;  %v387_v7 = vld [vmem:[#allocation2 + $0xe0] sm:$0xff] }
  0xf8   : > { %v773_v19 = vld [vmem:[#allocation2 + $0x20] sm:$0xff]  ;;  %v791_v20 = vld [vmem:[#allocation2 + $0xb0] sm:$0xff]  ;;  %738 = vst.msk [vmem:[#allocation2 + $0x30] sm:$0xff] %vm324_vm1, %v703_v16  ;;  %756 = vst.msk [vmem:[#allocation2 + $0xc0] sm:$0xff] %vm324_vm1, %v721_v17 }
  0xf9   : > { %915 = vst.msk [vmem:[%s1529_s14 + $0x18] sm:$0xff] %vm324_vm1, %v881_v12  ;;  %933 = vst.msk [vmem:[%s1529_s14 + $0xa8] sm:$0xff] %vm324_vm1, %v899_v13  ;;  %v814_v24 = vadd.f32 %v1517_v10, %v773_v19  ;;  %v832_v25 = vadd.f32 %v1517_v10, %v791_v20  ;;  %v589_v26 = vpop.f32.mrf.mxu0  ;;  %v661_v27 = vpop.f32.mrf.mxu1  ;;  %v870_v16 = vld [vmem:[%s1510_s9 + $0xd0] sm:$0xff]  ;;  %v370_v19 = vld [vmem:[#allocation2 + $0x58] sm:$0xff] }
  0xfa   : > { %v704_v32 = vadd.f32 %v589_v26, %v366_v18  ;;  %v722_v33 = vadd.f32 %v661_v27, %v384_v23 }
  0xfb   : > { %v882_v28 = vadd.f32 %v848_v14, %v814_v24  ;;  %v900_v29 = vadd.f32 %v866_v15, %v832_v25  ;;  %v1150_v37 = vpop.f32.mrf.mxu0  ;;  %v1186_v38 = vpop.f32.mrf.mxu1  ;;  %v852_v15 = vld [vmem:[%s1510_s9 + $0x40] sm:$0xff]  ;;  %v388_v24 = vld [vmem:[#allocation2 + $0xe8] sm:$0xff] }
  0xfc   : > { %v774_v35 = vld [vmem:[#allocation2 + $0x28] sm:$0xff]  ;;  %v792_v36 = vld [vmem:[#allocation2 + $0xb8] sm:$0xff]  ;;  %739 = vst.msk [vmem:[#allocation2 + $0x38] sm:$0xff] %vm324_vm1, %v704_v32  ;;  %757 = vst.msk [vmem:[#allocation2 + $0xc8] sm:$0xff] %vm324_vm1, %v722_v33 }
  0xfd   : > { %916 = vst.msk [vmem:[%s1529_s14 + $0x20] sm:$0xff] %vm324_vm1, %v882_v28  ;;  %934 = vst.msk [vmem:[%s1529_s14 + $0xb0] sm:$0xff] %vm324_vm1, %v900_v29  ;;  %v815_v40 = vadd.f32 %v1517_v10, %v774_v35  ;;  %v833_v41 = vadd.f32 %v1517_v10, %v792_v36  ;;  %v594_v42 = vpop.f32.mrf.mxu0  ;;  %v666_v43 = vpop.f32.mrf.mxu1  ;;  %v871_v32 = vld [vmem:[%s1510_s9 + $0xd8] sm:$0xff]  ;;  %v371_v35 = vld [vmem:[#allocation2 + $0x60] sm:$0xff] }
  0xfe   : > { %v705_v48 = vadd.f32 %v594_v42, %v367_v34  ;;  %v723_v49 = vadd.f32 %v666_v43, %v385_v39 }
  0xff   : > { %v883_v44 = vadd.f32 %v849_v30, %v815_v40  ;;  %v901_v45 = vadd.f32 %v867_v31, %v833_v41  ;;  %v775_v51 = vld [vmem:[#allocation2 + $0x30] sm:$0xff]  ;;  %v793_v52 = vld [vmem:[#allocation2 + $0xc0] sm:$0xff]  ;;  %v1153_v53 = vpop.f32.mrf.mxu0  ;;  %v1189_v54 = vpop.f32.mrf.mxu1  ;;  %v853_v31 = vld [vmem:[%s1510_s9 + $0x48] sm:$0xff] }
 0x100   : > { %v816_v56 = vadd.f32 %v1517_v10, %v775_v51  ;;  %v834_v57 = vadd.f32 %v1517_v10, %v793_v52  ;;  %740 = vst.msk [vmem:[#allocation2 + $0x40] sm:$0xff] %vm324_vm1, %v705_v48  ;;  %758 = vst.msk [vmem:[#allocation2 + $0xd0] sm:$0xff] %vm324_vm1, %v723_v49  ;;  %v389_v40 = vld [vmem:[#allocation2 + $0xf0] sm:$0xff]  ;;  %v872_v48 = vld [vmem:[%s1510_s9 + $0xe0] sm:$0xff] }
 0x101   : > { %917 = vst.msk [vmem:[%s1529_s14 + $0x28] sm:$0xff] %vm324_vm1, %v883_v44  ;;  %935 = vst.msk [vmem:[%s1529_s14 + $0xb8] sm:$0xff] %vm324_vm1, %v901_v45  ;;  %v597_v58 = vpop.f32.mrf.mxu0  ;;  %v669_v59 = vpop.f32.mrf.mxu1  ;;  %v372_v51 = vld [vmem:[#allocation2 + $0x68] sm:$0xff] }
 0x102   : > { %v884_v60 = vadd.f32 %v850_v46, %v816_v56  ;;  %v902_v61 = vadd.f32 %v868_v47, %v834_v57  ;;  %v706_v0 = vadd.f32 %v597_v58, %v368_v50  ;;  %v724_v2 = vadd.f32 %v669_v59, %v386_v55  ;;  %v854_v47 = vld [vmem:[%s1510_s9 + $0x50] sm:$0xff]  ;;  %v390_v56 = vld [vmem:[#allocation2 + $0xf8] sm:$0xff] }
 0x103   : > { %v776_v3 = vld [vmem:[#allocation2 + $0x38] sm:$0xff]  ;;  %v794_v4 = vld [vmem:[#allocation2 + $0xc8] sm:$0xff]  ;;  %v1154_v5 = vpop.f32.mrf.mxu0  ;;  %v1190_v6 = vpop.f32.mrf.mxu1 }
 0x104   : > { %918 = vst.msk [vmem:[%s1529_s14 + $0x30] sm:$0xff] %vm324_vm1, %v884_v60  ;;  %936 = vst.msk [vmem:[%s1529_s14 + $0xc0] sm:$0xff] %vm324_vm1, %v902_v61  ;;  %v817_v8 = vadd.f32 %v1517_v10, %v776_v3  ;;  %v835_v9 = vadd.f32 %v1517_v10, %v794_v4  ;;  %v373_v3 = vld [vmem:[#allocation2 + $0x70] sm:$0xff] }
 0x105   : > { %741 = vst.msk [vmem:[#allocation2 + $0x48] sm:$0xff] %vm324_vm1, %v706_v0  ;;  %759 = vst.msk [vmem:[#allocation2 + $0xd8] sm:$0xff] %vm324_vm1, %v724_v2  ;;  %v602_v11 = vpop.f32.mrf.mxu0  ;;  %v674_v12 = vpop.f32.mrf.mxu1  ;;  %v873_v0 = vld [vmem:[%s1510_s9 + $0xe8] sm:$0xff] }
 0x106   : > { %v885_v13 = vadd.f32 %v851_v62, %v817_v8  ;;  %v903_v14 = vadd.f32 %v869_v63, %v835_v9  ;;  %v707_v17 = vadd.f32 %v602_v11, %v369_v1  ;;  %v725_v18 = vadd.f32 %v674_v12, %v387_v7  ;;  %v855_v63 = vld [vmem:[%s1510_s9 + $0x58] sm:$0xff]  ;;  %v391_v8 = vld [vmem:[#allocation2 + $0x100] sm:$0xff] }
 0x107   : > { %v777_v20 = vld [vmem:[#allocation2 + $0x40] sm:$0xff]  ;;  %v795_v21 = vld [vmem:[#allocation2 + $0xd0] sm:$0xff]  ;;  %v1157_v22 = vpop.f32.mrf.mxu0  ;;  %v1193_v23 = vpop.f32.mrf.mxu1 }
 0x108   : > { %919 = vst.msk [vmem:[%s1529_s14 + $0x38] sm:$0xff] %vm324_vm1, %v885_v13  ;;  %937 = vst.msk [vmem:[%s1529_s14 + $0xc8] sm:$0xff] %vm324_vm1, %v903_v14  ;;  %v818_v25 = vadd.f32 %v1517_v10, %v777_v20  ;;  %v836_v26 = vadd.f32 %v1517_v10, %v795_v21  ;;  %v374_v20 = vld [vmem:[#allocation2 + $0x78] sm:$0xff] }
 0x109   : > { %742 = vst.msk [vmem:[#allocation2 + $0x50] sm:$0xff] %vm324_vm1, %v707_v17  ;;  %760 = vst.msk [vmem:[#allocation2 + $0xe0] sm:$0xff] %vm324_vm1, %v725_v18  ;;  %v605_v27 = vpop.f32.mrf.mxu0  ;;  %v677_v28 = vpop.f32.mrf.mxu1  ;;  %v874_v17 = vld [vmem:[%s1510_s9 + $0xf0] sm:$0xff] }
 0x10a   : > { %v886_v29 = vadd.f32 %v852_v15, %v818_v25  ;;  %v904_v30 = vadd.f32 %v870_v16, %v836_v26  ;;  %v708_v33 = vadd.f32 %v605_v27, %v370_v19  ;;  %v726_v34 = vadd.f32 %v677_v28, %v388_v24  ;;  %v856_v16 = vld [vmem:[%s1510_s9 + $0x60] sm:$0xff]  ;;  %v392_v25 = vld [vmem:[#allocation2 + $0x108] sm:$0xff] }
 0x10b   : > { %v1158_v38 = vpop.f32.mrf.mxu0  ;;  %v1194_v39 = vpop.f32.mrf.mxu1 }
 0x10c   : > { %v778_v36 = vld [vmem:[#allocation2 + $0x48] sm:$0xff]  ;;  %v796_v37 = vld [vmem:[#allocation2 + $0xd8] sm:$0xff]  ;;  %920 = vst.msk [vmem:[%s1529_s14 + $0x40] sm:$0xff] %vm324_vm1, %v886_v29  ;;  %938 = vst.msk [vmem:[%s1529_s14 + $0xd0] sm:$0xff] %vm324_vm1, %v904_v30 }
 0x10d   : > { %v819_v41 = vadd.f32 %v1517_v10, %v778_v36  ;;  %v837_v42 = vadd.f32 %v1517_v10, %v796_v37  ;;  %743 = vst.msk [vmem:[#allocation2 + $0x58] sm:$0xff] %vm324_vm1, %v708_v33  ;;  %761 = vst.msk [vmem:[#allocation2 + $0xe8] sm:$0xff] %vm324_vm1, %v726_v34  ;;  %v610_v43 = vpop.f32.mrf.mxu0  ;;  %v682_v44 = vpop.f32.mrf.mxu1  ;;  %v875_v38 = vld [vmem:[%s1510_s9 + $0xf8] sm:$0xff] }
 0x10e   : > { %v709_v49 = vadd.f32 %v610_v43, %v371_v35  ;;  %v727_v50 = vadd.f32 %v682_v44, %v389_v40  ;;  %v375_v35 = vld [vmem:[#allocation2 + $0x80] sm:$0xff] }
 0x10f   : > { %v887_v45 = vadd.f32 %v853_v31, %v819_v41  ;;  %v905_v46 = vadd.f32 %v871_v32, %v837_v42  ;;  %v1161_v54 = vpop.f32.mrf.mxu0  ;;  %v1197_v55 = vpop.f32.mrf.mxu1  ;;  %v857_v32 = vld [vmem:[%s1510_s9 + $0x68] sm:$0xff] }
 0x110   : > { %v779_v52 = vld [vmem:[#allocation2 + $0x50] sm:$0xff]  ;;  %v797_v53 = vld [vmem:[#allocation2 + $0xe0] sm:$0xff]  ;;  %744 = vst.msk [vmem:[#allocation2 + $0x60] sm:$0xff] %vm324_vm1, %v709_v49  ;;  %762 = vst.msk [vmem:[#allocation2 + $0xf0] sm:$0xff] %vm324_vm1, %v727_v50 }
 0x111   : > { %921 = vst.msk [vmem:[%s1529_s14 + $0x48] sm:$0xff] %vm324_vm1, %v887_v45  ;;  %939 = vst.msk [vmem:[%s1529_s14 + $0xd8] sm:$0xff] %vm324_vm1, %v905_v46  ;;  %v820_v57 = vadd.f32 %v1517_v10, %v779_v52  ;;  %v838_v58 = vadd.f32 %v1517_v10, %v797_v53  ;;  %v613_v59 = vpop.f32.mrf.mxu0  ;;  %v685_v60 = vpop.f32.mrf.mxu1  ;;  %v858_v46 = vld [vmem:[%s1510_s9 + $0x70] sm:$0xff] }
 0x112   : > { %v710_v2 = vadd.f32 %v613_v59, %v372_v51  ;;  %v728_v1 = vadd.f32 %v685_v60, %v390_v56  ;;  %v876_v51 = vld [vmem:[%s1510_s9 + $0x100] sm:$0xff] }
 0x113   : > { %v888_v61 = vadd.f32 %v854_v47, %v820_v57  ;;  %v906_v62 = vadd.f32 %v872_v48, %v838_v58  ;;  %v1162_v6 = vpop.f32.mrf.mxu0  ;;  %v1198_v7 = vpop.f32.mrf.mxu1  ;;  %v376_v48 = vld [vmem:[#allocation2 + $0x88] sm:$0xff]  ;;  %v859_v58 = vld [vmem:[%s1510_s9 + $0x78] sm:$0xff] }
 0x114   : > { %v780_v4 = vld [vmem:[#allocation2 + $0x58] sm:$0xff]  ;;  %v798_v5 = vld [vmem:[#allocation2 + $0xe8] sm:$0xff]  ;;  %745 = vst.msk [vmem:[#allocation2 + $0x68] sm:$0xff] %vm324_vm1, %v710_v2  ;;  %763 = vst.msk [vmem:[#allocation2 + $0xf8] sm:$0xff] %vm324_vm1, %v728_v1 }
 0x115   : > { %922 = vst.msk [vmem:[%s1529_s14 + $0x50] sm:$0xff] %vm324_vm1, %v888_v61  ;;  %940 = vst.msk [vmem:[%s1529_s14 + $0xe0] sm:$0xff] %vm324_vm1, %v906_v62  ;;  %v821_v9 = vadd.f32 %v1517_v10, %v780_v4  ;;  %v839_v11 = vadd.f32 %v1517_v10, %v798_v5  ;;  %v618_v12 = vpop.f32.mrf.mxu0  ;;  %v690_v13 = vpop.f32.mrf.mxu1  ;;  %v877_v62 = vld [vmem:[%s1510_s9 + $0x108] sm:$0xff]  ;;  %v860_v5 = vld [vmem:[%s1510_s9 + $0x80] sm:$0xff] }
 0x116   : > { %v711_v18 = vadd.f32 %v618_v12, %v373_v3  ;;  %v729_v19 = vadd.f32 %v690_v13, %v391_v8 }
 0x117   : > { %v889_v14 = vadd.f32 %v855_v63, %v821_v9  ;;  %v907_v15 = vadd.f32 %v873_v0, %v839_v11  ;;  %v781_v21 = vld [vmem:[#allocation2 + $0x60] sm:$0xff]  ;;  %v799_v22 = vld [vmem:[#allocation2 + $0xf0] sm:$0xff]  ;;  %v1165_v23 = vpop.f32.mrf.mxu0  ;;  %v1201_v24 = vpop.f32.mrf.mxu1  ;;  %v861_v9 = vld [vmem:[%s1510_s9 + $0x88] sm:$0xff] }
 0x118   : > { %v822_v26 = vadd.f32 %v1517_v10, %v781_v21  ;;  %v840_v27 = vadd.f32 %v1517_v10, %v799_v22  ;;  %746 = vst.msk [vmem:[#allocation2 + $0x70] sm:$0xff] %vm324_vm1, %v711_v18  ;;  %764 = vst.msk [vmem:[#allocation2 + $0x100] sm:$0xff] %vm324_vm1, %v729_v19 }
 0x119   : > { %923 = vst.msk [vmem:[%s1529_s14 + $0x58] sm:$0xff] %vm324_vm1, %v889_v14  ;;  %941 = vst.msk [vmem:[%s1529_s14 + $0xe8] sm:$0xff] %vm324_vm1, %v907_v15  ;;  %v621_v28 = vpop.f32.mrf.mxu0  ;;  %v693_v29 = vpop.f32.mrf.mxu1 }
 0x11a   : > { %v890_v30 = vadd.f32 %v856_v16, %v822_v26  ;;  %v908_v31 = vadd.f32 %v874_v17, %v840_v27  ;;  %v712_v33 = vadd.f32 %v621_v28, %v374_v20  ;;  %v730_v34 = vadd.f32 %v693_v29, %v392_v25 }
 0x11b   : > { %v782_v36 = vld [vmem:[#allocation2 + $0x68] sm:$0xff]  ;;  %v800_v37 = vld [vmem:[#allocation2 + $0xf8] sm:$0xff]  ;;  %v1166_v39 = vpop.f32.mrf.mxu0  ;;  %v1202_v40 = vpop.f32.mrf.mxu1 }
 0x11c   : > { %924 = vst.msk [vmem:[%s1529_s14 + $0x60] sm:$0xff] %vm324_vm1, %v890_v30  ;;  %942 = vst.msk [vmem:[%s1529_s14 + $0xf0] sm:$0xff] %vm324_vm1, %v908_v31  ;;  %v823_v41 = vadd.f32 %v1517_v10, %v782_v36  ;;  %v841_v42 = vadd.f32 %v1517_v10, %v800_v37 }
 0x11d   : > { %747 = vst.msk [vmem:[#allocation2 + $0x78] sm:$0xff] %vm324_vm1, %v712_v33  ;;  %765 = vst.msk [vmem:[#allocation2 + $0x108] sm:$0xff] %vm324_vm1, %v730_v34  ;;  %v626_v43 = vpop.f32.mrf.mxu0 }
 0x11e   : > { %v891_v44 = vadd.f32 %v857_v32, %v823_v41  ;;  %v909_v45 = vadd.f32 %v875_v38, %v841_v42  ;;  %v713_v47 = vadd.f32 %v626_v43, %v375_v35 }
 0x11f   : > { %v783_v49 = vld [vmem:[#allocation2 + $0x70] sm:$0xff]  ;;  %v801_v50 = vld [vmem:[#allocation2 + $0x100] sm:$0xff]  ;;  %v1169_v52 = vpop.f32.mrf.mxu0 }
 0x120   : > { %925 = vst.msk [vmem:[%s1529_s14 + $0x68] sm:$0xff] %vm324_vm1, %v891_v44  ;;  %943 = vst.msk [vmem:[%s1529_s14 + $0xf8] sm:$0xff] %vm324_vm1, %v909_v45  ;;  %v824_v53 = vadd.f32 %v1517_v10, %v783_v49  ;;  %v842_v54 = vadd.f32 %v1517_v10, %v801_v50 }
 0x121   : > { %748 = vst.msk [vmem:[#allocation2 + $0x80] sm:$0xff] %vm324_vm1, %v713_v47  ;;  %v629_v55 = vpop.f32.mrf.mxu0 }
 0x122   : > { %v892_v56 = vadd.f32 %v858_v46, %v824_v53  ;;  %v910_v57 = vadd.f32 %v876_v51, %v842_v54  ;;  %v714_v59 = vadd.f32 %v629_v55, %v376_v48 }
 0x123   : > { %v1170_v63 = vpop.f32.mrf.mxu0 }
 0x124   : > { %v784_v60 = vld [vmem:[#allocation2 + $0x78] sm:$0xff]  ;;  %v802_v61 = vld [vmem:[#allocation2 + $0x108] sm:$0xff]  ;;  %926 = vst.msk [vmem:[%s1529_s14 + $0x70] sm:$0xff] %vm324_vm1, %v892_v56  ;;  %944 = vst.msk [vmem:[%s1529_s14 + $0x100] sm:$0xff] %vm324_vm1, %v910_v57 }
 0x125   : > { %v825_v0 = vadd.f32 %v1517_v10, %v784_v60  ;;  %v843_v2 = vadd.f32 %v1517_v10, %v802_v61  ;;  %749 = vst.msk [vmem:[#allocation2 + $0x88] sm:$0xff] %vm324_vm1, %v714_v59 }
 0x127   : > { %v893_v1 = vadd.f32 %v859_v58, %v825_v0  ;;  %v911_v3 = vadd.f32 %v877_v62, %v843_v2 }
 0x128   : > { %v785_v4 = vld [vmem:[#allocation2 + $0x80] sm:$0xff] }
 0x129   : > { %927 = vst.msk [vmem:[%s1529_s14 + $0x78] sm:$0xff] %vm324_vm1, %v893_v1  ;;  %945 = vst.msk [vmem:[%s1529_s14 + $0x108] sm:$0xff] %vm324_vm1, %v911_v3  ;;  %v826_v6 = vadd.f32 %v1517_v10, %v785_v4 }
 0x12b   : > { %v894_v7 = vadd.f32 %v860_v5, %v826_v6 }
 0x12c   : > { %v786_v8 = vld [vmem:[#allocation2 + $0x88] sm:$0xff] }
 0x12d   : > { %928 = vst.msk [vmem:[%s1529_s14 + $0x80] sm:$0xff] %vm324_vm1, %v894_v7  ;;  %v827_v11 = vadd.f32 %v1517_v10, %v786_v8 }
 0x12f   : > { %v895_v12 = vadd.f32 %v861_v9, %v827_v11 }
 0x131   : > { %929 = vst.msk [vmem:[%s1529_s14 + $0x88] sm:$0xff] %vm324_vm1, %v895_v12 }
 0x132 PF: > { %s14_s17 = sadd.s32 1, %s1263_s17   ;;  %s1706_s15 = smov %s1259_s16 }
 0x133   : > { %p11_p5 = scmp.ge.s32.totalorder %s14_s17, 4   ;;  %s1707_s16 = smov %s1709_s18 }
 0x135   :  { %13 = sbr.rel (!%p11_p5) target bundleno = 2 (0x2), region = 83 }

</bundles_post_ra>
